<compile_context>
chip_gen: v7x
topology: tpu7x:2x2x1
jax: 0.10.0
libtpu: 0.0.40
codegen_flags: <defaults>
</compile_context>

<pallas_src>
import functools

import jax
import jax.numpy as jnp
from jax.experimental import pallas as pl
from jax.experimental.pallas import tpu as pltpu

NEG_SLOPE = 0.01   # nn.LeakyReLU() default negative_slope
BN_EPS = 1e-5

# Static architecture config (Python ints -> never traced under jit).
N_CHAN = (3, 32, 64, 128, 256, 256)
STRIDE = (2, 2, 2, 2, 1)
KSIZE = (3, 3, 3, 3, 1)
PAD = (1, 1, 1, 1, 0)
CONV1_KDIM = 32            # conv1 im2col patch dim, padded 27 -> 32


# --------------------------------------------------------------------------
# Generation-aware VMEM budgeting
# --------------------------------------------------------------------------
_VMEM_CACHE = None


def _vmem_budget_and_limit():
    """(tile-sizing budget, compiler scoped-vmem limit) in bytes."""
    global _VMEM_CACHE
    if _VMEM_CACHE is None:
        try:
            cap = int(pltpu.get_tpu_info().vmem_capacity_bytes)
        except Exception:                      # conservative fallback
            cap = 64 * 1024 * 1024
        budget = min(int(cap * 0.35), 44 * 1024 * 1024)
        limit = min(int(cap * 0.70), 96 * 1024 * 1024)
        _VMEM_CACHE = (budget, limit)
    return _VMEM_CACHE


# --------------------------------------------------------------------------
# Fused GEMM kernel:  out = affine( LeakyReLU( x @ w + b ) )
#   aux row 0 = bias, row 1 = BN scale, row 2 = BN shift
# --------------------------------------------------------------------------
def _fused_matmul_kernel(x_ref, w_ref, aux_ref, o_ref, *, apply_act, apply_affine):
    y = jnp.dot(x_ref[...], w_ref[...], preferred_element_type=jnp.float32)
    aux = aux_ref[...]                                  # (3, N) f32
    y = y + aux[0:1, :]                                 # conv/linear bias
    if apply_act:
        y = jnp.maximum(y, NEG_SLOPE * y)               # LeakyReLU (slope < 1)
    if apply_affine:
        y = y * aux[1:2, :] + aux[2:3, :]               # folded BatchNorm
    o_ref[...] = y.astype(o_ref.dtype)


def _pick_tile_m(M, K, N, out_bytes, budget):
    """Largest M-tile (multiple of 8) fitting the VMEM budget; capped so the
    grid has >=2 steps whenever M allows (v7x has 2 TensorCores)."""
    def fits(tm):
        vmem = (2 * tm * K * 2             # double-buffered bf16 x tile
                + 2 * tm * N * out_bytes   # double-buffered out tile
                + tm * N * 4               # f32 matmul result before the cast
                + 2 * K * N * 2            # weight (conservatively x2 buffered)
                + 2 * 3 * N * 4)           # aux   (conservatively x2 buffered)
        return vmem <= budget

    if M <= 8:
        return M
    tm = 8
    while tm * 2 <= M and fits(tm * 2):
        tm *= 2
    if tm * 2 > M and M >= 16:             # force >=2 grid steps
        cand = ((pl.cdiv(M, 2) + 7) // 8) * 8
        while cand > 8 and not fits(cand):
            cand = ((cand // 2 + 7) // 8) * 8
        tm = max(8, cand)
    return tm


def fused_linear(x, w, aux, *, apply_act, apply_affine, out_dtype=jnp.bfloat16):
    """x:(M,K) @ w:(K,N) with fused bias / LeakyReLU / affine-BN epilogue."""
    M, K = x.shape
    K2, N = w.shape
    assert K == K2 and aux.shape == (3, N)
    budget, vmem_limit = _vmem_budget_and_limit()
    out_bytes = jnp.dtype(out_dtype).itemsize
    tm = _pick_tile_m(M, K, N, out_bytes, budget)
    grid = (pl.cdiv(M, tm),)

    kernel = functools.partial(_fused_matmul_kernel,
                               apply_act=apply_act, apply_affine=apply_affine)
    flops = 2 * M * K * N
    bytes_accessed = M * K * 2 + K * N * 2 + 3 * N * 4 + M * N * out_bytes

    return pl.pallas_call(
        kernel,
        out_shape=jax.ShapeDtypeStruct((M, N), out_dtype),
        grid=grid,
        in_specs=[
            pl.BlockSpec((tm, K), lambda i: (i, 0)),    # streamed over M
            pl.BlockSpec((K, N), lambda i: (0, 0)),     # weight resident
            pl.BlockSpec((3, N), lambda i: (0, 0)),     # packed epilogue params
        ],
        out_specs=pl.BlockSpec((tm, N), lambda i: (i, 0)),
        compiler_params=pltpu.CompilerParams(
            dimension_semantics=("parallel",),
            vmem_limit_bytes=vmem_limit),
        cost_estimate=pl.CostEstimate(flops=int(flops), transcendentals=0,
                                      bytes_accessed=int(bytes_accessed)),
    )(x.astype(jnp.bfloat16), w, aux)


# --------------------------------------------------------------------------
# Fused 3x3 / stride-2 / pad-1 conv kernel with IN-KERNEL im2col.
# Input is the padded activation with W folded into channels:
#   xw[b, h, m, p*C + c] == x_padded[b, h, 2m + p, c]
# Patch scratch layout: 6 column groups of 2C, group g = di*2 + half holds
# source columns (2w + 2*half, 2w + 2*half + 1) of padded row 2r+di; the
# weight is packed to match (the 4th tap of each row-pair is zero).
# --------------------------------------------------------------------------
def _fused_conv3x3s2_kernel(xw_ref, w_ref, aux_ref, o_ref, patch_ref, *,
                            Ho, Wo, Cin):
    c2 = 2 * Cin
    for r in range(Ho):
        for di in range(3):
            row = 2 * r + di
            for half in range(2):
                g = di * 2 + half
                patch_ref[r * Wo:(r + 1) * Wo, g * c2:(g + 1) * c2] = (
                    xw_ref[0, row, half:half + Wo, :])
    y = jnp.dot(patch_ref[...], w_ref[...], preferred_element_type=jnp.float32)
    aux = aux_ref[...]                                  # (3, Cout) f32
    y = y + aux[0:1, :]                                 # conv bias
    y = jnp.maximum(y, NEG_SLOPE * y)                   # LeakyReLU
    y = y * aux[1:2, :] + aux[2:3, :]                   # folded BatchNorm
    o_ref[0] = y.astype(o_ref.dtype)


def conv3x3_s2_fused(x, layer):
    """x: (B, H, W, C) NHWC bf16 -> (B, H/2, W/2, Cout) bf16."""
    B, H, W, C = x.shape
    assert H % 2 == 0 and W % 2 == 0
    Ho, Wo = H // 2, W // 2
    Cout = layer["w"].shape[-1]
    xp = jnp.pad(x, ((0, 0), (1, 1), (1, 1), (0, 0)))
    Hp, Wp2 = H + 2, (W + 2) // 2
    xw = xp.reshape(B, Hp, Wp2, 2 * C)        # free W-fold (pure reshape)

    _, vmem_limit = _vmem_budget_and_limit()
    flops = 2 * B * Ho * Wo * 12 * C * Cout
    bytes_accessed = (int(xw.size) * 2 + int(layer["w"].size) * 2
                      + int(layer["aux"].size) * 4 + B * Ho * Wo * Cout * 2)

    out = pl.pallas_call(
        functools.partial(_fused_conv3x3s2_kernel, Ho=Ho, Wo=Wo, Cin=C),
        out_shape=jax.ShapeDtypeStruct((B, Ho * Wo, Cout), jnp.bfloat16),
        grid=(B,),
        in_specs=[
            pl.BlockSpec((1, Hp, Wp2, 2 * C), lambda b: (b, 0, 0, 0)),
            pl.BlockSpec((12 * C, Cout), lambda b: (0, 0)),
            pl.BlockSpec((3, Cout), lambda b: (0, 0)),
        ],
        out_specs=pl.BlockSpec((1, Ho * Wo, Cout), lambda b: (b, 0, 0)),
        scratch_shapes=[pltpu.VMEM((Ho * Wo, 12 * C), jnp.bfloat16)],
        compiler_params=pltpu.CompilerParams(
            dimension_semantics=("parallel",),
            vmem_limit_bytes=vmem_limit),
        cost_estimate=pl.CostEstimate(flops=int(flops), transcendentals=0,
                                      bytes_accessed=int(bytes_accessed)),
    )(xw, layer["w"], layer["aux"])
    return out.reshape(B, Ho, Wo, Cout)


# --------------------------------------------------------------------------
# Fused MLP tail kernel: fc -> LeakyReLU -> (+cond) embed -> LeakyReLU ->
#                        [mu | logvar] (clamp only on the logvar half)
# --------------------------------------------------------------------------
def _tail_kernel(flat_ref, cond_ref, fc_w_ref, fc_b_ref,
                 ew_h_ref, ew_c_ref, e_b_ref, ml_w_ref, ml_aux_ref, o_ref):
    h = jnp.dot(flat_ref[...], fc_w_ref[...], preferred_element_type=jnp.float32)
    h = h + fc_b_ref[...]
    h = jnp.maximum(h, NEG_SLOPE * h)

    # embed(cat(h, cond)) == h @ W_h + cond @ W_c + b
    e = jnp.dot(h.astype(jnp.bfloat16), ew_h_ref[...],
                preferred_element_type=jnp.float32)
    e = e + jnp.dot(cond_ref[...], ew_c_ref[...],
                    preferred_element_type=jnp.float32)
    e = e + e_b_ref[...]
    e = jnp.maximum(e, NEG_SLOPE * e)

    ml = jnp.dot(e.astype(jnp.bfloat16), ml_w_ref[...],
                 preferred_element_type=jnp.float32)
    ml_aux = ml_aux_ref[...]                            # (2, 2L) f32
    ml = ml + ml_aux[0:1, :]                            # [mu_b | logvar_b]
    ml = jnp.maximum(ml, ml_aux[1:2, :])                # [-inf | -9] clamp
    o_ref[...] = ml.astype(o_ref.dtype)


def fused_tail(flat, cond, params):
    B, fc_in = flat.shape
    H = params["fc_w"].shape[1]
    L2 = params["ml_w"].shape[1]
    Cc = cond.shape[1]

    tb = B
    for cand in (1024, 512, 256, 128, 64, 32, 16, 8):   # tile batch when large
        if B % cand == 0 and B // cand >= 2:
            tb = cand
            break
    grid = (B // tb,)

    _, vmem_limit = _vmem_budget_and_limit()
    args = (flat.astype(jnp.bfloat16), cond.astype(jnp.bfloat16),
            params["fc_w"], params["fc_b"],
            params["emb_wh"], params["emb_wc"], params["emb_b"],
            params["ml_w"], params["ml_aux"])
    in_specs = [
        pl.BlockSpec((tb, fc_in), lambda i: (i, 0)),
        pl.BlockSpec((tb, Cc), lambda i: (i, 0)),
        pl.BlockSpec(params["fc_w"].shape, lambda i: (0, 0)),
        pl.BlockSpec(params["fc_b"].shape, lambda i: (0, 0)),
        pl.BlockSpec(params["emb_wh"].shape, lambda i: (0, 0)),
        pl.BlockSpec(params["emb_wc"].shape, lambda i: (0, 0)),
        pl.BlockSpec(params["emb_b"].shape, lambda i: (0, 0)),
        pl.BlockSpec(params["ml_w"].shape, lambda i: (0, 0)),
        pl.BlockSpec(params["ml_aux"].shape, lambda i: (0, 0)),
    ]
    flops = 2 * B * (fc_in * H + H * H + Cc * H + H * L2)
    bytes_accessed = sum(int(a.size) * a.dtype.itemsize for a in args) + B * L2 * 4

    return pl.pallas_call(
        _tail_kernel,
        out_shape=jax.ShapeDtypeStruct((B, L2), jnp.float32),
        grid=grid,
        in_specs=in_specs,
        out_specs=pl.BlockSpec((tb, L2), lambda i: (i, 0)),
        compiler_params=pltpu.CompilerParams(
            dimension_semantics=("parallel",),
            vmem_limit_bytes=vmem_limit),
        cost_estimate=pl.CostEstimate(flops=int(flops), transcendentals=0,
                                      bytes_accessed=int(bytes_accessed)),
    )(*args)


# --------------------------------------------------------------------------
# Host glue for conv1 only (Cin=3): tiny im2col, patch dim padded 27 -> 32.
# --------------------------------------------------------------------------
def im2col_conv1(x):
    B, H, W, C = x.shape
    xp = jnp.pad(x, ((0, 0), (1, 1), (1, 1), (0, 0)))
    Ho, Wo = H // 2, W // 2
    cols = []
    for di in range(3):
        for dj in range(3):
            cols.append(xp[:, di:di + 2 * Ho:2, dj:dj + 2 * Wo:2, :])
    cols.append(jnp.zeros((B, Ho, Wo, CONV1_KDIM - 9 * C), x.dtype))
    return jnp.concatenate(cols, axis=-1), Ho, Wo


# --------------------------------------------------------------------------
# Parameter construction (deterministic, synthetic).  Params hold ONLY jnp
# arrays; all structural hyper-params stay static Python values.
# --------------------------------------------------------------------------
def _fuse_s2_weight(w_hwio):
    """(3,3,Cin,Cout) HWIO -> (12*Cin, Cout), matching the in-kernel W-folded
    patch layout (6 groups of 2*Cin; phantom 4th tap of each row-pair = 0)."""
    _, _, cin, cout = w_hwio.shape
    zeros = jnp.zeros((cin, cout), w_hwio.dtype)
    groups = []
    for di in range(3):
        groups.append(jnp.concatenate([w_hwio[di, 0], w_hwio[di, 1]], axis=0))
        groups.append(jnp.concatenate([w_hwio[di, 2], zeros], axis=0))
    return jnp.concatenate(groups, axis=0)


def init_encoder_params(key, cond_dim, latent_dim, hidden_dim):
    n_layers = len(N_CHAN) - 1
    keys = jax.random.split(key, n_layers + 4)
    conv = []
    for i in range(n_layers):
        cin, cout, k = N_CHAN[i], N_CHAN[i + 1], KSIZE[i]
        fan_in = k * k * cin
        wk, bk, gk = jax.random.split(keys[i], 3)
        w = jax.random.normal(wk, (k, k, cin, cout), jnp.float32) / jnp.sqrt(fan_in)
        b = 0.01 * jax.random.normal(bk, (cout,), jnp.float32)
        if i < n_layers - 1:                      # BatchNorm2d (running stats)
            g1, g2, g3, g4 = jax.random.split(gk, 4)
            gamma = 1.0 + 0.1 * jax.random.normal(g1, (cout,), jnp.float32)
            beta = 0.1 * jax.random.normal(g2, (cout,), jnp.float32)
            r_mean = 0.1 * jax.random.normal(g3, (cout,), jnp.float32)
            r_var = 1.0 + 0.1 * jnp.abs(jax.random.normal(g4, (cout,), jnp.float32))
            scale = gamma / jnp.sqrt(r_var + BN_EPS)
            shift = beta - r_mean * scale
        else:                                     # nn.Identity()
            scale = jnp.ones((cout,), jnp.float32)
            shift = jnp.zeros((cout,), jnp.float32)
        aux = jnp.stack([b, scale, shift], axis=0)               # (3, Cout) f32
        if i == 0:                                # conv1: padded im2col GEMM
            wmat = jnp.pad(w.reshape(fan_in, cout),
                           ((0, CONV1_KDIM - fan_in), (0, 0)))
        elif k == 3:                              # conv2..4: fused conv kernel
            wmat = _fuse_s2_weight(w)
        else:                                     # conv5: 1x1 conv == GEMM
            wmat = w.reshape(cin, cout)
        conv.append(dict(w=wmat.astype(jnp.bfloat16), aux=aux))
    params = {"conv": conv}

    def linear(key, fin, fout):
        wk, bk = jax.random.split(key)
        w = jax.random.normal(wk, (fin, fout), jnp.float32) / jnp.sqrt(fin)
        b = 0.01 * jax.random.normal(bk, (fout,), jnp.float32)
        return w, b

    # fc: generated in PyTorch NCHW-flatten row order, permuted ONCE to the
    # NHWC-flatten order used by the forward pass.
    fc_in = N_CHAN[-1] * 4 * 4
    fc_w, fc_b = linear(keys[n_layers + 0], fc_in, hidden_dim)
    fc_w = fc_w.reshape(N_CHAN[-1], 4, 4, hidden_dim) \
               .transpose(1, 2, 0, 3).reshape(fc_in, hidden_dim)
    params["fc_w"] = fc_w.astype(jnp.bfloat16)
    params["fc_b"] = fc_b.reshape(1, hidden_dim)

    # embed: split into hidden part and cond part so torch.cat((x, cond)) is
    # expressed as two fused matmuls in one kernel.
    emb_w, emb_b = linear(keys[n_layers + 1], hidden_dim + cond_dim, hidden_dim)
    params["emb_wh"] = emb_w[:hidden_dim].astype(jnp.bfloat16)
    if cond_dim > 0:
        params["emb_wc"] = emb_w[hidden_dim:].astype(jnp.bfloat16)
    else:
        params["emb_wc"] = jnp.zeros((1, hidden_dim), jnp.bfloat16)
    params["emb_b"] = emb_b.reshape(1, hidden_dim)

    # mu and logvar fused into one GEMM; clamp row = [-inf ... | -9 ...]
    mu_w, mu_b = linear(keys[n_layers + 2], hidden_dim, latent_dim)
    lv_w, lv_b = linear(keys[n_layers + 3], hidden_dim, latent_dim)
    params["ml_w"] = jnp.concatenate([mu_w, lv_w], axis=1).astype(jnp.bfloat16)
    ml_b = jnp.concatenate([mu_b, lv_b], axis=0)
    ml_clamp = jnp.concatenate([jnp.full((latent_dim,), -jnp.inf, jnp.float32),
                                jnp.full((latent_dim,), -9.0, jnp.float32)])
    params["ml_aux"] = jnp.stack([ml_b, ml_clamp], axis=0)       # (2, 2*latent)
    return params


# --------------------------------------------------------------------------
# Forward pass (mirrors Encoder.forward, inference mode)
# --------------------------------------------------------------------------
def encoder_forward(params, x_nchw, cond):
    x = jnp.transpose(x_nchw.astype(jnp.bfloat16), (0, 2, 3, 1))   # NCHW -> NHWC
    B = x.shape[0]

    # conv1 (Cin=3): host im2col (tiny) -> fused GEMM, patch dim padded to 32.
    patches, Ho, Wo = im2col_conv1(x)
    y = fused_linear(patches.reshape(B * Ho * Wo, CONV1_KDIM),
                     params["conv"][0]["w"], params["conv"][0]["aux"],
                     apply_act=True, apply_affine=True)
    x = y.reshape(B, Ho, Wo, -1)

    # conv2..conv4: im2col fused into the kernel (no HBM patch round trip).
    for i in (1, 2, 3):
        x = conv3x3_s2_fused(x, params["conv"][i])

    # conv5: 1x1 conv (Identity instead of BatchNorm) == plain fused GEMM.
    B, H, W, C = x.shape
    y = fused_linear(x.reshape(B * H * W, C),
                     params["conv"][4]["w"], params["conv"][4]["aux"],
                     apply_act=True, apply_affine=False)
    x = y.reshape(B, H, W, -1)

    flat = x.reshape(B, -1)            # NHWC flatten (fc_w rows permuted at init)

    if cond.shape[-1] == 0:            # cond_dim == 0: embed(x) path
        cond = jnp.zeros((B, 1), jnp.bfloat16)

    out = fused_tail(flat, cond, params)               # (B, 2*latent) f32
    latent = params["ml_w"].shape[1] // 2
    mu = out[:, :latent]
    logvar = out[:, latent:]
    return mu, logvar


# --------------------------------------------------------------------------
if __name__ == "__main__":
    # The fc layer requires the conv stack to end at 4x4 spatial, which
    # implies a 3x64x64 input (64 -> 32 -> 16 -> 8 -> 4 -> 4).
    batch, cond_dim, latent_dim, hidden_dim = 2, 4, 16, 32

    key = jax.random.PRNGKey(0)
    k_params, k_x, k_cond = jax.random.split(key, 3)

    params = init_encoder_params(k_params, cond_dim, latent_dim, hidden_dim)
    x = jax.random.normal(k_x, (batch, 3, 64, 64), jnp.float32)      # NCHW
    cond = jax.random.normal(k_cond, (batch, cond_dim), jnp.float32)

    mu, logvar = jax.jit(encoder_forward)(params, x, cond)
    jax.block_until_ready((mu, logvar))

    assert mu.shape == (batch, latent_dim)
    assert logvar.shape == (batch, latent_dim)
    assert bool(jnp.all(logvar >= -9.0))
    print("KERNEL_OK")
</pallas_src>

<mosaic_0001>
module attributes {stable_mosaic.version = 11 : i64} {
  func.func @_fused_matmul_kernel(%arg0: i32, %arg1: memref<1024x32xbf16, #tpu.memory_space<vmem>>, %arg2: memref<32x32xbf16, #tpu.memory_space<vmem>>, %arg3: memref<3x32xf32, #tpu.memory_space<vmem>>, %arg4: memref<1024x32xbf16, #tpu.memory_space<vmem>>) attributes {dimension_semantics = [#tpu.dimension_semantics<parallel>], iteration_bounds = array<i64: 2>, scalar_prefetch = 0 : i64, scratch_operands = 0 : i64, tpu.core_type = #tpu.core_type<tc>, window_params = [{transform_indices = @transform_0, window_bounds = array<i64: 1024, 32>}, {pipeline_mode = #tpu.pipeline_mode<synchronous>, transform_indices = @transform_1, window_bounds = array<i64: 32, 32>}, {pipeline_mode = #tpu.pipeline_mode<synchronous>, transform_indices = @transform_2, window_bounds = array<i64: 3, 32>}, {transform_indices = @transform_3, window_bounds = array<i64: 1024, 32>}]} {
    %c0 = arith.constant 0 : index
    %c0_0 = arith.constant 0 : index
    %0 = vector.load %arg1[%c0, %c0_0] : memref<1024x32xbf16, #tpu.memory_space<vmem>>, vector<1024x32xbf16>
    %c0_1 = arith.constant 0 : index
    %c0_2 = arith.constant 0 : index
    %1 = vector.load %arg2[%c0_1, %c0_2] : memref<32x32xbf16, #tpu.memory_space<vmem>>, vector<32x32xbf16>
    %cst = arith.constant dense<0.000000e+00> : vector<1024x32xf32>
    %2 = tpu.matmul %0, %1, %cst {dimension_numbers = #tpu.dot_dimension_numbers<[1], [0], [0], [1], [0, 0, 1, 1], [], []>} : vector<1024x32xbf16>, vector<32x32xbf16>, vector<1024x32xf32> -> vector<1024x32xf32>
    %c0_3 = arith.constant 0 : index
    %c0_4 = arith.constant 0 : index
    %3 = vector.load %arg3[%c0_3, %c0_4] : memref<3x32xf32, #tpu.memory_space<vmem>>, vector<3x32xf32>
    %4 = vector.extract_strided_slice %3 {offsets = [0, 0], sizes = [1, 32], strides = [1, 1]} : vector<3x32xf32> to vector<1x32xf32>
    %5 = vector.broadcast %4 : vector<1x32xf32> to vector<1024x32xf32>
    %6 = arith.addf %2, %5 : vector<1024x32xf32>
    %cst_5 = arith.constant 0.00999999977 : f32
    %7 = vector.broadcast %cst_5 : f32 to vector<1024x32xf32>
    %8 = arith.mulf %7, %6 : vector<1024x32xf32>
    %9 = arith.maximumf %6, %8 : vector<1024x32xf32>
    %10 = vector.extract_strided_slice %3 {offsets = [1, 0], sizes = [1, 32], strides = [1, 1]} : vector<3x32xf32> to vector<1x32xf32>
    %11 = vector.broadcast %10 : vector<1x32xf32> to vector<1024x32xf32>
    %12 = arith.mulf %9, %11 : vector<1024x32xf32>
    %13 = vector.extract_strided_slice %3 {offsets = [2, 0], sizes = [1, 32], strides = [1, 1]} : vector<3x32xf32> to vector<1x32xf32>
    %14 = vector.broadcast %13 : vector<1x32xf32> to vector<1024x32xf32>
    %15 = arith.addf %12, %14 : vector<1024x32xf32>
    %16 = arith.truncf %15 : vector<1024x32xf32> to vector<1024x32xbf16>
    %c0_6 = arith.constant 0 : index
    %c0_7 = arith.constant 0 : index
    %17 = vector.load %arg4[%c0_6, %c0_7] : memref<1024x32xbf16, #tpu.memory_space<vmem>>, vector<1024x32xbf16>
    tpu.vector_store %arg4[%c0_6, %c0_7], %16 {strides = array<i32>} : memref<1024x32xbf16, #tpu.memory_space<vmem>>, vector<1024x32xbf16>,
    return
  }
  func.func @transform_0(%arg0: i32) -> (i32, i32) {
    %c0_i32 = arith.constant 0 : i32
    %c0_i32_0 = arith.constant 0 : i32
    return %arg0, %c0_i32 : i32, i32
  }
  func.func @transform_1(%arg0: i32) -> (i32, i32) {
    %c0_i32 = arith.constant 0 : i32
    %c0_i32_0 = arith.constant 0 : i32
    %c0_i32_1 = arith.constant 0 : i32
    return %c0_i32, %c0_i32_0 : i32, i32
  }
  func.func @transform_2(%arg0: i32) -> (i32, i32) {
    %c0_i32 = arith.constant 0 : i32
    %c0_i32_0 = arith.constant 0 : i32
    %c0_i32_1 = arith.constant 0 : i32
    return %c0_i32, %c0_i32_0 : i32, i32
  }
  func.func @transform_3(%arg0: i32) -> (i32, i32) {
    %c0_i32 = arith.constant 0 : i32
    %c0_i32_0 = arith.constant 0 : i32
    return %arg0, %c0_i32 : i32, i32
  }
}

module attributes {stable_mosaic.version = 11 : i64} {
  func.func @_fused_conv3x3s2_kernel(%arg0: i32, %arg1: memref<1x34x17x64xbf16, #tpu.memory_space<vmem>>, %arg2: memref<384x64xbf16, #tpu.memory_space<vmem>>, %arg3: memref<3x64xf32, #tpu.memory_space<vmem>>, %arg4: memref<1x256x64xbf16, #tpu.memory_space<vmem>>, %arg5: memref<256x384xbf16, #tpu.memory_space<vmem>>) attributes {dimension_semantics = [#tpu.dimension_semantics<parallel>], iteration_bounds = array<i64: 2>, scalar_prefetch = 0 : i64, scratch_operands = 1 : i64, tpu.core_type = #tpu.core_type<tc>, window_params = [{transform_indices = @transform_0, window_bounds = array<i64: 1, 34, 17, 64>}, {pipeline_mode = #tpu.pipeline_mode<synchronous>, transform_indices = @transform_1, window_bounds = array<i64: 384, 64>}, {pipeline_mode = #tpu.pipeline_mode<synchronous>, transform_indices = @transform_2, window_bounds = array<i64: 3, 64>}, {transform_indices = @transform_3, window_bounds = array<i64: 1, 256, 64>}]} {
    %c0 = arith.constant 0 : index
    %c0_0 = arith.constant 0 : index
    %c0_1 = arith.constant 0 : index
    %c0_2 = arith.constant 0 : index
    %0 = vector.load %arg1[%c0, %c0_0, %c0_1, %c0_2] : memref<1x34x17x64xbf16, #tpu.memory_space<vmem>>, vector<1x1x16x64xbf16>
    %1 = vector.shape_cast %0 : vector<1x1x16x64xbf16> to vector<16x64xbf16>
    %c0_3 = arith.constant 0 : index
    %c0_4 = arith.constant 0 : index
    %2 = vector.load %arg5[%c0_3, %c0_4] : memref<256x384xbf16, #tpu.memory_space<vmem>>, vector<16x64xbf16>
    tpu.vector_store %arg5[%c0_3, %c0_4], %1 {strides = array<i32>} : memref<256x384xbf16, #tpu.memory_space<vmem>>, vector<16x64xbf16>,
    %c0_5 = arith.constant 0 : index
    %c0_6 = arith.constant 0 : index
    %c1 = arith.constant 1 : index
    %c0_7 = arith.constant 0 : index
    %3 = vector.load %arg1[%c0_5, %c0_6, %c1, %c0_7] : memref<1x34x17x64xbf16, #tpu.memory_space<vmem>>, vector<1x1x16x64xbf16>
    %4 = vector.shape_cast %3 : vector<1x1x16x64xbf16> to vector<16x64xbf16>
    %c0_8 = arith.constant 0 : index
    %c64 = arith.constant 64 : index
    %5 = vector.load %arg5[%c0_8, %c64] : memref<256x384xbf16, #tpu.memory_space<vmem>>, vector<16x64xbf16>
    tpu.vector_store %arg5[%c0_8, %c64], %4 {strides = array<i32>} : memref<256x384xbf16, #tpu.memory_space<vmem>>, vector<16x64xbf16>,
    %c0_9 = arith.constant 0 : index
    %c1_10 = arith.constant 1 : index
    %c0_11 = arith.constant 0 : index
    %c0_12 = arith.constant 0 : index
    %6 = vector.load %arg1[%c0_9, %c1_10, %c0_11, %c0_12] : memref<1x34x17x64xbf16, #tpu.memory_space<vmem>>, vector<1x1x16x64xbf16>
    %7 = vector.shape_cast %6 : vector<1x1x16x64xbf16> to vector<16x64xbf16>
    %c0_13 = arith.constant 0 : index
    %c128 = arith.constant 128 : index
    %8 = vector.load %arg5[%c0_13, %c128] : memref<256x384xbf16, #tpu.memory_space<vmem>>, vector<16x64xbf16>
    tpu.vector_store %arg5[%c0_13, %c128], %7 {strides = array<i32>} : memref<256x384xbf16, #tpu.memory_space<vmem>>, vector<16x64xbf16>,
    %c0_14 = arith.constant 0 : index
    %c1_15 = arith.constant 1 : index
    %c1_16 = arith.constant 1 : index
    %c0_17 = arith.constant 0 : index
    %9 = vector.load %arg1[%c0_14, %c1_15, %c1_16, %c0_17] : memref<1x34x17x64xbf16, #tpu.memory_space<vmem>>, vector<1x1x16x64xbf16>
    %10 = vector.shape_cast %9 : vector<1x1x16x64xbf16> to vector<16x64xbf16>
    %c0_18 = arith.constant 0 : index
    %c192 = arith.constant 192 : index
    %11 = vector.load %arg5[%c0_18, %c192] : memref<256x384xbf16, #tpu.memory_space<vmem>>, vector<16x64xbf16>
    tpu.vector_store %arg5[%c0_18, %c192], %10 {strides = array<i32>} : memref<256x384xbf16, #tpu.memory_space<vmem>>, vector<16x64xbf16>,
    %c0_19 = arith.constant 0 : index
    %c2 = arith.constant 2 : index
    %c0_20 = arith.constant 0 : index
    %c0_21 = arith.constant 0 : index
    %12 = vector.load %arg1[%c0_19, %c2, %c0_20, %c0_21] : memref<1x34x17x64xbf16, #tpu.memory_space<vmem>>, vector<1x1x16x64xbf16>
    %13 = vector.shape_cast %12 : vector<1x1x16x64xbf16> to vector<16x64xbf16>
    %c0_22 = arith.constant 0 : index
    %c256 = arith.constant 256 : index
    %14 = vector.load %arg5[%c0_22, %c256] : memref<256x384xbf16, #tpu.memory_space<vmem>>, vector<16x64xbf16>
    tpu.vector_store %arg5[%c0_22, %c256], %13 {strides = array<i32>} : memref<256x384xbf16, #tpu.memory_space<vmem>>, vector<16x64xbf16>,
    %c0_23 = arith.constant 0 : index
    %c2_24 = arith.constant 2 : index
    %c1_25 = arith.constant 1 : index
    %c0_26 = arith.constant 0 : index
    %15 = vector.load %arg1[%c0_23, %c2_24, %c1_25, %c0_26] : memref<1x34x17x64xbf16, #tpu.memory_space<vmem>>, vector<1x1x16x64xbf16>
    %16 = vector.shape_cast %15 : vector<1x1x16x64xbf16> to vector<16x64xbf16>
    %c0_27 = arith.constant 0 : index
    %c320 = arith.constant 320 : index
    %17 = vector.load %arg5[%c0_27, %c320] : memref<256x384xbf16, #tpu.memory_space<vmem>>, vector<16x64xbf16>
    tpu.vector_store %arg5[%c0_27, %c320], %16 {strides = array<i32>} : memref<256x384xbf16, #tpu.memory_space<vmem>>, vector<16x64xbf16>,
    %c0_28 = arith.constant 0 : index
    %c2_29 = arith.constant 2 : index
    %c0_30 = arith.constant 0 : index
    %c0_31 = arith.constant 0 : index
    %18 = vector.load %arg1[%c0_28, %c2_29, %c0_30, %c0_31] : memref<1x34x17x64xbf16, #tpu.memory_space<vmem>>, vector<1x1x16x64xbf16>
    %19 = vector.shape_cast %18 : vector<1x1x16x64xbf16> to vector<16x64xbf16>
    %c16 = arith.constant 16 : index
    %c0_32 = arith.constant 0 : index
    %20 = vector.load %arg5[%c16, %c0_32] : memref<256x384xbf16, #tpu.memory_space<vmem>>, vector<16x64xbf16>
    tpu.vector_store %arg5[%c16, %c0_32], %19 {strides = array<i32>} : memref<256x384xbf16, #tpu.memory_space<vmem>>, vector<16x64xbf16>,
    %c0_33 = arith.constant 0 : index
    %c2_34 = arith.constant 2 : index
    %c1_35 = arith.constant 1 : index
    %c0_36 = arith.constant 0 : index
    %21 = vector.load %arg1[%c0_33, %c2_34, %c1_35, %c0_36] : memref<1x34x17x64xbf16, #tpu.memory_space<vmem>>, vector<1x1x16x64xbf16>
    %22 = vector.shape_cast %21 : vector<1x1x16x64xbf16> to vector<16x64xbf16>
    %c16_37 = arith.constant 16 : index
    %c64_38 = arith.constant 64 : index
    %23 = vector.load %arg5[%c16_37, %c64_38] : memref<256x384xbf16, #tpu.memory_space<vmem>>, vector<16x64xbf16>
    tpu.vector_store %arg5[%c16_37, %c64_38], %22 {strides = array<i32>} : memref<256x384xbf16, #tpu.memory_space<vmem>>, vector<16x64xbf16>,
    %c0_39 = arith.constant 0 : index
    %c3 = arith.constant 3 : index
    %c0_40 = arith.constant 0 : index
    %c0_41 = arith.constant 0 : index
    %24 = vector.load %arg1[%c0_39, %c3, %c0_40, %c0_41] : memref<1x34x17x64xbf16, #tpu.memory_space<vmem>>, vector<1x1x16x64xbf16>
    %25 = vector.shape_cast %24 : vector<1x1x16x64xbf16> to vector<16x64xbf16>
    %c16_42 = arith.constant 16 : index
    %c128_43 = arith.constant 128 : index
    %26 = vector.load %arg5[%c16_42, %c128_43] : memref<256x384xbf16, #tpu.memory_space<vmem>>, vector<16x64xbf16>
    tpu.vector_store %arg5[%c16_42, %c128_43], %25 {strides = array<i32>} : memref<256x384xbf16, #tpu.memory_space<vmem>>, vector<16x64xbf16>,
    %c0_44 = arith.constant 0 : index
    %c3_45 = arith.constant 3 : index
    %c1_46 = arith.constant 1 : index
    %c0_47 = arith.constant 0 : index
    %27 = vector.load %arg1[%c0_44, %c3_45, %c1_46, %c0_47] : memref<1x34x17x64xbf16, #tpu.memory_space<vmem>>, vector<1x1x16x64xbf16>
    %28 = vector.shape_cast %27 : vector<1x1x16x64xbf16> to vector<16x64xbf16>
    %c16_48 = arith.constant 16 : index
    %c192_49 = arith.constant 192 : index
    %29 = vector.load %arg5[%c16_48, %c192_49] : memref<256x384xbf16, #tpu.memory_space<vmem>>, vector<16x64xbf16>
    tpu.vector_store %arg5[%c16_48, %c192_49], %28 {strides = array<i32>} : memref<256x384xbf16, #tpu.memory_space<vmem>>, vector<16x64xbf16>,
    %c0_50 = arith.constant 0 : index
    %c4 = arith.constant 4 : index
    %c0_51 = arith.constant 0 : index
    %c0_52 = arith.constant 0 : index
    %30 = vector.load %arg1[%c0_50, %c4, %c0_51, %c0_52] : memref<1x34x17x64xbf16, #tpu.memory_space<vmem>>, vector<1x1x16x64xbf16>
    %31 = vector.shape_cast %30 : vector<1x1x16x64xbf16> to vector<16x64xbf16>
    %c16_53 = arith.constant 16 : index
    %c256_54 = arith.constant 256 : index
    %32 = vector.load %arg5[%c16_53, %c256_54] : memref<256x384xbf16, #tpu.memory_space<vmem>>, vector<16x64xbf16>
    tpu.vector_store %arg5[%c16_53, %c256_54], %31 {strides = array<i32>} : memref<256x384xbf16, #tpu.memory_space<vmem>>, vector<16x64xbf16>,
    %c0_55 = arith.constant 0 : index
    %c4_56 = arith.constant 4 : index
    %c1_57 = arith.constant 1 : index
    %c0_58 = arith.constant 0 : index
    %33 = vector.load %arg1[%c0_55, %c4_56, %c1_57, %c0_58] : memref<1x34x17x64xbf16, #tpu.memory_space<vmem>>, vector<1x1x16x64xbf16>
    %34 = vector.shape_cast %33 : vector<1x1x16x64xbf16> to vector<16x64xbf16>
    %c16_59 = arith.constant 16 : index
    %c320_60 = arith.constant 320 : index
    %35 = vector.load %arg5[%c16_59, %c320_60] : memref<256x384xbf16, #tpu.memory_space<vmem>>, vector<16x64xbf16>
    tpu.vector_store %arg5[%c16_59, %c320_60], %34 {strides = array<i32>} : memref<256x384xbf16, #tpu.memory_space<vmem>>, vector<16x64xbf16>,
    %c0_61 = arith.constant 0 : index
    %c4_62 = arith.constant 4 : index
    %c0_63 = arith.constant 0 : index
    %c0_64 = arith.constant 0 : index
    %36 = vector.load %arg1[%c0_61, %c4_62, %c0_63, %c0_64] : memref<1x34x17x64xbf16, #tpu.memory_space<vmem>>, vector<1x1x16x64xbf16>
    %37 = vector.shape_cast %36 : vector<1x1x16x64xbf16> to vector<16x64xbf16>
    %c32 = arith.constant 32 : index
    %c0_65 = arith.constant 0 : index
    %38 = vector.load %arg5[%c32, %c0_65] : memref<256x384xbf16, #tpu.memory_space<vmem>>, vector<16x64xbf16>
    tpu.vector_store %arg5[%c32, %c0_65], %37 {strides = array<i32>} : memref<256x384xbf16, #tpu.memory_space<vmem>>, vector<16x64xbf16>,
    %c0_66 = arith.constant 0 : index
    %c4_67 = arith.constant 4 : index
    %c1_68 = arith.constant 1 : index
    %c0_69 = arith.constant 0 : index
    %39 = vector.load %arg1[%c0_66, %c4_67, %c1_68, %c0_69] : memref<1x34x17x64xbf16, #tpu.memory_space<vmem>>, vector<1x1x16x64xbf16>
    %40 = vector.shape_cast %39 : vector<1x1x16x64xbf16> to vector<16x64xbf16>
    %c32_70 = arith.constant 32 : index
    %c64_71 = arith.constant 64 : index
    %41 = vector.load %arg5[%c32_70, %c64_71] : memref<256x384xbf16, #tpu.memory_space<vmem>>, vector<16x64xbf16>
    tpu.vector_store %arg5[%c32_70, %c64_71], %40 {strides = array<i32>} : memref<256x384xbf16, #tpu.memory_space<vmem>>, vector<16x64xbf16>,
    %c0_72 = arith.constant 0 : index
    %c5 = arith.constant 5 : index
    %c0_73 = arith.constant 0 : index
    %c0_74 = arith.constant 0 : index
    %42 = vector.load %arg1[%c0_72, %c5, %c0_73, %c0_74] : memref<1x34x17x64xbf16, #tpu.memory_space<vmem>>, vector<1x1x16x64xbf16>
    %43 = vector.shape_cast %42 : vector<1x1x16x64xbf16> to vector<16x64xbf16>
    %c32_75 = arith.constant 32 : index
    %c128_76 = arith.constant 128 : index
    %44 = vector.load %arg5[%c32_75, %c128_76] : memref<256x384xbf16, #tpu.memory_space<vmem>>, vector<16x64xbf16>
    tpu.vector_store %arg5[%c32_75, %c128_76], %43 {strides = array<i32>} : memref<256x384xbf16, #tpu.memory_space<vmem>>, vector<16x64xbf16>,
    %c0_77 = arith.constant 0 : index
    %c5_78 = arith.constant 5 : index
    %c1_79 = arith.constant 1 : index
    %c0_80 = arith.constant 0 : index
    %45 = vector.load %arg1[%c0_77, %c5_78, %c1_79, %c0_80] : memref<1x34x17x64xbf16, #tpu.memory_space<vmem>>, vector<1x1x16x64xbf16>
    %46 = vector.shape_cast %45 : vector<1x1x16x64xbf16> to vector<16x64xbf16>
    %c32_81 = arith.constant 32 : index
    %c192_82 = arith.constant 192 : index
    %47 = vector.load %arg5[%c32_81, %c192_82] : memref<256x384xbf16, #tpu.memory_space<vmem>>, vector<16x64xbf16>
    tpu.vector_store %arg5[%c32_81, %c192_82], %46 {strides = array<i32>} : memref<256x384xbf16, #tpu.memory_space<vmem>>, vector<16x64xbf16>,
    %c0_83 = arith.constant 0 : index
    %c6 = arith.constant 6 : index
    %c0_84 = arith.constant 0 : index
    %c0_85 = arith.constant 0 : index
    %48 = vector.load %arg1[%c0_83, %c6, %c0_84, %c0_85] : memref<1x34x17x64xbf16, #tpu.memory_space<vmem>>, vector<1x1x16x64xbf16>
    %49 = vector.shape_cast %48 : vector<1x1x16x64xbf16> to vector<16x64xbf16>
    %c32_86 = arith.constant 32 : index
    %c256_87 = arith.constant 256 : index
    %50 = vector.load %arg5[%c32_86, %c256_87] : memref<256x384xbf16, #tpu.memory_space<vmem>>, vector<16x64xbf16>
    tpu.vector_store %arg5[%c32_86, %c256_87], %49 {strides = array<i32>} : memref<256x384xbf16, #tpu.memory_space<vmem>>, vector<16x64xbf16>,
    %c0_88 = arith.constant 0 : index
    %c6_89 = arith.constant 6 : index
    %c1_90 = arith.constant 1 : index
    %c0_91 = arith.constant 0 : index
    %51 = vector.load %arg1[%c0_88, %c6_89, %c1_90, %c0_91] : memref<1x34x17x64xbf16, #tpu.memory_space<vmem>>, vector<1x1x16x64xbf16>
    %52 = vector.shape_cast %51 : vector<1x1x16x64xbf16> to vector<16x64xbf16>
    %c32_92 = arith.constant 32 : index
    %c320_93 = arith.constant 320 : index
    %53 = vector.load %arg5[%c32_92, %c320_93] : memref<256x384xbf16, #tpu.memory_space<vmem>>, vector<16x64xbf16>
    tpu.vector_store %arg5[%c32_92, %c320_93], %52 {strides = array<i32>} : memref<256x384xbf16, #tpu.memory_space<vmem>>, vector<16x64xbf16>,
    %c0_94 = arith.constant 0 : index
    %c6_95 = arith.constant 6 : index
    %c0_96 = arith.constant 0 : index
    %c0_97 = arith.constant 0 : index
    %54 = vector.load %arg1[%c0_94, %c6_95, %c0_96, %c0_97] : memref<1x34x17x64xbf16, #tpu.memory_space<vmem>>, vector<1x1x16x64xbf16>
    %55 = vector.shape_cast %54 : vector<1x1x16x64xbf16> to vector<16x64xbf16>
    %c48 = arith.constant 48 : index
    %c0_98 = arith.constant 0 : index
    %56 = vector.load %arg5[%c48, %c0_98] : memref<256x384xbf16, #tpu.memory_space<vmem>>, vector<16x64xbf16>
    tpu.vector_store %arg5[%c48, %c0_98], %55 {strides = array<i32>} : memref<256x384xbf16, #tpu.memory_space<vmem>>, vector<16x64xbf16>,
    %c0_99 = arith.constant 0 : index
    %c6_100 = arith.constant 6 : index
    %c1_101 = arith.constant 1 : index
    %c0_102 = arith.constant 0 : index
    %57 = vector.load %arg1[%c0_99, %c6_100, %c1_101, %c0_102] : memref<1x34x17x64xbf16, #tpu.memory_space<vmem>>, vector<1x1x16x64xbf16>
    %58 = vector.shape_cast %57 : vector<1x1x16x64xbf16> to vector<16x64xbf16>
    %c48_103 = arith.constant 48 : index
    %c64_104 = arith.constant 64 : index
    %59 = vector.load %arg5[%c48_103, %c64_104] : memref<256x384xbf16, #tpu.memory_space<vmem>>, vector<16x64xbf16>
    tpu.vector_store %arg5[%c48_103, %c64_104], %58 {strides = array<i32>} : memref<256x384xbf16, #tpu.memory_space<vmem>>, vector<16x64xbf16>,
    %c0_105 = arith.constant 0 : index
    %c7 = arith.constant 7 : index
    %c0_106 = arith.constant 0 : index
    %c0_107 = arith.constant 0 : index
    %60 = vector.load %arg1[%c0_105, %c7, %c0_106, %c0_107] : memref<1x34x17x64xbf16, #tpu.memory_space<vmem>>, vector<1x1x16x64xbf16>
    %61 = vector.shape_cast %60 : vector<1x1x16x64xbf16> to vector<16x64xbf16>
    %c48_108 = arith.constant 48 : index
    %c128_109 = arith.constant 128 : index
    %62 = vector.load %arg5[%c48_108, %c128_109] : memref<256x384xbf16, #tpu.memory_space<vmem>>, vector<16x64xbf16>
    tpu.vector_store %arg5[%c48_108, %c128_109], %61 {strides = array<i32>} : memref<256x384xbf16, #tpu.memory_space<vmem>>, vector<16x64xbf16>,
    %c0_110 = arith.constant 0 : index
    %c7_111 = arith.constant 7 : index
    %c1_112 = arith.constant 1 : index
    %c0_113 = arith.constant 0 : index
    %63 = vector.load %arg1[%c0_110, %c7_111, %c1_112, %c0_113] : memref<1x34x17x64xbf16, #tpu.memory_space<vmem>>, vector<1x1x16x64xbf16>
    %64 = vector.shape_cast %63 : vector<1x1x16x64xbf16> to vector<16x64xbf16>
    %c48_114 = arith.constant 48 : index
    %c192_115 = arith.constant 192 : index
    %65 = vector.load %arg5[%c48_114, %c192_115] : memref<256x384xbf16, #tpu.memory_space<vmem>>, vector<16x64xbf16>
    tpu.vector_store %arg5[%c48_114, %c192_115], %64 {strides = array<i32>} : memref<256x384xbf16, #tpu.memory_space<vmem>>, vector<16x64xbf16>,
    %c0_116 = arith.constant 0 : index
    %c8 = arith.constant 8 : index
    %c0_117 = arith.constant 0 : index
    %c0_118 = arith.constant 0 : index
    %66 = vector.load %arg1[%c0_116, %c8, %c0_117, %c0_118] : memref<1x34x17x64xbf16, #tpu.memory_space<vmem>>, vector<1x1x16x64xbf16>
    %67 = vector.shape_cast %66 : vector<1x1x16x64xbf16> to vector<16x64xbf16>
    %c48_119 = arith.constant 48 : index
    %c256_120 = arith.constant 256 : index
    %68 = vector.load %arg5[%c48_119, %c256_120] : memref<256x384xbf16, #tpu.memory_space<vmem>>, vector<16x64xbf16>
    tpu.vector_store %arg5[%c48_119, %c256_120], %67 {strides = array<i32>} : memref<256x384xbf16, #tpu.memory_space<vmem>>, vector<16x64xbf16>,
    %c0_121 = arith.constant 0 : index
    %c8_122 = arith.constant 8 : index
    %c1_123 = arith.constant 1 : index
    %c0_124 = arith.constant 0 : index
    %69 = vector.load %arg1[%c0_121, %c8_122, %c1_123, %c0_124] : memref<1x34x17x64xbf16, #tpu.memory_space<vmem>>, vector<1x1x16x64xbf16>
    %70 = vector.shape_cast %69 : vector<1x1x16x64xbf16> to vector<16x64xbf16>
    %c48_125 = arith.constant 48 : index
    %c320_126 = arith.constant 320 : index
    %71 = vector.load %arg5[%c48_125, %c320_126] : memref<256x384xbf16, #tpu.memory_space<vmem>>, vector<16x64xbf16>
    tpu.vector_store %arg5[%c48_125, %c320_126], %70 {strides = array<i32>} : memref<256x384xbf16, #tpu.memory_space<vmem>>, vector<16x64xbf16>,
    %c0_127 = arith.constant 0 : index
    %c8_128 = arith.constant 8 : index
    %c0_129 = arith.constant 0 : index
    %c0_130 = arith.constant 0 : index
    %72 = vector.load %arg1[%c0_127, %c8_128, %c0_129, %c0_130] : memref<1x34x17x64xbf16, #tpu.memory_space<vmem>>, vector<1x1x16x64xbf16>
    %73 = vector.shape_cast %72 : vector<1x1x16x64xbf16> to vector<16x64xbf16>
    %c64_131 = arith.constant 64 : index
    %c0_132 = arith.constant 0 : index
    %74 = vector.load %arg5[%c64_131, %c0_132] : memref<256x384xbf16, #tpu.memory_space<vmem>>, vector<16x64xbf16>
    tpu.vector_store %arg5[%c64_131, %c0_132], %73 {strides = array<i32>} : memref<256x384xbf16, #tpu.memory_space<vmem>>, vector<16x64xbf16>,
    %c0_133 = arith.constant 0 : index
    %c8_134 = arith.constant 8 : index
    %c1_135 = arith.constant 1 : index
    %c0_136 = arith.constant 0 : index
    %75 = vector.load %arg1[%c0_133, %c8_134, %c1_135, %c0_136] : memref<1x34x17x64xbf16, #tpu.memory_space<vmem>>, vector<1x1x16x64xbf16>
    %76 = vector.shape_cast %75 : vector<1x1x16x64xbf16> to vector<16x64xbf16>
    %c64_137 = arith.constant 64 : index
    %c64_138 = arith.constant 64 : index
    %77 = vector.load %arg5[%c64_137, %c64_138] : memref<256x384xbf16, #tpu.memory_space<vmem>>, vector<16x64xbf16>
    tpu.vector_store %arg5[%c64_137, %c64_138], %76 {strides = array<i32>} : memref<256x384xbf16, #tpu.memory_space<vmem>>, vector<16x64xbf16>,
    %c0_139 = arith.constant 0 : index
    %c9 = arith.constant 9 : index
    %c0_140 = arith.constant 0 : index
    %c0_141 = arith.constant 0 : index
    %78 = vector.load %arg1[%c0_139, %c9, %c0_140, %c0_141] : memref<1x34x17x64xbf16, #tpu.memory_space<vmem>>, vector<1x1x16x64xbf16>
    %79 = vector.shape_cast %78 : vector<1x1x16x64xbf16> to vector<16x64xbf16>
    %c64_142 = arith.constant 64 : index
    %c128_143 = arith.constant 128 : index
    %80 = vector.load %arg5[%c64_142, %c128_143] : memref<256x384xbf16, #tpu.memory_space<vmem>>, vector<16x64xbf16>
    tpu.vector_store %arg5[%c64_142, %c128_143], %79 {strides = array<i32>} : memref<256x384xbf16, #tpu.memory_space<vmem>>, vector<16x64xbf16>,
    %c0_144 = arith.constant 0 : index
    %c9_145 = arith.constant 9 : index
    %c1_146 = arith.constant 1 : index
    %c0_147 = arith.constant 0 : index
    %81 = vector.load %arg1[%c0_144, %c9_145, %c1_146, %c0_147] : memref<1x34x17x64xbf16, #tpu.memory_space<vmem>>, vector<1x1x16x64xbf16>
    %82 = vector.shape_cast %81 : vector<1x1x16x64xbf16> to vector<16x64xbf16>
    %c64_148 = arith.constant 64 : index
    %c192_149 = arith.constant 192 : index
    %83 = vector.load %arg5[%c64_148, %c192_149] : memref<256x384xbf16, #tpu.memory_space<vmem>>, vector<16x64xbf16>
    tpu.vector_store %arg5[%c64_148, %c192_149], %82 {strides = array<i32>} : memref<256x384xbf16, #tpu.memory_space<vmem>>, vector<16x64xbf16>,
    %c0_150 = arith.constant 0 : index
    %c10 = arith.constant 10 : index
    %c0_151 = arith.constant 0 : index
    %c0_152 = arith.constant 0 : index
    %84 = vector.load %arg1[%c0_150, %c10, %c0_151, %c0_152] : memref<1x34x17x64xbf16, #tpu.memory_space<vmem>>, vector<1x1x16x64xbf16>
    %85 = vector.shape_cast %84 : vector<1x1x16x64xbf16> to vector<16x64xbf16>
    %c64_153 = arith.constant 64 : index
    %c256_154 = arith.constant 256 : index
    %86 = vector.load %arg5[%c64_153, %c256_154] : memref<256x384xbf16, #tpu.memory_space<vmem>>, vector<16x64xbf16>
    tpu.vector_store %arg5[%c64_153, %c256_154], %85 {strides = array<i32>} : memref<256x384xbf16, #tpu.memory_space<vmem>>, vector<16x64xbf16>,
    %c0_155 = arith.constant 0 : index
    %c10_156 = arith.constant 10 : index
    %c1_157 = arith.constant 1 : index
    %c0_158 = arith.constant 0 : index
    %87 = vector.load %arg1[%c0_155, %c10_156, %c1_157, %c0_158] : memref<1x34x17x64xbf16, #tpu.memory_space<vmem>>, vector<1x1x16x64xbf16>
    %88 = vector.shape_cast %87 : vector<1x1x16x64xbf16> to vector<16x64xbf16>
    %c64_159 = arith.constant 64 : index
    %c320_160 = arith.constant 320 : index
    %89 = vector.load %arg5[%c64_159, %c320_160] : memref<256x384xbf16, #tpu.memory_space<vmem>>, vector<16x64xbf16>
    tpu.vector_store %arg5[%c64_159, %c320_160], %88 {strides = array<i32>} : memref<256x384xbf16, #tpu.memory_space<vmem>>, vector<16x64xbf16>,
    %c0_161 = arith.constant 0 : index
    %c10_162 = arith.constant 10 : index
    %c0_163 = arith.constant 0 : index
    %c0_164 = arith.constant 0 : index
    %90 = vector.load %arg1[%c0_161, %c10_162, %c0_163, %c0_164] : memref<1x34x17x64xbf16, #tpu.memory_space<vmem>>, vector<1x1x16x64xbf16>
    %91 = vector.shape_cast %90 : vector<1x1x16x64xbf16> to vector<16x64xbf16>
    %c80 = arith.constant 80 : index
    %c0_165 = arith.constant 0 : index
    %92 = vector.load %arg5[%c80, %c0_165] : memref<256x384xbf16, #tpu.memory_space<vmem>>, vector<16x64xbf16>
    tpu.vector_store %arg5[%c80, %c0_165], %91 {strides = array<i32>} : memref<256x384xbf16, #tpu.memory_space<vmem>>, vector<16x64xbf16>,
    %c0_166 = arith.constant 0 : index
    %c10_167 = arith.constant 10 : index
    %c1_168 = arith.constant 1 : index
    %c0_169 = arith.constant 0 : index
    %93 = vector.load %arg1[%c0_166, %c10_167, %c1_168, %c0_169] : memref<1x34x17x64xbf16, #tpu.memory_space<vmem>>, vector<1x1x16x64xbf16>
    %94 = vector.shape_cast %93 : vector<1x1x16x64xbf16> to vector<16x64xbf16>
    %c80_170 = arith.constant 80 : index
    %c64_171 = arith.constant 64 : index
    %95 = vector.load %arg5[%c80_170, %c64_171] : memref<256x384xbf16, #tpu.memory_space<vmem>>, vector<16x64xbf16>
    tpu.vector_store %arg5[%c80_170, %c64_171], %94 {strides = array<i32>} : memref<256x384xbf16, #tpu.memory_space<vmem>>, vector<16x64xbf16>,
    %c0_172 = arith.constant 0 : index
    %c11 = arith.constant 11 : index
    %c0_173 = arith.constant 0 : index
    %c0_174 = arith.constant 0 : index
    %96 = vector.load %arg1[%c0_172, %c11, %c0_173, %c0_174] : memref<1x34x17x64xbf16, #tpu.memory_space<vmem>>, vector<1x1x16x64xbf16>
    %97 = vector.shape_cast %96 : vector<1x1x16x64xbf16> to vector<16x64xbf16>
    %c80_175 = arith.constant 80 : index
    %c128_176 = arith.constant 128 : index
    %98 = vector.load %arg5[%c80_175, %c128_176] : memref<256x384xbf16, #tpu.memory_space<vmem>>, vector<16x64xbf16>
    tpu.vector_store %arg5[%c80_175, %c128_176], %97 {strides = array<i32>} : memref<256x384xbf16, #tpu.memory_space<vmem>>, vector<16x64xbf16>,
    %c0_177 = arith.constant 0 : index
    %c11_178 = arith.constant 11 : index
    %c1_179 = arith.constant 1 : index
    %c0_180 = arith.constant 0 : index
    %99 = vector.load %arg1[%c0_177, %c11_178, %c1_179, %c0_180] : memref<1x34x17x64xbf16, #tpu.memory_space<vmem>>, vector<1x1x16x64xbf16>
    %100 = vector.shape_cast %99 : vector<1x1x16x64xbf16> to vector<16x64xbf16>
    %c80_181 = arith.constant 80 : index
    %c192_182 = arith.constant 192 : index
    %101 = vector.load %arg5[%c80_181, %c192_182] : memref<256x384xbf16, #tpu.memory_space<vmem>>, vector<16x64xbf16>
    tpu.vector_store %arg5[%c80_181, %c192_182], %100 {strides = array<i32>} : memref<256x384xbf16, #tpu.memory_space<vmem>>, vector<16x64xbf16>,
    %c0_183 = arith.constant 0 : index
    %c12 = arith.constant 12 : index
    %c0_184 = arith.constant 0 : index
    %c0_185 = arith.constant 0 : index
    %102 = vector.load %arg1[%c0_183, %c12, %c0_184, %c0_185] : memref<1x34x17x64xbf16, #tpu.memory_space<vmem>>, vector<1x1x16x64xbf16>
    %103 = vector.shape_cast %102 : vector<1x1x16x64xbf16> to vector<16x64xbf16>
    %c80_186 = arith.constant 80 : index
    %c256_187 = arith.constant 256 : index
    %104 = vector.load %arg5[%c80_186, %c256_187] : memref<256x384xbf16, #tpu.memory_space<vmem>>, vector<16x64xbf16>
    tpu.vector_store %arg5[%c80_186, %c256_187], %103 {strides = array<i32>} : memref<256x384xbf16, #tpu.memory_space<vmem>>, vector<16x64xbf16>,
    %c0_188 = arith.constant 0 : index
    %c12_189 = arith.constant 12 : index
    %c1_190 = arith.constant 1 : index
    %c0_191 = arith.constant 0 : index
    %105 = vector.load %arg1[%c0_188, %c12_189, %c1_190, %c0_191] : memref<1x34x17x64xbf16, #tpu.memory_space<vmem>>, vector<1x1x16x64xbf16>
    %106 = vector.shape_cast %105 : vector<1x1x16x64xbf16> to vector<16x64xbf16>
    %c80_192 = arith.constant 80 : index
    %c320_193 = arith.constant 320 : index
    %107 = vector.load %arg5[%c80_192, %c320_193] : memref<256x384xbf16, #tpu.memory_space<vmem>>, vector<16x64xbf16>
    tpu.vector_store %arg5[%c80_192, %c320_193], %106 {strides = array<i32>} : memref<256x384xbf16, #tpu.memory_space<vmem>>, vector<16x64xbf16>,
    %c0_194 = arith.constant 0 : index
    %c12_195 = arith.constant 12 : index
    %c0_196 = arith.constant 0 : index
    %c0_197 = arith.constant 0 : index
    %108 = vector.load %arg1[%c0_194, %c12_195, %c0_196, %c0_197] : memref<1x34x17x64xbf16, #tpu.memory_space<vmem>>, vector<1x1x16x64xbf16>
    %109 = vector.shape_cast %108 : vector<1x1x16x64xbf16> to vector<16x64xbf16>
    %c96 = arith.constant 96 : index
    %c0_198 = arith.constant 0 : index
    %110 = vector.load %arg5[%c96, %c0_198] : memref<256x384xbf16, #tpu.memory_space<vmem>>, vector<16x64xbf16>
    tpu.vector_store %arg5[%c96, %c0_198], %109 {strides = array<i32>} : memref<256x384xbf16, #tpu.memory_space<vmem>>, vector<16x64xbf16>,
    %c0_199 = arith.constant 0 : index
    %c12_200 = arith.constant 12 : index
    %c1_201 = arith.constant 1 : index
    %c0_202 = arith.constant 0 : index
    %111 = vector.load %arg1[%c0_199, %c12_200, %c1_201, %c0_202] : memref<1x34x17x64xbf16, #tpu.memory_space<vmem>>, vector<1x1x16x64xbf16>
    %112 = vector.shape_cast %111 : vector<1x1x16x64xbf16> to vector<16x64xbf16>
    %c96_203 = arith.constant 96 : index
    %c64_204 = arith.constant 64 : index
    %113 = vector.load %arg5[%c96_203, %c64_204] : memref<256x384xbf16, #tpu.memory_space<vmem>>, vector<16x64xbf16>
    tpu.vector_store %arg5[%c96_203, %c64_204], %112 {strides = array<i32>} : memref<256x384xbf16, #tpu.memory_space<vmem>>, vector<16x64xbf16>,
    %c0_205 = arith.constant 0 : index
    %c13 = arith.constant 13 : index
    %c0_206 = arith.constant 0 : index
    %c0_207 = arith.constant 0 : index
    %114 = vector.load %arg1[%c0_205, %c13, %c0_206, %c0_207] : memref<1x34x17x64xbf16, #tpu.memory_space<vmem>>, vector<1x1x16x64xbf16>
    %115 = vector.shape_cast %114 : vector<1x1x16x64xbf16> to vector<16x64xbf16>
    %c96_208 = arith.constant 96 : index
    %c128_209 = arith.constant 128 : index
    %116 = vector.load %arg5[%c96_208, %c128_209] : memref<256x384xbf16, #tpu.memory_space<vmem>>, vector<16x64xbf16>
    tpu.vector_store %arg5[%c96_208, %c128_209], %115 {strides = array<i32>} : memref<256x384xbf16, #tpu.memory_space<vmem>>, vector<16x64xbf16>,
    %c0_210 = arith.constant 0 : index
    %c13_211 = arith.constant 13 : index
    %c1_212 = arith.constant 1 : index
    %c0_213 = arith.constant 0 : index
    %117 = vector.load %arg1[%c0_210, %c13_211, %c1_212, %c0_213] : memref<1x34x17x64xbf16, #tpu.memory_space<vmem>>, vector<1x1x16x64xbf16>
    %118 = vector.shape_cast %117 : vector<1x1x16x64xbf16> to vector<16x64xbf16>
    %c96_214 = arith.constant 96 : index
    %c192_215 = arith.constant 192 : index
    %119 = vector.load %arg5[%c96_214, %c192_215] : memref<256x384xbf16, #tpu.memory_space<vmem>>, vector<16x64xbf16>
    tpu.vector_store %arg5[%c96_214, %c192_215], %118 {strides = array<i32>} : memref<256x384xbf16, #tpu.memory_space<vmem>>, vector<16x64xbf16>,
    %c0_216 = arith.constant 0 : index
    %c14 = arith.constant 14 : index
    %c0_217 = arith.constant 0 : index
    %c0_218 = arith.constant 0 : index
    %120 = vector.load %arg1[%c0_216, %c14, %c0_217, %c0_218] : memref<1x34x17x64xbf16, #tpu.memory_space<vmem>>, vector<1x1x16x64xbf16>
    %121 = vector.shape_cast %120 : vector<1x1x16x64xbf16> to vector<16x64xbf16>
    %c96_219 = arith.constant 96 : index
    %c256_220 = arith.constant 256 : index
    %122 = vector.load %arg5[%c96_219, %c256_220] : memref<256x384xbf16, #tpu.memory_space<vmem>>, vector<16x64xbf16>
    tpu.vector_store %arg5[%c96_219, %c256_220], %121 {strides = array<i32>} : memref<256x384xbf16, #tpu.memory_space<vmem>>, vector<16x64xbf16>,
    %c0_221 = arith.constant 0 : index
    %c14_222 = arith.constant 14 : index
    %c1_223 = arith.constant 1 : index
    %c0_224 = arith.constant 0 : index
    %123 = vector.load %arg1[%c0_221, %c14_222, %c1_223, %c0_224] : memref<1x34x17x64xbf16, #tpu.memory_space<vmem>>, vector<1x1x16x64xbf16>
    %124 = vector.shape_cast %123 : vector<1x1x16x64xbf16> to vector<16x64xbf16>
    %c96_225 = arith.constant 96 : index
    %c320_226 = arith.constant 320 : index
    %125 = vector.load %arg5[%c96_225, %c320_226] : memref<256x384xbf16, #tpu.memory_space<vmem>>, vector<16x64xbf16>
    tpu.vector_store %arg5[%c96_225, %c320_226], %124 {strides = array<i32>} : memref<256x384xbf16, #tpu.memory_space<vmem>>, vector<16x64xbf16>,
    %c0_227 = arith.constant 0 : index
    %c14_228 = arith.constant 14 : index
    %c0_229 = arith.constant 0 : index
    %c0_230 = arith.constant 0 : index
    %126 = vector.load %arg1[%c0_227, %c14_228, %c0_229, %c0_230] : memref<1x34x17x64xbf16, #tpu.memory_space<vmem>>, vector<1x1x16x64xbf16>
    %127 = vector.shape_cast %126 : vector<1x1x16x64xbf16> to vector<16x64xbf16>
    %c112 = arith.constant 112 : index
    %c0_231 = arith.constant 0 : index
    %128 = vector.load %arg5[%c112, %c0_231] : memref<256x384xbf16, #tpu.memory_space<vmem>>, vector<16x64xbf16>
    tpu.vector_store %arg5[%c112, %c0_231], %127 {strides = array<i32>} : memref<256x384xbf16, #tpu.memory_space<vmem>>, vector<16x64xbf16>,
    %c0_232 = arith.constant 0 : index
    %c14_233 = arith.constant 14 : index
    %c1_234 = arith.constant 1 : index
    %c0_235 = arith.constant 0 : index
    %129 = vector.load %arg1[%c0_232, %c14_233, %c1_234, %c0_235] : memref<1x34x17x64xbf16, #tpu.memory_space<vmem>>, vector<1x1x16x64xbf16>
    %130 = vector.shape_cast %129 : vector<1x1x16x64xbf16> to vector<16x64xbf16>
    %c112_236 = arith.constant 112 : index
    %c64_237 = arith.constant 64 : index
    %131 = vector.load %arg5[%c112_236, %c64_237] : memref<256x384xbf16, #tpu.memory_space<vmem>>, vector<16x64xbf16>
    tpu.vector_store %arg5[%c112_236, %c64_237], %130 {strides = array<i32>} : memref<256x384xbf16, #tpu.memory_space<vmem>>, vector<16x64xbf16>,
    %c0_238 = arith.constant 0 : index
    %c15 = arith.constant 15 : index
    %c0_239 = arith.constant 0 : index
    %c0_240 = arith.constant 0 : index
    %132 = vector.load %arg1[%c0_238, %c15, %c0_239, %c0_240] : memref<1x34x17x64xbf16, #tpu.memory_space<vmem>>, vector<1x1x16x64xbf16>
    %133 = vector.shape_cast %132 : vector<1x1x16x64xbf16> to vector<16x64xbf16>
    %c112_241 = arith.constant 112 : index
    %c128_242 = arith.constant 128 : index
    %134 = vector.load %arg5[%c112_241, %c128_242] : memref<256x384xbf16, #tpu.memory_space<vmem>>, vector<16x64xbf16>
    tpu.vector_store %arg5[%c112_241, %c128_242], %133 {strides = array<i32>} : memref<256x384xbf16, #tpu.memory_space<vmem>>, vector<16x64xbf16>,
    %c0_243 = arith.constant 0 : index
    %c15_244 = arith.constant 15 : index
    %c1_245 = arith.constant 1 : index
    %c0_246 = arith.constant 0 : index
    %135 = vector.load %arg1[%c0_243, %c15_244, %c1_245, %c0_246] : memref<1x34x17x64xbf16, #tpu.memory_space<vmem>>, vector<1x1x16x64xbf16>
    %136 = vector.shape_cast %135 : vector<1x1x16x64xbf16> to vector<16x64xbf16>
    %c112_247 = arith.constant 112 : index
    %c192_248 = arith.constant 192 : index
    %137 = vector.load %arg5[%c112_247, %c192_248] : memref<256x384xbf16, #tpu.memory_space<vmem>>, vector<16x64xbf16>
    tpu.vector_store %arg5[%c112_247, %c192_248], %136 {strides = array<i32>} : memref<256x384xbf16, #tpu.memory_space<vmem>>, vector<16x64xbf16>,
    %c0_249 = arith.constant 0 : index
    %c16_250 = arith.constant 16 : index
    %c0_251 = arith.constant 0 : index
    %c0_252 = arith.constant 0 : index
    %138 = vector.load %arg1[%c0_249, %c16_250, %c0_251, %c0_252] : memref<1x34x17x64xbf16, #tpu.memory_space<vmem>>, vector<1x1x16x64xbf16>
    %139 = vector.shape_cast %138 : vector<1x1x16x64xbf16> to vector<16x64xbf16>
    %c112_253 = arith.constant 112 : index
    %c256_254 = arith.constant 256 : index
    %140 = vector.load %arg5[%c112_253, %c256_254] : memref<256x384xbf16, #tpu.memory_space<vmem>>, vector<16x64xbf16>
    tpu.vector_store %arg5[%c112_253, %c256_254], %139 {strides = array<i32>} : memref<256x384xbf16, #tpu.memory_space<vmem>>, vector<16x64xbf16>,
    %c0_255 = arith.constant 0 : index
    %c16_256 = arith.constant 16 : index
    %c1_257 = arith.constant 1 : index
    %c0_258 = arith.constant 0 : index
    %141 = vector.load %arg1[%c0_255, %c16_256, %c1_257, %c0_258] : memref<1x34x17x64xbf16, #tpu.memory_space<vmem>>, vector<1x1x16x64xbf16>
    %142 = vector.shape_cast %141 : vector<1x1x16x64xbf16> to vector<16x64xbf16>
    %c112_259 = arith.constant 112 : index
    %c320_260 = arith.constant 320 : index
    %143 = vector.load %arg5[%c112_259, %c320_260] : memref<256x384xbf16, #tpu.memory_space<vmem>>, vector<16x64xbf16>
    tpu.vector_store %arg5[%c112_259, %c320_260], %142 {strides = array<i32>} : memref<256x384xbf16, #tpu.memory_space<vmem>>, vector<16x64xbf16>,
    %c0_261 = arith.constant 0 : index
    %c16_262 = arith.constant 16 : index
    %c0_263 = arith.constant 0 : index
    %c0_264 = arith.constant 0 : index
    %144 = vector.load %arg1[%c0_261, %c16_262, %c0_263, %c0_264] : memref<1x34x17x64xbf16, #tpu.memory_space<vmem>>, vector<1x1x16x64xbf16>
    %145 = vector.shape_cast %144 : vector<1x1x16x64xbf16> to vector<16x64xbf16>
    %c128_265 = arith.constant 128 : index
    %c0_266 = arith.constant 0 : index
    %146 = vector.load %arg5[%c128_265, %c0_266] : memref<256x384xbf16, #tpu.memory_space<vmem>>, vector<16x64xbf16>
    tpu.vector_store %arg5[%c128_265, %c0_266], %145 {strides = array<i32>} : memref<256x384xbf16, #tpu.memory_space<vmem>>, vector<16x64xbf16>,
    %c0_267 = arith.constant 0 : index
    %c16_268 = arith.constant 16 : index
    %c1_269 = arith.constant 1 : index
    %c0_270 = arith.constant 0 : index
    %147 = vector.load %arg1[%c0_267, %c16_268, %c1_269, %c0_270] : memref<1x34x17x64xbf16, #tpu.memory_space<vmem>>, vector<1x1x16x64xbf16>
    %148 = vector.shape_cast %147 : vector<1x1x16x64xbf16> to vector<16x64xbf16>
    %c128_271 = arith.constant 128 : index
    %c64_272 = arith.constant 64 : index
    %149 = vector.load %arg5[%c128_271, %c64_272] : memref<256x384xbf16, #tpu.memory_space<vmem>>, vector<16x64xbf16>
    tpu.vector_store %arg5[%c128_271, %c64_272], %148 {strides = array<i32>} : memref<256x384xbf16, #tpu.memory_space<vmem>>, vector<16x64xbf16>,
    %c0_273 = arith.constant 0 : index
    %c17 = arith.constant 17 : index
    %c0_274 = arith.constant 0 : index
    %c0_275 = arith.constant 0 : index
    %150 = vector.load %arg1[%c0_273, %c17, %c0_274, %c0_275] : memref<1x34x17x64xbf16, #tpu.memory_space<vmem>>, vector<1x1x16x64xbf16>
    %151 = vector.shape_cast %150 : vector<1x1x16x64xbf16> to vector<16x64xbf16>
    %c128_276 = arith.constant 128 : index
    %c128_277 = arith.constant 128 : index
    %152 = vector.load %arg5[%c128_276, %c128_277] : memref<256x384xbf16, #tpu.memory_space<vmem>>, vector<16x64xbf16>
    tpu.vector_store %arg5[%c128_276, %c128_277], %151 {strides = array<i32>} : memref<256x384xbf16, #tpu.memory_space<vmem>>, vector<16x64xbf16>,
    %c0_278 = arith.constant 0 : index
    %c17_279 = arith.constant 17 : index
    %c1_280 = arith.constant 1 : index
    %c0_281 = arith.constant 0 : index
    %153 = vector.load %arg1[%c0_278, %c17_279, %c1_280, %c0_281] : memref<1x34x17x64xbf16, #tpu.memory_space<vmem>>, vector<1x1x16x64xbf16>
    %154 = vector.shape_cast %153 : vector<1x1x16x64xbf16> to vector<16x64xbf16>
    %c128_282 = arith.constant 128 : index
    %c192_283 = arith.constant 192 : index
    %155 = vector.load %arg5[%c128_282, %c192_283] : memref<256x384xbf16, #tpu.memory_space<vmem>>, vector<16x64xbf16>
    tpu.vector_store %arg5[%c128_282, %c192_283], %154 {strides = array<i32>} : memref<256x384xbf16, #tpu.memory_space<vmem>>, vector<16x64xbf16>,
    %c0_284 = arith.constant 0 : index
    %c18 = arith.constant 18 : index
    %c0_285 = arith.constant 0 : index
    %c0_286 = arith.constant 0 : index
    %156 = vector.load %arg1[%c0_284, %c18, %c0_285, %c0_286] : memref<1x34x17x64xbf16, #tpu.memory_space<vmem>>, vector<1x1x16x64xbf16>
    %157 = vector.shape_cast %156 : vector<1x1x16x64xbf16> to vector<16x64xbf16>
    %c128_287 = arith.constant 128 : index
    %c256_288 = arith.constant 256 : index
    %158 = vector.load %arg5[%c128_287, %c256_288] : memref<256x384xbf16, #tpu.memory_space<vmem>>, vector<16x64xbf16>
    tpu.vector_store %arg5[%c128_287, %c256_288], %157 {strides = array<i32>} : memref<256x384xbf16, #tpu.memory_space<vmem>>, vector<16x64xbf16>,
    %c0_289 = arith.constant 0 : index
    %c18_290 = arith.constant 18 : index
    %c1_291 = arith.constant 1 : index
    %c0_292 = arith.constant 0 : index
    %159 = vector.load %arg1[%c0_289, %c18_290, %c1_291, %c0_292] : memref<1x34x17x64xbf16, #tpu.memory_space<vmem>>, vector<1x1x16x64xbf16>
    %160 = vector.shape_cast %159 : vector<1x1x16x64xbf16> to vector<16x64xbf16>
    %c128_293 = arith.constant 128 : index
    %c320_294 = arith.constant 320 : index
    %161 = vector.load %arg5[%c128_293, %c320_294] : memref<256x384xbf16, #tpu.memory_space<vmem>>, vector<16x64xbf16>
    tpu.vector_store %arg5[%c128_293, %c320_294], %160 {strides = array<i32>} : memref<256x384xbf16, #tpu.memory_space<vmem>>, vector<16x64xbf16>,
    %c0_295 = arith.constant 0 : index
    %c18_296 = arith.constant 18 : index
    %c0_297 = arith.constant 0 : index
    %c0_298 = arith.constant 0 : index
    %162 = vector.load %arg1[%c0_295, %c18_296, %c0_297, %c0_298] : memref<1x34x17x64xbf16, #tpu.memory_space<vmem>>, vector<1x1x16x64xbf16>
    %163 = vector.shape_cast %162 : vector<1x1x16x64xbf16> to vector<16x64xbf16>
    %c144 = arith.constant 144 : index
    %c0_299 = arith.constant 0 : index
    %164 = vector.load %arg5[%c144, %c0_299] : memref<256x384xbf16, #tpu.memory_space<vmem>>, vector<16x64xbf16>
    tpu.vector_store %arg5[%c144, %c0_299], %163 {strides = array<i32>} : memref<256x384xbf16, #tpu.memory_space<vmem>>, vector<16x64xbf16>,
    %c0_300 = arith.constant 0 : index
    %c18_301 = arith.constant 18 : index
    %c1_302 = arith.constant 1 : index
    %c0_303 = arith.constant 0 : index
    %165 = vector.load %arg1[%c0_300, %c18_301, %c1_302, %c0_303] : memref<1x34x17x64xbf16, #tpu.memory_space<vmem>>, vector<1x1x16x64xbf16>
    %166 = vector.shape_cast %165 : vector<1x1x16x64xbf16> to vector<16x64xbf16>
    %c144_304 = arith.constant 144 : index
    %c64_305 = arith.constant 64 : index
    %167 = vector.load %arg5[%c144_304, %c64_305] : memref<256x384xbf16, #tpu.memory_space<vmem>>, vector<16x64xbf16>
    tpu.vector_store %arg5[%c144_304, %c64_305], %166 {strides = array<i32>} : memref<256x384xbf16, #tpu.memory_space<vmem>>, vector<16x64xbf16>,
    %c0_306 = arith.constant 0 : index
    %c19 = arith.constant 19 : index
    %c0_307 = arith.constant 0 : index
    %c0_308 = arith.constant 0 : index
    %168 = vector.load %arg1[%c0_306, %c19, %c0_307, %c0_308] : memref<1x34x17x64xbf16, #tpu.memory_space<vmem>>, vector<1x1x16x64xbf16>
    %169 = vector.shape_cast %168 : vector<1x1x16x64xbf16> to vector<16x64xbf16>
    %c144_309 = arith.constant 144 : index
    %c128_310 = arith.constant 128 : index
    %170 = vector.load %arg5[%c144_309, %c128_310] : memref<256x384xbf16, #tpu.memory_space<vmem>>, vector<16x64xbf16>
    tpu.vector_store %arg5[%c144_309, %c128_310], %169 {strides = array<i32>} : memref<256x384xbf16, #tpu.memory_space<vmem>>, vector<16x64xbf16>,
    %c0_311 = arith.constant 0 : index
    %c19_312 = arith.constant 19 : index
    %c1_313 = arith.constant 1 : index
    %c0_314 = arith.constant 0 : index
    %171 = vector.load %arg1[%c0_311, %c19_312, %c1_313, %c0_314] : memref<1x34x17x64xbf16, #tpu.memory_space<vmem>>, vector<1x1x16x64xbf16>
    %172 = vector.shape_cast %171 : vector<1x1x16x64xbf16> to vector<16x64xbf16>
    %c144_315 = arith.constant 144 : index
    %c192_316 = arith.constant 192 : index
    %173 = vector.load %arg5[%c144_315, %c192_316] : memref<256x384xbf16, #tpu.memory_space<vmem>>, vector<16x64xbf16>
    tpu.vector_store %arg5[%c144_315, %c192_316], %172 {strides = array<i32>} : memref<256x384xbf16, #tpu.memory_space<vmem>>, vector<16x64xbf16>,
    %c0_317 = arith.constant 0 : index
    %c20 = arith.constant 20 : index
    %c0_318 = arith.constant 0 : index
    %c0_319 = arith.constant 0 : index
    %174 = vector.load %arg1[%c0_317, %c20, %c0_318, %c0_319] : memref<1x34x17x64xbf16, #tpu.memory_space<vmem>>, vector<1x1x16x64xbf16>
    %175 = vector.shape_cast %174 : vector<1x1x16x64xbf16> to vector<16x64xbf16>
    %c144_320 = arith.constant 144 : index
    %c256_321 = arith.constant 256 : index
    %176 = vector.load %arg5[%c144_320, %c256_321] : memref<256x384xbf16, #tpu.memory_space<vmem>>, vector<16x64xbf16>
    tpu.vector_store %arg5[%c144_320, %c256_321], %175 {strides = array<i32>} : memref<256x384xbf16, #tpu.memory_space<vmem>>, vector<16x64xbf16>,
    %c0_322 = arith.constant 0 : index
    %c20_323 = arith.constant 20 : index
    %c1_324 = arith.constant 1 : index
    %c0_325 = arith.constant 0 : index
    %177 = vector.load %arg1[%c0_322, %c20_323, %c1_324, %c0_325] : memref<1x34x17x64xbf16, #tpu.memory_space<vmem>>, vector<1x1x16x64xbf16>
    %178 = vector.shape_cast %177 : vector<1x1x16x64xbf16> to vector<16x64xbf16>
    %c144_326 = arith.constant 144 : index
    %c320_327 = arith.constant 320 : index
    %179 = vector.load %arg5[%c144_326, %c320_327] : memref<256x384xbf16, #tpu.memory_space<vmem>>, vector<16x64xbf16>
    tpu.vector_store %arg5[%c144_326, %c320_327], %178 {strides = array<i32>} : memref<256x384xbf16, #tpu.memory_space<vmem>>, vector<16x64xbf16>,
    %c0_328 = arith.constant 0 : index
    %c20_329 = arith.constant 20 : index
    %c0_330 = arith.constant 0 : index
    %c0_331 = arith.constant 0 : index
    %180 = vector.load %arg1[%c0_328, %c20_329, %c0_330, %c0_331] : memref<1x34x17x64xbf16, #tpu.memory_space<vmem>>, vector<1x1x16x64xbf16>
    %181 = vector.shape_cast %180 : vector<1x1x16x64xbf16> to vector<16x64xbf16>
    %c160 = arith.constant 160 : index
    %c0_332 = arith.constant 0 : index
    %182 = vector.load %arg5[%c160, %c0_332] : memref<256x384xbf16, #tpu.memory_space<vmem>>, vector<16x64xbf16>
    tpu.vector_store %arg5[%c160, %c0_332], %181 {strides = array<i32>} : memref<256x384xbf16, #tpu.memory_space<vmem>>, vector<16x64xbf16>,
    %c0_333 = arith.constant 0 : index
    %c20_334 = arith.constant 20 : index
    %c1_335 = arith.constant 1 : index
    %c0_336 = arith.constant 0 : index
    %183 = vector.load %arg1[%c0_333, %c20_334, %c1_335, %c0_336] : memref<1x34x17x64xbf16, #tpu.memory_space<vmem>>, vector<1x1x16x64xbf16>
    %184 = vector.shape_cast %183 : vector<1x1x16x64xbf16> to vector<16x64xbf16>
    %c160_337 = arith.constant 160 : index
    %c64_338 = arith.constant 64 : index
    %185 = vector.load %arg5[%c160_337, %c64_338] : memref<256x384xbf16, #tpu.memory_space<vmem>>, vector<16x64xbf16>
    tpu.vector_store %arg5[%c160_337, %c64_338], %184 {strides = array<i32>} : memref<256x384xbf16, #tpu.memory_space<vmem>>, vector<16x64xbf16>,
    %c0_339 = arith.constant 0 : index
    %c21 = arith.constant 21 : index
    %c0_340 = arith.constant 0 : index
    %c0_341 = arith.constant 0 : index
    %186 = vector.load %arg1[%c0_339, %c21, %c0_340, %c0_341] : memref<1x34x17x64xbf16, #tpu.memory_space<vmem>>, vector<1x1x16x64xbf16>
    %187 = vector.shape_cast %186 : vector<1x1x16x64xbf16> to vector<16x64xbf16>
    %c160_342 = arith.constant 160 : index
    %c128_343 = arith.constant 128 : index
    %188 = vector.load %arg5[%c160_342, %c128_343] : memref<256x384xbf16, #tpu.memory_space<vmem>>, vector<16x64xbf16>
    tpu.vector_store %arg5[%c160_342, %c128_343], %187 {strides = array<i32>} : memref<256x384xbf16, #tpu.memory_space<vmem>>, vector<16x64xbf16>,
    %c0_344 = arith.constant 0 : index
    %c21_345 = arith.constant 21 : index
    %c1_346 = arith.constant 1 : index
    %c0_347 = arith.constant 0 : index
    %189 = vector.load %arg1[%c0_344, %c21_345, %c1_346, %c0_347] : memref<1x34x17x64xbf16, #tpu.memory_space<vmem>>, vector<1x1x16x64xbf16>
    %190 = vector.shape_cast %189 : vector<1x1x16x64xbf16> to vector<16x64xbf16>
    %c160_348 = arith.constant 160 : index
    %c192_349 = arith.constant 192 : index
    %191 = vector.load %arg5[%c160_348, %c192_349] : memref<256x384xbf16, #tpu.memory_space<vmem>>, vector<16x64xbf16>
    tpu.vector_store %arg5[%c160_348, %c192_349], %190 {strides = array<i32>} : memref<256x384xbf16, #tpu.memory_space<vmem>>, vector<16x64xbf16>,
    %c0_350 = arith.constant 0 : index
    %c22 = arith.constant 22 : index
    %c0_351 = arith.constant 0 : index
    %c0_352 = arith.constant 0 : index
    %192 = vector.load %arg1[%c0_350, %c22, %c0_351, %c0_352] : memref<1x34x17x64xbf16, #tpu.memory_space<vmem>>, vector<1x1x16x64xbf16>
    %193 = vector.shape_cast %192 : vector<1x1x16x64xbf16> to vector<16x64xbf16>
    %c160_353 = arith.constant 160 : index
    %c256_354 = arith.constant 256 : index
    %194 = vector.load %arg5[%c160_353, %c256_354] : memref<256x384xbf16, #tpu.memory_space<vmem>>, vector<16x64xbf16>
    tpu.vector_store %arg5[%c160_353, %c256_354], %193 {strides = array<i32>} : memref<256x384xbf16, #tpu.memory_space<vmem>>, vector<16x64xbf16>,
    %c0_355 = arith.constant 0 : index
    %c22_356 = arith.constant 22 : index
    %c1_357 = arith.constant 1 : index
    %c0_358 = arith.constant 0 : index
    %195 = vector.load %arg1[%c0_355, %c22_356, %c1_357, %c0_358] : memref<1x34x17x64xbf16, #tpu.memory_space<vmem>>, vector<1x1x16x64xbf16>
    %196 = vector.shape_cast %195 : vector<1x1x16x64xbf16> to vector<16x64xbf16>
    %c160_359 = arith.constant 160 : index
    %c320_360 = arith.constant 320 : index
    %197 = vector.load %arg5[%c160_359, %c320_360] : memref<256x384xbf16, #tpu.memory_space<vmem>>, vector<16x64xbf16>
    tpu.vector_store %arg5[%c160_359, %c320_360], %196 {strides = array<i32>} : memref<256x384xbf16, #tpu.memory_space<vmem>>, vector<16x64xbf16>,
    %c0_361 = arith.constant 0 : index
    %c22_362 = arith.constant 22 : index
    %c0_363 = arith.constant 0 : index
    %c0_364 = arith.constant 0 : index
    %198 = vector.load %arg1[%c0_361, %c22_362, %c0_363, %c0_364] : memref<1x34x17x64xbf16, #tpu.memory_space<vmem>>, vector<1x1x16x64xbf16>
    %199 = vector.shape_cast %198 : vector<1x1x16x64xbf16> to vector<16x64xbf16>
    %c176 = arith.constant 176 : index
    %c0_365 = arith.constant 0 : index
    %200 = vector.load %arg5[%c176, %c0_365] : memref<256x384xbf16, #tpu.memory_space<vmem>>, vector<16x64xbf16>
    tpu.vector_store %arg5[%c176, %c0_365], %199 {strides = array<i32>} : memref<256x384xbf16, #tpu.memory_space<vmem>>, vector<16x64xbf16>,
    %c0_366 = arith.constant 0 : index
    %c22_367 = arith.constant 22 : index
    %c1_368 = arith.constant 1 : index
    %c0_369 = arith.constant 0 : index
    %201 = vector.load %arg1[%c0_366, %c22_367, %c1_368, %c0_369] : memref<1x34x17x64xbf16, #tpu.memory_space<vmem>>, vector<1x1x16x64xbf16>
    %202 = vector.shape_cast %201 : vector<1x1x16x64xbf16> to vector<16x64xbf16>
    %c176_370 = arith.constant 176 : index
    %c64_371 = arith.constant 64 : index
    %203 = vector.load %arg5[%c176_370, %c64_371] : memref<256x384xbf16, #tpu.memory_space<vmem>>, vector<16x64xbf16>
    tpu.vector_store %arg5[%c176_370, %c64_371], %202 {strides = array<i32>} : memref<256x384xbf16, #tpu.memory_space<vmem>>, vector<16x64xbf16>,
    %c0_372 = arith.constant 0 : index
    %c23 = arith.constant 23 : index
    %c0_373 = arith.constant 0 : index
    %c0_374 = arith.constant 0 : index
    %204 = vector.load %arg1[%c0_372, %c23, %c0_373, %c0_374] : memref<1x34x17x64xbf16, #tpu.memory_space<vmem>>, vector<1x1x16x64xbf16>
    %205 = vector.shape_cast %204 : vector<1x1x16x64xbf16> to vector<16x64xbf16>
    %c176_375 = arith.constant 176 : index
    %c128_376 = arith.constant 128 : index
    %206 = vector.load %arg5[%c176_375, %c128_376] : memref<256x384xbf16, #tpu.memory_space<vmem>>, vector<16x64xbf16>
    tpu.vector_store %arg5[%c176_375, %c128_376], %205 {strides = array<i32>} : memref<256x384xbf16, #tpu.memory_space<vmem>>, vector<16x64xbf16>,
    %c0_377 = arith.constant 0 : index
    %c23_378 = arith.constant 23 : index
    %c1_379 = arith.constant 1 : index
    %c0_380 = arith.constant 0 : index
    %207 = vector.load %arg1[%c0_377, %c23_378, %c1_379, %c0_380] : memref<1x34x17x64xbf16, #tpu.memory_space<vmem>>, vector<1x1x16x64xbf16>
    %208 = vector.shape_cast %207 : vector<1x1x16x64xbf16> to vector<16x64xbf16>
    %c176_381 = arith.constant 176 : index
    %c192_382 = arith.constant 192 : index
    %209 = vector.load %arg5[%c176_381, %c192_382] : memref<256x384xbf16, #tpu.memory_space<vmem>>, vector<16x64xbf16>
    tpu.vector_store %arg5[%c176_381, %c192_382], %208 {strides = array<i32>} : memref<256x384xbf16, #tpu.memory_space<vmem>>, vector<16x64xbf16>,
    %c0_383 = arith.constant 0 : index
    %c24 = arith.constant 24 : index
    %c0_384 = arith.constant 0 : index
    %c0_385 = arith.constant 0 : index
    %210 = vector.load %arg1[%c0_383, %c24, %c0_384, %c0_385] : memref<1x34x17x64xbf16, #tpu.memory_space<vmem>>, vector<1x1x16x64xbf16>
    %211 = vector.shape_cast %210 : vector<1x1x16x64xbf16> to vector<16x64xbf16>
    %c176_386 = arith.constant 176 : index
    %c256_387 = arith.constant 256 : index
    %212 = vector.load %arg5[%c176_386, %c256_387] : memref<256x384xbf16, #tpu.memory_space<vmem>>, vector<16x64xbf16>
    tpu.vector_store %arg5[%c176_386, %c256_387], %211 {strides = array<i32>} : memref<256x384xbf16, #tpu.memory_space<vmem>>, vector<16x64xbf16>,
    %c0_388 = arith.constant 0 : index
    %c24_389 = arith.constant 24 : index
    %c1_390 = arith.constant 1 : index
    %c0_391 = arith.constant 0 : index
    %213 = vector.load %arg1[%c0_388, %c24_389, %c1_390, %c0_391] : memref<1x34x17x64xbf16, #tpu.memory_space<vmem>>, vector<1x1x16x64xbf16>
    %214 = vector.shape_cast %213 : vector<1x1x16x64xbf16> to vector<16x64xbf16>
    %c176_392 = arith.constant 176 : index
    %c320_393 = arith.constant 320 : index
    %215 = vector.load %arg5[%c176_392, %c320_393] : memref<256x384xbf16, #tpu.memory_space<vmem>>, vector<16x64xbf16>
    tpu.vector_store %arg5[%c176_392, %c320_393], %214 {strides = array<i32>} : memref<256x384xbf16, #tpu.memory_space<vmem>>, vector<16x64xbf16>,
    %c0_394 = arith.constant 0 : index
    %c24_395 = arith.constant 24 : index
    %c0_396 = arith.constant 0 : index
    %c0_397 = arith.constant 0 : index
    %216 = vector.load %arg1[%c0_394, %c24_395, %c0_396, %c0_397] : memref<1x34x17x64xbf16, #tpu.memory_space<vmem>>, vector<1x1x16x64xbf16>
    %217 = vector.shape_cast %216 : vector<1x1x16x64xbf16> to vector<16x64xbf16>
    %c192_398 = arith.constant 192 : index
    %c0_399 = arith.constant 0 : index
    %218 = vector.load %arg5[%c192_398, %c0_399] : memref<256x384xbf16, #tpu.memory_space<vmem>>, vector<16x64xbf16>
    tpu.vector_store %arg5[%c192_398, %c0_399], %217 {strides = array<i32>} : memref<256x384xbf16, #tpu.memory_space<vmem>>, vector<16x64xbf16>,
    %c0_400 = arith.constant 0 : index
    %c24_401 = arith.constant 24 : index
    %c1_402 = arith.constant 1 : index
    %c0_403 = arith.constant 0 : index
    %219 = vector.load %arg1[%c0_400, %c24_401, %c1_402, %c0_403] : memref<1x34x17x64xbf16, #tpu.memory_space<vmem>>, vector<1x1x16x64xbf16>
    %220 = vector.shape_cast %219 : vector<1x1x16x64xbf16> to vector<16x64xbf16>
    %c192_404 = arith.constant 192 : index
    %c64_405 = arith.constant 64 : index
    %221 = vector.load %arg5[%c192_404, %c64_405] : memref<256x384xbf16, #tpu.memory_space<vmem>>, vector<16x64xbf16>
    tpu.vector_store %arg5[%c192_404, %c64_405], %220 {strides = array<i32>} : memref<256x384xbf16, #tpu.memory_space<vmem>>, vector<16x64xbf16>,
    %c0_406 = arith.constant 0 : index
    %c25 = arith.constant 25 : index
    %c0_407 = arith.constant 0 : index
    %c0_408 = arith.constant 0 : index
    %222 = vector.load %arg1[%c0_406, %c25, %c0_407, %c0_408] : memref<1x34x17x64xbf16, #tpu.memory_space<vmem>>, vector<1x1x16x64xbf16>
    %223 = vector.shape_cast %222 : vector<1x1x16x64xbf16> to vector<16x64xbf16>
    %c192_409 = arith.constant 192 : index
    %c128_410 = arith.constant 128 : index
    %224 = vector.load %arg5[%c192_409, %c128_410] : memref<256x384xbf16, #tpu.memory_space<vmem>>, vector<16x64xbf16>
    tpu.vector_store %arg5[%c192_409, %c128_410], %223 {strides = array<i32>} : memref<256x384xbf16, #tpu.memory_space<vmem>>, vector<16x64xbf16>,
    %c0_411 = arith.constant 0 : index
    %c25_412 = arith.constant 25 : index
    %c1_413 = arith.constant 1 : index
    %c0_414 = arith.constant 0 : index
    %225 = vector.load %arg1[%c0_411, %c25_412, %c1_413, %c0_414] : memref<1x34x17x64xbf16, #tpu.memory_space<vmem>>, vector<1x1x16x64xbf16>
    %226 = vector.shape_cast %225 : vector<1x1x16x64xbf16> to vector<16x64xbf16>
    %c192_415 = arith.constant 192 : index
    %c192_416 = arith.constant 192 : index
    %227 = vector.load %arg5[%c192_415, %c192_416] : memref<256x384xbf16, #tpu.memory_space<vmem>>, vector<16x64xbf16>
    tpu.vector_store %arg5[%c192_415, %c192_416], %226 {strides = array<i32>} : memref<256x384xbf16, #tpu.memory_space<vmem>>, vector<16x64xbf16>,
    %c0_417 = arith.constant 0 : index
    %c26 = arith.constant 26 : index
    %c0_418 = arith.constant 0 : index
    %c0_419 = arith.constant 0 : index
    %228 = vector.load %arg1[%c0_417, %c26, %c0_418, %c0_419] : memref<1x34x17x64xbf16, #tpu.memory_space<vmem>>, vector<1x1x16x64xbf16>
    %229 = vector.shape_cast %228 : vector<1x1x16x64xbf16> to vector<16x64xbf16>
    %c192_420 = arith.constant 192 : index
    %c256_421 = arith.constant 256 : index
    %230 = vector.load %arg5[%c192_420, %c256_421] : memref<256x384xbf16, #tpu.memory_space<vmem>>, vector<16x64xbf16>
    tpu.vector_store %arg5[%c192_420, %c256_421], %229 {strides = array<i32>} : memref<256x384xbf16, #tpu.memory_space<vmem>>, vector<16x64xbf16>,
    %c0_422 = arith.constant 0 : index
    %c26_423 = arith.constant 26 : index
    %c1_424 = arith.constant 1 : index
    %c0_425 = arith.constant 0 : index
    %231 = vector.load %arg1[%c0_422, %c26_423, %c1_424, %c0_425] : memref<1x34x17x64xbf16, #tpu.memory_space<vmem>>, vector<1x1x16x64xbf16>
    %232 = vector.shape_cast %231 : vector<1x1x16x64xbf16> to vector<16x64xbf16>
    %c192_426 = arith.constant 192 : index
    %c320_427 = arith.constant 320 : index
    %233 = vector.load %arg5[%c192_426, %c320_427] : memref<256x384xbf16, #tpu.memory_space<vmem>>, vector<16x64xbf16>
    tpu.vector_store %arg5[%c192_426, %c320_427], %232 {strides = array<i32>} : memref<256x384xbf16, #tpu.memory_space<vmem>>, vector<16x64xbf16>,
    %c0_428 = arith.constant 0 : index
    %c26_429 = arith.constant 26 : index
    %c0_430 = arith.constant 0 : index
    %c0_431 = arith.constant 0 : index
    %234 = vector.load %arg1[%c0_428, %c26_429, %c0_430, %c0_431] : memref<1x34x17x64xbf16, #tpu.memory_space<vmem>>, vector<1x1x16x64xbf16>
    %235 = vector.shape_cast %234 : vector<1x1x16x64xbf16> to vector<16x64xbf16>
    %c208 = arith.constant 208 : index
    %c0_432 = arith.constant 0 : index
    %236 = vector.load %arg5[%c208, %c0_432] : memref<256x384xbf16, #tpu.memory_space<vmem>>, vector<16x64xbf16>
    tpu.vector_store %arg5[%c208, %c0_432], %235 {strides = array<i32>} : memref<256x384xbf16, #tpu.memory_space<vmem>>, vector<16x64xbf16>,
    %c0_433 = arith.constant 0 : index
    %c26_434 = arith.constant 26 : index
    %c1_435 = arith.constant 1 : index
    %c0_436 = arith.constant 0 : index
    %237 = vector.load %arg1[%c0_433, %c26_434, %c1_435, %c0_436] : memref<1x34x17x64xbf16, #tpu.memory_space<vmem>>, vector<1x1x16x64xbf16>
    %238 = vector.shape_cast %237 : vector<1x1x16x64xbf16> to vector<16x64xbf16>
    %c208_437 = arith.constant 208 : index
    %c64_438 = arith.constant 64 : index
    %239 = vector.load %arg5[%c208_437, %c64_438] : memref<256x384xbf16, #tpu.memory_space<vmem>>, vector<16x64xbf16>
    tpu.vector_store %arg5[%c208_437, %c64_438], %238 {strides = array<i32>} : memref<256x384xbf16, #tpu.memory_space<vmem>>, vector<16x64xbf16>,
    %c0_439 = arith.constant 0 : index
    %c27 = arith.constant 27 : index
    %c0_440 = arith.constant 0 : index
    %c0_441 = arith.constant 0 : index
    %240 = vector.load %arg1[%c0_439, %c27, %c0_440, %c0_441] : memref<1x34x17x64xbf16, #tpu.memory_space<vmem>>, vector<1x1x16x64xbf16>
    %241 = vector.shape_cast %240 : vector<1x1x16x64xbf16> to vector<16x64xbf16>
    %c208_442 = arith.constant 208 : index
    %c128_443 = arith.constant 128 : index
    %242 = vector.load %arg5[%c208_442, %c128_443] : memref<256x384xbf16, #tpu.memory_space<vmem>>, vector<16x64xbf16>
    tpu.vector_store %arg5[%c208_442, %c128_443], %241 {strides = array<i32>} : memref<256x384xbf16, #tpu.memory_space<vmem>>, vector<16x64xbf16>,
    %c0_444 = arith.constant 0 : index
    %c27_445 = arith.constant 27 : index
    %c1_446 = arith.constant 1 : index
    %c0_447 = arith.constant 0 : index
    %243 = vector.load %arg1[%c0_444, %c27_445, %c1_446, %c0_447] : memref<1x34x17x64xbf16, #tpu.memory_space<vmem>>, vector<1x1x16x64xbf16>
    %244 = vector.shape_cast %243 : vector<1x1x16x64xbf16> to vector<16x64xbf16>
    %c208_448 = arith.constant 208 : index
    %c192_449 = arith.constant 192 : index
    %245 = vector.load %arg5[%c208_448, %c192_449] : memref<256x384xbf16, #tpu.memory_space<vmem>>, vector<16x64xbf16>
    tpu.vector_store %arg5[%c208_448, %c192_449], %244 {strides = array<i32>} : memref<256x384xbf16, #tpu.memory_space<vmem>>, vector<16x64xbf16>,
    %c0_450 = arith.constant 0 : index
    %c28 = arith.constant 28 : index
    %c0_451 = arith.constant 0 : index
    %c0_452 = arith.constant 0 : index
    %246 = vector.load %arg1[%c0_450, %c28, %c0_451, %c0_452] : memref<1x34x17x64xbf16, #tpu.memory_space<vmem>>, vector<1x1x16x64xbf16>
    %247 = vector.shape_cast %246 : vector<1x1x16x64xbf16> to vector<16x64xbf16>
    %c208_453 = arith.constant 208 : index
    %c256_454 = arith.constant 256 : index
    %248 = vector.load %arg5[%c208_453, %c256_454] : memref<256x384xbf16, #tpu.memory_space<vmem>>, vector<16x64xbf16>
    tpu.vector_store %arg5[%c208_453, %c256_454], %247 {strides = array<i32>} : memref<256x384xbf16, #tpu.memory_space<vmem>>, vector<16x64xbf16>,
    %c0_455 = arith.constant 0 : index
    %c28_456 = arith.constant 28 : index
    %c1_457 = arith.constant 1 : index
    %c0_458 = arith.constant 0 : index
    %249 = vector.load %arg1[%c0_455, %c28_456, %c1_457, %c0_458] : memref<1x34x17x64xbf16, #tpu.memory_space<vmem>>, vector<1x1x16x64xbf16>
    %250 = vector.shape_cast %249 : vector<1x1x16x64xbf16> to vector<16x64xbf16>
    %c208_459 = arith.constant 208 : index
    %c320_460 = arith.constant 320 : index
    %251 = vector.load %arg5[%c208_459, %c320_460] : memref<256x384xbf16, #tpu.memory_space<vmem>>, vector<16x64xbf16>
    tpu.vector_store %arg5[%c208_459, %c320_460], %250 {strides = array<i32>} : memref<256x384xbf16, #tpu.memory_space<vmem>>, vector<16x64xbf16>,
    %c0_461 = arith.constant 0 : index
    %c28_462 = arith.constant 28 : index
    %c0_463 = arith.constant 0 : index
    %c0_464 = arith.constant 0 : index
    %252 = vector.load %arg1[%c0_461, %c28_462, %c0_463, %c0_464] : memref<1x34x17x64xbf16, #tpu.memory_space<vmem>>, vector<1x1x16x64xbf16>
    %253 = vector.shape_cast %252 : vector<1x1x16x64xbf16> to vector<16x64xbf16>
    %c224 = arith.constant 224 : index
    %c0_465 = arith.constant 0 : index
    %254 = vector.load %arg5[%c224, %c0_465] : memref<256x384xbf16, #tpu.memory_space<vmem>>, vector<16x64xbf16>
    tpu.vector_store %arg5[%c224, %c0_465], %253 {strides = array<i32>} : memref<256x384xbf16, #tpu.memory_space<vmem>>, vector<16x64xbf16>,
    %c0_466 = arith.constant 0 : index
    %c28_467 = arith.constant 28 : index
    %c1_468 = arith.constant 1 : index
    %c0_469 = arith.constant 0 : index
    %255 = vector.load %arg1[%c0_466, %c28_467, %c1_468, %c0_469] : memref<1x34x17x64xbf16, #tpu.memory_space<vmem>>, vector<1x1x16x64xbf16>
    %256 = vector.shape_cast %255 : vector<1x1x16x64xbf16> to vector<16x64xbf16>
    %c224_470 = arith.constant 224 : index
    %c64_471 = arith.constant 64 : index
    %257 = vector.load %arg5[%c224_470, %c64_471] : memref<256x384xbf16, #tpu.memory_space<vmem>>, vector<16x64xbf16>
    tpu.vector_store %arg5[%c224_470, %c64_471], %256 {strides = array<i32>} : memref<256x384xbf16, #tpu.memory_space<vmem>>, vector<16x64xbf16>,
    %c0_472 = arith.constant 0 : index
    %c29 = arith.constant 29 : index
    %c0_473 = arith.constant 0 : index
    %c0_474 = arith.constant 0 : index
    %258 = vector.load %arg1[%c0_472, %c29, %c0_473, %c0_474] : memref<1x34x17x64xbf16, #tpu.memory_space<vmem>>, vector<1x1x16x64xbf16>
    %259 = vector.shape_cast %258 : vector<1x1x16x64xbf16> to vector<16x64xbf16>
    %c224_475 = arith.constant 224 : index
    %c128_476 = arith.constant 128 : index
    %260 = vector.load %arg5[%c224_475, %c128_476] : memref<256x384xbf16, #tpu.memory_space<vmem>>, vector<16x64xbf16>
    tpu.vector_store %arg5[%c224_475, %c128_476], %259 {strides = array<i32>} : memref<256x384xbf16, #tpu.memory_space<vmem>>, vector<16x64xbf16>,
    %c0_477 = arith.constant 0 : index
    %c29_478 = arith.constant 29 : index
    %c1_479 = arith.constant 1 : index
    %c0_480 = arith.constant 0 : index
    %261 = vector.load %arg1[%c0_477, %c29_478, %c1_479, %c0_480] : memref<1x34x17x64xbf16, #tpu.memory_space<vmem>>, vector<1x1x16x64xbf16>
    %262 = vector.shape_cast %261 : vector<1x1x16x64xbf16> to vector<16x64xbf16>
    %c224_481 = arith.constant 224 : index
    %c192_482 = arith.constant 192 : index
    %263 = vector.load %arg5[%c224_481, %c192_482] : memref<256x384xbf16, #tpu.memory_space<vmem>>, vector<16x64xbf16>
    tpu.vector_store %arg5[%c224_481, %c192_482], %262 {strides = array<i32>} : memref<256x384xbf16, #tpu.memory_space<vmem>>, vector<16x64xbf16>,
    %c0_483 = arith.constant 0 : index
    %c30 = arith.constant 30 : index
    %c0_484 = arith.constant 0 : index
    %c0_485 = arith.constant 0 : index
    %264 = vector.load %arg1[%c0_483, %c30, %c0_484, %c0_485] : memref<1x34x17x64xbf16, #tpu.memory_space<vmem>>, vector<1x1x16x64xbf16>
    %265 = vector.shape_cast %264 : vector<1x1x16x64xbf16> to vector<16x64xbf16>
    %c224_486 = arith.constant 224 : index
    %c256_487 = arith.constant 256 : index
    %266 = vector.load %arg5[%c224_486, %c256_487] : memref<256x384xbf16, #tpu.memory_space<vmem>>, vector<16x64xbf16>
    tpu.vector_store %arg5[%c224_486, %c256_487], %265 {strides = array<i32>} : memref<256x384xbf16, #tpu.memory_space<vmem>>, vector<16x64xbf16>,
    %c0_488 = arith.constant 0 : index
    %c30_489 = arith.constant 30 : index
    %c1_490 = arith.constant 1 : index
    %c0_491 = arith.constant 0 : index
    %267 = vector.load %arg1[%c0_488, %c30_489, %c1_490, %c0_491] : memref<1x34x17x64xbf16, #tpu.memory_space<vmem>>, vector<1x1x16x64xbf16>
    %268 = vector.shape_cast %267 : vector<1x1x16x64xbf16> to vector<16x64xbf16>
    %c224_492 = arith.constant 224 : index
    %c320_493 = arith.constant 320 : index
    %269 = vector.load %arg5[%c224_492, %c320_493] : memref<256x384xbf16, #tpu.memory_space<vmem>>, vector<16x64xbf16>
    tpu.vector_store %arg5[%c224_492, %c320_493], %268 {strides = array<i32>} : memref<256x384xbf16, #tpu.memory_space<vmem>>, vector<16x64xbf16>,
    %c0_494 = arith.constant 0 : index
    %c30_495 = arith.constant 30 : index
    %c0_496 = arith.constant 0 : index
    %c0_497 = arith.constant 0 : index
    %270 = vector.load %arg1[%c0_494, %c30_495, %c0_496, %c0_497] : memref<1x34x17x64xbf16, #tpu.memory_space<vmem>>, vector<1x1x16x64xbf16>
    %271 = vector.shape_cast %270 : vector<1x1x16x64xbf16> to vector<16x64xbf16>
    %c240 = arith.constant 240 : index
    %c0_498 = arith.constant 0 : index
    %272 = vector.load %arg5[%c240, %c0_498] : memref<256x384xbf16, #tpu.memory_space<vmem>>, vector<16x64xbf16>
    tpu.vector_store %arg5[%c240, %c0_498], %271 {strides = array<i32>} : memref<256x384xbf16, #tpu.memory_space<vmem>>, vector<16x64xbf16>,
    %c0_499 = arith.constant 0 : index
    %c30_500 = arith.constant 30 : index
    %c1_501 = arith.constant 1 : index
    %c0_502 = arith.constant 0 : index
    %273 = vector.load %arg1[%c0_499, %c30_500, %c1_501, %c0_502] : memref<1x34x17x64xbf16, #tpu.memory_space<vmem>>, vector<1x1x16x64xbf16>
    %274 = vector.shape_cast %273 : vector<1x1x16x64xbf16> to vector<16x64xbf16>
    %c240_503 = arith.constant 240 : index
    %c64_504 = arith.constant 64 : index
    %275 = vector.load %arg5[%c240_503, %c64_504] : memref<256x384xbf16, #tpu.memory_space<vmem>>, vector<16x64xbf16>
    tpu.vector_store %arg5[%c240_503, %c64_504], %274 {strides = array<i32>} : memref<256x384xbf16, #tpu.memory_space<vmem>>, vector<16x64xbf16>,
    %c0_505 = arith.constant 0 : index
    %c31 = arith.constant 31 : index
    %c0_506 = arith.constant 0 : index
    %c0_507 = arith.constant 0 : index
    %276 = vector.load %arg1[%c0_505, %c31, %c0_506, %c0_507] : memref<1x34x17x64xbf16, #tpu.memory_space<vmem>>, vector<1x1x16x64xbf16>
    %277 = vector.shape_cast %276 : vector<1x1x16x64xbf16> to vector<16x64xbf16>
    %c240_508 = arith.constant 240 : index
    %c128_509 = arith.constant 128 : index
    %278 = vector.load %arg5[%c240_508, %c128_509] : memref<256x384xbf16, #tpu.memory_space<vmem>>, vector<16x64xbf16>
    tpu.vector_store %arg5[%c240_508, %c128_509], %277 {strides = array<i32>} : memref<256x384xbf16, #tpu.memory_space<vmem>>, vector<16x64xbf16>,
    %c0_510 = arith.constant 0 : index
    %c31_511 = arith.constant 31 : index
    %c1_512 = arith.constant 1 : index
    %c0_513 = arith.constant 0 : index
    %279 = vector.load %arg1[%c0_510, %c31_511, %c1_512, %c0_513] : memref<1x34x17x64xbf16, #tpu.memory_space<vmem>>, vector<1x1x16x64xbf16>
    %280 = vector.shape_cast %279 : vector<1x1x16x64xbf16> to vector<16x64xbf16>
    %c240_514 = arith.constant 240 : index
    %c192_515 = arith.constant 192 : index
    %281 = vector.load %arg5[%c240_514, %c192_515] : memref<256x384xbf16, #tpu.memory_space<vmem>>, vector<16x64xbf16>
    tpu.vector_store %arg5[%c240_514, %c192_515], %280 {strides = array<i32>} : memref<256x384xbf16, #tpu.memory_space<vmem>>, vector<16x64xbf16>,
    %c0_516 = arith.constant 0 : index
    %c32_517 = arith.constant 32 : index
    %c0_518 = arith.constant 0 : index
    %c0_519 = arith.constant 0 : index
    %282 = vector.load %arg1[%c0_516, %c32_517, %c0_518, %c0_519] : memref<1x34x17x64xbf16, #tpu.memory_space<vmem>>, vector<1x1x16x64xbf16>
    %283 = vector.shape_cast %282 : vector<1x1x16x64xbf16> to vector<16x64xbf16>
    %c240_520 = arith.constant 240 : index
    %c256_521 = arith.constant 256 : index
    %284 = vector.load %arg5[%c240_520, %c256_521] : memref<256x384xbf16, #tpu.memory_space<vmem>>, vector<16x64xbf16>
    tpu.vector_store %arg5[%c240_520, %c256_521], %283 {strides = array<i32>} : memref<256x384xbf16, #tpu.memory_space<vmem>>, vector<16x64xbf16>,
    %c0_522 = arith.constant 0 : index
    %c32_523 = arith.constant 32 : index
    %c1_524 = arith.constant 1 : index
    %c0_525 = arith.constant 0 : index
    %285 = vector.load %arg1[%c0_522, %c32_523, %c1_524, %c0_525] : memref<1x34x17x64xbf16, #tpu.memory_space<vmem>>, vector<1x1x16x64xbf16>
    %286 = vector.shape_cast %285 : vector<1x1x16x64xbf16> to vector<16x64xbf16>
    %c240_526 = arith.constant 240 : index
    %c320_527 = arith.constant 320 : index
    %287 = vector.load %arg5[%c240_526, %c320_527] : memref<256x384xbf16, #tpu.memory_space<vmem>>, vector<16x64xbf16>
    tpu.vector_store %arg5[%c240_526, %c320_527], %286 {strides = array<i32>} : memref<256x384xbf16, #tpu.memory_space<vmem>>, vector<16x64xbf16>,
    %c0_528 = arith.constant 0 : index
    %c0_529 = arith.constant 0 : index
    %288 = vector.load %arg5[%c0_528, %c0_529] : memref<256x384xbf16, #tpu.memory_space<vmem>>, vector<256x384xbf16>
    %c0_530 = arith.constant 0 : index
    %c0_531 = arith.constant 0 : index
    %289 = vector.load %arg2[%c0_530, %c0_531] : memref<384x64xbf16, #tpu.memory_space<vmem>>, vector<384x64xbf16>
    %cst = arith.constant dense<0.000000e+00> : vector<256x64xf32>
    %290 = tpu.matmul %288, %289, %cst {dimension_numbers = #tpu.dot_dimension_numbers<[1], [0], [0], [1], [0, 0, 1, 1], [], []>} : vector<256x384xbf16>, vector<384x64xbf16>, vector<256x64xf32> -> vector<256x64xf32>
    %c0_532 = arith.constant 0 : index
    %c0_533 = arith.constant 0 : index
    %291 = vector.load %arg3[%c0_532, %c0_533] : memref<3x64xf32, #tpu.memory_space<vmem>>, vector<3x64xf32>
    %292 = vector.extract_strided_slice %291 {offsets = [0, 0], sizes = [1, 64], strides = [1, 1]} : vector<3x64xf32> to vector<1x64xf32>
    %293 = vector.broadcast %292 : vector<1x64xf32> to vector<256x64xf32>
    %294 = arith.addf %290, %293 : vector<256x64xf32>
    %cst_534 = arith.constant 0.00999999977 : f32
    %295 = vector.broadcast %cst_534 : f32 to vector<256x64xf32>
    %296 = arith.mulf %295, %294 : vector<256x64xf32>
    %297 = arith.maximumf %294, %296 : vector<256x64xf32>
    %298 = vector.extract_strided_slice %291 {offsets = [1, 0], sizes = [1, 64], strides = [1, 1]} : vector<3x64xf32> to vector<1x64xf32>
    %299 = vector.broadcast %298 : vector<1x64xf32> to vector<256x64xf32>
    %300 = arith.mulf %297, %299 : vector<256x64xf32>
    %301 = vector.extract_strided_slice %291 {offsets = [2, 0], sizes = [1, 64], strides = [1, 1]} : vector<3x64xf32> to vector<1x64xf32>
    %302 = vector.broadcast %301 : vector<1x64xf32> to vector<256x64xf32>
    %303 = arith.addf %300, %302 : vector<256x64xf32>
    %304 = arith.truncf %303 : vector<256x64xf32> to vector<256x64xbf16>
    %c0_535 = arith.constant 0 : index
    %c0_536 = arith.constant 0 : index
    %c0_537 = arith.constant 0 : index
    %305 = vector.load %arg4[%c0_535, %c0_536, %c0_537] : memref<1x256x64xbf16, #tpu.memory_space<vmem>>, vector<1x256x64xbf16>
    %306 = vector.shape_cast %305 : vector<1x256x64xbf16> to vector<256x64xbf16>
    %307 = vector.shape_cast %304 : vector<256x64xbf16> to vector<1x256x64xbf16>
    tpu.vector_store %arg4[%c0_535, %c0_536, %c0_537], %307 {strides = array<i32>} : memref<1x256x64xbf16, #tpu.memory_space<vmem>>, vector<1x256x64xbf16>,
    return
  }
  func.func @transform_0(%arg0: i32) -> (i32, i32, i32, i32) {
    %c0_i32 = arith.constant 0 : i32
    %c0_i32_0 = arith.constant 0 : i32
    %c0_i32_1 = arith.constant 0 : i32
    %c0_i32_2 = arith.constant 0 : i32
    return %arg0, %c0_i32, %c0_i32_0, %c0_i32_1 : i32, i32, i32, i32
  }
  func.func @transform_1(%arg0: i32) -> (i32, i32) {
    %c0_i32 = arith.constant 0 : i32
    %c0_i32_0 = arith.constant 0 : i32
    %c0_i32_1 = arith.constant 0 : i32
    return %c0_i32, %c0_i32_0 : i32, i32
  }
  func.func @transform_2(%arg0: i32) -> (i32, i32) {
    %c0_i32 = arith.constant 0 : i32
    %c0_i32_0 = arith.constant 0 : i32
    %c0_i32_1 = arith.constant 0 : i32
    return %c0_i32, %c0_i32_0 : i32, i32
  }
  func.func @transform_3(%arg0: i32) -> (i32, i32, i32) {
    %c0_i32 = arith.constant 0 : i32
    %c0_i32_0 = arith.constant 0 : i32
    %c0_i32_1 = arith.constant 0 : i32
    return %arg0, %c0_i32, %c0_i32_0 : i32, i32, i32
  }
}

module attributes {stable_mosaic.version = 11 : i64} {
  func.func @_fused_conv3x3s2_kernel(%arg0: i32, %arg1: memref<1x18x9x128xbf16, #tpu.memory_space<vmem>>, %arg2: memref<768x128xbf16, #tpu.memory_space<vmem>>, %arg3: memref<3x128xf32, #tpu.memory_space<vmem>>, %arg4: memref<1x64x128xbf16, #tpu.memory_space<vmem>>, %arg5: memref<64x768xbf16, #tpu.memory_space<vmem>>) attributes {dimension_semantics = [#tpu.dimension_semantics<parallel>], iteration_bounds = array<i64: 2>, scalar_prefetch = 0 : i64, scratch_operands = 1 : i64, tpu.core_type = #tpu.core_type<tc>, window_params = [{transform_indices = @transform_0, window_bounds = array<i64: 1, 18, 9, 128>}, {pipeline_mode = #tpu.pipeline_mode<synchronous>, transform_indices = @transform_1, window_bounds = array<i64: 768, 128>}, {pipeline_mode = #tpu.pipeline_mode<synchronous>, transform_indices = @transform_2, window_bounds = array<i64: 3, 128>}, {transform_indices = @transform_3, window_bounds = array<i64: 1, 64, 128>}]} {
    %c0 = arith.constant 0 : index
    %c0_0 = arith.constant 0 : index
    %c0_1 = arith.constant 0 : index
    %c0_2 = arith.constant 0 : index
    %0 = vector.load %arg1[%c0, %c0_0, %c0_1, %c0_2] : memref<1x18x9x128xbf16, #tpu.memory_space<vmem>>, vector<1x1x8x128xbf16>
    %1 = vector.shape_cast %0 : vector<1x1x8x128xbf16> to vector<8x128xbf16>
    %c0_3 = arith.constant 0 : index
    %c0_4 = arith.constant 0 : index
    %2 = vector.load %arg5[%c0_3, %c0_4] : memref<64x768xbf16, #tpu.memory_space<vmem>>, vector<8x128xbf16>
    tpu.vector_store %arg5[%c0_3, %c0_4], %1 {strides = array<i32>} : memref<64x768xbf16, #tpu.memory_space<vmem>>, vector<8x128xbf16>,
    %c0_5 = arith.constant 0 : index
    %c0_6 = arith.constant 0 : index
    %c1 = arith.constant 1 : index
    %c0_7 = arith.constant 0 : index
    %3 = vector.load %arg1[%c0_5, %c0_6, %c1, %c0_7] : memref<1x18x9x128xbf16, #tpu.memory_space<vmem>>, vector<1x1x8x128xbf16>
    %4 = vector.shape_cast %3 : vector<1x1x8x128xbf16> to vector<8x128xbf16>
    %c0_8 = arith.constant 0 : index
    %c128 = arith.constant 128 : index
    %5 = vector.load %arg5[%c0_8, %c128] : memref<64x768xbf16, #tpu.memory_space<vmem>>, vector<8x128xbf16>
    tpu.vector_store %arg5[%c0_8, %c128], %4 {strides = array<i32>} : memref<64x768xbf16, #tpu.memory_space<vmem>>, vector<8x128xbf16>,
    %c0_9 = arith.constant 0 : index
    %c1_10 = arith.constant 1 : index
    %c0_11 = arith.constant 0 : index
    %c0_12 = arith.constant 0 : index
    %6 = vector.load %arg1[%c0_9, %c1_10, %c0_11, %c0_12] : memref<1x18x9x128xbf16, #tpu.memory_space<vmem>>, vector<1x1x8x128xbf16>
    %7 = vector.shape_cast %6 : vector<1x1x8x128xbf16> to vector<8x128xbf16>
    %c0_13 = arith.constant 0 : index
    %c256 = arith.constant 256 : index
    %8 = vector.load %arg5[%c0_13, %c256] : memref<64x768xbf16, #tpu.memory_space<vmem>>, vector<8x128xbf16>
    tpu.vector_store %arg5[%c0_13, %c256], %7 {strides = array<i32>} : memref<64x768xbf16, #tpu.memory_space<vmem>>, vector<8x128xbf16>,
    %c0_14 = arith.constant 0 : index
    %c1_15 = arith.constant 1 : index
    %c1_16 = arith.constant 1 : index
    %c0_17 = arith.constant 0 : index
    %9 = vector.load %arg1[%c0_14, %c1_15, %c1_16, %c0_17] : memref<1x18x9x128xbf16, #tpu.memory_space<vmem>>, vector<1x1x8x128xbf16>
    %10 = vector.shape_cast %9 : vector<1x1x8x128xbf16> to vector<8x128xbf16>
    %c0_18 = arith.constant 0 : index
    %c384 = arith.constant 384 : index
    %11 = vector.load %arg5[%c0_18, %c384] : memref<64x768xbf16, #tpu.memory_space<vmem>>, vector<8x128xbf16>
    tpu.vector_store %arg5[%c0_18, %c384], %10 {strides = array<i32>} : memref<64x768xbf16, #tpu.memory_space<vmem>>, vector<8x128xbf16>,
    %c0_19 = arith.constant 0 : index
    %c2 = arith.constant 2 : index
    %c0_20 = arith.constant 0 : index
    %c0_21 = arith.constant 0 : index
    %12 = vector.load %arg1[%c0_19, %c2, %c0_20, %c0_21] : memref<1x18x9x128xbf16, #tpu.memory_space<vmem>>, vector<1x1x8x128xbf16>
    %13 = vector.shape_cast %12 : vector<1x1x8x128xbf16> to vector<8x128xbf16>
    %c0_22 = arith.constant 0 : index
    %c512 = arith.constant 512 : index
    %14 = vector.load %arg5[%c0_22, %c512] : memref<64x768xbf16, #tpu.memory_space<vmem>>, vector<8x128xbf16>
    tpu.vector_store %arg5[%c0_22, %c512], %13 {strides = array<i32>} : memref<64x768xbf16, #tpu.memory_space<vmem>>, vector<8x128xbf16>,
    %c0_23 = arith.constant 0 : index
    %c2_24 = arith.constant 2 : index
    %c1_25 = arith.constant 1 : index
    %c0_26 = arith.constant 0 : index
    %15 = vector.load %arg1[%c0_23, %c2_24, %c1_25, %c0_26] : memref<1x18x9x128xbf16, #tpu.memory_space<vmem>>, vector<1x1x8x128xbf16>
    %16 = vector.shape_cast %15 : vector<1x1x8x128xbf16> to vector<8x128xbf16>
    %c0_27 = arith.constant 0 : index
    %c640 = arith.constant 640 : index
    %17 = vector.load %arg5[%c0_27, %c640] : memref<64x768xbf16, #tpu.memory_space<vmem>>, vector<8x128xbf16>
    tpu.vector_store %arg5[%c0_27, %c640], %16 {strides = array<i32>} : memref<64x768xbf16, #tpu.memory_space<vmem>>, vector<8x128xbf16>,
    %c0_28 = arith.constant 0 : index
    %c2_29 = arith.constant 2 : index
    %c0_30 = arith.constant 0 : index
    %c0_31 = arith.constant 0 : index
    %18 = vector.load %arg1[%c0_28, %c2_29, %c0_30, %c0_31] : memref<1x18x9x128xbf16, #tpu.memory_space<vmem>>, vector<1x1x8x128xbf16>
    %19 = vector.shape_cast %18 : vector<1x1x8x128xbf16> to vector<8x128xbf16>
    %c8 = arith.constant 8 : index
    %c0_32 = arith.constant 0 : index
    %20 = vector.load %arg5[%c8, %c0_32] : memref<64x768xbf16, #tpu.memory_space<vmem>>, vector<8x128xbf16>
    tpu.vector_store %arg5[%c8, %c0_32], %19 {strides = array<i32>} : memref<64x768xbf16, #tpu.memory_space<vmem>>, vector<8x128xbf16>,
    %c0_33 = arith.constant 0 : index
    %c2_34 = arith.constant 2 : index
    %c1_35 = arith.constant 1 : index
    %c0_36 = arith.constant 0 : index
    %21 = vector.load %arg1[%c0_33, %c2_34, %c1_35, %c0_36] : memref<1x18x9x128xbf16, #tpu.memory_space<vmem>>, vector<1x1x8x128xbf16>
    %22 = vector.shape_cast %21 : vector<1x1x8x128xbf16> to vector<8x128xbf16>
    %c8_37 = arith.constant 8 : index
    %c128_38 = arith.constant 128 : index
    %23 = vector.load %arg5[%c8_37, %c128_38] : memref<64x768xbf16, #tpu.memory_space<vmem>>, vector<8x128xbf16>
    tpu.vector_store %arg5[%c8_37, %c128_38], %22 {strides = array<i32>} : memref<64x768xbf16, #tpu.memory_space<vmem>>, vector<8x128xbf16>,
    %c0_39 = arith.constant 0 : index
    %c3 = arith.constant 3 : index
    %c0_40 = arith.constant 0 : index
    %c0_41 = arith.constant 0 : index
    %24 = vector.load %arg1[%c0_39, %c3, %c0_40, %c0_41] : memref<1x18x9x128xbf16, #tpu.memory_space<vmem>>, vector<1x1x8x128xbf16>
    %25 = vector.shape_cast %24 : vector<1x1x8x128xbf16> to vector<8x128xbf16>
    %c8_42 = arith.constant 8 : index
    %c256_43 = arith.constant 256 : index
    %26 = vector.load %arg5[%c8_42, %c256_43] : memref<64x768xbf16, #tpu.memory_space<vmem>>, vector<8x128xbf16>
    tpu.vector_store %arg5[%c8_42, %c256_43], %25 {strides = array<i32>} : memref<64x768xbf16, #tpu.memory_space<vmem>>, vector<8x128xbf16>,
    %c0_44 = arith.constant 0 : index
    %c3_45 = arith.constant 3 : index
    %c1_46 = arith.constant 1 : index
    %c0_47 = arith.constant 0 : index
    %27 = vector.load %arg1[%c0_44, %c3_45, %c1_46, %c0_47] : memref<1x18x9x128xbf16, #tpu.memory_space<vmem>>, vector<1x1x8x128xbf16>
    %28 = vector.shape_cast %27 : vector<1x1x8x128xbf16> to vector<8x128xbf16>
    %c8_48 = arith.constant 8 : index
    %c384_49 = arith.constant 384 : index
    %29 = vector.load %arg5[%c8_48, %c384_49] : memref<64x768xbf16, #tpu.memory_space<vmem>>, vector<8x128xbf16>
    tpu.vector_store %arg5[%c8_48, %c384_49], %28 {strides = array<i32>} : memref<64x768xbf16, #tpu.memory_space<vmem>>, vector<8x128xbf16>,
    %c0_50 = arith.constant 0 : index
    %c4 = arith.constant 4 : index
    %c0_51 = arith.constant 0 : index
    %c0_52 = arith.constant 0 : index
    %30 = vector.load %arg1[%c0_50, %c4, %c0_51, %c0_52] : memref<1x18x9x128xbf16, #tpu.memory_space<vmem>>, vector<1x1x8x128xbf16>
    %31 = vector.shape_cast %30 : vector<1x1x8x128xbf16> to vector<8x128xbf16>
    %c8_53 = arith.constant 8 : index
    %c512_54 = arith.constant 512 : index
    %32 = vector.load %arg5[%c8_53, %c512_54] : memref<64x768xbf16, #tpu.memory_space<vmem>>, vector<8x128xbf16>
    tpu.vector_store %arg5[%c8_53, %c512_54], %31 {strides = array<i32>} : memref<64x768xbf16, #tpu.memory_space<vmem>>, vector<8x128xbf16>,
    %c0_55 = arith.constant 0 : index
    %c4_56 = arith.constant 4 : index
    %c1_57 = arith.constant 1 : index
    %c0_58 = arith.constant 0 : index
    %33 = vector.load %arg1[%c0_55, %c4_56, %c1_57, %c0_58] : memref<1x18x9x128xbf16, #tpu.memory_space<vmem>>, vector<1x1x8x128xbf16>
    %34 = vector.shape_cast %33 : vector<1x1x8x128xbf16> to vector<8x128xbf16>
    %c8_59 = arith.constant 8 : index
    %c640_60 = arith.constant 640 : index
    %35 = vector.load %arg5[%c8_59, %c640_60] : memref<64x768xbf16, #tpu.memory_space<vmem>>, vector<8x128xbf16>
    tpu.vector_store %arg5[%c8_59, %c640_60], %34 {strides = array<i32>} : memref<64x768xbf16, #tpu.memory_space<vmem>>, vector<8x128xbf16>,
    %c0_61 = arith.constant 0 : index
    %c4_62 = arith.constant 4 : index
    %c0_63 = arith.constant 0 : index
    %c0_64 = arith.constant 0 : index
    %36 = vector.load %arg1[%c0_61, %c4_62, %c0_63, %c0_64] : memref<1x18x9x128xbf16, #tpu.memory_space<vmem>>, vector<1x1x8x128xbf16>
    %37 = vector.shape_cast %36 : vector<1x1x8x128xbf16> to vector<8x128xbf16>
    %c16 = arith.constant 16 : index
    %c0_65 = arith.constant 0 : index
    %38 = vector.load %arg5[%c16, %c0_65] : memref<64x768xbf16, #tpu.memory_space<vmem>>, vector<8x128xbf16>
    tpu.vector_store %arg5[%c16, %c0_65], %37 {strides = array<i32>} : memref<64x768xbf16, #tpu.memory_space<vmem>>, vector<8x128xbf16>,
    %c0_66 = arith.constant 0 : index
    %c4_67 = arith.constant 4 : index
    %c1_68 = arith.constant 1 : index
    %c0_69 = arith.constant 0 : index
    %39 = vector.load %arg1[%c0_66, %c4_67, %c1_68, %c0_69] : memref<1x18x9x128xbf16, #tpu.memory_space<vmem>>, vector<1x1x8x128xbf16>
    %40 = vector.shape_cast %39 : vector<1x1x8x128xbf16> to vector<8x128xbf16>
    %c16_70 = arith.constant 16 : index
    %c128_71 = arith.constant 128 : index
    %41 = vector.load %arg5[%c16_70, %c128_71] : memref<64x768xbf16, #tpu.memory_space<vmem>>, vector<8x128xbf16>
    tpu.vector_store %arg5[%c16_70, %c128_71], %40 {strides = array<i32>} : memref<64x768xbf16, #tpu.memory_space<vmem>>, vector<8x128xbf16>,
    %c0_72 = arith.constant 0 : index
    %c5 = arith.constant 5 : index
    %c0_73 = arith.constant 0 : index
    %c0_74 = arith.constant 0 : index
    %42 = vector.load %arg1[%c0_72, %c5, %c0_73, %c0_74] : memref<1x18x9x128xbf16, #tpu.memory_space<vmem>>, vector<1x1x8x128xbf16>
    %43 = vector.shape_cast %42 : vector<1x1x8x128xbf16> to vector<8x128xbf16>
    %c16_75 = arith.constant 16 : index
    %c256_76 = arith.constant 256 : index
    %44 = vector.load %arg5[%c16_75, %c256_76] : memref<64x768xbf16, #tpu.memory_space<vmem>>, vector<8x128xbf16>
    tpu.vector_store %arg5[%c16_75, %c256_76], %43 {strides = array<i32>} : memref<64x768xbf16, #tpu.memory_space<vmem>>, vector<8x128xbf16>,
    %c0_77 = arith.constant 0 : index
    %c5_78 = arith.constant 5 : index
    %c1_79 = arith.constant 1 : index
    %c0_80 = arith.constant 0 : index
    %45 = vector.load %arg1[%c0_77, %c5_78, %c1_79, %c0_80] : memref<1x18x9x128xbf16, #tpu.memory_space<vmem>>, vector<1x1x8x128xbf16>
    %46 = vector.shape_cast %45 : vector<1x1x8x128xbf16> to vector<8x128xbf16>
    %c16_81 = arith.constant 16 : index
    %c384_82 = arith.constant 384 : index
    %47 = vector.load %arg5[%c16_81, %c384_82] : memref<64x768xbf16, #tpu.memory_space<vmem>>, vector<8x128xbf16>
    tpu.vector_store %arg5[%c16_81, %c384_82], %46 {strides = array<i32>} : memref<64x768xbf16, #tpu.memory_space<vmem>>, vector<8x128xbf16>,
    %c0_83 = arith.constant 0 : index
    %c6 = arith.constant 6 : index
    %c0_84 = arith.constant 0 : index
    %c0_85 = arith.constant 0 : index
    %48 = vector.load %arg1[%c0_83, %c6, %c0_84, %c0_85] : memref<1x18x9x128xbf16, #tpu.memory_space<vmem>>, vector<1x1x8x128xbf16>
    %49 = vector.shape_cast %48 : vector<1x1x8x128xbf16> to vector<8x128xbf16>
    %c16_86 = arith.constant 16 : index
    %c512_87 = arith.constant 512 : index
    %50 = vector.load %arg5[%c16_86, %c512_87] : memref<64x768xbf16, #tpu.memory_space<vmem>>, vector<8x128xbf16>
    tpu.vector_store %arg5[%c16_86, %c512_87], %49 {strides = array<i32>} : memref<64x768xbf16, #tpu.memory_space<vmem>>, vector<8x128xbf16>,
    %c0_88 = arith.constant 0 : index
    %c6_89 = arith.constant 6 : index
    %c1_90 = arith.constant 1 : index
    %c0_91 = arith.constant 0 : index
    %51 = vector.load %arg1[%c0_88, %c6_89, %c1_90, %c0_91] : memref<1x18x9x128xbf16, #tpu.memory_space<vmem>>, vector<1x1x8x128xbf16>
    %52 = vector.shape_cast %51 : vector<1x1x8x128xbf16> to vector<8x128xbf16>
    %c16_92 = arith.constant 16 : index
    %c640_93 = arith.constant 640 : index
    %53 = vector.load %arg5[%c16_92, %c640_93] : memref<64x768xbf16, #tpu.memory_space<vmem>>, vector<8x128xbf16>
    tpu.vector_store %arg5[%c16_92, %c640_93], %52 {strides = array<i32>} : memref<64x768xbf16, #tpu.memory_space<vmem>>, vector<8x128xbf16>,
    %c0_94 = arith.constant 0 : index
    %c6_95 = arith.constant 6 : index
    %c0_96 = arith.constant 0 : index
    %c0_97 = arith.constant 0 : index
    %54 = vector.load %arg1[%c0_94, %c6_95, %c0_96, %c0_97] : memref<1x18x9x128xbf16, #tpu.memory_space<vmem>>, vector<1x1x8x128xbf16>
    %55 = vector.shape_cast %54 : vector<1x1x8x128xbf16> to vector<8x128xbf16>
    %c24 = arith.constant 24 : index
    %c0_98 = arith.constant 0 : index
    %56 = vector.load %arg5[%c24, %c0_98] : memref<64x768xbf16, #tpu.memory_space<vmem>>, vector<8x128xbf16>
    tpu.vector_store %arg5[%c24, %c0_98], %55 {strides = array<i32>} : memref<64x768xbf16, #tpu.memory_space<vmem>>, vector<8x128xbf16>,
    %c0_99 = arith.constant 0 : index
    %c6_100 = arith.constant 6 : index
    %c1_101 = arith.constant 1 : index
    %c0_102 = arith.constant 0 : index
    %57 = vector.load %arg1[%c0_99, %c6_100, %c1_101, %c0_102] : memref<1x18x9x128xbf16, #tpu.memory_space<vmem>>, vector<1x1x8x128xbf16>
    %58 = vector.shape_cast %57 : vector<1x1x8x128xbf16> to vector<8x128xbf16>
    %c24_103 = arith.constant 24 : index
    %c128_104 = arith.constant 128 : index
    %59 = vector.load %arg5[%c24_103, %c128_104] : memref<64x768xbf16, #tpu.memory_space<vmem>>, vector<8x128xbf16>
    tpu.vector_store %arg5[%c24_103, %c128_104], %58 {strides = array<i32>} : memref<64x768xbf16, #tpu.memory_space<vmem>>, vector<8x128xbf16>,
    %c0_105 = arith.constant 0 : index
    %c7 = arith.constant 7 : index
    %c0_106 = arith.constant 0 : index
    %c0_107 = arith.constant 0 : index
    %60 = vector.load %arg1[%c0_105, %c7, %c0_106, %c0_107] : memref<1x18x9x128xbf16, #tpu.memory_space<vmem>>, vector<1x1x8x128xbf16>
    %61 = vector.shape_cast %60 : vector<1x1x8x128xbf16> to vector<8x128xbf16>
    %c24_108 = arith.constant 24 : index
    %c256_109 = arith.constant 256 : index
    %62 = vector.load %arg5[%c24_108, %c256_109] : memref<64x768xbf16, #tpu.memory_space<vmem>>, vector<8x128xbf16>
    tpu.vector_store %arg5[%c24_108, %c256_109], %61 {strides = array<i32>} : memref<64x768xbf16, #tpu.memory_space<vmem>>, vector<8x128xbf16>,
    %c0_110 = arith.constant 0 : index
    %c7_111 = arith.constant 7 : index
    %c1_112 = arith.constant 1 : index
    %c0_113 = arith.constant 0 : index
    %63 = vector.load %arg1[%c0_110, %c7_111, %c1_112, %c0_113] : memref<1x18x9x128xbf16, #tpu.memory_space<vmem>>, vector<1x1x8x128xbf16>
    %64 = vector.shape_cast %63 : vector<1x1x8x128xbf16> to vector<8x128xbf16>
    %c24_114 = arith.constant 24 : index
    %c384_115 = arith.constant 384 : index
    %65 = vector.load %arg5[%c24_114, %c384_115] : memref<64x768xbf16, #tpu.memory_space<vmem>>, vector<8x128xbf16>
    tpu.vector_store %arg5[%c24_114, %c384_115], %64 {strides = array<i32>} : memref<64x768xbf16, #tpu.memory_space<vmem>>, vector<8x128xbf16>,
    %c0_116 = arith.constant 0 : index
    %c8_117 = arith.constant 8 : index
    %c0_118 = arith.constant 0 : index
    %c0_119 = arith.constant 0 : index
    %66 = vector.load %arg1[%c0_116, %c8_117, %c0_118, %c0_119] : memref<1x18x9x128xbf16, #tpu.memory_space<vmem>>, vector<1x1x8x128xbf16>
    %67 = vector.shape_cast %66 : vector<1x1x8x128xbf16> to vector<8x128xbf16>
    %c24_120 = arith.constant 24 : index
    %c512_121 = arith.constant 512 : index
    %68 = vector.load %arg5[%c24_120, %c512_121] : memref<64x768xbf16, #tpu.memory_space<vmem>>, vector<8x128xbf16>
    tpu.vector_store %arg5[%c24_120, %c512_121], %67 {strides = array<i32>} : memref<64x768xbf16, #tpu.memory_space<vmem>>, vector<8x128xbf16>,
    %c0_122 = arith.constant 0 : index
    %c8_123 = arith.constant 8 : index
    %c1_124 = arith.constant 1 : index
    %c0_125 = arith.constant 0 : index
    %69 = vector.load %arg1[%c0_122, %c8_123, %c1_124, %c0_125] : memref<1x18x9x128xbf16, #tpu.memory_space<vmem>>, vector<1x1x8x128xbf16>
    %70 = vector.shape_cast %69 : vector<1x1x8x128xbf16> to vector<8x128xbf16>
    %c24_126 = arith.constant 24 : index
    %c640_127 = arith.constant 640 : index
    %71 = vector.load %arg5[%c24_126, %c640_127] : memref<64x768xbf16, #tpu.memory_space<vmem>>, vector<8x128xbf16>
    tpu.vector_store %arg5[%c24_126, %c640_127], %70 {strides = array<i32>} : memref<64x768xbf16, #tpu.memory_space<vmem>>, vector<8x128xbf16>,
    %c0_128 = arith.constant 0 : index
    %c8_129 = arith.constant 8 : index
    %c0_130 = arith.constant 0 : index
    %c0_131 = arith.constant 0 : index
    %72 = vector.load %arg1[%c0_128, %c8_129, %c0_130, %c0_131] : memref<1x18x9x128xbf16, #tpu.memory_space<vmem>>, vector<1x1x8x128xbf16>
    %73 = vector.shape_cast %72 : vector<1x1x8x128xbf16> to vector<8x128xbf16>
    %c32 = arith.constant 32 : index
    %c0_132 = arith.constant 0 : index
    %74 = vector.load %arg5[%c32, %c0_132] : memref<64x768xbf16, #tpu.memory_space<vmem>>, vector<8x128xbf16>
    tpu.vector_store %arg5[%c32, %c0_132], %73 {strides = array<i32>} : memref<64x768xbf16, #tpu.memory_space<vmem>>, vector<8x128xbf16>,
    %c0_133 = arith.constant 0 : index
    %c8_134 = arith.constant 8 : index
    %c1_135 = arith.constant 1 : index
    %c0_136 = arith.constant 0 : index
    %75 = vector.load %arg1[%c0_133, %c8_134, %c1_135, %c0_136] : memref<1x18x9x128xbf16, #tpu.memory_space<vmem>>, vector<1x1x8x128xbf16>
    %76 = vector.shape_cast %75 : vector<1x1x8x128xbf16> to vector<8x128xbf16>
    %c32_137 = arith.constant 32 : index
    %c128_138 = arith.constant 128 : index
    %77 = vector.load %arg5[%c32_137, %c128_138] : memref<64x768xbf16, #tpu.memory_space<vmem>>, vector<8x128xbf16>
    tpu.vector_store %arg5[%c32_137, %c128_138], %76 {strides = array<i32>} : memref<64x768xbf16, #tpu.memory_space<vmem>>, vector<8x128xbf16>,
    %c0_139 = arith.constant 0 : index
    %c9 = arith.constant 9 : index
    %c0_140 = arith.constant 0 : index
    %c0_141 = arith.constant 0 : index
    %78 = vector.load %arg1[%c0_139, %c9, %c0_140, %c0_141] : memref<1x18x9x128xbf16, #tpu.memory_space<vmem>>, vector<1x1x8x128xbf16>
    %79 = vector.shape_cast %78 : vector<1x1x8x128xbf16> to vector<8x128xbf16>
    %c32_142 = arith.constant 32 : index
    %c256_143 = arith.constant 256 : index
    %80 = vector.load %arg5[%c32_142, %c256_143] : memref<64x768xbf16, #tpu.memory_space<vmem>>, vector<8x128xbf16>
    tpu.vector_store %arg5[%c32_142, %c256_143], %79 {strides = array<i32>} : memref<64x768xbf16, #tpu.memory_space<vmem>>, vector<8x128xbf16>,
    %c0_144 = arith.constant 0 : index
    %c9_145 = arith.constant 9 : index
    %c1_146 = arith.constant 1 : index
    %c0_147 = arith.constant 0 : index
    %81 = vector.load %arg1[%c0_144, %c9_145, %c1_146, %c0_147] : memref<1x18x9x128xbf16, #tpu.memory_space<vmem>>, vector<1x1x8x128xbf16>
    %82 = vector.shape_cast %81 : vector<1x1x8x128xbf16> to vector<8x128xbf16>
    %c32_148 = arith.constant 32 : index
    %c384_149 = arith.constant 384 : index
    %83 = vector.load %arg5[%c32_148, %c384_149] : memref<64x768xbf16, #tpu.memory_space<vmem>>, vector<8x128xbf16>
    tpu.vector_store %arg5[%c32_148, %c384_149], %82 {strides = array<i32>} : memref<64x768xbf16, #tpu.memory_space<vmem>>, vector<8x128xbf16>,
    %c0_150 = arith.constant 0 : index
    %c10 = arith.constant 10 : index
    %c0_151 = arith.constant 0 : index
    %c0_152 = arith.constant 0 : index
    %84 = vector.load %arg1[%c0_150, %c10, %c0_151, %c0_152] : memref<1x18x9x128xbf16, #tpu.memory_space<vmem>>, vector<1x1x8x128xbf16>
    %85 = vector.shape_cast %84 : vector<1x1x8x128xbf16> to vector<8x128xbf16>
    %c32_153 = arith.constant 32 : index
    %c512_154 = arith.constant 512 : index
    %86 = vector.load %arg5[%c32_153, %c512_154] : memref<64x768xbf16, #tpu.memory_space<vmem>>, vector<8x128xbf16>
    tpu.vector_store %arg5[%c32_153, %c512_154], %85 {strides = array<i32>} : memref<64x768xbf16, #tpu.memory_space<vmem>>, vector<8x128xbf16>,
    %c0_155 = arith.constant 0 : index
    %c10_156 = arith.constant 10 : index
    %c1_157 = arith.constant 1 : index
    %c0_158 = arith.constant 0 : index
    %87 = vector.load %arg1[%c0_155, %c10_156, %c1_157, %c0_158] : memref<1x18x9x128xbf16, #tpu.memory_space<vmem>>, vector<1x1x8x128xbf16>
    %88 = vector.shape_cast %87 : vector<1x1x8x128xbf16> to vector<8x128xbf16>
    %c32_159 = arith.constant 32 : index
    %c640_160 = arith.constant 640 : index
    %89 = vector.load %arg5[%c32_159, %c640_160] : memref<64x768xbf16, #tpu.memory_space<vmem>>, vector<8x128xbf16>
    tpu.vector_store %arg5[%c32_159, %c640_160], %88 {strides = array<i32>} : memref<64x768xbf16, #tpu.memory_space<vmem>>, vector<8x128xbf16>,
    %c0_161 = arith.constant 0 : index
    %c10_162 = arith.constant 10 : index
    %c0_163 = arith.constant 0 : index
    %c0_164 = arith.constant 0 : index
    %90 = vector.load %arg1[%c0_161, %c10_162, %c0_163, %c0_164] : memref<1x18x9x128xbf16, #tpu.memory_space<vmem>>, vector<1x1x8x128xbf16>
    %91 = vector.shape_cast %90 : vector<1x1x8x128xbf16> to vector<8x128xbf16>
    %c40 = arith.constant 40 : index
    %c0_165 = arith.constant 0 : index
    %92 = vector.load %arg5[%c40, %c0_165] : memref<64x768xbf16, #tpu.memory_space<vmem>>, vector<8x128xbf16>
    tpu.vector_store %arg5[%c40, %c0_165], %91 {strides = array<i32>} : memref<64x768xbf16, #tpu.memory_space<vmem>>, vector<8x128xbf16>,
    %c0_166 = arith.constant 0 : index
    %c10_167 = arith.constant 10 : index
    %c1_168 = arith.constant 1 : index
    %c0_169 = arith.constant 0 : index
    %93 = vector.load %arg1[%c0_166, %c10_167, %c1_168, %c0_169] : memref<1x18x9x128xbf16, #tpu.memory_space<vmem>>, vector<1x1x8x128xbf16>
    %94 = vector.shape_cast %93 : vector<1x1x8x128xbf16> to vector<8x128xbf16>
    %c40_170 = arith.constant 40 : index
    %c128_171 = arith.constant 128 : index
    %95 = vector.load %arg5[%c40_170, %c128_171] : memref<64x768xbf16, #tpu.memory_space<vmem>>, vector<8x128xbf16>
    tpu.vector_store %arg5[%c40_170, %c128_171], %94 {strides = array<i32>} : memref<64x768xbf16, #tpu.memory_space<vmem>>, vector<8x128xbf16>,
    %c0_172 = arith.constant 0 : index
    %c11 = arith.constant 11 : index
    %c0_173 = arith.constant 0 : index
    %c0_174 = arith.constant 0 : index
    %96 = vector.load %arg1[%c0_172, %c11, %c0_173, %c0_174] : memref<1x18x9x128xbf16, #tpu.memory_space<vmem>>, vector<1x1x8x128xbf16>
    %97 = vector.shape_cast %96 : vector<1x1x8x128xbf16> to vector<8x128xbf16>
    %c40_175 = arith.constant 40 : index
    %c256_176 = arith.constant 256 : index
    %98 = vector.load %arg5[%c40_175, %c256_176] : memref<64x768xbf16, #tpu.memory_space<vmem>>, vector<8x128xbf16>
    tpu.vector_store %arg5[%c40_175, %c256_176], %97 {strides = array<i32>} : memref<64x768xbf16, #tpu.memory_space<vmem>>, vector<8x128xbf16>,
    %c0_177 = arith.constant 0 : index
    %c11_178 = arith.constant 11 : index
    %c1_179 = arith.constant 1 : index
    %c0_180 = arith.constant 0 : index
    %99 = vector.load %arg1[%c0_177, %c11_178, %c1_179, %c0_180] : memref<1x18x9x128xbf16, #tpu.memory_space<vmem>>, vector<1x1x8x128xbf16>
    %100 = vector.shape_cast %99 : vector<1x1x8x128xbf16> to vector<8x128xbf16>
    %c40_181 = arith.constant 40 : index
    %c384_182 = arith.constant 384 : index
    %101 = vector.load %arg5[%c40_181, %c384_182] : memref<64x768xbf16, #tpu.memory_space<vmem>>, vector<8x128xbf16>
    tpu.vector_store %arg5[%c40_181, %c384_182], %100 {strides = array<i32>} : memref<64x768xbf16, #tpu.memory_space<vmem>>, vector<8x128xbf16>,
    %c0_183 = arith.constant 0 : index
    %c12 = arith.constant 12 : index
    %c0_184 = arith.constant 0 : index
    %c0_185 = arith.constant 0 : index
    %102 = vector.load %arg1[%c0_183, %c12, %c0_184, %c0_185] : memref<1x18x9x128xbf16, #tpu.memory_space<vmem>>, vector<1x1x8x128xbf16>
    %103 = vector.shape_cast %102 : vector<1x1x8x128xbf16> to vector<8x128xbf16>
    %c40_186 = arith.constant 40 : index
    %c512_187 = arith.constant 512 : index
    %104 = vector.load %arg5[%c40_186, %c512_187] : memref<64x768xbf16, #tpu.memory_space<vmem>>, vector<8x128xbf16>
    tpu.vector_store %arg5[%c40_186, %c512_187], %103 {strides = array<i32>} : memref<64x768xbf16, #tpu.memory_space<vmem>>, vector<8x128xbf16>,
    %c0_188 = arith.constant 0 : index
    %c12_189 = arith.constant 12 : index
    %c1_190 = arith.constant 1 : index
    %c0_191 = arith.constant 0 : index
    %105 = vector.load %arg1[%c0_188, %c12_189, %c1_190, %c0_191] : memref<1x18x9x128xbf16, #tpu.memory_space<vmem>>, vector<1x1x8x128xbf16>
    %106 = vector.shape_cast %105 : vector<1x1x8x128xbf16> to vector<8x128xbf16>
    %c40_192 = arith.constant 40 : index
    %c640_193 = arith.constant 640 : index
    %107 = vector.load %arg5[%c40_192, %c640_193] : memref<64x768xbf16, #tpu.memory_space<vmem>>, vector<8x128xbf16>
    tpu.vector_store %arg5[%c40_192, %c640_193], %106 {strides = array<i32>} : memref<64x768xbf16, #tpu.memory_space<vmem>>, vector<8x128xbf16>,
    %c0_194 = arith.constant 0 : index
    %c12_195 = arith.constant 12 : index
    %c0_196 = arith.constant 0 : index
    %c0_197 = arith.constant 0 : index
    %108 = vector.load %arg1[%c0_194, %c12_195, %c0_196, %c0_197] : memref<1x18x9x128xbf16, #tpu.memory_space<vmem>>, vector<1x1x8x128xbf16>
    %109 = vector.shape_cast %108 : vector<1x1x8x128xbf16> to vector<8x128xbf16>
    %c48 = arith.constant 48 : index
    %c0_198 = arith.constant 0 : index
    %110 = vector.load %arg5[%c48, %c0_198] : memref<64x768xbf16, #tpu.memory_space<vmem>>, vector<8x128xbf16>
    tpu.vector_store %arg5[%c48, %c0_198], %109 {strides = array<i32>} : memref<64x768xbf16, #tpu.memory_space<vmem>>, vector<8x128xbf16>,
    %c0_199 = arith.constant 0 : index
    %c12_200 = arith.constant 12 : index
    %c1_201 = arith.constant 1 : index
    %c0_202 = arith.constant 0 : index
    %111 = vector.load %arg1[%c0_199, %c12_200, %c1_201, %c0_202] : memref<1x18x9x128xbf16, #tpu.memory_space<vmem>>, vector<1x1x8x128xbf16>
    %112 = vector.shape_cast %111 : vector<1x1x8x128xbf16> to vector<8x128xbf16>
    %c48_203 = arith.constant 48 : index
    %c128_204 = arith.constant 128 : index
    %113 = vector.load %arg5[%c48_203, %c128_204] : memref<64x768xbf16, #tpu.memory_space<vmem>>, vector<8x128xbf16>
    tpu.vector_store %arg5[%c48_203, %c128_204], %112 {strides = array<i32>} : memref<64x768xbf16, #tpu.memory_space<vmem>>, vector<8x128xbf16>,
    %c0_205 = arith.constant 0 : index
    %c13 = arith.constant 13 : index
    %c0_206 = arith.constant 0 : index
    %c0_207 = arith.constant 0 : index
    %114 = vector.load %arg1[%c0_205, %c13, %c0_206, %c0_207] : memref<1x18x9x128xbf16, #tpu.memory_space<vmem>>, vector<1x1x8x128xbf16>
    %115 = vector.shape_cast %114 : vector<1x1x8x128xbf16> to vector<8x128xbf16>
    %c48_208 = arith.constant 48 : index
    %c256_209 = arith.constant 256 : index
    %116 = vector.load %arg5[%c48_208, %c256_209] : memref<64x768xbf16, #tpu.memory_space<vmem>>, vector<8x128xbf16>
    tpu.vector_store %arg5[%c48_208, %c256_209], %115 {strides = array<i32>} : memref<64x768xbf16, #tpu.memory_space<vmem>>, vector<8x128xbf16>,
    %c0_210 = arith.constant 0 : index
    %c13_211 = arith.constant 13 : index
    %c1_212 = arith.constant 1 : index
    %c0_213 = arith.constant 0 : index
    %117 = vector.load %arg1[%c0_210, %c13_211, %c1_212, %c0_213] : memref<1x18x9x128xbf16, #tpu.memory_space<vmem>>, vector<1x1x8x128xbf16>
    %118 = vector.shape_cast %117 : vector<1x1x8x128xbf16> to vector<8x128xbf16>
    %c48_214 = arith.constant 48 : index
    %c384_215 = arith.constant 384 : index
    %119 = vector.load %arg5[%c48_214, %c384_215] : memref<64x768xbf16, #tpu.memory_space<vmem>>, vector<8x128xbf16>
    tpu.vector_store %arg5[%c48_214, %c384_215], %118 {strides = array<i32>} : memref<64x768xbf16, #tpu.memory_space<vmem>>, vector<8x128xbf16>,
    %c0_216 = arith.constant 0 : index
    %c14 = arith.constant 14 : index
    %c0_217 = arith.constant 0 : index
    %c0_218 = arith.constant 0 : index
    %120 = vector.load %arg1[%c0_216, %c14, %c0_217, %c0_218] : memref<1x18x9x128xbf16, #tpu.memory_space<vmem>>, vector<1x1x8x128xbf16>
    %121 = vector.shape_cast %120 : vector<1x1x8x128xbf16> to vector<8x128xbf16>
    %c48_219 = arith.constant 48 : index
    %c512_220 = arith.constant 512 : index
    %122 = vector.load %arg5[%c48_219, %c512_220] : memref<64x768xbf16, #tpu.memory_space<vmem>>, vector<8x128xbf16>
    tpu.vector_store %arg5[%c48_219, %c512_220], %121 {strides = array<i32>} : memref<64x768xbf16, #tpu.memory_space<vmem>>, vector<8x128xbf16>,
    %c0_221 = arith.constant 0 : index
    %c14_222 = arith.constant 14 : index
    %c1_223 = arith.constant 1 : index
    %c0_224 = arith.constant 0 : index
    %123 = vector.load %arg1[%c0_221, %c14_222, %c1_223, %c0_224] : memref<1x18x9x128xbf16, #tpu.memory_space<vmem>>, vector<1x1x8x128xbf16>
    %124 = vector.shape_cast %123 : vector<1x1x8x128xbf16> to vector<8x128xbf16>
    %c48_225 = arith.constant 48 : index
    %c640_226 = arith.constant 640 : index
    %125 = vector.load %arg5[%c48_225, %c640_226] : memref<64x768xbf16, #tpu.memory_space<vmem>>, vector<8x128xbf16>
    tpu.vector_store %arg5[%c48_225, %c640_226], %124 {strides = array<i32>} : memref<64x768xbf16, #tpu.memory_space<vmem>>, vector<8x128xbf16>,
    %c0_227 = arith.constant 0 : index
    %c14_228 = arith.constant 14 : index
    %c0_229 = arith.constant 0 : index
    %c0_230 = arith.constant 0 : index
    %126 = vector.load %arg1[%c0_227, %c14_228, %c0_229, %c0_230] : memref<1x18x9x128xbf16, #tpu.memory_space<vmem>>, vector<1x1x8x128xbf16>
    %127 = vector.shape_cast %126 : vector<1x1x8x128xbf16> to vector<8x128xbf16>
    %c56 = arith.constant 56 : index
    %c0_231 = arith.constant 0 : index
    %128 = vector.load %arg5[%c56, %c0_231] : memref<64x768xbf16, #tpu.memory_space<vmem>>, vector<8x128xbf16>
    tpu.vector_store %arg5[%c56, %c0_231], %127 {strides = array<i32>} : memref<64x768xbf16, #tpu.memory_space<vmem>>, vector<8x128xbf16>,
    %c0_232 = arith.constant 0 : index
    %c14_233 = arith.constant 14 : index
    %c1_234 = arith.constant 1 : index
    %c0_235 = arith.constant 0 : index
    %129 = vector.load %arg1[%c0_232, %c14_233, %c1_234, %c0_235] : memref<1x18x9x128xbf16, #tpu.memory_space<vmem>>, vector<1x1x8x128xbf16>
    %130 = vector.shape_cast %129 : vector<1x1x8x128xbf16> to vector<8x128xbf16>
    %c56_236 = arith.constant 56 : index
    %c128_237 = arith.constant 128 : index
    %131 = vector.load %arg5[%c56_236, %c128_237] : memref<64x768xbf16, #tpu.memory_space<vmem>>, vector<8x128xbf16>
    tpu.vector_store %arg5[%c56_236, %c128_237], %130 {strides = array<i32>} : memref<64x768xbf16, #tpu.memory_space<vmem>>, vector<8x128xbf16>,
    %c0_238 = arith.constant 0 : index
    %c15 = arith.constant 15 : index
    %c0_239 = arith.constant 0 : index
    %c0_240 = arith.constant 0 : index
    %132 = vector.load %arg1[%c0_238, %c15, %c0_239, %c0_240] : memref<1x18x9x128xbf16, #tpu.memory_space<vmem>>, vector<1x1x8x128xbf16>
    %133 = vector.shape_cast %132 : vector<1x1x8x128xbf16> to vector<8x128xbf16>
    %c56_241 = arith.constant 56 : index
    %c256_242 = arith.constant 256 : index
    %134 = vector.load %arg5[%c56_241, %c256_242] : memref<64x768xbf16, #tpu.memory_space<vmem>>, vector<8x128xbf16>
    tpu.vector_store %arg5[%c56_241, %c256_242], %133 {strides = array<i32>} : memref<64x768xbf16, #tpu.memory_space<vmem>>, vector<8x128xbf16>,
    %c0_243 = arith.constant 0 : index
    %c15_244 = arith.constant 15 : index
    %c1_245 = arith.constant 1 : index
    %c0_246 = arith.constant 0 : index
    %135 = vector.load %arg1[%c0_243, %c15_244, %c1_245, %c0_246] : memref<1x18x9x128xbf16, #tpu.memory_space<vmem>>, vector<1x1x8x128xbf16>
    %136 = vector.shape_cast %135 : vector<1x1x8x128xbf16> to vector<8x128xbf16>
    %c56_247 = arith.constant 56 : index
    %c384_248 = arith.constant 384 : index
    %137 = vector.load %arg5[%c56_247, %c384_248] : memref<64x768xbf16, #tpu.memory_space<vmem>>, vector<8x128xbf16>
    tpu.vector_store %arg5[%c56_247, %c384_248], %136 {strides = array<i32>} : memref<64x768xbf16, #tpu.memory_space<vmem>>, vector<8x128xbf16>,
    %c0_249 = arith.constant 0 : index
    %c16_250 = arith.constant 16 : index
    %c0_251 = arith.constant 0 : index
    %c0_252 = arith.constant 0 : index
    %138 = vector.load %arg1[%c0_249, %c16_250, %c0_251, %c0_252] : memref<1x18x9x128xbf16, #tpu.memory_space<vmem>>, vector<1x1x8x128xbf16>
    %139 = vector.shape_cast %138 : vector<1x1x8x128xbf16> to vector<8x128xbf16>
    %c56_253 = arith.constant 56 : index
    %c512_254 = arith.constant 512 : index
    %140 = vector.load %arg5[%c56_253, %c512_254] : memref<64x768xbf16, #tpu.memory_space<vmem>>, vector<8x128xbf16>
    tpu.vector_store %arg5[%c56_253, %c512_254], %139 {strides = array<i32>} : memref<64x768xbf16, #tpu.memory_space<vmem>>, vector<8x128xbf16>,
    %c0_255 = arith.constant 0 : index
    %c16_256 = arith.constant 16 : index
    %c1_257 = arith.constant 1 : index
    %c0_258 = arith.constant 0 : index
    %141 = vector.load %arg1[%c0_255, %c16_256, %c1_257, %c0_258] : memref<1x18x9x128xbf16, #tpu.memory_space<vmem>>, vector<1x1x8x128xbf16>
    %142 = vector.shape_cast %141 : vector<1x1x8x128xbf16> to vector<8x128xbf16>
    %c56_259 = arith.constant 56 : index
    %c640_260 = arith.constant 640 : index
    %143 = vector.load %arg5[%c56_259, %c640_260] : memref<64x768xbf16, #tpu.memory_space<vmem>>, vector<8x128xbf16>
    tpu.vector_store %arg5[%c56_259, %c640_260], %142 {strides = array<i32>} : memref<64x768xbf16, #tpu.memory_space<vmem>>, vector<8x128xbf16>,
    %c0_261 = arith.constant 0 : index
    %c0_262 = arith.constant 0 : index
    %144 = vector.load %arg5[%c0_261, %c0_262] : memref<64x768xbf16, #tpu.memory_space<vmem>>, vector<64x768xbf16>
    %c0_263 = arith.constant 0 : index
    %c0_264 = arith.constant 0 : index
    %145 = vector.load %arg2[%c0_263, %c0_264] : memref<768x128xbf16, #tpu.memory_space<vmem>>, vector<768x128xbf16>
    %cst = arith.constant dense<0.000000e+00> : vector<64x128xf32>
    %146 = tpu.matmul %144, %145, %cst {dimension_numbers = #tpu.dot_dimension_numbers<[1], [0], [0], [1], [0, 0, 1, 1], [], []>} : vector<64x768xbf16>, vector<768x128xbf16>, vector<64x128xf32> -> vector<64x128xf32>
    %c0_265 = arith.constant 0 : index
    %c0_266 = arith.constant 0 : index
    %147 = vector.load %arg3[%c0_265, %c0_266] : memref<3x128xf32, #tpu.memory_space<vmem>>, vector<3x128xf32>
    %148 = vector.extract_strided_slice %147 {offsets = [0, 0], sizes = [1, 128], strides = [1, 1]} : vector<3x128xf32> to vector<1x128xf32>
    %149 = vector.broadcast %148 : vector<1x128xf32> to vector<64x128xf32>
    %150 = arith.addf %146, %149 : vector<64x128xf32>
    %cst_267 = arith.constant 0.00999999977 : f32
    %151 = vector.broadcast %cst_267 : f32 to vector<64x128xf32>
    %152 = arith.mulf %151, %150 : vector<64x128xf32>
    %153 = arith.maximumf %150, %152 : vector<64x128xf32>
    %154 = vector.extract_strided_slice %147 {offsets = [1, 0], sizes = [1, 128], strides = [1, 1]} : vector<3x128xf32> to vector<1x128xf32>
    %155 = vector.broadcast %154 : vector<1x128xf32> to vector<64x128xf32>
    %156 = arith.mulf %153, %155 : vector<64x128xf32>
    %157 = vector.extract_strided_slice %147 {offsets = [2, 0], sizes = [1, 128], strides = [1, 1]} : vector<3x128xf32> to vector<1x128xf32>
    %158 = vector.broadcast %157 : vector<1x128xf32> to vector<64x128xf32>
    %159 = arith.addf %156, %158 : vector<64x128xf32>
    %160 = arith.truncf %159 : vector<64x128xf32> to vector<64x128xbf16>
    %c0_268 = arith.constant 0 : index
    %c0_269 = arith.constant 0 : index
    %c0_270 = arith.constant 0 : index
    %161 = vector.load %arg4[%c0_268, %c0_269, %c0_270] : memref<1x64x128xbf16, #tpu.memory_space<vmem>>, vector<1x64x128xbf16>
    %162 = vector.shape_cast %161 : vector<1x64x128xbf16> to vector<64x128xbf16>
    %163 = vector.shape_cast %160 : vector<64x128xbf16> to vector<1x64x128xbf16>
    tpu.vector_store %arg4[%c0_268, %c0_269, %c0_270], %163 {strides = array<i32>} : memref<1x64x128xbf16, #tpu.memory_space<vmem>>, vector<1x64x128xbf16>,
    return
  }
  func.func @transform_0(%arg0: i32) -> (i32, i32, i32, i32) {
    %c0_i32 = arith.constant 0 : i32
    %c0_i32_0 = arith.constant 0 : i32
    %c0_i32_1 = arith.constant 0 : i32
    %c0_i32_2 = arith.constant 0 : i32
    return %arg0, %c0_i32, %c0_i32_0, %c0_i32_1 : i32, i32, i32, i32
  }
  func.func @transform_1(%arg0: i32) -> (i32, i32) {
    %c0_i32 = arith.constant 0 : i32
    %c0_i32_0 = arith.constant 0 : i32
    %c0_i32_1 = arith.constant 0 : i32
    return %c0_i32, %c0_i32_0 : i32, i32
  }
  func.func @transform_2(%arg0: i32) -> (i32, i32) {
    %c0_i32 = arith.constant 0 : i32
    %c0_i32_0 = arith.constant 0 : i32
    %c0_i32_1 = arith.constant 0 : i32
    return %c0_i32, %c0_i32_0 : i32, i32
  }
  func.func @transform_3(%arg0: i32) -> (i32, i32, i32) {
    %c0_i32 = arith.constant 0 : i32
    %c0_i32_0 = arith.constant 0 : i32
    %c0_i32_1 = arith.constant 0 : i32
    return %arg0, %c0_i32, %c0_i32_0 : i32, i32, i32
  }
}

module attributes {stable_mosaic.version = 11 : i64} {
  func.func @_fused_conv3x3s2_kernel(%arg0: i32, %arg1: memref<1x10x5x256xbf16, #tpu.memory_space<vmem>>, %arg2: memref<1536x256xbf16, #tpu.memory_space<vmem>>, %arg3: memref<3x256xf32, #tpu.memory_space<vmem>>, %arg4: memref<1x16x256xbf16, #tpu.memory_space<vmem>>, %arg5: memref<16x1536xbf16, #tpu.memory_space<vmem>>) attributes {dimension_semantics = [#tpu.dimension_semantics<parallel>], iteration_bounds = array<i64: 2>, scalar_prefetch = 0 : i64, scratch_operands = 1 : i64, tpu.core_type = #tpu.core_type<tc>, window_params = [{transform_indices = @transform_0, window_bounds = array<i64: 1, 10, 5, 256>}, {pipeline_mode = #tpu.pipeline_mode<synchronous>, transform_indices = @transform_1, window_bounds = array<i64: 1536, 256>}, {pipeline_mode = #tpu.pipeline_mode<synchronous>, transform_indices = @transform_2, window_bounds = array<i64: 3, 256>}, {transform_indices = @transform_3, window_bounds = array<i64: 1, 16, 256>}]} {
    %c0 = arith.constant 0 : index
    %c0_0 = arith.constant 0 : index
    %c0_1 = arith.constant 0 : index
    %c0_2 = arith.constant 0 : index
    %0 = vector.load %arg1[%c0, %c0_0, %c0_1, %c0_2] : memref<1x10x5x256xbf16, #tpu.memory_space<vmem>>, vector<1x1x4x256xbf16>
    %1 = vector.shape_cast %0 : vector<1x1x4x256xbf16> to vector<4x256xbf16>
    %c0_3 = arith.constant 0 : index
    %c0_4 = arith.constant 0 : index
    %2 = vector.load %arg5[%c0_3, %c0_4] : memref<16x1536xbf16, #tpu.memory_space<vmem>>, vector<4x256xbf16>
    tpu.vector_store %arg5[%c0_3, %c0_4], %1 {strides = array<i32>} : memref<16x1536xbf16, #tpu.memory_space<vmem>>, vector<4x256xbf16>,
    %c0_5 = arith.constant 0 : index
    %c0_6 = arith.constant 0 : index
    %c1 = arith.constant 1 : index
    %c0_7 = arith.constant 0 : index
    %3 = vector.load %arg1[%c0_5, %c0_6, %c1, %c0_7] : memref<1x10x5x256xbf16, #tpu.memory_space<vmem>>, vector<1x1x4x256xbf16>
    %4 = vector.shape_cast %3 : vector<1x1x4x256xbf16> to vector<4x256xbf16>
    %c0_8 = arith.constant 0 : index
    %c256 = arith.constant 256 : index
    %5 = vector.load %arg5[%c0_8, %c256] : memref<16x1536xbf16, #tpu.memory_space<vmem>>, vector<4x256xbf16>
    tpu.vector_store %arg5[%c0_8, %c256], %4 {strides = array<i32>} : memref<16x1536xbf16, #tpu.memory_space<vmem>>, vector<4x256xbf16>,
    %c0_9 = arith.constant 0 : index
    %c1_10 = arith.constant 1 : index
    %c0_11 = arith.constant 0 : index
    %c0_12 = arith.constant 0 : index
    %6 = vector.load %arg1[%c0_9, %c1_10, %c0_11, %c0_12] : memref<1x10x5x256xbf16, #tpu.memory_space<vmem>>, vector<1x1x4x256xbf16>
    %7 = vector.shape_cast %6 : vector<1x1x4x256xbf16> to vector<4x256xbf16>
    %c0_13 = arith.constant 0 : index
    %c512 = arith.constant 512 : index
    %8 = vector.load %arg5[%c0_13, %c512] : memref<16x1536xbf16, #tpu.memory_space<vmem>>, vector<4x256xbf16>
    tpu.vector_store %arg5[%c0_13, %c512], %7 {strides = array<i32>} : memref<16x1536xbf16, #tpu.memory_space<vmem>>, vector<4x256xbf16>,
    %c0_14 = arith.constant 0 : index
    %c1_15 = arith.constant 1 : index
    %c1_16 = arith.constant 1 : index
    %c0_17 = arith.constant 0 : index
    %9 = vector.load %arg1[%c0_14, %c1_15, %c1_16, %c0_17] : memref<1x10x5x256xbf16, #tpu.memory_space<vmem>>, vector<1x1x4x256xbf16>
    %10 = vector.shape_cast %9 : vector<1x1x4x256xbf16> to vector<4x256xbf16>
    %c0_18 = arith.constant 0 : index
    %c768 = arith.constant 768 : index
    %11 = vector.load %arg5[%c0_18, %c768] : memref<16x1536xbf16, #tpu.memory_space<vmem>>, vector<4x256xbf16>
    tpu.vector_store %arg5[%c0_18, %c768], %10 {strides = array<i32>} : memref<16x1536xbf16, #tpu.memory_space<vmem>>, vector<4x256xbf16>,
    %c0_19 = arith.constant 0 : index
    %c2 = arith.constant 2 : index
    %c0_20 = arith.constant 0 : index
    %c0_21 = arith.constant 0 : index
    %12 = vector.load %arg1[%c0_19, %c2, %c0_20, %c0_21] : memref<1x10x5x256xbf16, #tpu.memory_space<vmem>>, vector<1x1x4x256xbf16>
    %13 = vector.shape_cast %12 : vector<1x1x4x256xbf16> to vector<4x256xbf16>
    %c0_22 = arith.constant 0 : index
    %c1024 = arith.constant 1024 : index
    %14 = vector.load %arg5[%c0_22, %c1024] : memref<16x1536xbf16, #tpu.memory_space<vmem>>, vector<4x256xbf16>
    tpu.vector_store %arg5[%c0_22, %c1024], %13 {strides = array<i32>} : memref<16x1536xbf16, #tpu.memory_space<vmem>>, vector<4x256xbf16>,
    %c0_23 = arith.constant 0 : index
    %c2_24 = arith.constant 2 : index
    %c1_25 = arith.constant 1 : index
    %c0_26 = arith.constant 0 : index
    %15 = vector.load %arg1[%c0_23, %c2_24, %c1_25, %c0_26] : memref<1x10x5x256xbf16, #tpu.memory_space<vmem>>, vector<1x1x4x256xbf16>
    %16 = vector.shape_cast %15 : vector<1x1x4x256xbf16> to vector<4x256xbf16>
    %c0_27 = arith.constant 0 : index
    %c1280 = arith.constant 1280 : index
    %17 = vector.load %arg5[%c0_27, %c1280] : memref<16x1536xbf16, #tpu.memory_space<vmem>>, vector<4x256xbf16>
    tpu.vector_store %arg5[%c0_27, %c1280], %16 {strides = array<i32>} : memref<16x1536xbf16, #tpu.memory_space<vmem>>, vector<4x256xbf16>,
    %c0_28 = arith.constant 0 : index
    %c2_29 = arith.constant 2 : index
    %c0_30 = arith.constant 0 : index
    %c0_31 = arith.constant 0 : index
    %18 = vector.load %arg1[%c0_28, %c2_29, %c0_30, %c0_31] : memref<1x10x5x256xbf16, #tpu.memory_space<vmem>>, vector<1x1x4x256xbf16>
    %19 = vector.shape_cast %18 : vector<1x1x4x256xbf16> to vector<4x256xbf16>
    %c4 = arith.constant 4 : index
    %c0_32 = arith.constant 0 : index
    %20 = vector.load %arg5[%c4, %c0_32] : memref<16x1536xbf16, #tpu.memory_space<vmem>>, vector<4x256xbf16>
    tpu.vector_store %arg5[%c4, %c0_32], %19 {strides = array<i32>} : memref<16x1536xbf16, #tpu.memory_space<vmem>>, vector<4x256xbf16>,
    %c0_33 = arith.constant 0 : index
    %c2_34 = arith.constant 2 : index
    %c1_35 = arith.constant 1 : index
    %c0_36 = arith.constant 0 : index
    %21 = vector.load %arg1[%c0_33, %c2_34, %c1_35, %c0_36] : memref<1x10x5x256xbf16, #tpu.memory_space<vmem>>, vector<1x1x4x256xbf16>
    %22 = vector.shape_cast %21 : vector<1x1x4x256xbf16> to vector<4x256xbf16>
    %c4_37 = arith.constant 4 : index
    %c256_38 = arith.constant 256 : index
    %23 = vector.load %arg5[%c4_37, %c256_38] : memref<16x1536xbf16, #tpu.memory_space<vmem>>, vector<4x256xbf16>
    tpu.vector_store %arg5[%c4_37, %c256_38], %22 {strides = array<i32>} : memref<16x1536xbf16, #tpu.memory_space<vmem>>, vector<4x256xbf16>,
    %c0_39 = arith.constant 0 : index
    %c3 = arith.constant 3 : index
    %c0_40 = arith.constant 0 : index
    %c0_41 = arith.constant 0 : index
    %24 = vector.load %arg1[%c0_39, %c3, %c0_40, %c0_41] : memref<1x10x5x256xbf16, #tpu.memory_space<vmem>>, vector<1x1x4x256xbf16>
    %25 = vector.shape_cast %24 : vector<1x1x4x256xbf16> to vector<4x256xbf16>
    %c4_42 = arith.constant 4 : index
    %c512_43 = arith.constant 512 : index
    %26 = vector.load %arg5[%c4_42, %c512_43] : memref<16x1536xbf16, #tpu.memory_space<vmem>>, vector<4x256xbf16>
    tpu.vector_store %arg5[%c4_42, %c512_43], %25 {strides = array<i32>} : memref<16x1536xbf16, #tpu.memory_space<vmem>>, vector<4x256xbf16>,
    %c0_44 = arith.constant 0 : index
    %c3_45 = arith.constant 3 : index
    %c1_46 = arith.constant 1 : index
    %c0_47 = arith.constant 0 : index
    %27 = vector.load %arg1[%c0_44, %c3_45, %c1_46, %c0_47] : memref<1x10x5x256xbf16, #tpu.memory_space<vmem>>, vector<1x1x4x256xbf16>
    %28 = vector.shape_cast %27 : vector<1x1x4x256xbf16> to vector<4x256xbf16>
    %c4_48 = arith.constant 4 : index
    %c768_49 = arith.constant 768 : index
    %29 = vector.load %arg5[%c4_48, %c768_49] : memref<16x1536xbf16, #tpu.memory_space<vmem>>, vector<4x256xbf16>
    tpu.vector_store %arg5[%c4_48, %c768_49], %28 {strides = array<i32>} : memref<16x1536xbf16, #tpu.memory_space<vmem>>, vector<4x256xbf16>,
    %c0_50 = arith.constant 0 : index
    %c4_51 = arith.constant 4 : index
    %c0_52 = arith.constant 0 : index
    %c0_53 = arith.constant 0 : index
    %30 = vector.load %arg1[%c0_50, %c4_51, %c0_52, %c0_53] : memref<1x10x5x256xbf16, #tpu.memory_space<vmem>>, vector<1x1x4x256xbf16>
    %31 = vector.shape_cast %30 : vector<1x1x4x256xbf16> to vector<4x256xbf16>
    %c4_54 = arith.constant 4 : index
    %c1024_55 = arith.constant 1024 : index
    %32 = vector.load %arg5[%c4_54, %c1024_55] : memref<16x1536xbf16, #tpu.memory_space<vmem>>, vector<4x256xbf16>
    tpu.vector_store %arg5[%c4_54, %c1024_55], %31 {strides = array<i32>} : memref<16x1536xbf16, #tpu.memory_space<vmem>>, vector<4x256xbf16>,
    %c0_56 = arith.constant 0 : index
    %c4_57 = arith.constant 4 : index
    %c1_58 = arith.constant 1 : index
    %c0_59 = arith.constant 0 : index
    %33 = vector.load %arg1[%c0_56, %c4_57, %c1_58, %c0_59] : memref<1x10x5x256xbf16, #tpu.memory_space<vmem>>, vector<1x1x4x256xbf16>
    %34 = vector.shape_cast %33 : vector<1x1x4x256xbf16> to vector<4x256xbf16>
    %c4_60 = arith.constant 4 : index
    %c1280_61 = arith.constant 1280 : index
    %35 = vector.load %arg5[%c4_60, %c1280_61] : memref<16x1536xbf16, #tpu.memory_space<vmem>>, vector<4x256xbf16>
    tpu.vector_store %arg5[%c4_60, %c1280_61], %34 {strides = array<i32>} : memref<16x1536xbf16, #tpu.memory_space<vmem>>, vector<4x256xbf16>,
    %c0_62 = arith.constant 0 : index
    %c4_63 = arith.constant 4 : index
    %c0_64 = arith.constant 0 : index
    %c0_65 = arith.constant 0 : index
    %36 = vector.load %arg1[%c0_62, %c4_63, %c0_64, %c0_65] : memref<1x10x5x256xbf16, #tpu.memory_space<vmem>>, vector<1x1x4x256xbf16>
    %37 = vector.shape_cast %36 : vector<1x1x4x256xbf16> to vector<4x256xbf16>
    %c8 = arith.constant 8 : index
    %c0_66 = arith.constant 0 : index
    %38 = vector.load %arg5[%c8, %c0_66] : memref<16x1536xbf16, #tpu.memory_space<vmem>>, vector<4x256xbf16>
    tpu.vector_store %arg5[%c8, %c0_66], %37 {strides = array<i32>} : memref<16x1536xbf16, #tpu.memory_space<vmem>>, vector<4x256xbf16>,
    %c0_67 = arith.constant 0 : index
    %c4_68 = arith.constant 4 : index
    %c1_69 = arith.constant 1 : index
    %c0_70 = arith.constant 0 : index
    %39 = vector.load %arg1[%c0_67, %c4_68, %c1_69, %c0_70] : memref<1x10x5x256xbf16, #tpu.memory_space<vmem>>, vector<1x1x4x256xbf16>
    %40 = vector.shape_cast %39 : vector<1x1x4x256xbf16> to vector<4x256xbf16>
    %c8_71 = arith.constant 8 : index
    %c256_72 = arith.constant 256 : index
    %41 = vector.load %arg5[%c8_71, %c256_72] : memref<16x1536xbf16, #tpu.memory_space<vmem>>, vector<4x256xbf16>
    tpu.vector_store %arg5[%c8_71, %c256_72], %40 {strides = array<i32>} : memref<16x1536xbf16, #tpu.memory_space<vmem>>, vector<4x256xbf16>,
    %c0_73 = arith.constant 0 : index
    %c5 = arith.constant 5 : index
    %c0_74 = arith.constant 0 : index
    %c0_75 = arith.constant 0 : index
    %42 = vector.load %arg1[%c0_73, %c5, %c0_74, %c0_75] : memref<1x10x5x256xbf16, #tpu.memory_space<vmem>>, vector<1x1x4x256xbf16>
    %43 = vector.shape_cast %42 : vector<1x1x4x256xbf16> to vector<4x256xbf16>
    %c8_76 = arith.constant 8 : index
    %c512_77 = arith.constant 512 : index
    %44 = vector.load %arg5[%c8_76, %c512_77] : memref<16x1536xbf16, #tpu.memory_space<vmem>>, vector<4x256xbf16>
    tpu.vector_store %arg5[%c8_76, %c512_77], %43 {strides = array<i32>} : memref<16x1536xbf16, #tpu.memory_space<vmem>>, vector<4x256xbf16>,
    %c0_78 = arith.constant 0 : index
    %c5_79 = arith.constant 5 : index
    %c1_80 = arith.constant 1 : index
    %c0_81 = arith.constant 0 : index
    %45 = vector.load %arg1[%c0_78, %c5_79, %c1_80, %c0_81] : memref<1x10x5x256xbf16, #tpu.memory_space<vmem>>, vector<1x1x4x256xbf16>
    %46 = vector.shape_cast %45 : vector<1x1x4x256xbf16> to vector<4x256xbf16>
    %c8_82 = arith.constant 8 : index
    %c768_83 = arith.constant 768 : index
    %47 = vector.load %arg5[%c8_82, %c768_83] : memref<16x1536xbf16, #tpu.memory_space<vmem>>, vector<4x256xbf16>
    tpu.vector_store %arg5[%c8_82, %c768_83], %46 {strides = array<i32>} : memref<16x1536xbf16, #tpu.memory_space<vmem>>, vector<4x256xbf16>,
    %c0_84 = arith.constant 0 : index
    %c6 = arith.constant 6 : index
    %c0_85 = arith.constant 0 : index
    %c0_86 = arith.constant 0 : index
    %48 = vector.load %arg1[%c0_84, %c6, %c0_85, %c0_86] : memref<1x10x5x256xbf16, #tpu.memory_space<vmem>>, vector<1x1x4x256xbf16>
    %49 = vector.shape_cast %48 : vector<1x1x4x256xbf16> to vector<4x256xbf16>
    %c8_87 = arith.constant 8 : index
    %c1024_88 = arith.constant 1024 : index
    %50 = vector.load %arg5[%c8_87, %c1024_88] : memref<16x1536xbf16, #tpu.memory_space<vmem>>, vector<4x256xbf16>
    tpu.vector_store %arg5[%c8_87, %c1024_88], %49 {strides = array<i32>} : memref<16x1536xbf16, #tpu.memory_space<vmem>>, vector<4x256xbf16>,
    %c0_89 = arith.constant 0 : index
    %c6_90 = arith.constant 6 : index
    %c1_91 = arith.constant 1 : index
    %c0_92 = arith.constant 0 : index
    %51 = vector.load %arg1[%c0_89, %c6_90, %c1_91, %c0_92] : memref<1x10x5x256xbf16, #tpu.memory_space<vmem>>, vector<1x1x4x256xbf16>
    %52 = vector.shape_cast %51 : vector<1x1x4x256xbf16> to vector<4x256xbf16>
    %c8_93 = arith.constant 8 : index
    %c1280_94 = arith.constant 1280 : index
    %53 = vector.load %arg5[%c8_93, %c1280_94] : memref<16x1536xbf16, #tpu.memory_space<vmem>>, vector<4x256xbf16>
    tpu.vector_store %arg5[%c8_93, %c1280_94], %52 {strides = array<i32>} : memref<16x1536xbf16, #tpu.memory_space<vmem>>, vector<4x256xbf16>,
    %c0_95 = arith.constant 0 : index
    %c6_96 = arith.constant 6 : index
    %c0_97 = arith.constant 0 : index
    %c0_98 = arith.constant 0 : index
    %54 = vector.load %arg1[%c0_95, %c6_96, %c0_97, %c0_98] : memref<1x10x5x256xbf16, #tpu.memory_space<vmem>>, vector<1x1x4x256xbf16>
    %55 = vector.shape_cast %54 : vector<1x1x4x256xbf16> to vector<4x256xbf16>
    %c12 = arith.constant 12 : index
    %c0_99 = arith.constant 0 : index
    %56 = vector.load %arg5[%c12, %c0_99] : memref<16x1536xbf16, #tpu.memory_space<vmem>>, vector<4x256xbf16>
    tpu.vector_store %arg5[%c12, %c0_99], %55 {strides = array<i32>} : memref<16x1536xbf16, #tpu.memory_space<vmem>>, vector<4x256xbf16>,
    %c0_100 = arith.constant 0 : index
    %c6_101 = arith.constant 6 : index
    %c1_102 = arith.constant 1 : index
    %c0_103 = arith.constant 0 : index
    %57 = vector.load %arg1[%c0_100, %c6_101, %c1_102, %c0_103] : memref<1x10x5x256xbf16, #tpu.memory_space<vmem>>, vector<1x1x4x256xbf16>
    %58 = vector.shape_cast %57 : vector<1x1x4x256xbf16> to vector<4x256xbf16>
    %c12_104 = arith.constant 12 : index
    %c256_105 = arith.constant 256 : index
    %59 = vector.load %arg5[%c12_104, %c256_105] : memref<16x1536xbf16, #tpu.memory_space<vmem>>, vector<4x256xbf16>
    tpu.vector_store %arg5[%c12_104, %c256_105], %58 {strides = array<i32>} : memref<16x1536xbf16, #tpu.memory_space<vmem>>, vector<4x256xbf16>,
    %c0_106 = arith.constant 0 : index
    %c7 = arith.constant 7 : index
    %c0_107 = arith.constant 0 : index
    %c0_108 = arith.constant 0 : index
    %60 = vector.load %arg1[%c0_106, %c7, %c0_107, %c0_108] : memref<1x10x5x256xbf16, #tpu.memory_space<vmem>>, vector<1x1x4x256xbf16>
    %61 = vector.shape_cast %60 : vector<1x1x4x256xbf16> to vector<4x256xbf16>
    %c12_109 = arith.constant 12 : index
    %c512_110 = arith.constant 512 : index
    %62 = vector.load %arg5[%c12_109, %c512_110] : memref<16x1536xbf16, #tpu.memory_space<vmem>>, vector<4x256xbf16>
    tpu.vector_store %arg5[%c12_109, %c512_110], %61 {strides = array<i32>} : memref<16x1536xbf16, #tpu.memory_space<vmem>>, vector<4x256xbf16>,
    %c0_111 = arith.constant 0 : index
    %c7_112 = arith.constant 7 : index
    %c1_113 = arith.constant 1 : index
    %c0_114 = arith.constant 0 : index
    %63 = vector.load %arg1[%c0_111, %c7_112, %c1_113, %c0_114] : memref<1x10x5x256xbf16, #tpu.memory_space<vmem>>, vector<1x1x4x256xbf16>
    %64 = vector.shape_cast %63 : vector<1x1x4x256xbf16> to vector<4x256xbf16>
    %c12_115 = arith.constant 12 : index
    %c768_116 = arith.constant 768 : index
    %65 = vector.load %arg5[%c12_115, %c768_116] : memref<16x1536xbf16, #tpu.memory_space<vmem>>, vector<4x256xbf16>
    tpu.vector_store %arg5[%c12_115, %c768_116], %64 {strides = array<i32>} : memref<16x1536xbf16, #tpu.memory_space<vmem>>, vector<4x256xbf16>,
    %c0_117 = arith.constant 0 : index
    %c8_118 = arith.constant 8 : index
    %c0_119 = arith.constant 0 : index
    %c0_120 = arith.constant 0 : index
    %66 = vector.load %arg1[%c0_117, %c8_118, %c0_119, %c0_120] : memref<1x10x5x256xbf16, #tpu.memory_space<vmem>>, vector<1x1x4x256xbf16>
    %67 = vector.shape_cast %66 : vector<1x1x4x256xbf16> to vector<4x256xbf16>
    %c12_121 = arith.constant 12 : index
    %c1024_122 = arith.constant 1024 : index
    %68 = vector.load %arg5[%c12_121, %c1024_122] : memref<16x1536xbf16, #tpu.memory_space<vmem>>, vector<4x256xbf16>
    tpu.vector_store %arg5[%c12_121, %c1024_122], %67 {strides = array<i32>} : memref<16x1536xbf16, #tpu.memory_space<vmem>>, vector<4x256xbf16>,
    %c0_123 = arith.constant 0 : index
    %c8_124 = arith.constant 8 : index
    %c1_125 = arith.constant 1 : index
    %c0_126 = arith.constant 0 : index
    %69 = vector.load %arg1[%c0_123, %c8_124, %c1_125, %c0_126] : memref<1x10x5x256xbf16, #tpu.memory_space<vmem>>, vector<1x1x4x256xbf16>
    %70 = vector.shape_cast %69 : vector<1x1x4x256xbf16> to vector<4x256xbf16>
    %c12_127 = arith.constant 12 : index
    %c1280_128 = arith.constant 1280 : index
    %71 = vector.load %arg5[%c12_127, %c1280_128] : memref<16x1536xbf16, #tpu.memory_space<vmem>>, vector<4x256xbf16>
    tpu.vector_store %arg5[%c12_127, %c1280_128], %70 {strides = array<i32>} : memref<16x1536xbf16, #tpu.memory_space<vmem>>, vector<4x256xbf16>,
    %c0_129 = arith.constant 0 : index
    %c0_130 = arith.constant 0 : index
    %72 = vector.load %arg5[%c0_129, %c0_130] : memref<16x1536xbf16, #tpu.memory_space<vmem>>, vector<16x1536xbf16>
    %c0_131 = arith.constant 0 : index
    %c0_132 = arith.constant 0 : index
    %73 = vector.load %arg2[%c0_131, %c0_132] : memref<1536x256xbf16, #tpu.memory_space<vmem>>, vector<1536x256xbf16>
    %cst = arith.constant dense<0.000000e+00> : vector<16x256xf32>
    %74 = tpu.matmul %72, %73, %cst {dimension_numbers = #tpu.dot_dimension_numbers<[1], [0], [0], [1], [0, 0, 1, 1], [], []>} : vector<16x1536xbf16>, vector<1536x256xbf16>, vector<16x256xf32> -> vector<16x256xf32>
    %c0_133 = arith.constant 0 : index
    %c0_134 = arith.constant 0 : index
    %75 = vector.load %arg3[%c0_133, %c0_134] : memref<3x256xf32, #tpu.memory_space<vmem>>, vector<3x256xf32>
    %76 = vector.extract_strided_slice %75 {offsets = [0, 0], sizes = [1, 256], strides = [1, 1]} : vector<3x256xf32> to vector<1x256xf32>
    %77 = vector.broadcast %76 : vector<1x256xf32> to vector<16x256xf32>
    %78 = arith.addf %74, %77 : vector<16x256xf32>
    %cst_135 = arith.constant 0.00999999977 : f32
    %79 = vector.broadcast %cst_135 : f32 to vector<16x256xf32>
    %80 = arith.mulf %79, %78 : vector<16x256xf32>
    %81 = arith.maximumf %78, %80 : vector<16x256xf32>
    %82 = vector.extract_strided_slice %75 {offsets = [1, 0], sizes = [1, 256], strides = [1, 1]} : vector<3x256xf32> to vector<1x256xf32>
    %83 = vector.broadcast %82 : vector<1x256xf32> to vector<16x256xf32>
    %84 = arith.mulf %81, %83 : vector<16x256xf32>
    %85 = vector.extract_strided_slice %75 {offsets = [2, 0], sizes = [1, 256], strides = [1, 1]} : vector<3x256xf32> to vector<1x256xf32>
    %86 = vector.broadcast %85 : vector<1x256xf32> to vector<16x256xf32>
    %87 = arith.addf %84, %86 : vector<16x256xf32>
    %88 = arith.truncf %87 : vector<16x256xf32> to vector<16x256xbf16>
    %c0_136 = arith.constant 0 : index
    %c0_137 = arith.constant 0 : index
    %c0_138 = arith.constant 0 : index
    %89 = vector.load %arg4[%c0_136, %c0_137, %c0_138] : memref<1x16x256xbf16, #tpu.memory_space<vmem>>, vector<1x16x256xbf16>
    %90 = vector.shape_cast %89 : vector<1x16x256xbf16> to vector<16x256xbf16>
    %91 = vector.shape_cast %88 : vector<16x256xbf16> to vector<1x16x256xbf16>
    tpu.vector_store %arg4[%c0_136, %c0_137, %c0_138], %91 {strides = array<i32>} : memref<1x16x256xbf16, #tpu.memory_space<vmem>>, vector<1x16x256xbf16>,
    return
  }
  func.func @transform_0(%arg0: i32) -> (i32, i32, i32, i32) {
    %c0_i32 = arith.constant 0 : i32
    %c0_i32_0 = arith.constant 0 : i32
    %c0_i32_1 = arith.constant 0 : i32
    %c0_i32_2 = arith.constant 0 : i32
    return %arg0, %c0_i32, %c0_i32_0, %c0_i32_1 : i32, i32, i32, i32
  }
  func.func @transform_1(%arg0: i32) -> (i32, i32) {
    %c0_i32 = arith.constant 0 : i32
    %c0_i32_0 = arith.constant 0 : i32
    %c0_i32_1 = arith.constant 0 : i32
    return %c0_i32, %c0_i32_0 : i32, i32
  }
  func.func @transform_2(%arg0: i32) -> (i32, i32) {
    %c0_i32 = arith.constant 0 : i32
    %c0_i32_0 = arith.constant 0 : i32
    %c0_i32_1 = arith.constant 0 : i32
    return %c0_i32, %c0_i32_0 : i32, i32
  }
  func.func @transform_3(%arg0: i32) -> (i32, i32, i32) {
    %c0_i32 = arith.constant 0 : i32
    %c0_i32_0 = arith.constant 0 : i32
    %c0_i32_1 = arith.constant 0 : i32
    return %arg0, %c0_i32, %c0_i32_0 : i32, i32, i32
  }
}

module attributes {stable_mosaic.version = 11 : i64} {
  func.func @_fused_matmul_kernel(%arg0: i32, %arg1: memref<16x256xbf16, #tpu.memory_space<vmem>>, %arg2: memref<256x256xbf16, #tpu.memory_space<vmem>>, %arg3: memref<3x256xf32, #tpu.memory_space<vmem>>, %arg4: memref<16x256xbf16, #tpu.memory_space<vmem>>) attributes {dimension_semantics = [#tpu.dimension_semantics<parallel>], iteration_bounds = array<i64: 2>, scalar_prefetch = 0 : i64, scratch_operands = 0 : i64, tpu.core_type = #tpu.core_type<tc>, window_params = [{transform_indices = @transform_0, window_bounds = array<i64: 16, 256>}, {pipeline_mode = #tpu.pipeline_mode<synchronous>, transform_indices = @transform_1, window_bounds = array<i64: 256, 256>}, {pipeline_mode = #tpu.pipeline_mode<synchronous>, transform_indices = @transform_2, window_bounds = array<i64: 3, 256>}, {transform_indices = @transform_3, window_bounds = array<i64: 16, 256>}]} {
    %c0 = arith.constant 0 : index
    %c0_0 = arith.constant 0 : index
    %0 = vector.load %arg1[%c0, %c0_0] : memref<16x256xbf16, #tpu.memory_space<vmem>>, vector<16x256xbf16>
    %c0_1 = arith.constant 0 : index
    %c0_2 = arith.constant 0 : index
    %1 = vector.load %arg2[%c0_1, %c0_2] : memref<256x256xbf16, #tpu.memory_space<vmem>>, vector<256x256xbf16>
    %cst = arith.constant dense<0.000000e+00> : vector<16x256xf32>
    %2 = tpu.matmul %0, %1, %cst {dimension_numbers = #tpu.dot_dimension_numbers<[1], [0], [0], [1], [0, 0, 1, 1], [], []>} : vector<16x256xbf16>, vector<256x256xbf16>, vector<16x256xf32> -> vector<16x256xf32>
    %c0_3 = arith.constant 0 : index
    %c0_4 = arith.constant 0 : index
    %3 = vector.load %arg3[%c0_3, %c0_4] : memref<3x256xf32, #tpu.memory_space<vmem>>, vector<3x256xf32>
    %4 = vector.extract_strided_slice %3 {offsets = [0, 0], sizes = [1, 256], strides = [1, 1]} : vector<3x256xf32> to vector<1x256xf32>
    %5 = vector.broadcast %4 : vector<1x256xf32> to vector<16x256xf32>
    %6 = arith.addf %2, %5 : vector<16x256xf32>
    %cst_5 = arith.constant 0.00999999977 : f32
    %7 = vector.broadcast %cst_5 : f32 to vector<16x256xf32>
    %8 = arith.mulf %7, %6 : vector<16x256xf32>
    %9 = arith.maximumf %6, %8 : vector<16x256xf32>
    %10 = arith.truncf %9 : vector<16x256xf32> to vector<16x256xbf16>
    %c0_6 = arith.constant 0 : index
    %c0_7 = arith.constant 0 : index
    %11 = vector.load %arg4[%c0_6, %c0_7] : memref<16x256xbf16, #tpu.memory_space<vmem>>, vector<16x256xbf16>
    tpu.vector_store %arg4[%c0_6, %c0_7], %10 {strides = array<i32>} : memref<16x256xbf16, #tpu.memory_space<vmem>>, vector<16x256xbf16>,
    return
  }
  func.func @transform_0(%arg0: i32) -> (i32, i32) {
    %c0_i32 = arith.constant 0 : i32
    %c0_i32_0 = arith.constant 0 : i32
    return %arg0, %c0_i32 : i32, i32
  }
  func.func @transform_1(%arg0: i32) -> (i32, i32) {
    %c0_i32 = arith.constant 0 : i32
    %c0_i32_0 = arith.constant 0 : i32
    %c0_i32_1 = arith.constant 0 : i32
    return %c0_i32, %c0_i32_0 : i32, i32
  }
  func.func @transform_2(%arg0: i32) -> (i32, i32) {
    %c0_i32 = arith.constant 0 : i32
    %c0_i32_0 = arith.constant 0 : i32
    %c0_i32_1 = arith.constant 0 : i32
    return %c0_i32, %c0_i32_0 : i32, i32
  }
  func.func @transform_3(%arg0: i32) -> (i32, i32) {
    %c0_i32 = arith.constant 0 : i32
    %c0_i32_0 = arith.constant 0 : i32
    return %arg0, %c0_i32 : i32, i32
  }
}

module attributes {stable_mosaic.version = 11 : i64} {
  func.func @_tail_kernel(%arg0: i32, %arg1: memref<2x4096xbf16, #tpu.memory_space<vmem>>, %arg2: memref<2x4xbf16, #tpu.memory_space<vmem>>, %arg3: memref<4096x32xbf16, #tpu.memory_space<vmem>>, %arg4: memref<1x32xf32, #tpu.memory_space<vmem>>, %arg5: memref<32x32xbf16, #tpu.memory_space<vmem>>, %arg6: memref<4x32xbf16, #tpu.memory_space<vmem>>, %arg7: memref<1x32xf32, #tpu.memory_space<vmem>>, %arg8: memref<32x32xbf16, #tpu.memory_space<vmem>>, %arg9: memref<2x32xf32, #tpu.memory_space<vmem>>, %arg10: memref<2x32xf32, #tpu.memory_space<vmem>>) attributes {dimension_semantics = [#tpu.dimension_semantics<parallel>], iteration_bounds = array<i64: 1>, scalar_prefetch = 0 : i64, scratch_operands = 0 : i64, tpu.core_type = #tpu.core_type<tc>, window_params = [{transform_indices = @transform_0, window_bounds = array<i64: 2, 4096>}, {transform_indices = @transform_1, window_bounds = array<i64: 2, 4>}, {pipeline_mode = #tpu.pipeline_mode<synchronous>, transform_indices = @transform_2, window_bounds = array<i64: 4096, 32>}, {pipeline_mode = #tpu.pipeline_mode<synchronous>, transform_indices = @transform_3, window_bounds = array<i64: 1, 32>}, {pipeline_mode = #tpu.pipeline_mode<synchronous>, transform_indices = @transform_4, window_bounds = array<i64: 32, 32>}, {pipeline_mode = #tpu.pipeline_mode<synchronous>, transform_indices = @transform_5, window_bounds = array<i64: 4, 32>}, {pipeline_mode = #tpu.pipeline_mode<synchronous>, transform_indices = @transform_6, window_bounds = array<i64: 1, 32>}, {pipeline_mode = #tpu.pipeline_mode<synchronous>, transform_indices = @transform_7, window_bounds = array<i64: 32, 32>}, {pipeline_mode = #tpu.pipeline_mode<synchronous>, transform_indices = @transform_8, window_bounds = array<i64: 2, 32>}, {transform_indices = @transform_9, window_bounds = array<i64: 2, 32>}]} {
    %c0 = arith.constant 0 : index
    %c0_0 = arith.constant 0 : index
    %0 = vector.load %arg1[%c0, %c0_0] : memref<2x4096xbf16, #tpu.memory_space<vmem>>, vector<2x4096xbf16>
    %c0_1 = arith.constant 0 : index
    %c0_2 = arith.constant 0 : index
    %1 = vector.load %arg3[%c0_1, %c0_2] : memref<4096x32xbf16, #tpu.memory_space<vmem>>, vector<4096x32xbf16>
    %cst = arith.constant dense<0.000000e+00> : vector<2x32xf32>
    %2 = tpu.matmul %0, %1, %cst {dimension_numbers = #tpu.dot_dimension_numbers<[1], [0], [0], [1], [0, 0, 1, 1], [], []>} : vector<2x4096xbf16>, vector<4096x32xbf16>, vector<2x32xf32> -> vector<2x32xf32>
    %c0_3 = arith.constant 0 : index
    %c0_4 = arith.constant 0 : index
    %3 = vector.load %arg4[%c0_3, %c0_4] : memref<1x32xf32, #tpu.memory_space<vmem>>, vector<1x32xf32>
    %4 = vector.broadcast %3 : vector<1x32xf32> to vector<2x32xf32>
    %5 = arith.addf %2, %4 : vector<2x32xf32>
    %cst_5 = arith.constant 0.00999999977 : f32
    %6 = vector.broadcast %cst_5 : f32 to vector<2x32xf32>
    %7 = arith.mulf %6, %5 : vector<2x32xf32>
    %8 = arith.maximumf %5, %7 : vector<2x32xf32>
    %9 = arith.truncf %8 : vector<2x32xf32> to vector<2x32xbf16>
    %c0_6 = arith.constant 0 : index
    %c0_7 = arith.constant 0 : index
    %10 = vector.load %arg5[%c0_6, %c0_7] : memref<32x32xbf16, #tpu.memory_space<vmem>>, vector<32x32xbf16>
    %cst_8 = arith.constant dense<0.000000e+00> : vector<2x32xf32>
    %11 = tpu.matmul %9, %10, %cst_8 {dimension_numbers = #tpu.dot_dimension_numbers<[1], [0], [0], [1], [0, 0, 1, 1], [], []>} : vector<2x32xbf16>, vector<32x32xbf16>, vector<2x32xf32> -> vector<2x32xf32>
    %c0_9 = arith.constant 0 : index
    %c0_10 = arith.constant 0 : index
    %12 = vector.load %arg2[%c0_9, %c0_10] : memref<2x4xbf16, #tpu.memory_space<vmem>>, vector<2x4xbf16>
    %c0_11 = arith.constant 0 : index
    %c0_12 = arith.constant 0 : index
    %13 = vector.load %arg6[%c0_11, %c0_12] : memref<4x32xbf16, #tpu.memory_space<vmem>>, vector<4x32xbf16>
    %cst_13 = arith.constant dense<0.000000e+00> : vector<2x32xf32>
    %14 = tpu.matmul %12, %13, %cst_13 {dimension_numbers = #tpu.dot_dimension_numbers<[1], [0], [0], [1], [0, 0, 1, 1], [], []>} : vector<2x4xbf16>, vector<4x32xbf16>, vector<2x32xf32> -> vector<2x32xf32>
    %15 = arith.addf %11, %14 : vector<2x32xf32>
    %c0_14 = arith.constant 0 : index
    %c0_15 = arith.constant 0 : index
    %16 = vector.load %arg7[%c0_14, %c0_15] : memref<1x32xf32, #tpu.memory_space<vmem>>, vector<1x32xf32>
    %17 = vector.broadcast %16 : vector<1x32xf32> to vector<2x32xf32>
    %18 = arith.addf %15, %17 : vector<2x32xf32>
    %cst_16 = arith.constant 0.00999999977 : f32
    %19 = vector.broadcast %cst_16 : f32 to vector<2x32xf32>
    %20 = arith.mulf %19, %18 : vector<2x32xf32>
    %21 = arith.maximumf %18, %20 : vector<2x32xf32>
    %22 = arith.truncf %21 : vector<2x32xf32> to vector<2x32xbf16>
    %c0_17 = arith.constant 0 : index
    %c0_18 = arith.constant 0 : index
    %23 = vector.load %arg8[%c0_17, %c0_18] : memref<32x32xbf16, #tpu.memory_space<vmem>>, vector<32x32xbf16>
    %cst_19 = arith.constant dense<0.000000e+00> : vector<2x32xf32>
    %24 = tpu.matmul %22, %23, %cst_19 {dimension_numbers = #tpu.dot_dimension_numbers<[1], [0], [0], [1], [0, 0, 1, 1], [], []>} : vector<2x32xbf16>, vector<32x32xbf16>, vector<2x32xf32> -> vector<2x32xf32>
    %c0_20 = arith.constant 0 : index
    %c0_21 = arith.constant 0 : index
    %25 = vector.load %arg9[%c0_20, %c0_21] : memref<2x32xf32, #tpu.memory_space<vmem>>, vector<2x32xf32>
    %26 = vector.extract_strided_slice %25 {offsets = [0, 0], sizes = [1, 32], strides = [1, 1]} : vector<2x32xf32> to vector<1x32xf32>
    %27 = vector.broadcast %26 : vector<1x32xf32> to vector<2x32xf32>
    %28 = arith.addf %24, %27 : vector<2x32xf32>
    %29 = vector.extract_strided_slice %25 {offsets = [1, 0], sizes = [1, 32], strides = [1, 1]} : vector<2x32xf32> to vector<1x32xf32>
    %30 = vector.broadcast %29 : vector<1x32xf32> to vector<2x32xf32>
    %31 = arith.maximumf %28, %30 : vector<2x32xf32>
    %c0_22 = arith.constant 0 : index
    %c0_23 = arith.constant 0 : index
    %32 = vector.load %arg10[%c0_22, %c0_23] : memref<2x32xf32, #tpu.memory_space<vmem>>, vector<2x32xf32>
    tpu.vector_store %arg10[%c0_22, %c0_23], %31 {strides = array<i32>} : memref<2x32xf32, #tpu.memory_space<vmem>>, vector<2x32xf32>,
    return
  }
  func.func @transform_0(%arg0: i32) -> (i32, i32) {
    %c0_i32 = arith.constant 0 : i32
    %c0_i32_0 = arith.constant 0 : i32
    return %arg0, %c0_i32 : i32, i32
  }
  func.func @transform_1(%arg0: i32) -> (i32, i32) {
    %c0_i32 = arith.constant 0 : i32
    %c0_i32_0 = arith.constant 0 : i32
    return %arg0, %c0_i32 : i32, i32
  }
  func.func @transform_2(%arg0: i32) -> (i32, i32) {
    %c0_i32 = arith.constant 0 : i32
    %c0_i32_0 = arith.constant 0 : i32
    %c0_i32_1 = arith.constant 0 : i32
    return %c0_i32, %c0_i32_0 : i32, i32
  }
  func.func @transform_3(%arg0: i32) -> (i32, i32) {
    %c0_i32 = arith.constant 0 : i32
    %c0_i32_0 = arith.constant 0 : i32
    %c0_i32_1 = arith.constant 0 : i32
    return %c0_i32, %c0_i32_0 : i32, i32
  }
  func.func @transform_4(%arg0: i32) -> (i32, i32) {
    %c0_i32 = arith.constant 0 : i32
    %c0_i32_0 = arith.constant 0 : i32
    %c0_i32_1 = arith.constant 0 : i32
    return %c0_i32, %c0_i32_0 : i32, i32
  }
  func.func @transform_5(%arg0: i32) -> (i32, i32) {
    %c0_i32 = arith.constant 0 : i32
    %c0_i32_0 = arith.constant 0 : i32
    %c0_i32_1 = arith.constant 0 : i32
    return %c0_i32, %c0_i32_0 : i32, i32
  }
  func.func @transform_6(%arg0: i32) -> (i32, i32) {
    %c0_i32 = arith.constant 0 : i32
    %c0_i32_0 = arith.constant 0 : i32
    %c0_i32_1 = arith.constant 0 : i32
    return %c0_i32, %c0_i32_0 : i32, i32
  }
  func.func @transform_7(%arg0: i32) -> (i32, i32) {
    %c0_i32 = arith.constant 0 : i32
    %c0_i32_0 = arith.constant 0 : i32
    %c0_i32_1 = arith.constant 0 : i32
    return %c0_i32, %c0_i32_0 : i32, i32
  }
  func.func @transform_8(%arg0: i32) -> (i32, i32) {
    %c0_i32 = arith.constant 0 : i32
    %c0_i32_0 = arith.constant 0 : i32
    %c0_i32_1 = arith.constant 0 : i32
    return %c0_i32, %c0_i32_0 : i32, i32
  }
  func.func @transform_9(%arg0: i32) -> (i32, i32) {
    %c0_i32 = arith.constant 0 : i32
    %c0_i32_0 = arith.constant 0 : i32
    return %arg0, %c0_i32 : i32, i32
  }
}

</mosaic_0001>

<bundles_post_ra>
// kernel: encoder_forward.6
= control target key start
LH: loop header
LB: loop body
LE: loop exit
PB: predicated region body
PF: predicated region fallthrough
CT: control target
= control target key end

     0   :  { %s3300_s12 = smov 0   ;;  %s4423_s0 = inlined_call_operand.vmem [shape: bf16[2048,32], index: 0, kind: input, shape index: {}]   ;;  %s4424_s1 = inlined_call_operand.vmem [shape: bf16[32,32], index: 1, kind: input, shape index: {}]   ;;  %s4425_s2 = inlined_call_operand.vmem [shape: f32[3,32], index: 2, kind: input, shape index: {}]   ;;  %s4426_s3 = inlined_call_operand.vmem [shape: bf16[2048,32], index: 3, kind: output, shape index: {}]  }
   0x1 LB: > { %s2599_s13 = sadd.s32 4294967295, %s3278_s12   ;;  %p2603_p0 = scmp.ge.s32.totalorder %s3278_s12, 1  ;;  %s3278_s12 = sphi %s3300_s12, %s13_s12  }
   0x2   : > { %p138_p1 = scmp.lt.s32.totalorder %s3278_s12, 3 }
   0x4   : > { %p139_p2 = pnand %p2603_p0, %p138_p1 }
   0x6   : > { %142 = sbr.rel (%p139_p2) target bundleno = 435 (0x1b3), region = 32 }
   0xd   : > { %v3206_v0 = vld [vmem:[%s4424_s1] sm:$0xff]   ;;  %s2604_s16 = sshll.u32 %s2599_s13, 7  ;;  %v3207_v1 = vld [vmem:[%s4424_s1 + $0x8] sm:$0xff]   ;;  %vm644_vm0 = vcmask 261120   ;;  %vm2414_vm1 = vcmask 257024  }
   0xe   : > { %p163_p3 = scmp.lt.s32.totalorder %s2604_s16, 255  ;;  %3062 = vmatprep.subr.bf16.mxu0 %v3206_v0  ;;  %3194 = vmatprep.subr.bf16.mxu1 %v3206_v0 }
   0xf   : > { %3063 = vmatpush3.bf16.msra.mxu0 %v3206_v0  ;;  %3196 = vmatpush3.bf16.msra.mxu1 %v3206_v0 }
  0x10   : > { %s4438_s16 = smov (!%p163_p3, %s2604_s16), 255  ;;  %3064 = vmatprep.subr.bf16.mxu0 %v3207_v1  ;;  %3195 = vmatprep.subr.bf16.mxu1 %v3207_v1 }
  0x11   : > { %s2605_s19 = sshll.u32 %s4438_s16, 2 }
  0x12   : > { %s3322_s22 = scalar_lea.vmem %s4423_s0, %s2605_s19  ;;  %s3480_s27 = scalar_lea.vmem %s4426_s3, %s2605_s19 }
  0x13   : > { %3065 = vmatpush3.bf16.msra.mxu0 %v3207_v1  ;;  %3197 = vmatpush3.bf16.msra.mxu1 %v3207_v1  ;;  %v3208_v2 = vld [vmem:[%s3322_s22] sm:$0xff]   ;;  %v3210_v4 = vld [vmem:[%s3322_s22 + $0x8] sm:$0xff]   ;;  %v3212_v6 = vld [vmem:[%s3322_s22 + $0x10] sm:$0xff]  }
  0x14   : > { %v3209_v3 = vld [vmem:[%s3322_s22 + $0x100] sm:$0xff]   ;;  %3066 = vmatprep.mubr.msk.bf16.mxu0 %vm644_vm0, %v3208_v2  ;;  %v3211_v5 = vld [vmem:[%s3322_s22 + $0x108] sm:$0xff]   ;;  %v3213_v7 = vld [vmem:[%s3322_s22 + $0x110] sm:$0xff]   ;;  %v308_v2 = vlaneseq }
  0x15   : > { %3130 = vmatprep.mubr.msk.bf16.mxu1 %vm644_vm0, %v3209_v3  ;;  %v3214_v8 = vld [vmem:[%s3322_s22 + $0x18] sm:$0xff]   ;;  %v3216_v10 = vld [vmem:[%s3322_s22 + $0x20] sm:$0xff]   ;;  %v3218_v12 = vld [vmem:[%s3322_s22 + $0x28] sm:$0xff]  }
  0x16   : > { %3067 = vmatmul.mubr.msk.bf16.vlgmr.msra.gmra.mrb[0].mxu0 %vm644_vm0, %v3210_v4  ;;  %3131 = vmatmul.mubr.msk.bf16.vlgmr.msra.gmra.mrb[0].mxu1 %vm644_vm0, %v3211_v5  ;;  %v3215_v9 = vld [vmem:[%s3322_s22 + $0x118] sm:$0xff]   ;;  %v3217_v11 = vld [vmem:[%s3322_s22 + $0x120] sm:$0xff]   ;;  %v3219_v13 = vld [vmem:[%s3322_s22 + $0x128] sm:$0xff]   ;;  %v309_v3 = vshrl.u32 %v308_v2, 7 }
  0x17   : > { %3070 = vmatprep.mubr.msk.bf16.mxu0 %vm644_vm0, %v3212_v6  ;;  %3134 = vmatprep.mubr.msk.bf16.mxu1 %vm644_vm0, %v3213_v7  ;;  %v3220_v14 = vld [vmem:[%s3322_s22 + $0x30] sm:$0xff]   ;;  %v3222_v16 = vld [vmem:[%s3322_s22 + $0x38] sm:$0xff]   ;;  %v3224_v18 = vld [vmem:[%s3322_s22 + $0x40] sm:$0xff]  }
  0x18   : > { %v3221_v15 = vld [vmem:[%s3322_s22 + $0x130] sm:$0xff]   ;;  %v3223_v17 = vld [vmem:[%s3322_s22 + $0x138] sm:$0xff]   ;;  %v3225_v19 = vld [vmem:[%s3322_s22 + $0x140] sm:$0xff]   ;;  %v310_v4 = vsub.s32 0, %v309_v3  ;;  %v1640_v7 = vsub.s32 1, %v309_v3 }
  0x19   : > { %v3226_v20 = vld [vmem:[%s3322_s22 + $0x48] sm:$0xff]   ;;  %v3228_v22 = vld [vmem:[%s3322_s22 + $0x50] sm:$0xff]   ;;  %v3230_v24 = vld [vmem:[%s3322_s22 + $0x58] sm:$0xff]  }
  0x1a   : > { %v3227_v21 = vld [vmem:[%s3322_s22 + $0x148] sm:$0xff]   ;;  %v3229_v23 = vld [vmem:[%s3322_s22 + $0x150] sm:$0xff]   ;;  %v3231_v25 = vld [vmem:[%s3322_s22 + $0x158] sm:$0xff]  }
  0x1b   : > { %v3232_v26 = vld [vmem:[%s3322_s22 + $0x60] sm:$0xff]   ;;  %v3234_v28 = vld [vmem:[%s3322_s22 + $0x68] sm:$0xff]   ;;  %v3236_v30 = vld [vmem:[%s3322_s22 + $0x70] sm:$0xff]  }
  0x1c   : > { %v3233_v27 = vld [vmem:[%s3322_s22 + $0x160] sm:$0xff]   ;;  %v3235_v29 = vld [vmem:[%s3322_s22 + $0x168] sm:$0xff]   ;;  %v3237_v31 = vld [vmem:[%s3322_s22 + $0x170] sm:$0xff]  }
  0x1d   : > { %v3238_v32 = vld [vmem:[%s3322_s22 + $0x78] sm:$0xff]   ;;  %v3240_v34 = vld [vmem:[%s3322_s22 + $0x80] sm:$0xff]   ;;  %v3242_v36 = vld [vmem:[%s3322_s22 + $0x88] sm:$0xff]  }
  0x1e   : > { %3071 = vmatmul.mubr.msk.bf16.gmra.mrb[4].mxu0 %vm644_vm0, %v3214_v8  ;;  %3135 = vmatmul.mubr.msk.bf16.gmra.mrb[4].mxu1 %vm644_vm0, %v3215_v9  ;;  %v3239_v33 = vld [vmem:[%s3322_s22 + $0x178] sm:$0xff]   ;;  %v3241_v35 = vld [vmem:[%s3322_s22 + $0x180] sm:$0xff]   ;;  %v3243_v37 = vld [vmem:[%s3322_s22 + $0x188] sm:$0xff]   ;;  %v1772_v8 = vsub.s32 2, %v309_v3 }
  0x1f   : > { %3074 = vmatprep.mubr.msk.bf16.mxu0 %vm644_vm0, %v3216_v10  ;;  %3138 = vmatprep.mubr.msk.bf16.mxu1 %vm644_vm0, %v3217_v11  ;;  %v3244_v38 = vld [vmem:[%s3322_s22 + $0x90] sm:$0xff]   ;;  %v3246_v40 = vld [vmem:[%s3322_s22 + $0x98] sm:$0xff]   ;;  %v3248_v42 = vld [vmem:[%s3322_s22 + $0xa0] sm:$0xff]  }
  0x20   : > { %v3245_v39 = vld [vmem:[%s3322_s22 + $0x190] sm:$0xff]   ;;  %v3247_v41 = vld [vmem:[%s3322_s22 + $0x198] sm:$0xff]   ;;  %v3249_v43 = vld [vmem:[%s3322_s22 + $0x1a0] sm:$0xff]  }
  0x21   : > { %v3250_v44 = vld [vmem:[%s3322_s22 + $0xa8] sm:$0xff]   ;;  %v3252_v46 = vld [vmem:[%s3322_s22 + $0xb0] sm:$0xff]   ;;  %v3254_v48 = vld [vmem:[%s3322_s22 + $0xb8] sm:$0xff]  }
  0x22   : > { %v3251_v45 = vld [vmem:[%s3322_s22 + $0x1a8] sm:$0xff]   ;;  %v3253_v47 = vld [vmem:[%s3322_s22 + $0x1b0] sm:$0xff]   ;;  %v3255_v49 = vld [vmem:[%s3322_s22 + $0x1b8] sm:$0xff]  }
  0x23   : > { %v3256_v50 = vld [vmem:[%s3322_s22 + $0xc0] sm:$0xff]   ;;  %v3258_v52 = vld [vmem:[%s3322_s22 + $0xc8] sm:$0xff]   ;;  %v3260_v54 = vld [vmem:[%s3322_s22 + $0xd0] sm:$0xff]  }
  0x24   : > { %v3257_v51 = vld [vmem:[%s3322_s22 + $0x1c0] sm:$0xff]   ;;  %v3259_v53 = vld [vmem:[%s3322_s22 + $0x1c8] sm:$0xff]   ;;  %v3261_v55 = vld [vmem:[%s3322_s22 + $0x1d0] sm:$0xff]  }
  0x25   : > { %v3262_v56 = vld [vmem:[%s3322_s22 + $0xd8] sm:$0xff]   ;;  %v3264_v58 = vld [vmem:[%s3322_s22 + $0xe0] sm:$0xff]   ;;  %v3266_v60 = vld [vmem:[%s3322_s22 + $0xe8] sm:$0xff]  }
  0x26   : > { %3075 = vmatmul.mubr.msk.bf16.gmra.mrb[8].mxu0 %vm644_vm0, %v3218_v12  ;;  %3139 = vmatmul.mubr.msk.bf16.gmra.mrb[8].mxu1 %vm644_vm0, %v3219_v13  ;;  %v3263_v57 = vld [vmem:[%s3322_s22 + $0x1d8] sm:$0xff]   ;;  %v3265_v59 = vld [vmem:[%s3322_s22 + $0x1e0] sm:$0xff]   ;;  %v3267_v61 = vld [vmem:[%s3322_s22 + $0x1e8] sm:$0xff]  }
  0x27   : > { %3078 = vmatprep.mubr.msk.bf16.mxu0 %vm644_vm0, %v3220_v14  ;;  %3142 = vmatprep.mubr.msk.bf16.mxu1 %vm644_vm0, %v3221_v15  ;;  %v3268_v62 = vld [vmem:[%s3322_s22 + $0xf0] sm:$0xff]   ;;  %v3270_v0 = vld [vmem:[%s3322_s22 + $0xf8] sm:$0xff]   ;;  %v307_v5 = vld [vmem:[%s4425_s2] sm:$0x7] }
  0x28   : > { %v3269_v63 = vld [vmem:[%s3322_s22 + $0x1f0] sm:$0xff]   ;;  %v3271_v1 = vld [vmem:[%s3322_s22 + $0x1f8] sm:$0xff]   ;;  %v3455_v6 = vrot.slane %v307_v5, %v310_v4  ;;  %v3458_v13 = vrot.slane %v307_v5, %v1640_v7  ;;  %v3460_v14 = vrot.slane %v307_v5, %v1772_v8 }
  0x2e   : > { %3079 = vmatmul.mubr.msk.bf16.gmra.mrb[12].mxu0 %vm644_vm0, %v3222_v16  ;;  %3143 = vmatmul.mubr.msk.bf16.gmra.mrb[12].mxu1 %vm644_vm0, %v3223_v17 }
  0x2f   : > { %3082 = vmatprep.mubr.msk.bf16.mxu0 %vm644_vm0, %v3224_v18  ;;  %3146 = vmatprep.mubr.msk.bf16.mxu1 %vm644_vm0, %v3225_v19 }
  0x36   : > { %3083 = vmatmul.mubr.msk.bf16.gmra.mrb[16].mxu0 %vm644_vm0, %v3226_v20  ;;  %3147 = vmatmul.mubr.msk.bf16.gmra.mrb[16].mxu1 %vm644_vm0, %v3227_v21 }
  0x37   : > { %3086 = vmatprep.mubr.msk.bf16.mxu0 %vm644_vm0, %v3228_v22  ;;  %3150 = vmatprep.mubr.msk.bf16.mxu1 %vm644_vm0, %v3229_v23 }
  0x3e   : > { %3087 = vmatmul.mubr.msk.bf16.gmra.mrb[20].mxu0 %vm644_vm0, %v3230_v24  ;;  %3151 = vmatmul.mubr.msk.bf16.gmra.mrb[20].mxu1 %vm644_vm0, %v3231_v25 }
  0x3f   : > { %3090 = vmatprep.mubr.msk.bf16.mxu0 %vm644_vm0, %v3232_v26  ;;  %3154 = vmatprep.mubr.msk.bf16.mxu1 %vm644_vm0, %v3233_v27 }
  0x46   : > { %3091 = vmatmul.mubr.msk.bf16.gmra.mrb[24].mxu0 %vm644_vm0, %v3234_v28  ;;  %3155 = vmatmul.mubr.msk.bf16.gmra.mrb[24].mxu1 %vm644_vm0, %v3235_v29 }
  0x47   : > { %3094 = vmatprep.mubr.msk.bf16.mxu0 %vm644_vm0, %v3236_v30  ;;  %3158 = vmatprep.mubr.msk.bf16.mxu1 %vm644_vm0, %v3237_v31 }
  0x4e   : > { %3095 = vmatmul.mubr.msk.bf16.gmra.mrb[28].mxu0 %vm644_vm0, %v3238_v32  ;;  %3159 = vmatmul.mubr.msk.bf16.gmra.mrb[28].mxu1 %vm644_vm0, %v3239_v33 }
  0x4f   : > { %3098 = vmatprep.mubr.msk.bf16.mxu0 %vm644_vm0, %v3240_v34  ;;  %3162 = vmatprep.mubr.msk.bf16.mxu1 %vm644_vm0, %v3241_v35 }
  0x56   : > { %3099 = vmatmul.mubr.msk.bf16.gmra.mrb[32].mxu0 %vm644_vm0, %v3242_v36  ;;  %3163 = vmatmul.mubr.msk.bf16.gmra.mrb[32].mxu1 %vm644_vm0, %v3243_v37 }
  0x57   : > { %3102 = vmatprep.mubr.msk.bf16.mxu0 %vm644_vm0, %v3244_v38  ;;  %3166 = vmatprep.mubr.msk.bf16.mxu1 %vm644_vm0, %v3245_v39 }
  0x5e   : > { %3103 = vmatmul.mubr.msk.bf16.gmra.mrb[36].mxu0 %vm644_vm0, %v3246_v40  ;;  %3167 = vmatmul.mubr.msk.bf16.gmra.mrb[36].mxu1 %vm644_vm0, %v3247_v41 }
  0x5f   : > { %3106 = vmatprep.mubr.msk.bf16.mxu0 %vm644_vm0, %v3248_v42  ;;  %3170 = vmatprep.mubr.msk.bf16.mxu1 %vm644_vm0, %v3249_v43 }
  0x66   : > { %3107 = vmatmul.mubr.msk.bf16.gmra.mrb[40].mxu0 %vm644_vm0, %v3250_v44  ;;  %3171 = vmatmul.mubr.msk.bf16.gmra.mrb[40].mxu1 %vm644_vm0, %v3251_v45 }
  0x67   : > { %3110 = vmatprep.mubr.msk.bf16.mxu0 %vm644_vm0, %v3252_v46  ;;  %3174 = vmatprep.mubr.msk.bf16.mxu1 %vm644_vm0, %v3253_v47 }
  0x6e   : > { %3111 = vmatmul.mubr.msk.bf16.gmra.mrb[44].mxu0 %vm644_vm0, %v3254_v48  ;;  %3175 = vmatmul.mubr.msk.bf16.gmra.mrb[44].mxu1 %vm644_vm0, %v3255_v49 }
  0x6f   : > { %3114 = vmatprep.mubr.msk.bf16.mxu0 %vm644_vm0, %v3256_v50  ;;  %3178 = vmatprep.mubr.msk.bf16.mxu1 %vm644_vm0, %v3257_v51 }
  0x76   : > { %3115 = vmatmul.mubr.msk.bf16.gmra.mrb[48].mxu0 %vm644_vm0, %v3258_v52  ;;  %3179 = vmatmul.mubr.msk.bf16.gmra.mrb[48].mxu1 %vm644_vm0, %v3259_v53 }
  0x77   : > { %3118 = vmatprep.mubr.msk.bf16.mxu0 %vm644_vm0, %v3260_v54  ;;  %3182 = vmatprep.mubr.msk.bf16.mxu1 %vm644_vm0, %v3261_v55 }
  0x7e   : > { %3119 = vmatmul.mubr.msk.bf16.gmra.mrb[52].mxu0 %vm644_vm0, %v3262_v56  ;;  %3183 = vmatmul.mubr.msk.bf16.gmra.mrb[52].mxu1 %vm644_vm0, %v3263_v57 }
  0x7f   : > { %3122 = vmatprep.mubr.msk.bf16.mxu0 %vm644_vm0, %v3264_v58  ;;  %3186 = vmatprep.mubr.msk.bf16.mxu1 %vm644_vm0, %v3265_v59 }
  0x86   : > { %3123 = vmatmul.mubr.msk.bf16.gmra.mrb[56].mxu0 %vm644_vm0, %v3266_v60  ;;  %3187 = vmatmul.mubr.msk.bf16.gmra.mrb[56].mxu1 %vm644_vm0, %v3267_v61 }
  0x87   : > { %3126 = vmatprep.mubr.msk.bf16.mxu0 %vm644_vm0, %v3268_v62  ;;  %3190 = vmatprep.mubr.msk.bf16.mxu1 %vm644_vm0, %v3269_v63 }
  0x8e   : > { %3127 = vmatmul.mubr.msk.bf16.gmra.mrb[60].mxu0 %vm644_vm0, %v3270_v0  ;;  %3191 = vmatmul.mubr.msk.bf16.gmra.mrb[60].mxu1 %vm644_vm0, %v3271_v1 }
  0xe9   : > { %v3068_v9 = vpop.f32.mrb[0].mxu0  ;;  %v3132_v11 = vpop.f32.mrb[0].mxu1 }
  0xea   : > { %v880_v10 = vadd.f32 %v3068_v9, %v3455_v6  ;;  %v871_v12 = vpop.f32.mrb[1].mxu0  ;;  %v1136_v15 = vadd.f32 %v3132_v11, %v3455_v6  ;;  %v1127_v17 = vpop.f32.mrb[1].mxu1 }
  0xeb   : > { %v872_v16 = vadd.f32 %v871_v12, %v3455_v6  ;;  %v3069_v18 = vpop.f32.mrb[2].mxu0  ;;  %v1128_v20 = vadd.f32 %v1127_v17, %v3455_v6  ;;  %v3133_v22 = vpop.f32.mrb[2].mxu1 }
  0xec   : > { %v1384_v19 = vmul.f32 0.01, %v880_v10  ;;  %v883_v21 = vadd.f32 %v3069_v18, %v3455_v6  ;;  %v874_v23 = vpop.f32.mrb[3].mxu0  ;;  %v1448_v24 = vmul.f32 0.01, %v1136_v15  ;;  %v1139_v26 = vadd.f32 %v3133_v22, %v3455_v6  ;;  %v1130_v28 = vpop.f32.mrb[3].mxu1 }
  0xed   : > { %v1382_v25 = vmul.f32 0.01, %v872_v16  ;;  %v875_v27 = vadd.f32 %v874_v23, %v3455_v6  ;;  %v1446_v30 = vmul.f32 0.01, %v1128_v20  ;;  %v1131_v32 = vadd.f32 %v1130_v28, %v3455_v6 }
  0xee   : > { %v1512_v29 = vmax.f32 %v880_v10, %v1384_v19  ;;  %v1385_v31 = vmul.f32 0.01, %v883_v21  ;;  %v1576_v33 = vmax.f32 %v1136_v15, %v1448_v24  ;;  %v1449_v35 = vmul.f32 0.01, %v1139_v26 }
  0xef   : > { %v1510_v34 = vmax.f32 %v872_v16, %v1382_v25  ;;  %v1383_v36 = vmul.f32 0.01, %v875_v27  ;;  %v1574_v38 = vmax.f32 %v1128_v20, %v1446_v30  ;;  %v1447_v40 = vmul.f32 0.01, %v1131_v32 }
  0xf0   : > { %v1644_v37 = vmul.f32 %v3458_v13, %v1512_v29  ;;  %v1513_v39 = vmax.f32 %v883_v21, %v1385_v31  ;;  %v1708_v41 = vmul.f32 %v3458_v13, %v1576_v33  ;;  %v1577_v43 = vmax.f32 %v1139_v26, %v1449_v35 }
  0xf1   : > { %v1642_v42 = vmul.f32 %v3458_v13, %v1510_v34  ;;  %v1511_v44 = vmax.f32 %v875_v27, %v1383_v36  ;;  %v3072_v45 = vpop.f32.mrb[4].mxu0  ;;  %v1706_v47 = vmul.f32 %v3458_v13, %v1574_v38  ;;  %v1575_v49 = vmax.f32 %v1131_v32, %v1447_v40  ;;  %v3136_v50 = vpop.f32.mrb[4].mxu1 }
  0xf2   : > { %v1776_v46 = vadd.f32 %v3460_v14, %v1644_v37  ;;  %v1645_v48 = vmul.f32 %v3458_v13, %v1513_v39  ;;  %v887_v51 = vpop.f32.mrb[5].mxu0  ;;  %v1840_v52 = vadd.f32 %v3460_v14, %v1708_v41  ;;  %v1709_v54 = vmul.f32 %v3458_v13, %v1577_v43  ;;  %v1143_v56 = vpop.f32.mrb[5].mxu1 }
  0xf3   : > { %v1774_v53 = vadd.f32 %v3460_v14, %v1642_v42  ;;  %v1643_v55 = vmul.f32 %v3458_v13, %v1511_v44  ;;  %v3073_v57 = vpop.f32.mrb[6].mxu0  ;;  %v1838_v59 = vadd.f32 %v3460_v14, %v1706_v47  ;;  %v1707_v61 = vmul.f32 %v3458_v13, %v1575_v49  ;;  %v3137_v62 = vpop.f32.mrb[6].mxu1 }
  0xf4   : > { %v2870_v58 = vpack.c.bf16 %v1776_v46, %v1776_v46  ;;  %v1777_v60 = vadd.f32 %v3460_v14, %v1645_v48  ;;  %v890_v63 = vpop.f32.mrb[7].mxu0  ;;  %v2934_v0 = vpack.c.bf16 %v1840_v52, %v1840_v52  ;;  %v1841_v2 = vadd.f32 %v3460_v14, %v1709_v54  ;;  %v1146_v4 = vpop.f32.mrb[7].mxu1 }
  0xf5   : > { %v2868_v1 = vpack.c.bf16 %v1774_v53, %v1774_v53  ;;  %v1775_v3 = vadd.f32 %v3460_v14, %v1643_v55  ;;  %v2932_v5 = vpack.c.bf16 %v1838_v59, %v1838_v59  ;;  %v1839_v8 = vadd.f32 %v3460_v14, %v1707_v61 }
  0xf6   : > { %2417 = vst.msk [vmem:[%s3480_s27 + $0x8] sm:$0xf] %vm2414_vm1, %v2870_v58  ;;  %v2871_v7 = vpack.c.bf16 %v1777_v60, %v1777_v60  ;;  %v896_v9 = vadd.f32 %v3072_v45, %v3455_v6  ;;  %2481 = vst.msk [vmem:[%s3480_s27 + $0x108] sm:$0xf] %vm2414_vm1, %v2934_v0  ;;  %v2935_v10 = vpack.c.bf16 %v1841_v2, %v1841_v2 }
  0xf7   : > { %2415 = vst.msk [vmem:[%s3480_s27] sm:$0xf] %vm2414_vm1, %v2868_v1  ;;  %v2869_v11 = vpack.c.bf16 %v1775_v3, %v1775_v3  ;;  %v1152_v12 = vadd.f32 %v3136_v50, %v3455_v6  ;;  %v888_v15 = vadd.f32 %v887_v51, %v3455_v6  ;;  %2479 = vst.msk [vmem:[%s3480_s27 + $0x100] sm:$0xf] %vm2414_vm1, %v2932_v5 }
  0xf8   : > { %2418 = vst.msk [vmem:[%s3480_s27 + $0xc] sm:$0xf] %vm2414_vm1, %v2871_v7  ;;  %v2933_v16 = vpack.c.bf16 %v1839_v8, %v1839_v8  ;;  %v1388_v17 = vmul.f32 0.01, %v896_v9  ;;  %v1144_v18 = vadd.f32 %v1143_v56, %v3455_v6  ;;  %v899_v19 = vadd.f32 %v3073_v57, %v3455_v6  ;;  %2482 = vst.msk [vmem:[%s3480_s27 + $0x10c] sm:$0xf] %vm2414_vm1, %v2935_v10 }
  0xf9   : > { %2416 = vst.msk [vmem:[%s3480_s27 + $0x4] sm:$0xf] %vm2414_vm1, %v2869_v11  ;;  %v1452_v20 = vmul.f32 0.01, %v1152_v12  ;;  %v1386_v21 = vmul.f32 0.01, %v888_v15  ;;  %v1155_v22 = vadd.f32 %v3137_v62, %v3455_v6  ;;  %v891_v23 = vadd.f32 %v890_v63, %v3455_v6 }
  0xfa   : > { %v3076_v24 = vpop.f32.mrb[8].mxu0  ;;  %2480 = vst.msk [vmem:[%s3480_s27 + $0x104] sm:$0xf] %vm2414_vm1, %v2933_v16  ;;  %v1516_v25 = vmax.f32 %v896_v9, %v1388_v17  ;;  %v1450_v26 = vmul.f32 0.01, %v1144_v18  ;;  %v1147_v28 = vadd.f32 %v1146_v4, %v3455_v6  ;;  %v3140_v29 = vpop.f32.mrb[8].mxu1 }
  0xfb   : > { %v1389_v27 = vmul.f32 0.01, %v899_v19  ;;  %v903_v30 = vpop.f32.mrb[9].mxu0  ;;  %v1580_v31 = vmax.f32 %v1152_v12, %v1452_v20  ;;  %v1514_v32 = vmax.f32 %v888_v15, %v1386_v21  ;;  %v1453_v33 = vmul.f32 0.01, %v1155_v22  ;;  %v1159_v35 = vpop.f32.mrb[9].mxu1 }
  0xfc   : > { %v1387_v34 = vmul.f32 0.01, %v891_v23  ;;  %v3077_v36 = vpop.f32.mrb[10].mxu0  ;;  %v1648_v37 = vmul.f32 %v3458_v13, %v1516_v25  ;;  %v1578_v38 = vmax.f32 %v1144_v18, %v1450_v26  ;;  %v1451_v40 = vmul.f32 0.01, %v1147_v28  ;;  %v3141_v41 = vpop.f32.mrb[10].mxu1 }
  0xfd   : > { %v1517_v39 = vmax.f32 %v899_v19, %v1389_v27  ;;  %v906_v42 = vpop.f32.mrb[11].mxu0  ;;  %v1712_v43 = vmul.f32 %v3458_v13, %v1580_v31  ;;  %v1646_v44 = vmul.f32 %v3458_v13, %v1514_v32  ;;  %v1581_v45 = vmax.f32 %v1155_v22, %v1453_v33  ;;  %v1162_v47 = vpop.f32.mrb[11].mxu1 }
  0xfe   : > { %v1515_v46 = vmax.f32 %v891_v23, %v1387_v34  ;;  %v1780_v48 = vadd.f32 %v3460_v14, %v1648_v37  ;;  %v1710_v49 = vmul.f32 %v3458_v13, %v1578_v38  ;;  %v1579_v51 = vmax.f32 %v1147_v28, %v1451_v40 }
  0xff   : > { %v1649_v50 = vmul.f32 %v3458_v13, %v1517_v39  ;;  %v1844_v52 = vadd.f32 %v3460_v14, %v1712_v43  ;;  %v1778_v53 = vadd.f32 %v3460_v14, %v1646_v44  ;;  %v1713_v54 = vmul.f32 %v3458_v13, %v1581_v45 }
 0x100   : > { %v1647_v55 = vmul.f32 %v3458_v13, %v1515_v46  ;;  %v2874_v56 = vpack.c.bf16 %v1780_v48, %v1780_v48  ;;  %v1842_v57 = vadd.f32 %v3460_v14, %v1710_v49  ;;  %v1711_v59 = vmul.f32 %v3458_v13, %v1579_v51 }
 0x101   : > { %v1781_v58 = vadd.f32 %v3460_v14, %v1649_v50  ;;  %v2938_v60 = vpack.c.bf16 %v1844_v52, %v1844_v52  ;;  %v2872_v61 = vpack.c.bf16 %v1778_v53, %v1778_v53  ;;  %v1845_v62 = vadd.f32 %v3460_v14, %v1713_v54  ;;  %v3531_v0 = vpop.f32.mrb[12].mxu0  ;;  %v3537_v5 = vpop.f32.mrb[12].mxu1 }
 0x102   : > { %v1779_v63 = vadd.f32 %v3460_v14, %v1647_v55  ;;  %2421 = vst.msk [vmem:[%s3480_s27 + $0x18] sm:$0xf] %vm2414_vm1, %v2874_v56  ;;  %v2936_v1 = vpack.c.bf16 %v1842_v57, %v1842_v57  ;;  %v1843_v3 = vadd.f32 %v3460_v14, %v1711_v59  ;;  %v912_v4 = vadd.f32 %v3076_v24, %v3455_v6  ;;  %v3539_v7 = vpop.f32.mrb[13].mxu0  ;;  %v3547_v12 = vpop.f32.mrb[13].mxu1 }
 0x103   : > { %v2875_v2 = vpack.c.bf16 %v1781_v58, %v1781_v58  ;;  %2485 = vst.msk [vmem:[%s3480_s27 + $0x118] sm:$0xf] %vm2414_vm1, %v2938_v60  ;;  %2419 = vst.msk [vmem:[%s3480_s27 + $0x10] sm:$0xf] %vm2414_vm1, %v2872_v61  ;;  %v2939_v8 = vpack.c.bf16 %v1845_v62, %v1845_v62  ;;  %v1168_v10 = vadd.f32 %v3140_v29, %v3455_v6  ;;  %v3549_v15 = vpop.f32.mrb[14].mxu0  ;;  %v3557_v20 = vpop.f32.mrb[14].mxu1 }
 0x104   : > { %v2873_v9 = vpack.c.bf16 %v1779_v63, %v1779_v63  ;;  %v904_v11 = vadd.f32 %v903_v30, %v3455_v6  ;;  %2483 = vst.msk [vmem:[%s3480_s27 + $0x110] sm:$0xf] %vm2414_vm1, %v2936_v1  ;;  %v2937_v16 = vpack.c.bf16 %v1843_v3, %v1843_v3  ;;  %v1392_v17 = vmul.f32 0.01, %v912_v4  ;;  %v3559_v21 = vpop.f32.mrb[15].mxu0  ;;  %v3567_v26 = vpop.f32.mrb[15].mxu1 }
 0x105   : > { %2422 = vst.msk [vmem:[%s3480_s27 + $0x1c] sm:$0xf] %vm2414_vm1, %v2875_v2  ;;  %v1160_v18 = vadd.f32 %v1159_v35, %v3455_v6  ;;  %v915_v19 = vadd.f32 %v3077_v36, %v3455_v6  ;;  %2486 = vst.msk [vmem:[%s3480_s27 + $0x11c] sm:$0xf] %vm2414_vm1, %v2939_v8  ;;  %v1456_v22 = vmul.f32 0.01, %v1168_v10  ;;  %v1171_v24 = vadd.f32 %v3141_v41, %v3455_v6 }
 0x106   : > { %2420 = vst.msk [vmem:[%s3480_s27 + $0x14] sm:$0xf] %vm2414_vm1, %v2873_v9  ;;  %v1390_v23 = vmul.f32 0.01, %v904_v11  ;;  %v907_v25 = vadd.f32 %v906_v42, %v3455_v6  ;;  %2484 = vst.msk [vmem:[%s3480_s27 + $0x114] sm:$0xf] %vm2414_vm1, %v2937_v16  ;;  %v1520_v27 = vmax.f32 %v912_v4, %v1392_v17  ;;  %v1163_v30 = vadd.f32 %v1162_v47, %v3455_v6 }
 0x107   : > { %v1454_v28 = vmul.f32 0.01, %v1160_v18  ;;  %v1393_v29 = vmul.f32 0.01, %v915_v19  ;;  %v1584_v31 = vmax.f32 %v1168_v10, %v1456_v22  ;;  %v1457_v33 = vmul.f32 0.01, %v1171_v24 }
 0x108   : > { %v1518_v32 = vmax.f32 %v904_v11, %v1390_v23  ;;  %v1391_v34 = vmul.f32 0.01, %v907_v25  ;;  %v1652_v35 = vmul.f32 %v3458_v13, %v1520_v27  ;;  %v1455_v38 = vmul.f32 0.01, %v1163_v30 }
 0x109   : > { %v1582_v36 = vmax.f32 %v1160_v18, %v1454_v28  ;;  %v1521_v37 = vmax.f32 %v915_v19, %v1393_v29  ;;  %v1716_v39 = vmul.f32 %v3458_v13, %v1584_v31  ;;  %v1585_v41 = vmax.f32 %v1171_v24, %v1457_v33  ;;  %v3575_v43 = vpop.f32.mrb[16].mxu0  ;;  %v3580_v48 = vpop.f32.mrb[16].mxu1 }
 0x10a   : > { %v1650_v40 = vmul.f32 %v3458_v13, %v1518_v32  ;;  %v1519_v42 = vmax.f32 %v907_v25, %v1391_v34  ;;  %v1784_v44 = vadd.f32 %v3460_v14, %v1652_v35  ;;  %v1583_v47 = vmax.f32 %v1163_v30, %v1455_v38  ;;  %v3582_v49 = vpop.f32.mrb[17].mxu0  ;;  %v3588_v54 = vpop.f32.mrb[17].mxu1 }
 0x10b   : > { %v1714_v45 = vmul.f32 %v3458_v13, %v1582_v36  ;;  %v1653_v46 = vmul.f32 %v3458_v13, %v1521_v37  ;;  %v1848_v50 = vadd.f32 %v3460_v14, %v1716_v39  ;;  %v1717_v52 = vmul.f32 %v3458_v13, %v1585_v41  ;;  %v3590_v55 = vpop.f32.mrb[18].mxu0  ;;  %v3595_v60 = vpop.f32.mrb[18].mxu1 }
 0x10c   : > { %v1782_v51 = vadd.f32 %v3460_v14, %v1650_v40  ;;  %v1651_v53 = vmul.f32 %v3458_v13, %v1519_v42  ;;  %v2878_v56 = vpack.c.bf16 %v1784_v44, %v1784_v44  ;;  %v1715_v59 = vmul.f32 %v3458_v13, %v1583_v47  ;;  %v3597_v61 = vpop.f32.mrb[19].mxu0  ;;  %v3601_v3 = vpop.f32.mrb[19].mxu1 }
 0x10d   : > { %v1846_v57 = vadd.f32 %v3460_v14, %v1714_v45  ;;  %v1785_v58 = vadd.f32 %v3460_v14, %v1653_v46  ;;  %v2942_v62 = vpack.c.bf16 %v1848_v50, %v1848_v50  ;;  %v1849_v1 = vadd.f32 %v3460_v14, %v1717_v52 }
 0x10e   : > { %v2876_v63 = vpack.c.bf16 %v1782_v51, %v1782_v51  ;;  %v1783_v2 = vadd.f32 %v3460_v14, %v1651_v53  ;;  %2425 = vst.msk [vmem:[%s3480_s27 + $0x28] sm:$0xf] %vm2414_vm1, %v2878_v56  ;;  %v1847_v9 = vadd.f32 %v3460_v14, %v1715_v59  ;;  %v928_v10 = vadd.f32 %v3531_v0, %v3455_v6 }
 0x10f   : > { %v2940_v4 = vpack.c.bf16 %v1846_v57, %v1846_v57  ;;  %v2879_v8 = vpack.c.bf16 %v1785_v58, %v1785_v58  ;;  %2489 = vst.msk [vmem:[%s3480_s27 + $0x128] sm:$0xf] %vm2414_vm1, %v2942_v62  ;;  %v2943_v11 = vpack.c.bf16 %v1849_v1, %v1849_v1  ;;  %v1184_v17 = vadd.f32 %v3537_v5, %v3455_v6 }
 0x110   : > { %2423 = vst.msk [vmem:[%s3480_s27 + $0x20] sm:$0xf] %vm2414_vm1, %v2876_v63  ;;  %v2877_v16 = vpack.c.bf16 %v1783_v2, %v1783_v2  ;;  %v920_v18 = vadd.f32 %v3539_v7, %v3455_v6  ;;  %v2941_v19 = vpack.c.bf16 %v1847_v9, %v1847_v9  ;;  %v1396_v22 = vmul.f32 0.01, %v928_v10 }
 0x111   : > { %2487 = vst.msk [vmem:[%s3480_s27 + $0x120] sm:$0xf] %vm2414_vm1, %v2940_v4  ;;  %2426 = vst.msk [vmem:[%s3480_s27 + $0x2c] sm:$0xf] %vm2414_vm1, %v2879_v8  ;;  %v1176_v0 = vadd.f32 %v3547_v12, %v3455_v6  ;;  %v931_v23 = vadd.f32 %v3549_v15, %v3455_v6  ;;  %v1460_v5 = vmul.f32 0.01, %v1184_v17  ;;  %v1187_v7 = vadd.f32 %v3557_v20, %v3455_v6 }
 0x112   : > { %2490 = vst.msk [vmem:[%s3480_s27 + $0x12c] sm:$0xf] %vm2414_vm1, %v2943_v11  ;;  %2424 = vst.msk [vmem:[%s3480_s27 + $0x24] sm:$0xf] %vm2414_vm1, %v2877_v16  ;;  %v1394_v24 = vmul.f32 0.01, %v920_v18  ;;  %v923_v25 = vadd.f32 %v3559_v21, %v3455_v6  ;;  %v1524_v12 = vmax.f32 %v928_v10, %v1396_v22  ;;  %v1179_v15 = vadd.f32 %v3567_v26, %v3455_v6 }
 0x113   : > { %v3632_v27 = vpop.f32.mrb[20].mxu0  ;;  %2488 = vst.msk [vmem:[%s3480_s27 + $0x124] sm:$0xf] %vm2414_vm1, %v2941_v19  ;;  %v1458_v28 = vmul.f32 0.01, %v1176_v0  ;;  %v3638_v30 = vpop.f32.mrb[20].mxu1  ;;  %v1588_v32 = vmax.f32 %v1184_v17, %v1460_v5  ;;  %v1200_v5 = vadd.f32 %v3580_v48, %v3455_v6  ;;  %v947_v48 = vadd.f32 %v3590_v55, %v3455_v6 }
 0x114   : > { %v1397_v29 = vmul.f32 0.01, %v931_v23  ;;  %v3640_v31 = vpop.f32.mrb[21].mxu0  ;;  %v1522_v33 = vmax.f32 %v920_v18, %v1394_v24  ;;  %v1461_v20 = vmul.f32 0.01, %v1187_v7  ;;  %v3642_v35 = vpop.f32.mrb[21].mxu1  ;;  %v1656_v36 = vmul.f32 %v3458_v13, %v1524_v12 }
 0x115   : > { %v1395_v34 = vmul.f32 0.01, %v923_v25  ;;  %v3644_v21 = vpop.f32.mrb[22].mxu0  ;;  %v1586_v37 = vmax.f32 %v1176_v0, %v1458_v28  ;;  %v1459_v39 = vmul.f32 0.01, %v1179_v15  ;;  %v3647_v40 = vpop.f32.mrb[22].mxu1  ;;  %v1720_v41 = vmul.f32 %v3458_v13, %v1588_v32 }
 0x116   : > { %v1525_v38 = vmax.f32 %v931_v23, %v1397_v29  ;;  %v3649_v26 = vpop.f32.mrb[23].mxu0  ;;  %v1654_v42 = vmul.f32 %v3458_v13, %v1522_v33  ;;  %v1589_v44 = vmax.f32 %v1187_v7, %v1461_v20  ;;  %v3653_v46 = vpop.f32.mrb[23].mxu1  ;;  %v1788_v47 = vadd.f32 %v3460_v14, %v1656_v36 }
 0x117   : > { %v1523_v45 = vmax.f32 %v923_v25, %v1395_v34  ;;  %v1718_v50 = vmul.f32 %v3458_v13, %v1586_v37  ;;  %v1587_v52 = vmax.f32 %v1179_v15, %v1459_v39  ;;  %v1852_v53 = vadd.f32 %v3460_v14, %v1720_v41 }
 0x118   : > { %v1657_v51 = vmul.f32 %v3458_v13, %v1525_v38  ;;  %v1786_v56 = vadd.f32 %v3460_v14, %v1654_v42  ;;  %v1721_v57 = vmul.f32 %v3458_v13, %v1589_v44  ;;  %v2882_v59 = vpack.c.bf16 %v1788_v47, %v1788_v47 }
 0x119   : > { %v1655_v58 = vmul.f32 %v3458_v13, %v1523_v45  ;;  %v1850_v62 = vadd.f32 %v3460_v14, %v1718_v50  ;;  %v1719_v1 = vmul.f32 %v3458_v13, %v1587_v52  ;;  %v2946_v2 = vpack.c.bf16 %v1852_v53, %v1852_v53  ;;  %v3667_v10 = vpop.f32.mrb[24].mxu0  ;;  %v3674_v19 = vpop.f32.mrb[24].mxu1 }
 0x11a   : > { %v1789_v63 = vadd.f32 %v3460_v14, %v1657_v51  ;;  %v2880_v4 = vpack.c.bf16 %v1786_v56, %v1786_v56  ;;  %v1853_v8 = vadd.f32 %v3460_v14, %v1721_v57  ;;  %2429 = vst.msk [vmem:[%s3480_s27 + $0x38] sm:$0xf] %vm2414_vm1, %v2882_v59  ;;  %v944_v18 = vadd.f32 %v3575_v43, %v3455_v6  ;;  %v3676_v22 = vpop.f32.mrb[25].mxu0  ;;  %v3686_v7 = vpop.f32.mrb[25].mxu1 }
 0x11b   : > { %v1787_v9 = vadd.f32 %v3460_v14, %v1655_v58  ;;  %v2944_v11 = vpack.c.bf16 %v1850_v62, %v1850_v62  ;;  %v1851_v17 = vadd.f32 %v3460_v14, %v1719_v1  ;;  %2493 = vst.msk [vmem:[%s3480_s27 + $0x138] sm:$0xf] %vm2414_vm1, %v2946_v2  ;;  %v936_v24 = vadd.f32 %v3582_v49, %v3455_v6  ;;  %v3688_v43 = vpop.f32.mrb[26].mxu0  ;;  %v3698_v29 = vpop.f32.mrb[26].mxu1 }
 0x11c   : > { %v2883_v16 = vpack.c.bf16 %v1789_v63, %v1789_v63  ;;  %2427 = vst.msk [vmem:[%s3480_s27 + $0x30] sm:$0xf] %vm2414_vm1, %v2880_v4  ;;  %v2947_v0 = vpack.c.bf16 %v1853_v8, %v1853_v8  ;;  %v1400_v12 = vmul.f32 0.01, %v944_v18  ;;  %v1192_v28 = vadd.f32 %v3588_v54, %v3455_v6  ;;  %v3700_v49 = vpop.f32.mrb[27].mxu0  ;;  %v3710_v54 = vpop.f32.mrb[27].mxu1 }
 0x11d   : > { %v2881_v23 = vpack.c.bf16 %v1787_v9, %v1787_v9  ;;  %2491 = vst.msk [vmem:[%s3480_s27 + $0x130] sm:$0xf] %vm2414_vm1, %v2944_v11  ;;  %v2945_v25 = vpack.c.bf16 %v1851_v17, %v1851_v17  ;;  %v1464_v15 = vmul.f32 0.01, %v1200_v5  ;;  %v1398_v32 = vmul.f32 0.01, %v936_v24 }
 0x11e   : > { %2430 = vst.msk [vmem:[%s3480_s27 + $0x3c] sm:$0xf] %vm2414_vm1, %v2883_v16  ;;  %2494 = vst.msk [vmem:[%s3480_s27 + $0x13c] sm:$0xf] %vm2414_vm1, %v2947_v0  ;;  %v1203_v33 = vadd.f32 %v3595_v60, %v3455_v6  ;;  %v939_v20 = vadd.f32 %v3597_v61, %v3455_v6  ;;  %v1528_v55 = vmax.f32 %v944_v18, %v1400_v12  ;;  %v1462_v34 = vmul.f32 0.01, %v1192_v28 }
 0x11f   : > { %2428 = vst.msk [vmem:[%s3480_s27 + $0x34] sm:$0xf] %vm2414_vm1, %v2881_v23  ;;  %2492 = vst.msk [vmem:[%s3480_s27 + $0x134] sm:$0xf] %vm2414_vm1, %v2945_v25  ;;  %v1401_v36 = vmul.f32 0.01, %v947_v48  ;;  %v1195_v37 = vadd.f32 %v3601_v3, %v3455_v6  ;;  %v1592_v38 = vmax.f32 %v1200_v5, %v1464_v15  ;;  %v1526_v39 = vmax.f32 %v936_v24, %v1398_v32 }
 0x120   : > { %v1465_v41 = vmul.f32 0.01, %v1203_v33  ;;  %v1399_v42 = vmul.f32 0.01, %v939_v20  ;;  %v1660_v44 = vmul.f32 %v3458_v13, %v1528_v55  ;;  %v1590_v60 = vmax.f32 %v1192_v28, %v1462_v34 }
 0x121   : > { %v1529_v45 = vmax.f32 %v947_v48, %v1401_v36  ;;  %v1463_v47 = vmul.f32 0.01, %v1195_v37  ;;  %v1724_v61 = vmul.f32 %v3458_v13, %v1592_v38  ;;  %v1658_v50 = vmul.f32 %v3458_v13, %v1526_v39  ;;  %v3719_v53 = vpop.f32.mrb[28].mxu0  ;;  %v3724_v59 = vpop.f32.mrb[28].mxu1 }
 0x122   : > { %v1593_v51 = vmax.f32 %v1203_v33, %v1465_v41  ;;  %v1527_v52 = vmax.f32 %v939_v20, %v1399_v42  ;;  %v1792_v56 = vadd.f32 %v3460_v14, %v1660_v44  ;;  %v1722_v3 = vmul.f32 %v3458_v13, %v1590_v60  ;;  %v3726_v62 = vpop.f32.mrb[29].mxu0  ;;  %v3732_v8 = vpop.f32.mrb[29].mxu1 }
 0x123   : > { %v1661_v57 = vmul.f32 %v3458_v13, %v1529_v45  ;;  %v1591_v58 = vmax.f32 %v1195_v37, %v1463_v47  ;;  %v1856_v63 = vadd.f32 %v3460_v14, %v1724_v61  ;;  %v1790_v1 = vadd.f32 %v3460_v14, %v1658_v50  ;;  %v3734_v9 = vpop.f32.mrb[30].mxu0  ;;  %v3739_v0 = vpop.f32.mrb[30].mxu1 }
 0x124   : > { %v1725_v2 = vmul.f32 %v3458_v13, %v1593_v51  ;;  %v1659_v4 = vmul.f32 %v3458_v13, %v1527_v52  ;;  %v2886_v11 = vpack.c.bf16 %v1792_v56, %v1792_v56  ;;  %v1854_v16 = vadd.f32 %v3460_v14, %v1722_v3  ;;  %v3741_v23 = vpop.f32.mrb[31].mxu0  ;;  %v3745_v28 = vpop.f32.mrb[31].mxu1 }
 0x125   : > { %v1793_v17 = vadd.f32 %v3460_v14, %v1661_v57  ;;  %v1723_v18 = vmul.f32 %v3458_v13, %v1591_v58  ;;  %v2950_v5 = vpack.c.bf16 %v1856_v63, %v1856_v63  ;;  %v2884_v24 = vpack.c.bf16 %v1790_v1, %v1790_v1 }
 0x126   : > { %v1857_v25 = vadd.f32 %v3460_v14, %v1725_v2  ;;  %v1791_v12 = vadd.f32 %v3460_v14, %v1659_v4  ;;  %2433 = vst.msk [vmem:[%s3480_s27 + $0x48] sm:$0xf] %vm2414_vm1, %v2886_v11  ;;  %v2948_v48 = vpack.c.bf16 %v1854_v16, %v1854_v16  ;;  %v960_v33 = vadd.f32 %v3632_v27, %v3455_v6 }
 0x127   : > { %v2887_v15 = vpack.c.bf16 %v1793_v17, %v1793_v17  ;;  %v1855_v32 = vadd.f32 %v3460_v14, %v1723_v18  ;;  %2497 = vst.msk [vmem:[%s3480_s27 + $0x148] sm:$0xf] %vm2414_vm1, %v2950_v5  ;;  %2431 = vst.msk [vmem:[%s3480_s27 + $0x40] sm:$0xf] %vm2414_vm1, %v2884_v24  ;;  %v1216_v34 = vadd.f32 %v3638_v30, %v3455_v6 }
 0x128   : > { %v2951_v20 = vpack.c.bf16 %v1857_v25, %v1857_v25  ;;  %v2885_v55 = vpack.c.bf16 %v1791_v12, %v1791_v12  ;;  %v952_v36 = vadd.f32 %v3640_v31, %v3455_v6  ;;  %2495 = vst.msk [vmem:[%s3480_s27 + $0x140] sm:$0xf] %vm2414_vm1, %v2948_v48  ;;  %v1404_v38 = vmul.f32 0.01, %v960_v33 }
 0x129   : > { %2434 = vst.msk [vmem:[%s3480_s27 + $0x4c] sm:$0xf] %vm2414_vm1, %v2887_v15  ;;  %v2949_v37 = vpack.c.bf16 %v1855_v32, %v1855_v32  ;;  %v1208_v27 = vadd.f32 %v3642_v35, %v3455_v6  ;;  %v963_v39 = vadd.f32 %v3644_v21, %v3455_v6  ;;  %v1468_v30 = vmul.f32 0.01, %v1216_v34  ;;  %v3776_v44 = vpop.f32.mrb[32].mxu0  ;;  %v3782_v47 = vpop.f32.mrb[32].mxu1 }
 0x12a   : > { %2498 = vst.msk [vmem:[%s3480_s27 + $0x14c] sm:$0xf] %vm2414_vm1, %v2951_v20  ;;  %2432 = vst.msk [vmem:[%s3480_s27 + $0x44] sm:$0xf] %vm2414_vm1, %v2885_v55  ;;  %v1402_v41 = vmul.f32 0.01, %v952_v36  ;;  %v1219_v31 = vadd.f32 %v3647_v40, %v3455_v6  ;;  %v955_v42 = vadd.f32 %v3649_v26, %v3455_v6  ;;  %v1532_v35 = vmax.f32 %v960_v33, %v1404_v38 }
 0x12b   : > { %2496 = vst.msk [vmem:[%s3480_s27 + $0x144] sm:$0xf] %vm2414_vm1, %v2949_v37  ;;  %v1466_v60 = vmul.f32 0.01, %v1208_v27  ;;  %v1405_v45 = vmul.f32 0.01, %v963_v39  ;;  %v1211_v21 = vadd.f32 %v3653_v46, %v3455_v6  ;;  %v1596_v50 = vmax.f32 %v1216_v34, %v1468_v30 }
 0x12c   : > { %v3784_v61 = vpop.f32.mrb[33].mxu0  ;;  %v1530_v51 = vmax.f32 %v952_v36, %v1402_v41  ;;  %v1469_v40 = vmul.f32 0.01, %v1219_v31  ;;  %v1403_v52 = vmul.f32 0.01, %v955_v42  ;;  %v3786_v56 = vpop.f32.mrb[33].mxu1  ;;  %v1664_v3 = vmul.f32 %v3458_v13, %v1532_v35 }
 0x12d   : > { %v3788_v26 = vpop.f32.mrb[34].mxu0  ;;  %v1594_v57 = vmax.f32 %v1208_v27, %v1466_v60  ;;  %v1533_v58 = vmax.f32 %v963_v39, %v1405_v45  ;;  %v1467_v63 = vmul.f32 0.01, %v1211_v21  ;;  %v3791_v1 = vpop.f32.mrb[34].mxu1  ;;  %v1728_v2 = vmul.f32 %v3458_v13, %v1596_v50 }
 0x12e   : > { %v3793_v46 = vpop.f32.mrb[35].mxu0  ;;  %v1662_v4 = vmul.f32 %v3458_v13, %v1530_v51  ;;  %v1597_v11 = vmax.f32 %v1219_v31, %v1469_v40  ;;  %v1531_v16 = vmax.f32 %v955_v42, %v1403_v52  ;;  %v3797_v17 = vpop.f32.mrb[35].mxu1  ;;  %v1796_v18 = vadd.f32 %v3460_v14, %v1664_v3 }
 0x12f   : > { %v1726_v5 = vmul.f32 %v3458_v13, %v1594_v57  ;;  %v1665_v24 = vmul.f32 %v3458_v13, %v1533_v58  ;;  %v1595_v25 = vmax.f32 %v1211_v21, %v1467_v63  ;;  %v1860_v12 = vadd.f32 %v3460_v14, %v1728_v2 }
 0x130   : > { %v1794_v48 = vadd.f32 %v3460_v14, %v1662_v4  ;;  %v1729_v15 = vmul.f32 %v3458_v13, %v1597_v11  ;;  %v1663_v32 = vmul.f32 %v3458_v13, %v1531_v16  ;;  %v2890_v33 = vpack.c.bf16 %v1796_v18, %v1796_v18 }
 0x131   : > { %v1858_v20 = vadd.f32 %v3460_v14, %v1726_v5  ;;  %v1797_v55 = vadd.f32 %v3460_v14, %v1665_v24  ;;  %v1727_v34 = vmul.f32 %v3458_v13, %v1595_v25  ;;  %v2954_v36 = vpack.c.bf16 %v1860_v12, %v1860_v12  ;;  %v3811_v39 = vpop.f32.mrb[36].mxu0  ;;  %v3818_v35 = vpop.f32.mrb[36].mxu1 }
 0x132   : > { %v2888_v37 = vpack.c.bf16 %v1794_v48, %v1794_v48  ;;  %v1861_v38 = vadd.f32 %v3460_v14, %v1729_v15  ;;  %v1795_v27 = vadd.f32 %v3460_v14, %v1663_v32  ;;  %2437 = vst.msk [vmem:[%s3480_s27 + $0x58] sm:$0xf] %vm2414_vm1, %v2890_v33  ;;  %v976_v42 = vadd.f32 %v3667_v10, %v3455_v6  ;;  %v3820_v60 = vpop.f32.mrb[37].mxu0  ;;  %v3830_v40 = vpop.f32.mrb[37].mxu1 }
 0x133   : > { %v2952_v30 = vpack.c.bf16 %v1858_v20, %v1858_v20  ;;  %v2891_v41 = vpack.c.bf16 %v1797_v55, %v1797_v55  ;;  %v1859_v31 = vadd.f32 %v3460_v14, %v1727_v34  ;;  %2501 = vst.msk [vmem:[%s3480_s27 + $0x158] sm:$0xf] %vm2414_vm1, %v2954_v36  ;;  %v1232_v50 = vadd.f32 %v3674_v19, %v3455_v6  ;;  %v3832_v10 = vpop.f32.mrb[38].mxu0  ;;  %v3842_v58 = vpop.f32.mrb[38].mxu1 }
 0x134   : > { %2435 = vst.msk [vmem:[%s3480_s27 + $0x50] sm:$0xf] %vm2414_vm1, %v2888_v37  ;;  %v2955_v45 = vpack.c.bf16 %v1861_v38, %v1861_v38  ;;  %v2889_v21 = vpack.c.bf16 %v1795_v27, %v1795_v27  ;;  %v968_v51 = vadd.f32 %v3676_v22, %v3455_v6  ;;  %v1408_v3 = vmul.f32 0.01, %v976_v42  ;;  %v3844_v22 = vpop.f32.mrb[39].mxu0 }
 0x135   : > { %2499 = vst.msk [vmem:[%s3480_s27 + $0x150] sm:$0xf] %vm2414_vm1, %v2952_v30  ;;  %2438 = vst.msk [vmem:[%s3480_s27 + $0x5c] sm:$0xf] %vm2414_vm1, %v2891_v41  ;;  %v2953_v52 = vpack.c.bf16 %v1859_v31, %v1859_v31  ;;  %v1224_v57 = vadd.f32 %v3686_v7, %v3455_v6  ;;  %v979_v19 = vadd.f32 %v3688_v43, %v3455_v6  ;;  %v1472_v63 = vmul.f32 0.01, %v1232_v50 }
 0x136   : > { %2502 = vst.msk [vmem:[%s3480_s27 + $0x15c] sm:$0xf] %vm2414_vm1, %v2955_v45  ;;  %2436 = vst.msk [vmem:[%s3480_s27 + $0x54] sm:$0xf] %vm2414_vm1, %v2889_v21  ;;  %v1406_v2 = vmul.f32 0.01, %v968_v51  ;;  %v1235_v4 = vadd.f32 %v3698_v29, %v3455_v6  ;;  %v971_v11 = vadd.f32 %v3700_v49, %v3455_v6  ;;  %v1536_v43 = vmax.f32 %v976_v42, %v1408_v3 }
 0x137   : > { %v3854_v7 = vpop.f32.mrb[39].mxu1  ;;  %2500 = vst.msk [vmem:[%s3480_s27 + $0x154] sm:$0xf] %vm2414_vm1, %v2953_v52  ;;  %v1470_v16 = vmul.f32 0.01, %v1224_v57  ;;  %v1227_v5 = vadd.f32 %v3710_v54, %v3455_v6  ;;  %v1600_v24 = vmax.f32 %v1232_v50, %v1472_v63 }
 0x138   : > { %v1409_v18 = vmul.f32 0.01, %v979_v19  ;;  %v1534_v25 = vmax.f32 %v968_v51, %v1406_v2  ;;  %v1473_v12 = vmul.f32 0.01, %v1235_v4  ;;  %v1407_v48 = vmul.f32 0.01, %v971_v11 }
 0x139   : > { %v1668_v15 = vmul.f32 %v3458_v13, %v1536_v43  ;;  %v1598_v29 = vmax.f32 %v1224_v57, %v1470_v16  ;;  %v1471_v33 = vmul.f32 0.01, %v1227_v5  ;;  %v1732_v49 = vmul.f32 %v3458_v13, %v1600_v24  ;;  %v3863_v36 = vpop.f32.mrb[40].mxu0  ;;  %v3868_v30 = vpop.f32.mrb[40].mxu1 }
 0x13a   : > { %v1537_v32 = vmax.f32 %v979_v19, %v1409_v18  ;;  %v1666_v20 = vmul.f32 %v3458_v13, %v1534_v25  ;;  %v1601_v55 = vmax.f32 %v1235_v4, %v1473_v12  ;;  %v1535_v34 = vmax.f32 %v971_v11, %v1407_v48  ;;  %v3870_v41 = vpop.f32.mrb[41].mxu0  ;;  %v3876_v50 = vpop.f32.mrb[41].mxu1 }
 0x13b   : > { %v1800_v37 = vadd.f32 %v3460_v14, %v1668_v15  ;;  %v1730_v54 = vmul.f32 %v3458_v13, %v1598_v29  ;;  %v1599_v27 = vmax.f32 %v1227_v5, %v1471_v33  ;;  %v1864_v31 = vadd.f32 %v3460_v14, %v1732_v49  ;;  %v3878_v51 = vpop.f32.mrb[42].mxu0  ;;  %v3883_v63 = vpop.f32.mrb[42].mxu1 }
 0x13c   : > { %v1669_v38 = vmul.f32 %v3458_v13, %v1537_v32  ;;  %v1798_v42 = vadd.f32 %v3460_v14, %v1666_v20  ;;  %v1733_v45 = vmul.f32 %v3458_v13, %v1601_v55  ;;  %v1667_v21 = vmul.f32 %v3458_v13, %v1535_v34  ;;  %v3885_v2 = vpop.f32.mrb[43].mxu0  ;;  %v3889_v18 = vpop.f32.mrb[43].mxu1 }
 0x13d   : > { %v2894_v52 = vpack.c.bf16 %v1800_v37, %v1800_v37  ;;  %v1862_v3 = vadd.f32 %v3460_v14, %v1730_v54  ;;  %v1731_v19 = vmul.f32 %v3458_v13, %v1599_v27  ;;  %v2958_v4 = vpack.c.bf16 %v1864_v31, %v1864_v31 }
 0x13e   : > { %v1801_v57 = vadd.f32 %v3460_v14, %v1669_v38  ;;  %v2892_v11 = vpack.c.bf16 %v1798_v42, %v1798_v42  ;;  %v1865_v43 = vadd.f32 %v3460_v14, %v1733_v45  ;;  %v1799_v16 = vadd.f32 %v3460_v14, %v1667_v21 }
 0x13f   : > { %2441 = vst.msk [vmem:[%s3480_s27 + $0x68] sm:$0xf] %vm2414_vm1, %v2894_v52  ;;  %v2956_v5 = vpack.c.bf16 %v1862_v3, %v1862_v3  ;;  %v1863_v25 = vadd.f32 %v3460_v14, %v1731_v19  ;;  %v992_v12 = vadd.f32 %v3719_v53, %v3455_v6  ;;  %2505 = vst.msk [vmem:[%s3480_s27 + $0x168] sm:$0xf] %vm2414_vm1, %v2958_v4 }
 0x140   : > { %v2895_v24 = vpack.c.bf16 %v1801_v57, %v1801_v57  ;;  %2439 = vst.msk [vmem:[%s3480_s27 + $0x60] sm:$0xf] %vm2414_vm1, %v2892_v11  ;;  %v2959_v48 = vpack.c.bf16 %v1865_v43, %v1865_v43  ;;  %v2893_v15 = vpack.c.bf16 %v1799_v16, %v1799_v16  ;;  %v1248_v29 = vadd.f32 %v3724_v59, %v3455_v6 }
 0x141   : > { %v984_v32 = vadd.f32 %v3726_v62, %v3455_v6  ;;  %2503 = vst.msk [vmem:[%s3480_s27 + $0x160] sm:$0xf] %vm2414_vm1, %v2956_v5  ;;  %v2957_v33 = vpack.c.bf16 %v1863_v25, %v1863_v25  ;;  %v1412_v49 = vmul.f32 0.01, %v992_v12  ;;  %v1240_v53 = vadd.f32 %v3732_v8, %v3455_v6  ;;  %v3920_v37 = vpop.f32.mrb[44].mxu0  ;;  %v3926_v27 = vpop.f32.mrb[44].mxu1 }
 0x142   : > { %2442 = vst.msk [vmem:[%s3480_s27 + $0x6c] sm:$0xf] %vm2414_vm1, %v2895_v24  ;;  %v995_v20 = vadd.f32 %v3734_v9, %v3455_v6  ;;  %2506 = vst.msk [vmem:[%s3480_s27 + $0x16c] sm:$0xf] %vm2414_vm1, %v2959_v48  ;;  %v1476_v59 = vmul.f32 0.01, %v1248_v29  ;;  %v1251_v62 = vadd.f32 %v3739_v0, %v3455_v6  ;;  %v987_v34 = vadd.f32 %v3741_v23, %v3455_v6 }
 0x143   : > { %2440 = vst.msk [vmem:[%s3480_s27 + $0x64] sm:$0xf] %vm2414_vm1, %v2893_v15  ;;  %v1410_v55 = vmul.f32 0.01, %v984_v32  ;;  %2504 = vst.msk [vmem:[%s3480_s27 + $0x164] sm:$0xf] %vm2414_vm1, %v2957_v33  ;;  %v1540_v8 = vmax.f32 %v992_v12, %v1412_v49  ;;  %v1243_v9 = vadd.f32 %v3745_v28, %v3455_v6 }
 0x144   : > { %v1474_v54 = vmul.f32 0.01, %v1240_v53  ;;  %v1413_v38 = vmul.f32 0.01, %v995_v20  ;;  %v3928_v31 = vpop.f32.mrb[45].mxu0  ;;  %v1604_v42 = vmax.f32 %v1248_v29, %v1476_v59  ;;  %v3930_v52 = vpop.f32.mrb[45].mxu1 }
 0x145   : > { %v1538_v45 = vmax.f32 %v984_v32, %v1410_v55  ;;  %v1477_v0 = vmul.f32 0.01, %v1251_v62  ;;  %v1411_v21 = vmul.f32 0.01, %v987_v34  ;;  %v3932_v23 = vpop.f32.mrb[46].mxu0  ;;  %v1672_v3 = vmul.f32 %v3458_v13, %v1540_v8  ;;  %v3935_v11 = vpop.f32.mrb[46].mxu1 }
 0x146   : > { %v1602_v57 = vmax.f32 %v1240_v53, %v1474_v54  ;;  %v1541_v19 = vmax.f32 %v995_v20, %v1413_v38  ;;  %v1475_v4 = vmul.f32 0.01, %v1243_v9  ;;  %v3937_v28 = vpop.f32.mrb[47].mxu0  ;;  %v1736_v43 = vmul.f32 %v3458_v13, %v1604_v42  ;;  %v3941_v25 = vpop.f32.mrb[47].mxu1 }
 0x147   : > { %v1670_v16 = vmul.f32 %v3458_v13, %v1538_v45  ;;  %v1605_v5 = vmax.f32 %v1251_v62, %v1477_v0  ;;  %v1539_v24 = vmax.f32 %v987_v34, %v1411_v21  ;;  %v1804_v12 = vadd.f32 %v3460_v14, %v1672_v3 }
 0x148   : > { %v1734_v48 = vmul.f32 %v3458_v13, %v1602_v57  ;;  %v1673_v15 = vmul.f32 %v3458_v13, %v1541_v19  ;;  %v1603_v29 = vmax.f32 %v1243_v9, %v1475_v4  ;;  %v1868_v32 = vadd.f32 %v3460_v14, %v1736_v43 }
 0x149   : > { %v1802_v33 = vadd.f32 %v3460_v14, %v1670_v16  ;;  %v1737_v49 = vmul.f32 %v3458_v13, %v1605_v5  ;;  %v1671_v53 = vmul.f32 %v3458_v13, %v1539_v24  ;;  %v2898_v20 = vpack.c.bf16 %v1804_v12, %v1804_v12  ;;  %v3955_v9 = vpop.f32.mrb[48].mxu0  ;;  %v3962_v3 = vpop.f32.mrb[48].mxu1 }
 0x14a   : > { %v1866_v59 = vadd.f32 %v3460_v14, %v1734_v48  ;;  %v1805_v55 = vadd.f32 %v3460_v14, %v1673_v15  ;;  %v1735_v62 = vmul.f32 %v3458_v13, %v1603_v29  ;;  %v2962_v34 = vpack.c.bf16 %v1868_v32, %v1868_v32  ;;  %v3964_v57 = vpop.f32.mrb[49].mxu0  ;;  %v3974_v5 = vpop.f32.mrb[49].mxu1 }
 0x14b   : > { %v2896_v8 = vpack.c.bf16 %v1802_v33, %v1802_v33  ;;  %v1869_v54 = vadd.f32 %v3460_v14, %v1737_v49  ;;  %v1803_v38 = vadd.f32 %v3460_v14, %v1671_v53  ;;  %2445 = vst.msk [vmem:[%s3480_s27 + $0x78] sm:$0xf] %vm2414_vm1, %v2898_v20  ;;  %v1008_v21 = vadd.f32 %v3776_v44, %v3455_v6  ;;  %v3976_v44 = vpop.f32.mrb[50].mxu0  ;;  %v3986_v15 = vpop.f32.mrb[50].mxu1 }
 0x14c   : > { %v2960_v42 = vpack.c.bf16 %v1866_v59, %v1866_v59  ;;  %v2899_v45 = vpack.c.bf16 %v1805_v55, %v1805_v55  ;;  %v1867_v0 = vadd.f32 %v3460_v14, %v1735_v62  ;;  %2509 = vst.msk [vmem:[%s3480_s27 + $0x178] sm:$0xf] %vm2414_vm1, %v2962_v34  ;;  %v1264_v43 = vadd.f32 %v3782_v47, %v3455_v6 }
 0x14d   : > { %2443 = vst.msk [vmem:[%s3480_s27 + $0x70] sm:$0xf] %vm2414_vm1, %v2896_v8  ;;  %v2963_v19 = vpack.c.bf16 %v1869_v54, %v1869_v54  ;;  %v2897_v4 = vpack.c.bf16 %v1803_v38, %v1803_v38  ;;  %v1000_v16 = vadd.f32 %v3784_v61, %v3455_v6  ;;  %v1416_v12 = vmul.f32 0.01, %v1008_v21  ;;  %v3988_v61 = vpop.f32.mrb[51].mxu0 }
 0x14e   : > { %2507 = vst.msk [vmem:[%s3480_s27 + $0x170] sm:$0xf] %vm2414_vm1, %v2960_v42  ;;  %2446 = vst.msk [vmem:[%s3480_s27 + $0x7c] sm:$0xf] %vm2414_vm1, %v2899_v45  ;;  %v2961_v24 = vpack.c.bf16 %v1867_v0, %v1867_v0  ;;  %v1256_v48 = vadd.f32 %v3786_v56, %v3455_v6  ;;  %v1011_v47 = vadd.f32 %v3788_v26, %v3455_v6  ;;  %v1480_v29 = vmul.f32 0.01, %v1264_v43 }
 0x14f   : > { %2510 = vst.msk [vmem:[%s3480_s27 + $0x17c] sm:$0xf] %vm2414_vm1, %v2963_v19  ;;  %2444 = vst.msk [vmem:[%s3480_s27 + $0x74] sm:$0xf] %vm2414_vm1, %v2897_v4  ;;  %v1414_v32 = vmul.f32 0.01, %v1000_v16  ;;  %v1267_v33 = vadd.f32 %v3791_v1, %v3455_v6  ;;  %v1003_v49 = vadd.f32 %v3793_v46, %v3455_v6  ;;  %v1544_v26 = vmax.f32 %v1008_v21, %v1416_v12 }
 0x150   : > { %v3998_v56 = vpop.f32.mrb[51].mxu1  ;;  %2508 = vst.msk [vmem:[%s3480_s27 + $0x174] sm:$0xf] %vm2414_vm1, %v2961_v24  ;;  %v1478_v53 = vmul.f32 0.01, %v1256_v48  ;;  %v1259_v59 = vadd.f32 %v3797_v17, %v3455_v6  ;;  %v1608_v55 = vmax.f32 %v1264_v43, %v1480_v29 }
 0x151   : > { %v1417_v20 = vmul.f32 0.01, %v1011_v47  ;;  %v1542_v62 = vmax.f32 %v1000_v16, %v1414_v32  ;;  %v1481_v34 = vmul.f32 0.01, %v1267_v33  ;;  %v1415_v8 = vmul.f32 0.01, %v1003_v49 }
 0x152   : > { %v1676_v54 = vmul.f32 %v3458_v13, %v1544_v26  ;;  %v1606_v1 = vmax.f32 %v1256_v48, %v1478_v53  ;;  %v1479_v42 = vmul.f32 0.01, %v1259_v59  ;;  %v1740_v46 = vmul.f32 %v3458_v13, %v1608_v55  ;;  %v4007_v19 = vpop.f32.mrb[52].mxu0  ;;  %v4012_v24 = vpop.f32.mrb[52].mxu1 }
 0x153   : > { %v1545_v38 = vmax.f32 %v1011_v47, %v1417_v20  ;;  %v1674_v45 = vmul.f32 %v3458_v13, %v1542_v62  ;;  %v1609_v0 = vmax.f32 %v1267_v33, %v1481_v34  ;;  %v1543_v21 = vmax.f32 %v1003_v49, %v1415_v8  ;;  %v4014_v12 = vpop.f32.mrb[53].mxu0  ;;  %v4020_v33 = vpop.f32.mrb[53].mxu1 }
 0x154   : > { %v1808_v4 = vadd.f32 %v3460_v14, %v1676_v54  ;;  %v1738_v17 = vmul.f32 %v3458_v13, %v1606_v1  ;;  %v1607_v16 = vmax.f32 %v1259_v59, %v1479_v42  ;;  %v1872_v48 = vadd.f32 %v3460_v14, %v1740_v46  ;;  %v4022_v49 = vpop.f32.mrb[54].mxu0  ;;  %v4027_v55 = vpop.f32.mrb[54].mxu1 }
 0x155   : > { %v1677_v43 = vmul.f32 %v3458_v13, %v1545_v38  ;;  %v1806_v47 = vadd.f32 %v3460_v14, %v1674_v45  ;;  %v1741_v29 = vmul.f32 %v3458_v13, %v1609_v0  ;;  %v1675_v32 = vmul.f32 %v3458_v13, %v1543_v21  ;;  %v4029_v62 = vpop.f32.mrb[55].mxu0  ;;  %v4033_v38 = vpop.f32.mrb[55].mxu1 }
 0x156   : > { %v2902_v26 = vpack.c.bf16 %v1808_v4, %v1808_v4  ;;  %v1870_v53 = vadd.f32 %v3460_v14, %v1738_v17  ;;  %v1739_v59 = vmul.f32 %v3458_v13, %v1607_v16  ;;  %v2966_v34 = vpack.c.bf16 %v1872_v48, %v1872_v48 }
 0x157   : > { %v1809_v20 = vadd.f32 %v3460_v14, %v1677_v43  ;;  %v2900_v8 = vpack.c.bf16 %v1806_v47, %v1806_v47  ;;  %v1873_v54 = vadd.f32 %v3460_v14, %v1741_v29  ;;  %v1807_v1 = vadd.f32 %v3460_v14, %v1675_v32 }
 0x158   : > { %2449 = vst.msk [vmem:[%s3480_s27 + $0x88] sm:$0xf] %vm2414_vm1, %v2902_v26  ;;  %v2964_v42 = vpack.c.bf16 %v1870_v53, %v1870_v53  ;;  %v1871_v45 = vadd.f32 %v3460_v14, %v1739_v59  ;;  %v1024_v0 = vadd.f32 %v3811_v39, %v3455_v6  ;;  %2513 = vst.msk [vmem:[%s3480_s27 + $0x188] sm:$0xf] %vm2414_vm1, %v2966_v34 }
 0x159   : > { %v2903_v46 = vpack.c.bf16 %v1809_v20, %v1809_v20  ;;  %2447 = vst.msk [vmem:[%s3480_s27 + $0x80] sm:$0xf] %vm2414_vm1, %v2900_v8  ;;  %v2967_v21 = vpack.c.bf16 %v1873_v54, %v1873_v54  ;;  %v2901_v4 = vpack.c.bf16 %v1807_v1, %v1807_v1  ;;  %v1280_v17 = vadd.f32 %v3818_v35, %v3455_v6  ;;  %v4064_v26 = vpop.f32.mrb[56].mxu0  ;;  %v4070_v59 = vpop.f32.mrb[56].mxu1 }
 0x15a   : > { %v1016_v43 = vadd.f32 %v3820_v60, %v3455_v6  ;;  %2511 = vst.msk [vmem:[%s3480_s27 + $0x180] sm:$0xf] %vm2414_vm1, %v2964_v42  ;;  %v2965_v16 = vpack.c.bf16 %v1871_v45, %v1871_v45  ;;  %v1420_v48 = vmul.f32 0.01, %v1024_v0  ;;  %v1272_v39 = vadd.f32 %v3830_v40, %v3455_v6  ;;  %v4072_v34 = vpop.f32.mrb[57].mxu0  ;;  %v4074_v42 = vpop.f32.mrb[57].mxu1 }
 0x15b   : > { %2450 = vst.msk [vmem:[%s3480_s27 + $0x8c] sm:$0xf] %vm2414_vm1, %v2903_v46  ;;  %v1027_v47 = vadd.f32 %v3832_v10, %v3455_v6  ;;  %2514 = vst.msk [vmem:[%s3480_s27 + $0x18c] sm:$0xf] %vm2414_vm1, %v2967_v21  ;;  %v1484_v35 = vmul.f32 0.01, %v1280_v17  ;;  %v1283_v60 = vadd.f32 %v3842_v58, %v3455_v6  ;;  %v1019_v32 = vadd.f32 %v3844_v22, %v3455_v6 }
 0x15c   : > { %2448 = vst.msk [vmem:[%s3480_s27 + $0x84] sm:$0xf] %vm2414_vm1, %v2901_v4  ;;  %v1418_v29 = vmul.f32 0.01, %v1016_v43  ;;  %2512 = vst.msk [vmem:[%s3480_s27 + $0x184] sm:$0xf] %vm2414_vm1, %v2965_v16  ;;  %v1548_v40 = vmax.f32 %v1024_v0, %v1420_v48  ;;  %v1275_v10 = vadd.f32 %v3854_v7, %v3455_v6 }
 0x15d   : > { %v1482_v53 = vmul.f32 0.01, %v1272_v39  ;;  %v1421_v20 = vmul.f32 0.01, %v1027_v47  ;;  %v1612_v8 = vmax.f32 %v1280_v17, %v1484_v35  ;;  %v1485_v58 = vmul.f32 0.01, %v1283_v60 }
 0x15e   : > { %v1546_v54 = vmax.f32 %v1016_v43, %v1418_v29  ;;  %v1419_v1 = vmul.f32 0.01, %v1019_v32  ;;  %v4076_v22 = vpop.f32.mrb[58].mxu0  ;;  %v1680_v46 = vmul.f32 %v3458_v13, %v1548_v40  ;;  %v1483_v21 = vmul.f32 0.01, %v1275_v10  ;;  %v4079_v4 = vpop.f32.mrb[58].mxu1 }
 0x15f   : > { %4427 = vst [vmem:[#allocation2_spill] sm:$0xff] %v4076_v22  ;;  %v1610_v45 = vmax.f32 %v1272_v39, %v1482_v53  ;;  %v1549_v0 = vmax.f32 %v1027_v47, %v1421_v20  ;;  %v4081_v7 = vpop.f32.mrb[59].mxu0  ;;  %v1744_v16 = vmul.f32 %v3458_v13, %v1612_v8  ;;  %v1613_v43 = vmax.f32 %v1283_v60, %v1485_v58  ;;  %v4085_v35 = vpop.f32.mrb[59].mxu1 }
 0x160   : > { %v1678_v17 = vmul.f32 %v3458_v13, %v1546_v54  ;;  %v1547_v48 = vmax.f32 %v1019_v32, %v1419_v1  ;;  %v1812_v29 = vadd.f32 %v3460_v14, %v1680_v46  ;;  %v1611_v47 = vmax.f32 %v1275_v10, %v1483_v21 }
 0x161   : > { %v1742_v22 = vmul.f32 %v3458_v13, %v1610_v45  ;;  %v1681_v39 = vmul.f32 %v3458_v13, %v1549_v0  ;;  %v1876_v40 = vadd.f32 %v3460_v14, %v1744_v16  ;;  %v1745_v20 = vmul.f32 %v3458_v13, %v1613_v43  ;;  %v4099_v0 = vpop.f32.mrb[60].mxu0  ;;  %v4106_v43 = vpop.f32.mrb[60].mxu1 }
 0x162   : > { %v1810_v53 = vadd.f32 %v3460_v14, %v1678_v17  ;;  %v1679_v8 = vmul.f32 %v3458_v13, %v1547_v48  ;;  %v2906_v60 = vpack.c.bf16 %v1812_v29, %v1812_v29  ;;  %v1743_v58 = vmul.f32 %v3458_v13, %v1611_v47  ;;  %v4108_v48 = vpop.f32.mrb[61].mxu0 }
 0x163   : > { %v1874_v32 = vadd.f32 %v3460_v14, %v1742_v22  ;;  %v1813_v54 = vadd.f32 %v3460_v14, %v1681_v39  ;;  %v2970_v1 = vpack.c.bf16 %v1876_v40, %v1876_v40  ;;  %v1877_v10 = vadd.f32 %v3460_v14, %v1745_v20 }
 0x164   : > { %v2904_v46 = vpack.c.bf16 %v1810_v53, %v1810_v53  ;;  %v1811_v45 = vadd.f32 %v3460_v14, %v1679_v8  ;;  %2453 = vst.msk [vmem:[%s3480_s27 + $0x98] sm:$0xf] %vm2414_vm1, %v2906_v60  ;;  %v1875_v22 = vadd.f32 %v3460_v14, %v1743_v58  ;;  %v1040_v17 = vadd.f32 %v3863_v36, %v3455_v6  ;;  %v4118_v53 = vpop.f32.mrb[61].mxu1  ;;  %v4120_v36 = vpop.f32.mrb[62].mxu0 }
 0x165   : > { %v2968_v21 = vpack.c.bf16 %v1874_v32, %v1874_v32  ;;  %v2907_v16 = vpack.c.bf16 %v1813_v54, %v1813_v54  ;;  %2517 = vst.msk [vmem:[%s3480_s27 + $0x198] sm:$0xf] %vm2414_vm1, %v2970_v1  ;;  %v2971_v29 = vpack.c.bf16 %v1877_v10, %v1877_v10  ;;  %v1296_v47 = vadd.f32 %v3868_v30, %v3455_v6  ;;  %v4130_v32 = vpop.f32.mrb[62].mxu1 }
 0x166   : > { %2451 = vst.msk [vmem:[%s3480_s27 + $0x90] sm:$0xf] %vm2414_vm1, %v2904_v46  ;;  %v2905_v39 = vpack.c.bf16 %v1811_v45, %v1811_v45  ;;  %v1032_v40 = vadd.f32 %v3870_v41, %v3455_v6  ;;  %4428 = vst [vmem:[#allocation3_spill] sm:$0xff] %v4120_v36  ;;  %v2969_v20 = vpack.c.bf16 %v1875_v22, %v1875_v22  ;;  %v1424_v8 = vmul.f32 0.01, %v1040_v17  ;;  %v4132_v41 = vpop.f32.mrb[63].mxu0 }
 0x167   : > { %2515 = vst.msk [vmem:[%s3480_s27 + $0x190] sm:$0xf] %vm2414_vm1, %v2968_v21  ;;  %2454 = vst.msk [vmem:[%s3480_s27 + $0x9c] sm:$0xf] %vm2414_vm1, %v2907_v16  ;;  %v1288_v60 = vadd.f32 %v3876_v50, %v3455_v6  ;;  %v1043_v30 = vadd.f32 %v3878_v51, %v3455_v6  ;;  %v1488_v54 = vmul.f32 0.01, %v1296_v47  ;;  %v1299_v1 = vadd.f32 %v3883_v63, %v3455_v6 }
 0x168   : > { %4429 = vst [vmem:[#allocation4_spill] sm:$0xff] %v4130_v32  ;;  %4430 = vst [vmem:[#allocation5_spill] sm:$0xff] %v4132_v41  ;;  %v1422_v58 = vmul.f32 0.01, %v1032_v40  ;;  %v1035_v46 = vadd.f32 %v3885_v2, %v3455_v6  ;;  %v4142_v50 = vpop.f32.mrb[63].mxu1  ;;  %v1552_v51 = vmax.f32 %v1040_v17, %v1424_v8  ;;  %v1291_v21 = vadd.f32 %v3889_v18, %v3455_v6 }
 0x169   : > { %2518 = vst.msk [vmem:[%s3480_s27 + $0x19c] sm:$0xf] %vm2414_vm1, %v2971_v29  ;;  %2452 = vst.msk [vmem:[%s3480_s27 + $0x94] sm:$0xf] %vm2414_vm1, %v2905_v39  ;;  %v1486_v10 = vmul.f32 0.01, %v1288_v60  ;;  %v1616_v16 = vmax.f32 %v1296_v47, %v1488_v54 }
 0x16a   : > { %4431 = vst [vmem:[#allocation6_spill] sm:$0xff] %v4142_v50  ;;  %2516 = vst.msk [vmem:[%s3480_s27 + $0x194] sm:$0xf] %vm2414_vm1, %v2969_v20  ;;  %v1425_v45 = vmul.f32 0.01, %v1043_v30  ;;  %v1550_v22 = vmax.f32 %v1032_v40, %v1422_v58  ;;  %v1684_v41 = vmul.f32 %v3458_v13, %v1552_v51 }
 0x16b   : > { %v1489_v29 = vmul.f32 0.01, %v1299_v1  ;;  %v1423_v39 = vmul.f32 0.01, %v1035_v46  ;;  %v1614_v63 = vmax.f32 %v1288_v60, %v1486_v10  ;;  %v1487_v36 = vmul.f32 0.01, %v1291_v21 }
 0x16c   : > { %v1553_v32 = vmax.f32 %v1043_v30, %v1425_v45  ;;  %v1748_v2 = vmul.f32 %v3458_v13, %v1616_v16  ;;  %v1682_v50 = vmul.f32 %v3458_v13, %v1550_v22  ;;  %v1816_v8 = vadd.f32 %v3460_v14, %v1684_v41 }
 0x16d   : > { %v1617_v20 = vmax.f32 %v1299_v1, %v1489_v29  ;;  %v1551_v17 = vmax.f32 %v1035_v46, %v1423_v39  ;;  %v1746_v18 = vmul.f32 %v3458_v13, %v1614_v63  ;;  %v1615_v40 = vmax.f32 %v1291_v21, %v1487_v36 }
 0x16e   : > { %v1685_v47 = vmul.f32 %v3458_v13, %v1553_v32  ;;  %v1880_v54 = vadd.f32 %v3460_v14, %v1748_v2  ;;  %v1814_v60 = vadd.f32 %v3460_v14, %v1682_v50  ;;  %v2910_v1 = vpack.c.bf16 %v1816_v8, %v1816_v8 }
 0x16f   : > { %v1749_v30 = vmul.f32 %v3458_v13, %v1617_v20  ;;  %v1683_v58 = vmul.f32 %v3458_v13, %v1551_v17  ;;  %v1878_v46 = vadd.f32 %v3460_v14, %v1746_v18  ;;  %v1747_v51 = vmul.f32 %v3458_v13, %v1615_v40 }
 0x170   : > { %v1817_v41 = vadd.f32 %v3460_v14, %v1685_v47  ;;  %v2974_v32 = vpack.c.bf16 %v1880_v54, %v1880_v54  ;;  %v2908_v36 = vpack.c.bf16 %v1814_v60, %v1814_v60  ;;  %2457 = vst.msk [vmem:[%s3480_s27 + $0xa8] sm:$0xf] %vm2414_vm1, %v2910_v1  ;;  %v1056_v22 = vadd.f32 %v3920_v37, %v3455_v6 }
 0x171   : > { %v1881_v10 = vadd.f32 %v3460_v14, %v1749_v30  ;;  %v1815_v50 = vadd.f32 %v3460_v14, %v1683_v58  ;;  %v2972_v45 = vpack.c.bf16 %v1878_v46, %v1878_v46  ;;  %v1879_v16 = vadd.f32 %v3460_v14, %v1747_v51 }
 0x172   : > { %v2911_v21 = vpack.c.bf16 %v1817_v41, %v1817_v41  ;;  %2521 = vst.msk [vmem:[%s3480_s27 + $0x1a8] sm:$0xf] %vm2414_vm1, %v2974_v32  ;;  %2455 = vst.msk [vmem:[%s3480_s27 + $0xa0] sm:$0xf] %vm2414_vm1, %v2908_v36  ;;  %v1312_v63 = vadd.f32 %v3926_v27, %v3455_v6  ;;  %v1048_v2 = vadd.f32 %v3928_v31, %v3455_v6  ;;  %v1428_v17 = vmul.f32 0.01, %v1056_v22 }
 0x173   : > { %v2975_v29 = vpack.c.bf16 %v1881_v10, %v1881_v10  ;;  %v2909_v39 = vpack.c.bf16 %v1815_v50, %v1815_v50  ;;  %2519 = vst.msk [vmem:[%s3480_s27 + $0x1a0] sm:$0xf] %vm2414_vm1, %v2972_v45  ;;  %v2973_v20 = vpack.c.bf16 %v1879_v16, %v1879_v16  ;;  %v1304_v37 = vadd.f32 %v3930_v52, %v3455_v6 }
 0x174   : > { %2458 = vst.msk [vmem:[%s3480_s27 + $0xac] sm:$0xf] %vm2414_vm1, %v2911_v21  ;;  %v1059_v8 = vadd.f32 %v3932_v23, %v3455_v6  ;;  %v1492_v27 = vmul.f32 0.01, %v1312_v63  ;;  %v1426_v18 = vmul.f32 0.01, %v1048_v2  ;;  %v1315_v31 = vadd.f32 %v3935_v11, %v3455_v6 }
 0x175   : > { %2522 = vst.msk [vmem:[%s3480_s27 + $0x1ac] sm:$0xf] %vm2414_vm1, %v2975_v29  ;;  %2456 = vst.msk [vmem:[%s3480_s27 + $0xa4] sm:$0xf] %vm2414_vm1, %v2909_v39  ;;  %v1051_v47 = vadd.f32 %v3937_v28, %v3455_v6  ;;  %v1556_v40 = vmax.f32 %v1056_v22, %v1428_v17  ;;  %v1490_v54 = vmul.f32 0.01, %v1304_v37  ;;  %v1307_v23 = vadd.f32 %v3941_v25, %v3455_v6 }
 0x176   : > { %2520 = vst.msk [vmem:[%s3480_s27 + $0x1a4] sm:$0xf] %vm2414_vm1, %v2973_v20  ;;  %v1429_v52 = vmul.f32 0.01, %v1059_v8  ;;  %v1620_v60 = vmax.f32 %v1312_v63, %v1492_v27  ;;  %v1554_v30 = vmax.f32 %v1048_v2, %v1426_v18  ;;  %v1493_v58 = vmul.f32 0.01, %v1315_v31 }
 0x177   : > { %v1427_v1 = vmul.f32 0.01, %v1051_v47  ;;  %v1688_v46 = vmul.f32 %v3458_v13, %v1556_v40  ;;  %v1618_v41 = vmax.f32 %v1304_v37, %v1490_v54  ;;  %v1491_v11 = vmul.f32 0.01, %v1307_v23 }
 0x178   : > { %v1557_v51 = vmax.f32 %v1059_v8, %v1429_v52  ;;  %v1752_v32 = vmul.f32 %v3458_v13, %v1620_v60  ;;  %v1686_v28 = vmul.f32 %v3458_v13, %v1554_v30  ;;  %v1621_v36 = vmax.f32 %v1315_v31, %v1493_v58 }
 0x179   : > { %v1555_v10 = vmax.f32 %v1051_v47, %v1427_v1  ;;  %v1820_v50 = vadd.f32 %v3460_v14, %v1688_v46  ;;  %v1750_v25 = vmul.f32 %v3458_v13, %v1618_v41  ;;  %v1619_v21 = vmax.f32 %v1307_v23, %v1491_v11 }
 0x17a   : > { %v1689_v45 = vmul.f32 %v3458_v13, %v1557_v51  ;;  %v1884_v16 = vadd.f32 %v3460_v14, %v1752_v32  ;;  %v1818_v22 = vadd.f32 %v3460_v14, %v1686_v28  ;;  %v1753_v29 = vmul.f32 %v3458_v13, %v1621_v36 }
 0x17b   : > { %v1687_v39 = vmul.f32 %v3458_v13, %v1555_v10  ;;  %v2914_v63 = vpack.c.bf16 %v1820_v50, %v1820_v50  ;;  %v1882_v2 = vadd.f32 %v3460_v14, %v1750_v25  ;;  %v1751_v17 = vmul.f32 %v3458_v13, %v1619_v21 }
 0x17c   : > { %v1821_v20 = vadd.f32 %v3460_v14, %v1689_v45  ;;  %v2978_v37 = vpack.c.bf16 %v1884_v16, %v1884_v16  ;;  %v2912_v8 = vpack.c.bf16 %v1818_v22, %v1818_v22  ;;  %v1885_v27 = vadd.f32 %v3460_v14, %v1753_v29 }
 0x17d   : > { %v1819_v18 = vadd.f32 %v3460_v14, %v1687_v39  ;;  %2461 = vst.msk [vmem:[%s3480_s27 + $0xb8] sm:$0xf] %vm2414_vm1, %v2914_v63  ;;  %v2976_v31 = vpack.c.bf16 %v1882_v2, %v1882_v2  ;;  %v1883_v40 = vadd.f32 %v3460_v14, %v1751_v17  ;;  %v1072_v54 = vadd.f32 %v3955_v9, %v3455_v6 }
 0x17e   : > { %v2915_v47 = vpack.c.bf16 %v1821_v20, %v1821_v20  ;;  %2525 = vst.msk [vmem:[%s3480_s27 + $0x1b8] sm:$0xf] %vm2414_vm1, %v2978_v37  ;;  %2459 = vst.msk [vmem:[%s3480_s27 + $0xb0] sm:$0xf] %vm2414_vm1, %v2912_v8  ;;  %v2979_v52 = vpack.c.bf16 %v1885_v27, %v1885_v27  ;;  %v1328_v60 = vadd.f32 %v3962_v3, %v3455_v6 }
 0x17f   : > { %v2913_v23 = vpack.c.bf16 %v1819_v18, %v1819_v18  ;;  %v1064_v30 = vadd.f32 %v3964_v57, %v3455_v6  ;;  %2523 = vst.msk [vmem:[%s3480_s27 + $0x1b0] sm:$0xf] %vm2414_vm1, %v2976_v31  ;;  %v2977_v58 = vpack.c.bf16 %v1883_v40, %v1883_v40  ;;  %v1432_v1 = vmul.f32 0.01, %v1072_v54 }
 0x180   : > { %2462 = vst.msk [vmem:[%s3480_s27 + $0xbc] sm:$0xf] %vm2414_vm1, %v2915_v47  ;;  %v1320_v9 = vadd.f32 %v3974_v5, %v3455_v6  ;;  %v1075_v46 = vadd.f32 %v3976_v44, %v3455_v6  ;;  %2526 = vst.msk [vmem:[%s3480_s27 + $0x1bc] sm:$0xf] %vm2414_vm1, %v2979_v52  ;;  %v1496_v3 = vmul.f32 0.01, %v1328_v60  ;;  %v1331_v57 = vadd.f32 %v3986_v15, %v3455_v6 }
 0x181   : > { %2460 = vst.msk [vmem:[%s3480_s27 + $0xb4] sm:$0xf] %vm2414_vm1, %v2913_v23  ;;  %v1430_v41 = vmul.f32 0.01, %v1064_v30  ;;  %v1067_v51 = vadd.f32 %v3988_v61, %v3455_v6  ;;  %2524 = vst.msk [vmem:[%s3480_s27 + $0x1b4] sm:$0xf] %vm2414_vm1, %v2977_v58  ;;  %v1560_v11 = vmax.f32 %v1072_v54, %v1432_v1  ;;  %v1323_v44 = vadd.f32 %v3998_v56, %v3455_v6 }
 0x182   : > { %v1494_v32 = vmul.f32 0.01, %v1320_v9  ;;  %v1433_v5 = vmul.f32 0.01, %v1075_v46  ;;  %v1624_v28 = vmax.f32 %v1328_v60, %v1496_v3  ;;  %v1497_v10 = vmul.f32 0.01, %v1331_v57 }
 0x183   : > { %v1558_v36 = vmax.f32 %v1064_v30, %v1430_v41  ;;  %v1431_v50 = vmul.f32 0.01, %v1067_v51  ;;  %v1692_v25 = vmul.f32 %v3458_v13, %v1560_v11  ;;  %v1495_v15 = vmul.f32 0.01, %v1323_v44 }
 0x184   : > { %v1622_v45 = vmax.f32 %v1320_v9, %v1494_v32  ;;  %v1561_v21 = vmax.f32 %v1075_v46, %v1433_v5  ;;  %v1756_v16 = vmul.f32 %v3458_v13, %v1624_v28  ;;  %v1625_v22 = vmax.f32 %v1331_v57, %v1497_v10 }
 0x185   : > { %v1690_v61 = vmul.f32 %v3458_v13, %v1558_v36  ;;  %v1559_v29 = vmax.f32 %v1067_v51, %v1431_v50  ;;  %v1824_v39 = vadd.f32 %v3460_v14, %v1692_v25  ;;  %v1623_v2 = vmax.f32 %v1323_v44, %v1495_v15 }
 0x186   : > { %v1754_v56 = vmul.f32 %v3458_v13, %v1622_v45  ;;  %v1693_v63 = vmul.f32 %v3458_v13, %v1561_v21  ;;  %v1888_v20 = vadd.f32 %v3460_v14, %v1756_v16  ;;  %v1757_v37 = vmul.f32 %v3458_v13, %v1625_v22 }
 0x187   : > { %v1822_v17 = vadd.f32 %v3460_v14, %v1690_v61  ;;  %v1691_v8 = vmul.f32 %v3458_v13, %v1559_v29  ;;  %v2918_v27 = vpack.c.bf16 %v1824_v39, %v1824_v39  ;;  %v1755_v47 = vmul.f32 %v3458_v13, %v1623_v2 }
 0x188   : > { %v1886_v18 = vadd.f32 %v3460_v14, %v1754_v56  ;;  %v1825_v31 = vadd.f32 %v3460_v14, %v1693_v63  ;;  %v2982_v40 = vpack.c.bf16 %v1888_v20, %v1888_v20  ;;  %v1889_v52 = vadd.f32 %v3460_v14, %v1757_v37 }
 0x189   : > { %v2916_v54 = vpack.c.bf16 %v1822_v17, %v1822_v17  ;;  %v1823_v23 = vadd.f32 %v3460_v14, %v1691_v8  ;;  %2465 = vst.msk [vmem:[%s3480_s27 + $0xc8] sm:$0xf] %vm2414_vm1, %v2918_v27  ;;  %v1887_v58 = vadd.f32 %v3460_v14, %v1755_v47  ;;  %v1088_v1 = vadd.f32 %v4007_v19, %v3455_v6 }
 0x18a   : > { %v2980_v60 = vpack.c.bf16 %v1886_v18, %v1886_v18  ;;  %v2919_v30 = vpack.c.bf16 %v1825_v31, %v1825_v31  ;;  %2529 = vst.msk [vmem:[%s3480_s27 + $0x1c8] sm:$0xf] %vm2414_vm1, %v2982_v40  ;;  %v2983_v9 = vpack.c.bf16 %v1889_v52, %v1889_v52  ;;  %v1344_v3 = vadd.f32 %v4012_v24, %v3455_v6 }
 0x18b   : > { %2463 = vst.msk [vmem:[%s3480_s27 + $0xc0] sm:$0xf] %vm2414_vm1, %v2916_v54  ;;  %v2917_v46 = vpack.c.bf16 %v1823_v23, %v1823_v23  ;;  %v1080_v41 = vadd.f32 %v4014_v12, %v3455_v6  ;;  %v2981_v57 = vpack.c.bf16 %v1887_v58, %v1887_v58  ;;  %v1436_v51 = vmul.f32 0.01, %v1088_v1 }
 0x18c   : > { %2527 = vst.msk [vmem:[%s3480_s27 + $0x1c0] sm:$0xf] %vm2414_vm1, %v2980_v60  ;;  %2466 = vst.msk [vmem:[%s3480_s27 + $0xcc] sm:$0xf] %vm2414_vm1, %v2919_v30  ;;  %v1336_v19 = vadd.f32 %v4020_v33, %v3455_v6  ;;  %v1091_v11 = vadd.f32 %v4022_v49, %v3455_v6  ;;  %v1500_v24 = vmul.f32 0.01, %v1344_v3  ;;  %v1347_v12 = vadd.f32 %v4027_v55, %v3455_v6 }
 0x18d   : > { %2530 = vst.msk [vmem:[%s3480_s27 + $0x1cc] sm:$0xf] %vm2414_vm1, %v2983_v9  ;;  %2464 = vst.msk [vmem:[%s3480_s27 + $0xc4] sm:$0xf] %vm2414_vm1, %v2917_v46  ;;  %v1434_v32 = vmul.f32 0.01, %v1080_v41  ;;  %v1083_v5 = vadd.f32 %v4029_v62, %v3455_v6  ;;  %v1564_v44 = vmax.f32 %v1088_v1, %v1436_v51  ;;  %v1339_v49 = vadd.f32 %v4033_v38, %v3455_v6 }
 0x18e   : > { %2528 = vst.msk [vmem:[%s3480_s27 + $0x1c4] sm:$0xf] %vm2414_vm1, %v2981_v57  ;;  %v1498_v28 = vmul.f32 0.01, %v1336_v19  ;;  %v1437_v33 = vmul.f32 0.01, %v1091_v11  ;;  %v1628_v36 = vmax.f32 %v1344_v3, %v1500_v24  ;;  %v1104_v30 = vadd.f32 %v4064_v26, %v3455_v6 }
 0x18f   : > { %v1562_v10 = vmax.f32 %v1080_v41, %v1434_v32  ;;  %v1501_v50 = vmul.f32 0.01, %v1347_v12  ;;  %v1435_v25 = vmul.f32 0.01, %v1083_v5  ;;  %v1696_v45 = vmul.f32 %v3458_v13, %v1564_v44  ;;  %v4432_v57 = vld [vmem:[#allocation2_spill] sm:$0xff] }
 0x190   : > { %v1626_v21 = vmax.f32 %v1336_v19, %v1498_v28  ;;  %v1565_v15 = vmax.f32 %v1091_v11, %v1437_v33  ;;  %v1499_v55 = vmul.f32 0.01, %v1339_v49  ;;  %v1760_v16 = vmul.f32 %v3458_v13, %v1628_v36 }
 0x191   : > { %v1694_v62 = vmul.f32 %v3458_v13, %v1562_v10  ;;  %v1629_v61 = vmax.f32 %v1347_v12, %v1501_v50  ;;  %v1563_v22 = vmax.f32 %v1083_v5, %v1435_v25  ;;  %v1828_v29 = vadd.f32 %v3460_v14, %v1696_v45 }
 0x192   : > { %v1758_v38 = vmul.f32 %v3458_v13, %v1626_v21  ;;  %v1697_v39 = vmul.f32 %v3458_v13, %v1565_v15  ;;  %v1627_v56 = vmax.f32 %v1339_v49, %v1499_v55  ;;  %v1892_v63 = vadd.f32 %v3460_v14, %v1760_v16 }
 0x193   : > { %v1826_v2 = vadd.f32 %v3460_v14, %v1694_v62  ;;  %v1761_v20 = vmul.f32 %v3458_v13, %v1629_v61  ;;  %v1695_v17 = vmul.f32 %v3458_v13, %v1563_v22  ;;  %v2922_v37 = vpack.c.bf16 %v1828_v29, %v1828_v29 }
 0x194   : > { %v1890_v8 = vadd.f32 %v3460_v14, %v1758_v38  ;;  %v1829_v27 = vadd.f32 %v3460_v14, %v1697_v39  ;;  %v1759_v18 = vmul.f32 %v3458_v13, %v1627_v56  ;;  %v2986_v31 = vpack.c.bf16 %v1892_v63, %v1892_v63 }
 0x195   : > { %v2920_v47 = vpack.c.bf16 %v1826_v2, %v1826_v2  ;;  %v1893_v40 = vadd.f32 %v3460_v14, %v1761_v20  ;;  %v1827_v54 = vadd.f32 %v3460_v14, %v1695_v17  ;;  %2469 = vst.msk [vmem:[%s3480_s27 + $0xd8] sm:$0xf] %vm2414_vm1, %v2922_v37  ;;  %v1360_v9 = vadd.f32 %v4070_v59, %v3455_v6 }
 0x196   : > { %v2984_v52 = vpack.c.bf16 %v1890_v8, %v1890_v8  ;;  %v2923_v23 = vpack.c.bf16 %v1829_v27, %v1829_v27  ;;  %v1891_v60 = vadd.f32 %v3460_v14, %v1759_v18  ;;  %2533 = vst.msk [vmem:[%s3480_s27 + $0x1d8] sm:$0xf] %vm2414_vm1, %v2986_v31  ;;  %v1096_v46 = vadd.f32 %v4072_v34, %v3455_v6 }
 0x197   : > { %2467 = vst.msk [vmem:[%s3480_s27 + $0xd0] sm:$0xf] %vm2414_vm1, %v2920_v47  ;;  %v2987_v58 = vpack.c.bf16 %v1893_v40, %v1893_v40  ;;  %v2921_v1 = vpack.c.bf16 %v1827_v54, %v1827_v54  ;;  %v1440_v41 = vmul.f32 0.01, %v1104_v30  ;;  %v1352_v26 = vadd.f32 %v4074_v42, %v3455_v6 }
 0x198   : > { %2531 = vst.msk [vmem:[%s3480_s27 + $0x1d0] sm:$0xf] %vm2414_vm1, %v2984_v52  ;;  %2470 = vst.msk [vmem:[%s3480_s27 + $0xdc] sm:$0xf] %vm2414_vm1, %v2923_v23  ;;  %v2985_v3 = vpack.c.bf16 %v1891_v60, %v1891_v60  ;;  %v1107_v51 = vadd.f32 %v4432_v57, %v3455_v6  ;;  %v1504_v59 = vmul.f32 0.01, %v1360_v9  ;;  %v1363_v34 = vadd.f32 %v4079_v4, %v3455_v6 }
 0x199   : > { %2534 = vst.msk [vmem:[%s3480_s27 + $0x1dc] sm:$0xf] %vm2414_vm1, %v2987_v58  ;;  %2468 = vst.msk [vmem:[%s3480_s27 + $0xd4] sm:$0xf] %vm2414_vm1, %v2921_v1  ;;  %v1438_v19 = vmul.f32 0.01, %v1096_v46  ;;  %v1099_v11 = vadd.f32 %v4081_v7, %v3455_v6  ;;  %v1568_v24 = vmax.f32 %v1104_v30, %v1440_v41  ;;  %v1355_v12 = vadd.f32 %v4085_v35, %v3455_v6 }
 0x19a   : > { %2532 = vst.msk [vmem:[%s3480_s27 + $0x1d4] sm:$0xf] %vm2414_vm1, %v2985_v3  ;;  %v1502_v32 = vmul.f32 0.01, %v1352_v26  ;;  %v1441_v42 = vmul.f32 0.01, %v1107_v51  ;;  %v1632_v5 = vmax.f32 %v1360_v9, %v1504_v59  ;;  %v1120_v18 = vadd.f32 %v4099_v0, %v3455_v6 }
 0x19b   : > { %v1566_v44 = vmax.f32 %v1096_v46, %v1438_v19  ;;  %v1505_v28 = vmul.f32 0.01, %v1363_v34  ;;  %v1439_v33 = vmul.f32 0.01, %v1099_v11  ;;  %v1700_v49 = vmul.f32 %v3458_v13, %v1568_v24  ;;  %v4433_v60 = vld [vmem:[#allocation3_spill] sm:$0xff]  ;;  %v4435_v9 = vld [vmem:[#allocation5_spill] sm:$0xff] }
 0x19c   : > { %v1630_v36 = vmax.f32 %v1352_v26, %v1502_v32  ;;  %v1569_v10 = vmax.f32 %v1107_v51, %v1441_v42  ;;  %v1503_v4 = vmul.f32 0.01, %v1355_v12  ;;  %v1764_v50 = vmul.f32 %v3458_v13, %v1632_v5  ;;  %v4436_v26 = vld [vmem:[#allocation6_spill] sm:$0xff] }
 0x19d   : > { %v1698_v7 = vmul.f32 %v3458_v13, %v1566_v44  ;;  %v1633_v25 = vmax.f32 %v1363_v34, %v1505_v28  ;;  %v1567_v45 = vmax.f32 %v1099_v11, %v1439_v33  ;;  %v1832_v21 = vadd.f32 %v3460_v14, %v1700_v49 }
 0x19e   : > { %v1762_v35 = vmul.f32 %v3458_v13, %v1630_v36  ;;  %v1701_v15 = vmul.f32 %v3458_v13, %v1569_v10  ;;  %v1631_v55 = vmax.f32 %v1355_v12, %v1503_v4  ;;  %v1896_v16 = vadd.f32 %v3460_v14, %v1764_v50 }
 0x19f   : > { %v1830_v62 = vadd.f32 %v3460_v14, %v1698_v7  ;;  %v1765_v61 = vmul.f32 %v3458_v13, %v1633_v25  ;;  %v1699_v22 = vmul.f32 %v3458_v13, %v1567_v45  ;;  %v2926_v29 = vpack.c.bf16 %v1832_v21, %v1832_v21 }
 0x1a0   : > { %v1894_v38 = vadd.f32 %v3460_v14, %v1762_v35  ;;  %v1833_v39 = vadd.f32 %v3460_v14, %v1701_v15  ;;  %v1763_v56 = vmul.f32 %v3458_v13, %v1631_v55  ;;  %v2990_v63 = vpack.c.bf16 %v1896_v16, %v1896_v16 }
 0x1a1   : > { %v2924_v2 = vpack.c.bf16 %v1830_v62, %v1830_v62  ;;  %v1897_v20 = vadd.f32 %v3460_v14, %v1765_v61  ;;  %v1831_v17 = vadd.f32 %v3460_v14, %v1699_v22  ;;  %2473 = vst.msk [vmem:[%s3480_s27 + $0xe8] sm:$0xf] %vm2414_vm1, %v2926_v29  ;;  %v1376_v40 = vadd.f32 %v4106_v43, %v3455_v6 }
 0x1a2   : > { %v2988_v37 = vpack.c.bf16 %v1894_v38, %v1894_v38  ;;  %v2927_v8 = vpack.c.bf16 %v1833_v39, %v1833_v39  ;;  %v1895_v27 = vadd.f32 %v3460_v14, %v1763_v56  ;;  %2537 = vst.msk [vmem:[%s3480_s27 + $0x1e8] sm:$0xf] %vm2414_vm1, %v2990_v63  ;;  %v1112_v54 = vadd.f32 %v4108_v48, %v3455_v6  ;;  %v4434_v48 = vld [vmem:[#allocation4_spill] sm:$0xff] }
 0x1a3   : > { %2471 = vst.msk [vmem:[%s3480_s27 + $0xe0] sm:$0xf] %vm2414_vm1, %v2924_v2  ;;  %v2991_v31 = vpack.c.bf16 %v1897_v20, %v1897_v20  ;;  %v2925_v47 = vpack.c.bf16 %v1831_v17, %v1831_v17  ;;  %v1444_v23 = vmul.f32 0.01, %v1120_v18  ;;  %v1368_v0 = vadd.f32 %v4118_v53, %v3455_v6 }
 0x1a4   : > { %2535 = vst.msk [vmem:[%s3480_s27 + $0x1e0] sm:$0xf] %vm2414_vm1, %v2988_v37  ;;  %2474 = vst.msk [vmem:[%s3480_s27 + $0xec] sm:$0xf] %vm2414_vm1, %v2927_v8  ;;  %v2989_v52 = vpack.c.bf16 %v1895_v27, %v1895_v27  ;;  %v1123_v30 = vadd.f32 %v4433_v60, %v3455_v6  ;;  %v1508_v43 = vmul.f32 0.01, %v1376_v40  ;;  %v1379_v1 = vadd.f32 %v4434_v48, %v3455_v6 }
 0x1a5   : > { %2538 = vst.msk [vmem:[%s3480_s27 + $0x1ec] sm:$0xf] %vm2414_vm1, %v2991_v31  ;;  %2472 = vst.msk [vmem:[%s3480_s27 + $0xe4] sm:$0xf] %vm2414_vm1, %v2925_v47  ;;  %v1442_v58 = vmul.f32 0.01, %v1112_v54  ;;  %v1115_v46 = vadd.f32 %v4435_v9, %v3455_v6  ;;  %v1572_v3 = vmax.f32 %v1120_v18, %v1444_v23  ;;  %v1371_v57 = vadd.f32 %v4436_v26, %v3455_v6 }
 0x1a6   : > { %2536 = vst.msk [vmem:[%s3480_s27 + $0x1e4] sm:$0xf] %vm2414_vm1, %v2989_v52  ;;  %v1506_v41 = vmul.f32 0.01, %v1368_v0  ;;  %v1445_v53 = vmul.f32 0.01, %v1123_v30  ;;  %v1636_v51 = vmax.f32 %v1376_v40, %v1508_v43 }
 0x1a7   : > { %v1570_v59 = vmax.f32 %v1112_v54, %v1442_v58  ;;  %v1509_v19 = vmul.f32 0.01, %v1379_v1  ;;  %v1443_v34 = vmul.f32 0.01, %v1115_v46  ;;  %v1704_v11 = vmul.f32 %v3458_v13, %v1572_v3 }
 0x1a8   : > { %v1634_v24 = vmax.f32 %v1368_v0, %v1506_v41  ;;  %v1573_v32 = vmax.f32 %v1123_v30, %v1445_v53  ;;  %v1507_v42 = vmul.f32 0.01, %v1371_v57  ;;  %v1768_v12 = vmul.f32 %v3458_v13, %v1636_v51 }
 0x1a9   : > { %v1702_v5 = vmul.f32 %v3458_v13, %v1570_v59  ;;  %v1637_v44 = vmax.f32 %v1379_v1, %v1509_v19  ;;  %v1571_v28 = vmax.f32 %v1115_v46, %v1443_v34  ;;  %v1836_v33 = vadd.f32 %v3460_v14, %v1704_v11 }
 0x1aa   : > { %v1766_v6 = vmul.f32 %v3458_v13, %v1634_v24  ;;  %v1705_v49 = vmul.f32 %v3458_v13, %v1573_v32  ;;  %v1635_v36 = vmax.f32 %v1371_v57, %v1507_v42  ;;  %v1900_v10 = vadd.f32 %v3460_v14, %v1768_v12 }
 0x1ab   : > { %v1834_v4 = vadd.f32 %v3460_v14, %v1702_v5  ;;  %v1769_v50 = vmul.f32 %v3458_v13, %v1637_v44  ;;  %v1703_v7 = vmul.f32 %v3458_v13, %v1571_v28  ;;  %v2930_v25 = vpack.c.bf16 %v1836_v33, %v1836_v33 }
 0x1ac   : > { %v1898_v45 = vadd.f32 %v3460_v14, %v1766_v6  ;;  %v1837_v21 = vadd.f32 %v3460_v14, %v1705_v49  ;;  %v1767_v35 = vmul.f32 %v3458_v13, %v1635_v36  ;;  %v2994_v15 = vpack.c.bf16 %v1900_v10, %v1900_v10 }
 0x1ad   : > { %v2928_v55 = vpack.c.bf16 %v1834_v4, %v1834_v4  ;;  %v1901_v16 = vadd.f32 %v3460_v14, %v1769_v50  ;;  %v1835_v62 = vadd.f32 %v3460_v14, %v1703_v7  ;;  %2477 = vst.msk [vmem:[%s3480_s27 + $0xf8] sm:$0xf] %vm2414_vm1, %v2930_v25 }
 0x1ae   : > { %v2992_v61 = vpack.c.bf16 %v1898_v45, %v1898_v45  ;;  %v2931_v22 = vpack.c.bf16 %v1837_v21, %v1837_v21  ;;  %v1899_v29 = vadd.f32 %v3460_v14, %v1767_v35  ;;  %2541 = vst.msk [vmem:[%s3480_s27 + $0x1f8] sm:$0xf] %vm2414_vm1, %v2994_v15 }
 0x1af   : > { %2475 = vst.msk [vmem:[%s3480_s27 + $0xf0] sm:$0xf] %vm2414_vm1, %v2928_v55  ;;  %v2995_v13 = vpack.c.bf16 %v1901_v16, %v1901_v16  ;;  %v2929_v38 = vpack.c.bf16 %v1835_v62, %v1835_v62 }
 0x1b0   : > { %2539 = vst.msk [vmem:[%s3480_s27 + $0x1f0] sm:$0xf] %vm2414_vm1, %v2992_v61  ;;  %2478 = vst.msk [vmem:[%s3480_s27 + $0xfc] sm:$0xf] %vm2414_vm1, %v2931_v22  ;;  %v2993_v39 = vpack.c.bf16 %v1899_v29, %v1899_v29 }
 0x1b1   : > { %2542 = vst.msk [vmem:[%s3480_s27 + $0x1fc] sm:$0xf] %vm2414_vm1, %v2995_v13  ;;  %2476 = vst.msk [vmem:[%s3480_s27 + $0xf4] sm:$0xf] %vm2414_vm1, %v2929_v38 }
 0x1b2   : > { %2540 = vst.msk [vmem:[%s3480_s27 + $0x1f4] sm:$0xf] %vm2414_vm1, %v2993_v39 }
 0x1b3 PF: > { %s13_s12 = sadd.s32 1, %s3278_s12  }
 0x1b4   : > { %p10_p4 = scmp.ge.s32.totalorder %s13_s12, 4  }
 0x1b6   :  { %12 = sbr.rel (!%p10_p4) target bundleno = 1 (0x1), region = 62 }

// kernel: encoder_forward.7
= control target key start
LH: loop header
LB: loop body
LE: loop exit
PB: predicated region body
PF: predicated region fallthrough
CT: control target
= control target key end

     0   :  { %s3739_s12 = smov 0   ;;  %s4383_s0 = inlined_call_operand.vmem [shape: bf16[2,34,17,64], index: 0, kind: input, shape index: {}]   ;;  %s4384_s1 = inlined_call_operand.vmem [shape: bf16[384,64], index: 1, kind: input, shape index: {}]   ;;  %s4385_s2 = inlined_call_operand.vmem [shape: f32[3,64], index: 2, kind: input, shape index: {}]   ;;  %s4386_s3 = inlined_call_operand.vmem [shape: bf16[2,256,64], index: 3, kind: output, shape index: {}]  }
   0x1 LB: > { %s2854_s13 = sadd.s32 4294967295, %s3716_s12   ;;  %p2858_p0 = scmp.ge.s32.totalorder %s3716_s12, 1  ;;  %s3716_s12 = sphi %s3739_s12, %s13_s12  }
   0x2   : > { %p137_p1 = scmp.lt.s32.totalorder %s3716_s12, 3 }
   0x4   : > { %p138_p2 = pnand %p2858_p0, %p137_p1 }
   0x5   : > { %p161_p3 = scmp.lt.s32.totalorder (!%p138_p2), %s2854_s13, 1  ;;  %v3638_v0 = vld [vmem:[%s4384_s1 + $0x40] sm:$0xff] (!%p138_p2)   ;;  %v3640_v2 = vld [vmem:[%s4384_s1 + $0x48] sm:$0xff] (!%p138_p2)   ;;  %vm193_vm0 = vsmask.f32 (!%p138_p2), 7424  ;;  %v3642_v4 = vld [vmem:[%s4384_s1 + $0x50] sm:$0xff] (!%p138_p2)  }
   0x6   : > { %141 = sbr.rel (%p138_p2) target bundleno = 474 (0x1da), region = 32  ;;  %v3639_v1 = vld [vmem:[%s4384_s1] sm:$0xff] (!%p138_p2)   ;;  %v3641_v3 = vld [vmem:[%s4384_s1 + $0x8] sm:$0xff] (!%p138_p2)   ;;  %3332 = vmatprep.subr.bf16.mxu0 (!%p138_p2), %v3638_v0  ;;  %3516 = vmatprep.subr.bf16.mxu1 (!%p138_p2), %v3638_v0  ;;  %s3718_s28 = smov (!%p138_p2), 64   ;;  %vm180_vm1 = vcmask (!%p138_p2), 523264   ;;  %vm209_vm2 = vcmask (!%p138_p2), 1048064  }
   0x7   : > { %3333 = vmatpush3.bf16.msra.mxu0 (!%p138_p2), %v3639_v1  ;;  %3524 = vmatpush3.bf16.msra.mxu1 (!%p138_p2), %v3639_v1  ;;  %vm2766_vm3 = vcmask (!%p138_p2), 519168  }
   0x8   : > { %3334 = vmatprep.subr.bf16.mxu0 (!%p138_p2), %v3640_v2  ;;  %3517 = vmatprep.subr.bf16.mxu1 (!%p138_p2), %v3640_v2 }
   0xb   : > { %3335 = vmatpush3.bf16.msra.mxu0 (!%p138_p2), %v3641_v3  ;;  %3525 = vmatpush3.bf16.msra.mxu1 (!%p138_p2), %v3641_v3 }
   0xc   : > { %3336 = vmatprep.subr.bf16.mxu0 (!%p138_p2), %v3642_v4  ;;  %3518 = vmatprep.subr.bf16.mxu1 (!%p138_p2), %v3642_v4 }
   0xd   : > { %s4388_s13 = smov (!%p161_p3, %s2854_s13), 1 }
   0xe   : > { %s3532_s14 = smul.u32 408, %s4388_s13  ;;  %s3299_s19 = sshll.u32 %s4388_s13, 7 }
   0xf   : > { %s4211_s21 = scalar_lea.vmem %s4386_s3, %s3299_s19 }
  0x10   : > { %s3762_s23 = scalar_lea.vmem %s4383_s0, %s3532_s14 }
  0x11   : > { %v3542_v5 = vld [vmem:[%s3762_s23 + $0xc] sm:$0xff]   ;;  %v3543_v6 = vld [vmem:[%s3762_s23 + $0x14] ss:$0 sps:$4 sm:$0x11]   ;;  %v3546_v17 = vld [vmem:[%s3762_s23] sm:$0xff]  }
  0x12   : > { %v3544_v7 = vld [vmem:[%s3762_s23 + $0x12c] sm:$0xff]   ;;  %v233_v8 = vshrl.u32 %v3542_v5, 16  ;;  %v235_v9 = vshll.u32 %v3542_v5, 16  ;;  %v240_v10 = vshll.u32 %v3543_v6, 16  ;;  %v195_v22 = vshrl.u32 %v3546_v17, 16  ;;  %v3548_v24 = vld [vmem:[%s3762_s23 + $0x120] sm:$0xff]  }
  0x13   : > { %v3545_v11 = vld [vmem:[%s3762_s23 + $0x134] ss:$0 sps:$4 sm:$0x11]   ;;  %v1553_v12 = vshrl.u32 %v3544_v7, 16  ;;  %v1555_v13 = vshll.u32 %v3544_v7, 16  ;;  %v197_v23 = vshll.u32 %v3546_v17, 16 }
  0x14   : > { %v237_v14 = vrot.slane %v235_v9, 1  ;;  %v242_v15 = vrot.slane %v240_v10, 1  ;;  %v1560_v16 = vshll.u32 %v3545_v11, 16  ;;  %v3547_v19 = vld [vmem:[%s3762_s23 + $0x8] ss:$0 sps:$4 sm:$0x11]  }
  0x15   : > { %v1557_v18 = vrot.slane %v1555_v13, 1  ;;  %v202_v26 = vshll.u32 %v3547_v19, 16  ;;  %v3549_v27 = vld [vmem:[%s3762_s23 + $0x128] ss:$0 sps:$4 sm:$0x11]   ;;  %v199_v29 = vrot.slane %v197_v23, 1 }
  0x16   : > { %v238_v20 = vor.u32 %v237_v14, %v233_v8  ;;  %v1562_v21 = vrot.slane %v1560_v16, 1  ;;  %v1516_v30 = vshrl.u32 %v3548_v24, 16  ;;  %v1518_v31 = vshll.u32 %v3548_v24, 16  ;;  %v3550_v32 = vld [vmem:[%s3762_s23 + $0x24] sm:$0xff]   ;;  %v3552_v42 = vld [vmem:[%s3762_s23 + $0x18] sm:$0xff]  }
  0x17   : > { %v1558_v25 = vor.u32 %v1557_v18, %v1553_v12  ;;  %v204_v34 = vrot.slane %v202_v26, 1  ;;  %v1523_v35 = vshll.u32 %v3549_v27, 16  ;;  %v200_v36 = vor.u32 %v199_v29, %v195_v22  ;;  %v3551_v38 = vld [vmem:[%s3762_s23 + $0x2c] ss:$0 sps:$4 sm:$0x11]   ;;  %v3554_v50 = vld [vmem:[%s3762_s23 + $0x144] sm:$0xff]  }
  0x18   : > { %v243_v28 = vsel %vm193_vm0, %v238_v20, %v242_v15  ;;  %v1520_v37 = vrot.slane %v1518_v31, 1  ;;  %v343_v39 = vshrl.u32 %v3550_v32, 16  ;;  %v345_v40 = vshll.u32 %v3550_v32, 16  ;;  %v3553_v47 = vld [vmem:[%s3762_s23 + $0x20] ss:$0 sps:$4 sm:$0x11]  }
  0x19   : > { %244 = vrot.lane.b32.xlu0 %v243_v28, %s3718_s28  ;;  %v1563_v33 = vsel %vm193_vm0, %v1558_v25, %v1562_v21  ;;  %v1525_v41 = vrot.slane %v1523_v35, 1  ;;  %v205_v43 = vsel %vm193_vm0, %v200_v36, %v204_v34  ;;  %v350_v46 = vshll.u32 %v3551_v38, 16  ;;  %v3556_v54 = vld [vmem:[%s3762_s23 + $0x138] sm:$0xff]   ;;  %v3555_v57 = vld [vmem:[%s3762_s23 + $0x14c] ss:$0 sps:$4 sm:$0x11]  }
  0x1a   : > { %1564 = vrot.lane.b32.xlu1 %v1563_v33, %s3718_s28  ;;  %v1521_v44 = vor.u32 %v1520_v37, %v1516_v30  ;;  %v347_v45 = vrot.slane %v345_v40, 1  ;;  %v306_v48 = vshrl.u32 %v3552_v42, 16  ;;  %v308_v49 = vshll.u32 %v3552_v42, 16  ;;  %v3558_v2 = vld [vmem:[%s3762_s23 + $0x3c] sm:$0xff]   ;;  %v3560_v18 = vld [vmem:[%s3762_s23 + $0x30] sm:$0xff]  }
  0x1b   : > { %v352_v53 = vrot.slane %v350_v46, 1  ;;  %v313_v56 = vshll.u32 %v3553_v47, 16  ;;  %v1663_v58 = vshrl.u32 %v3554_v50, 16  ;;  %v1665_v60 = vshll.u32 %v3554_v50, 16  ;;  %v3562_v20 = vld [vmem:[%s3762_s23 + $0x15c] sm:$0xff]   ;;  %v3564_v31 = vld [vmem:[%s3762_s23 + $0x150] sm:$0xff]  }
  0x1c   : > { %v1526_v51 = vsel %vm193_vm0, %v1521_v44, %v1525_v41  ;;  %v348_v52 = vor.u32 %v347_v45, %v343_v39  ;;  %v310_v55 = vrot.slane %v308_v49, 1  ;;  %v1626_v61 = vshrl.u32 %v3556_v54, 16  ;;  %v3557_v4 = vld [vmem:[%s3762_s23 + $0x140] ss:$0 sps:$4 sm:$0x11]   ;;  %v3566_v39 = vld [vmem:[%s3762_s23 + $0x54] sm:$0xff]  }
  0x1d   : > { %206 = vrot.lane.b32.xlu0 %v205_v43, %s3718_s28  ;;  %v315_v63 = vrot.slane %v313_v56, 1  ;;  %v1670_v0 = vshll.u32 %v3555_v57, 16  ;;  %v1628_v1 = vshll.u32 %v3556_v54, 16  ;;  %v1667_v3 = vrot.slane %v1665_v60, 1  ;;  %v3568_v50 = vld [vmem:[%s3762_s23 + $0x48] sm:$0xff]  }
  0x1e   : > { %1527 = vrot.lane.b32.xlu1 %v1526_v51, %s3718_s28  ;;  %v353_v59 = vsel %vm193_vm0, %v348_v52, %v352_v53  ;;  %v311_v62 = vor.u32 %v310_v55, %v306_v48  ;;  %v1633_v9 = vshll.u32 %v3557_v4, 16  ;;  %v3559_v10 = vld [vmem:[%s3762_s23 + $0x44] ss:$0 sps:$4 sm:$0x11]   ;;  %v453_v11 = vshrl.u32 %v3558_v2, 16 }
  0x1f   : > { %v1672_v6 = vrot.slane %v1670_v0, 1  ;;  %v1630_v7 = vrot.slane %v1628_v1, 1  ;;  %v1668_v8 = vor.u32 %v1667_v3, %v1663_v58  ;;  %v455_v12 = vshll.u32 %v3558_v2, 16  ;;  %v3561_v19 = vld [vmem:[%s3762_s23 + $0x38] ss:$0 sps:$4 sm:$0x11]  }
  0x20   : > { %v316_v5 = vsel %vm193_vm0, %v311_v62, %v315_v63  ;;  %v1635_v15 = vrot.slane %v1633_v9, 1  ;;  %v460_v17 = vshll.u32 %v3559_v10, 16  ;;  %v416_v24 = vshrl.u32 %v3560_v18, 16  ;;  %v3563_v27 = vld [vmem:[%s3762_s23 + $0x164] ss:$0 sps:$4 sm:$0x11]  }
  0x21   : > { %354 = vrot.lane.b32.xlu0 %v353_v59, %s3718_s28  ;;  %v1631_v13 = vor.u32 %v1630_v7, %v1626_v61  ;;  %v1673_v14 = vsel %vm193_vm0, %v1668_v8, %v1672_v6  ;;  %v457_v16 = vrot.slane %v455_v12, 1  ;;  %v418_v25 = vshll.u32 %v3560_v18, 16  ;;  %v3565_v35 = vld [vmem:[%s3762_s23 + $0x158] ss:$0 sps:$4 sm:$0x11]   ;;  %v3572_v62 = vld [vmem:[%s3762_s23 + $0x168] sm:$0xff]  }
  0x22   : > { %317 = vrot.lane.b32.xlu1 %v316_v5, %s3718_s28  ;;  %v462_v23 = vrot.slane %v460_v17, 1  ;;  %v423_v26 = vshll.u32 %v3561_v19, 16  ;;  %v1773_v28 = vshrl.u32 %v3562_v20, 16  ;;  %v1775_v30 = vshll.u32 %v3562_v20, 16  ;;  %v3570_v58 = vld [vmem:[%s3762_s23 + $0x174] sm:$0xff]   ;;  %v3574_v10 = vld [vmem:[%s3762_s23 + $0x6c] sm:$0xff]  }
  0x23   : > { %v1636_v21 = vsel %vm193_vm0, %v1631_v13, %v1635_v15  ;;  %v458_v22 = vor.u32 %v457_v16, %v453_v11  ;;  %v420_v32 = vrot.slane %v418_v25, 1  ;;  %v1780_v34 = vshll.u32 %v3563_v27, 16  ;;  %v3567_v45 = vld [vmem:[%s3762_s23 + $0x5c] ss:$0 sps:$4 sm:$0x11]  }
  0x24   : > { %v425_v33 = vrot.slane %v423_v26, 1  ;;  %v1777_v36 = vrot.slane %v1775_v30, 1  ;;  %v1736_v37 = vshrl.u32 %v3564_v31, 16  ;;  %v1738_v38 = vshll.u32 %v3564_v31, 16  ;;  %v3576_v26 = vld [vmem:[%s3762_s23 + $0x60] sm:$0xff]  }
  0x25   : > { %1674 = vrot.lane.b32.xlu0 %v1673_v14, %s3718_s28  ;;  %v463_v29 = vsel %vm193_vm0, %v458_v22, %v462_v23  ;;  %v421_v40 = vor.u32 %v420_v32, %v416_v24  ;;  %v1782_v41 = vrot.slane %v1780_v34, 1  ;;  %v1743_v42 = vshll.u32 %v3565_v35, 16  ;;  %v3569_v55 = vld [vmem:[%s3762_s23 + $0x50] ss:$0 sps:$4 sm:$0x11]  }
  0x26   : > { %1637 = vrot.lane.b32.xlu1 %v1636_v21, %s3718_s28  ;;  %v1778_v43 = vor.u32 %v1777_v36, %v1773_v28  ;;  %v1740_v44 = vrot.slane %v1738_v38, 1  ;;  %v563_v46 = vshrl.u32 %v3566_v39, 16  ;;  %v565_v47 = vshll.u32 %v3566_v39, 16  ;;  %v3571_v1 = vld [vmem:[%s3762_s23 + $0x17c] ss:$0 sps:$4 sm:$0x11]  }
  0x27   : > { %v426_v48 = vsel %vm193_vm0, %v421_v40, %v425_v33  ;;  %v1745_v49 = vrot.slane %v1743_v42, 1  ;;  %v570_v54 = vshll.u32 %v3567_v45, 16  ;;  %v526_v56 = vshrl.u32 %v3568_v50, 16  ;;  %v3573_v12 = vld [vmem:[%s3762_s23 + $0x170] ss:$0 sps:$4 sm:$0x11]  }
  0x28   : > { %v1783_v51 = vsel %vm193_vm0, %v1778_v43, %v1782_v41  ;;  %v1741_v52 = vor.u32 %v1740_v44, %v1736_v37  ;;  %v567_v53 = vrot.slane %v565_v47, 1  ;;  %v528_v57 = vshll.u32 %v3568_v50, 16  ;;  %v3575_v18 = vld [vmem:[%s3762_s23 + $0x74] ss:$0 sps:$4 sm:$0x11]   ;;  %v3578_v28 = vld [vmem:[%s3762_s23 + $0x18] sm:$0xff]  }
  0x29   : > { %464 = vrot.lane.b32.xlu0 %v463_v29, %s3718_s28  ;;  %v572_v61 = vrot.slane %v570_v54, 1  ;;  %v533_v0 = vshll.u32 %v3569_v55, 16  ;;  %v1883_v2 = vshrl.u32 %v3570_v58, 16  ;;  %v1885_v4 = vshll.u32 %v3570_v58, 16  ;;  %v3580_v39 = vld [vmem:[%s3762_s23 + $0x30] sm:$0xff]   ;;  %v3582_v47 = vld [vmem:[%s3762_s23 + $0x84] sm:$0xff]  }
  0x2a   : > { %427 = vrot.lane.b32.xlu1 %v426_v48, %s3718_s28  ;;  %v1746_v59 = vsel %vm193_vm0, %v1741_v52, %v1745_v49  ;;  %v568_v60 = vor.u32 %v567_v53, %v563_v46  ;;  %v530_v63 = vrot.slane %v528_v57, 1  ;;  %v1846_v5 = vshrl.u32 %v3572_v62, 16  ;;  %v3577_v27 = vld [vmem:[%s3762_s23 + $0x68] ss:$0 sps:$4 sm:$0x11]   ;;  %v3584_v58 = vld [vmem:[%s3762_s23 + $0x78] sm:$0xff]  }
  0x2b   : > { %v535_v7 = vrot.slane %v533_v0, 1  ;;  %v1890_v8 = vshll.u32 %v3571_v1, 16  ;;  %v1848_v9 = vshll.u32 %v3572_v62, 16  ;;  %v1887_v11 = vrot.slane %v1885_v4, 1 }
  0x2c   : > { %v573_v3 = vsel %vm193_vm0, %v568_v60, %v572_v61  ;;  %v531_v6 = vor.u32 %v530_v63, %v526_v56  ;;  %v1853_v17 = vshll.u32 %v3573_v12, 16  ;;  %v673_v19 = vshrl.u32 %v3574_v10, 16  ;;  %v3579_v35 = vld [vmem:[%s3762_s23 + $0x20] ss:$0 sps:$4 sm:$0x11]  }
  0x2d   : > { %1784 = vrot.lane.b32.xlu0 %v1783_v51, %s3718_s28  ;;  %v1892_v14 = vrot.slane %v1890_v8, 1  ;;  %v1850_v15 = vrot.slane %v1848_v9, 1  ;;  %v1888_v16 = vor.u32 %v1887_v11, %v1883_v2  ;;  %v675_v20 = vshll.u32 %v3574_v10, 16  ;;  %v3581_v43 = vld [vmem:[%s3762_s23 + $0x38] ss:$0 sps:$4 sm:$0x11]  }
  0x2e   : > { %1747 = vrot.lane.b32.xlu1 %v1746_v59, %s3718_s28  ;;  %v536_v13 = vsel %vm193_vm0, %v531_v6, %v535_v7  ;;  %v1855_v23 = vrot.slane %v1853_v17, 1  ;;  %v680_v25 = vshll.u32 %v3575_v18, 16  ;;  %v636_v32 = vshrl.u32 %v3576_v26, 16  ;;  %v3583_v53 = vld [vmem:[%s3762_s23 + $0x8c] ss:$0 sps:$4 sm:$0x11]  }
  0x2f   : > { %v1851_v21 = vor.u32 %v1850_v15, %v1846_v5  ;;  %v1893_v22 = vsel %vm193_vm0, %v1888_v16, %v1892_v14  ;;  %v677_v24 = vrot.slane %v675_v20, 1  ;;  %v638_v33 = vshll.u32 %v3576_v26, 16  ;;  %v3585_v63 = vld [vmem:[%s3762_s23 + $0x80] ss:$0 sps:$4 sm:$0x11]   ;;  %v3586_v2 = vld [vmem:[%s3762_s23 + $0x48] sm:$0xff]  }
  0x30   : > { %v682_v31 = vrot.slane %v680_v25, 1  ;;  %v643_v34 = vshll.u32 %v3577_v27, 16  ;;  %v270_v36 = vshrl.u32 %v3578_v28, 16  ;;  %v272_v38 = vshll.u32 %v3578_v28, 16  ;;  %v3588_v6 = vld [vmem:[%s3762_s23 + $0x60] sm:$0xff]  }
  0x31   : > { %574 = vrot.lane.b32.xlu0 %v573_v3, %s3718_s28  ;;  %v1856_v29 = vsel %vm193_vm0, %v1851_v21, %v1855_v23  ;;  %v678_v30 = vor.u32 %v677_v24, %v673_v19  ;;  %v640_v40 = vrot.slane %v638_v33, 1  ;;  %v277_v42 = vshll.u32 %v3579_v35, 16  ;;  %v3587_v9 = vld [vmem:[%s3762_s23 + $0x50] ss:$0 sps:$4 sm:$0x11]   ;;  %v3590_v18 = vld [vmem:[%s3762_s23 + $0x9c] sm:$0xff]  }
  0x32   : > { %537 = vrot.lane.b32.xlu1 %v536_v13, %s3718_s28  ;;  %v645_v41 = vrot.slane %v643_v34, 1  ;;  %v274_v44 = vrot.slane %v272_v38, 1  ;;  %v380_v45 = vshrl.u32 %v3580_v39, 16  ;;  %v382_v46 = vshll.u32 %v3580_v39, 16  ;;  %v3592_v34 = vld [vmem:[%s3762_s23 + $0x90] sm:$0xff]  }
  0x33   : > { %v683_v37 = vsel %vm193_vm0, %v678_v30, %v682_v31  ;;  %v641_v48 = vor.u32 %v640_v40, %v636_v32  ;;  %v279_v49 = vrot.slane %v277_v42, 1  ;;  %v387_v50 = vshll.u32 %v3581_v43, 16  ;;  %v3589_v20 = vld [vmem:[%s3762_s23 + $0x68] ss:$0 sps:$4 sm:$0x11]  }
  0x34   : > { %v275_v51 = vor.u32 %v274_v44, %v270_v36  ;;  %v384_v52 = vrot.slane %v382_v46, 1  ;;  %v783_v54 = vshrl.u32 %v3582_v47, 16  ;;  %v785_v55 = vshll.u32 %v3582_v47, 16  ;;  %v3591_v26 = vld [vmem:[%s3762_s23 + $0xa4] ss:$0 sps:$4 sm:$0x11]  }
  0x35   : > { %1894 = vrot.lane.b32.xlu0 %v1893_v22, %s3718_s28  ;;  %v646_v56 = vsel %vm193_vm0, %v641_v48, %v645_v41  ;;  %v389_v57 = vrot.slane %v387_v50, 1  ;;  %v790_v62 = vshll.u32 %v3583_v53, 16  ;;  %v746_v0 = vshrl.u32 %v3584_v58, 16  ;;  %v3593_v35 = vld [vmem:[%s3762_s23 + $0x98] ss:$0 sps:$4 sm:$0x11]  }
  0x36   : > { %1857 = vrot.lane.b32.xlu1 %v1856_v29, %s3718_s28  ;;  %v280_v59 = vsel %vm193_vm0, %v275_v51, %v279_v49  ;;  %v385_v60 = vor.u32 %v384_v52, %v380_v45  ;;  %v787_v61 = vrot.slane %v785_v55, 1  ;;  %v748_v1 = vshll.u32 %v3584_v58, 16  ;;  %v3594_v36 = vld [vmem:[%s3762_s23 + $0x78] sm:$0xff]   ;;  %v3595_v43 = vld [vmem:[%s3762_s23 + $0x80] ss:$0 sps:$4 sm:$0x11]  }
  0x37   : > { %v792_v5 = vrot.slane %v790_v62, 1  ;;  %v753_v8 = vshll.u32 %v3585_v63, 16  ;;  %v490_v10 = vshrl.u32 %v3586_v2, 16  ;;  %v492_v12 = vshll.u32 %v3586_v2, 16  ;;  %v3596_v47 = vld [vmem:[%s3762_s23 + $0x90] sm:$0xff]   ;;  %v3600_v2 = vld [vmem:[%s3762_s23 + $0xa8] sm:$0xff]  }
  0x38   : > { %v390_v3 = vsel %vm193_vm0, %v385_v60, %v389_v57  ;;  %v788_v4 = vor.u32 %v787_v61, %v783_v54  ;;  %v750_v7 = vrot.slane %v748_v1, 1  ;;  %v600_v13 = vshrl.u32 %v3588_v6, 16  ;;  %v3597_v51 = vld [vmem:[%s3762_s23 + $0x98] ss:$0 sps:$4 sm:$0x11]  }
  0x39   : > { %684 = vrot.lane.b32.xlu0 %v683_v37, %s3718_s28  ;;  %v755_v15 = vrot.slane %v753_v8, 1  ;;  %v497_v16 = vshll.u32 %v3587_v9, 16  ;;  %v602_v17 = vshll.u32 %v3588_v6, 16  ;;  %v494_v19 = vrot.slane %v492_v12, 1  ;;  %v3598_v55 = vld [vmem:[%s3762_s23 + $0xb4] sm:$0xff]  }
  0x3a   : > { %647 = vrot.lane.b32.xlu1 %v646_v56, %s3718_s28  ;;  %v793_v11 = vsel %vm193_vm0, %v788_v4, %v792_v5  ;;  %v751_v14 = vor.u32 %v750_v7, %v746_v0  ;;  %v607_v25 = vshll.u32 %v3589_v20, 16  ;;  %v893_v27 = vshrl.u32 %v3590_v18, 16  ;;  %v3599_v61 = vld [vmem:[%s3762_s23 + $0xbc] ss:$0 sps:$4 sm:$0x11]  }
  0x3b   : > { %v499_v22 = vrot.slane %v497_v16, 1  ;;  %v604_v23 = vrot.slane %v602_v17, 1  ;;  %v495_v24 = vor.u32 %v494_v19, %v490_v10  ;;  %v895_v28 = vshll.u32 %v3590_v18, 16  ;;  %v3601_v7 = vld [vmem:[%s3762_s23 + $0xb0] ss:$0 sps:$4 sm:$0x11]  }
  0x3c   : > { %v756_v21 = vsel %vm193_vm0, %v751_v14, %v755_v15  ;;  %v609_v31 = vrot.slane %v607_v25, 1  ;;  %v900_v33 = vshll.u32 %v3591_v26, 16  ;;  %v856_v40 = vshrl.u32 %v3592_v34, 16  ;;  %v3602_v10 = vld [vmem:[%s3762_s23 + $0xa8] sm:$0xff]   ;;  %v3604_v14 = vld [vmem:[%s3762_s23 + $0xc0] sm:$0xff]  }
  0x3d   : > { %281 = vrot.lane.b32.xlu0 %v280_v59, %s3718_s28  ;;  %v605_v29 = vor.u32 %v604_v23, %v600_v13  ;;  %v500_v30 = vsel %vm193_vm0, %v495_v24, %v499_v22  ;;  %v897_v32 = vrot.slane %v895_v28, 1  ;;  %v858_v41 = vshll.u32 %v3592_v34, 16  ;;  %v3603_v17 = vld [vmem:[%s3762_s23 + $0xb0] ss:$0 sps:$4 sm:$0x11]  }
  0x3e   : > { %391 = vrot.lane.b32.xlu1 %v390_v3, %s3718_s28  ;;  %v902_v39 = vrot.slane %v900_v33, 1  ;;  %v863_v42 = vshll.u32 %v3593_v35, 16  ;;  %v710_v44 = vshrl.u32 %v3594_v36, 16  ;;  %v712_v46 = vshll.u32 %v3594_v36, 16  ;;  %v3606_v26 = vld [vmem:[%s3762_s23 + $0xcc] sm:$0xff]  }
  0x3f   : > { %v610_v37 = vsel %vm193_vm0, %v605_v29, %v609_v31  ;;  %v898_v38 = vor.u32 %v897_v32, %v893_v27  ;;  %v860_v48 = vrot.slane %v858_v41, 1  ;;  %v717_v50 = vshll.u32 %v3595_v43, 16  ;;  %v3605_v28 = vld [vmem:[%s3762_s23 + $0xc8] ss:$0 sps:$4 sm:$0x11]  }
  0x40   : > { %v865_v49 = vrot.slane %v863_v42, 1  ;;  %v714_v52 = vrot.slane %v712_v46, 1  ;;  %v820_v53 = vshrl.u32 %v3596_v47, 16  ;;  %v822_v54 = vshll.u32 %v3596_v47, 16  ;;  %v3608_v42 = vld [vmem:[%s3762_s23 + $0xc0] sm:$0xff]  }
  0x41   : > { %794 = vrot.lane.b32.xlu0 %v793_v11, %s3718_s28  ;;  %v903_v45 = vsel %vm193_vm0, %v898_v38, %v902_v39  ;;  %v861_v56 = vor.u32 %v860_v48, %v856_v40  ;;  %v719_v57 = vrot.slane %v717_v50, 1  ;;  %v827_v58 = vshll.u32 %v3597_v51, 16  ;;  %v3607_v34 = vld [vmem:[%s3762_s23 + $0xd4] ss:$0 sps:$4 sm:$0x11]  }
  0x42   : > { %757 = vrot.lane.b32.xlu1 %v756_v21, %s3718_s28  ;;  %v715_v59 = vor.u32 %v714_v52, %v710_v44  ;;  %v824_v60 = vrot.slane %v822_v54, 1  ;;  %v1003_v62 = vshrl.u32 %v3598_v55, 16  ;;  %v1005_v63 = vshll.u32 %v3598_v55, 16  ;;  %v3609_v43 = vld [vmem:[%s3762_s23 + $0xc8] ss:$0 sps:$4 sm:$0x11]  }
  0x43   : > { %v866_v0 = vsel %vm193_vm0, %v861_v56, %v865_v49  ;;  %v829_v1 = vrot.slane %v827_v58, 1  ;;  %v1010_v6 = vshll.u32 %v3599_v61, 16  ;;  %v966_v8 = vshrl.u32 %v3600_v2, 16  ;;  %v3610_v44 = vld [vmem:[%s3762_s23 + $0xd8] sm:$0xff]   ;;  %v3612_v55 = vld [vmem:[%s3762_s23 + $0xf0] sm:$0xff]  }
  0x44   : > { %v720_v3 = vsel %vm193_vm0, %v715_v59, %v719_v57  ;;  %v825_v4 = vor.u32 %v824_v60, %v820_v53  ;;  %v1007_v5 = vrot.slane %v1005_v63, 1  ;;  %v968_v9 = vshll.u32 %v3600_v2, 16  ;;  %v3611_v51 = vld [vmem:[%s3762_s23 + $0xe0] ss:$0 sps:$4 sm:$0x11]   ;;  %v3614_v63 = vld [vmem:[%s3762_s23 + $0xe4] sm:$0xff]  }
  0x45   : > { %501 = vrot.lane.b32.xlu0 %v500_v30, %s3718_s28  ;;  %v1012_v13 = vrot.slane %v1010_v6, 1  ;;  %v973_v16 = vshll.u32 %v3601_v7, 16  ;;  %v930_v18 = vshrl.u32 %v3602_v10, 16  ;;  %v932_v20 = vshll.u32 %v3602_v10, 16  ;;  %v3616_v10 = vld [vmem:[%s3762_s23 + $0xd8] sm:$0xff]  }
  0x46   : > { %611 = vrot.lane.b32.xlu1 %v610_v37, %s3718_s28  ;;  %v830_v11 = vsel %vm193_vm0, %v825_v4, %v829_v1  ;;  %v1008_v12 = vor.u32 %v1007_v5, %v1003_v62  ;;  %v970_v15 = vrot.slane %v968_v9, 1  ;;  %v1040_v21 = vshrl.u32 %v3604_v14, 16  ;;  %v3613_v59 = vld [vmem:[%s3762_s23 + $0xf8] ss:$0 sps:$4 sm:$0x11]  }
  0x47   : > { %v975_v23 = vrot.slane %v973_v16, 1  ;;  %v937_v24 = vshll.u32 %v3603_v17, 16  ;;  %v1042_v25 = vshll.u32 %v3604_v14, 16  ;;  %v934_v27 = vrot.slane %v932_v20, 1 }
  0x48   : > { %v1013_v19 = vsel %vm193_vm0, %v1008_v12, %v1012_v13  ;;  %v971_v22 = vor.u32 %v970_v15, %v966_v8  ;;  %v1047_v33 = vshll.u32 %v3605_v28, 16  ;;  %v1113_v35 = vshrl.u32 %v3606_v26, 16  ;;  %v3615_v5 = vld [vmem:[%s3762_s23 + $0xec] ss:$0 sps:$4 sm:$0x11]  }
  0x49   : > { %904 = vrot.lane.b32.xlu0 %v903_v45, %s3718_s28  ;;  %v939_v30 = vrot.slane %v937_v24, 1  ;;  %v1044_v31 = vrot.slane %v1042_v25, 1  ;;  %v935_v32 = vor.u32 %v934_v27, %v930_v18  ;;  %v1115_v36 = vshll.u32 %v3606_v26, 16  ;;  %v3617_v15 = vld [vmem:[%s3762_s23 + $0xe0] ss:$0 sps:$4 sm:$0x11]  }
  0x4a   : > { %867 = vrot.lane.b32.xlu1 %v866_v0, %s3718_s28  ;;  %v976_v29 = vsel %vm193_vm0, %v971_v22, %v975_v23  ;;  %v1049_v39 = vrot.slane %v1047_v33, 1  ;;  %v1120_v41 = vshll.u32 %v3607_v34, 16  ;;  %v1076_v48 = vshrl.u32 %v3608_v42, 16  ;;  %v3618_v18 = vld [vmem:[%s3762_s23 + $0x108] sm:$0xff]   ;;  %v3620_v22 = vld [vmem:[%s3762_s23 + $0x120] sm:$0xff]  }
  0x4b   : > { %v1045_v37 = vor.u32 %v1044_v31, %v1040_v21  ;;  %v940_v38 = vsel %vm193_vm0, %v935_v32, %v939_v30  ;;  %v1117_v40 = vrot.slane %v1115_v36, 1  ;;  %v1078_v49 = vshll.u32 %v3608_v42, 16  ;;  %v3619_v25 = vld [vmem:[%s3762_s23 + $0x110] ss:$0 sps:$4 sm:$0x11]   ;;  %v3622_v34 = vld [vmem:[%s3762_s23 + $0xfc] sm:$0xff]  }
  0x4c   : > { %v1122_v47 = vrot.slane %v1120_v41, 1  ;;  %v1083_v50 = vshll.u32 %v3609_v43, 16  ;;  %v1150_v52 = vshrl.u32 %v3610_v44, 16  ;;  %v1152_v54 = vshll.u32 %v3610_v44, 16 }
  0x4d   : > { %721 = vrot.lane.b32.xlu0 %v720_v3, %s3718_s28  ;;  %v1050_v45 = vsel %vm193_vm0, %v1045_v37, %v1049_v39  ;;  %v1118_v46 = vor.u32 %v1117_v40, %v1113_v35  ;;  %v1080_v56 = vrot.slane %v1078_v49, 1  ;;  %v1157_v58 = vshll.u32 %v3611_v51, 16  ;;  %v3621_v36 = vld [vmem:[%s3762_s23 + $0x128] ss:$0 sps:$4 sm:$0x11]  }
  0x4e   : > { %831 = vrot.lane.b32.xlu1 %v830_v11, %s3718_s28  ;;  %v1085_v57 = vrot.slane %v1083_v50, 1  ;;  %v1154_v60 = vrot.slane %v1152_v54, 1  ;;  %v1260_v61 = vshrl.u32 %v3612_v55, 16  ;;  %v1262_v62 = vshll.u32 %v3612_v55, 16  ;;  %v3624_v50 = vld [vmem:[%s3762_s23 + $0xf0] sm:$0xff]  }
  0x4f   : > { %v1123_v53 = vsel %vm193_vm0, %v1118_v46, %v1122_v47  ;;  %v1081_v0 = vor.u32 %v1080_v56, %v1076_v48  ;;  %v1159_v1 = vrot.slane %v1157_v58, 1  ;;  %v1267_v2 = vshll.u32 %v3613_v59, 16  ;;  %v3623_v42 = vld [vmem:[%s3762_s23 + $0x104] ss:$0 sps:$4 sm:$0x11]  }
  0x50   : > { %v1155_v3 = vor.u32 %v1154_v60, %v1150_v52  ;;  %v1264_v4 = vrot.slane %v1262_v62, 1  ;;  %v1223_v6 = vshrl.u32 %v3614_v63, 16  ;;  %v1225_v7 = vshll.u32 %v3614_v63, 16  ;;  %v3625_v51 = vld [vmem:[%s3762_s23 + $0xf8] ss:$0 sps:$4 sm:$0x11]  }
  0x51   : > { %1014 = vrot.lane.b32.xlu0 %v1013_v19, %s3718_s28  ;;  %v1086_v8 = vsel %vm193_vm0, %v1081_v0, %v1085_v57  ;;  %v1269_v9 = vrot.slane %v1267_v2, 1  ;;  %v1230_v14 = vshll.u32 %v3615_v5, 16  ;;  %v1186_v16 = vshrl.u32 %v3616_v10, 16  ;;  %v3626_v52 = vld [vmem:[%s3762_s23 + $0x138] sm:$0xff]   ;;  %v3628_v63 = vld [vmem:[%s3762_s23 + $0x150] sm:$0xff]  }
  0x52   : > { %977 = vrot.lane.b32.xlu1 %v976_v29, %s3718_s28  ;;  %v1160_v11 = vsel %vm193_vm0, %v1155_v3, %v1159_v1  ;;  %v1265_v12 = vor.u32 %v1264_v4, %v1260_v61  ;;  %v1227_v13 = vrot.slane %v1225_v7, 1  ;;  %v1188_v17 = vshll.u32 %v3616_v10, 16  ;;  %v3627_v59 = vld [vmem:[%s3762_s23 + $0x140] ss:$0 sps:$4 sm:$0x11]   ;;  %v3630_v7 = vld [vmem:[%s3762_s23 + $0x114] sm:$0xff]  }
  0x53   : > { %v1232_v21 = vrot.slane %v1230_v14, 1  ;;  %v1193_v24 = vshll.u32 %v3617_v15, 16  ;;  %v1370_v26 = vshrl.u32 %v3618_v18, 16  ;;  %v1372_v28 = vshll.u32 %v3618_v18, 16  ;;  %v3632_v18 = vld [vmem:[%s3762_s23 + $0x108] sm:$0xff]  }
  0x54   : > { %v1270_v19 = vsel %vm193_vm0, %v1265_v12, %v1269_v9  ;;  %v1228_v20 = vor.u32 %v1227_v13, %v1223_v6  ;;  %v1190_v23 = vrot.slane %v1188_v17, 1  ;;  %v1480_v29 = vshrl.u32 %v3620_v22, 16  ;;  %v3629_v3 = vld [vmem:[%s3762_s23 + $0x158] ss:$0 sps:$4 sm:$0x11]  }
  0x55   : > { %941 = vrot.lane.b32.xlu0 %v940_v38, %s3718_s28  ;;  %v1195_v31 = vrot.slane %v1193_v24, 1  ;;  %v1377_v32 = vshll.u32 %v3619_v25, 16  ;;  %v1482_v33 = vshll.u32 %v3620_v22, 16  ;;  %v1374_v35 = vrot.slane %v1372_v28, 1 }
  0x56   : > { %1051 = vrot.lane.b32.xlu1 %v1050_v45, %s3718_s28  ;;  %v1233_v27 = vsel %vm193_vm0, %v1228_v20, %v1232_v21  ;;  %v1191_v30 = vor.u32 %v1190_v23, %v1186_v16  ;;  %v1487_v41 = vshll.u32 %v3621_v36, 16  ;;  %v1333_v43 = vshrl.u32 %v3622_v34, 16  ;;  %v3631_v13 = vld [vmem:[%s3762_s23 + $0x11c] ss:$0 sps:$4 sm:$0x11]  }
  0x57   : > { %v1379_v38 = vrot.slane %v1377_v32, 1  ;;  %v1484_v39 = vrot.slane %v1482_v33, 1  ;;  %v1375_v40 = vor.u32 %v1374_v35, %v1370_v26  ;;  %v1335_v44 = vshll.u32 %v3622_v34, 16  ;;  %v3633_v23 = vld [vmem:[%s3762_s23 + $0x110] ss:$0 sps:$4 sm:$0x11]  }
  0x58   : > { %v1196_v37 = vsel %vm193_vm0, %v1191_v30, %v1195_v31  ;;  %v1489_v47 = vrot.slane %v1487_v41, 1  ;;  %v1340_v49 = vshll.u32 %v3623_v42, 16  ;;  %v1296_v56 = vshrl.u32 %v3624_v50, 16  ;;  %v3634_v26 = vld [vmem:[%s3762_s23 + $0x168] sm:$0xff]   ;;  %v3636_v30 = vld [vmem:[%s3762_s23 + $0x180] sm:$0xff]   ;;  %v3643_v42 = vld [vmem:[%s4384_s1 + $0x10] sm:$0xff]  }
  0x59   : > { %1124 = vrot.lane.b32.xlu0 %v1123_v53, %s3718_s28  ;;  %v1485_v45 = vor.u32 %v1484_v39, %v1480_v29  ;;  %v1380_v46 = vsel %vm193_vm0, %v1375_v40, %v1379_v38  ;;  %v1337_v48 = vrot.slane %v1335_v44, 1  ;;  %v1298_v57 = vshll.u32 %v3624_v50, 16  ;;  %v3635_v33 = vld [vmem:[%s3762_s23 + $0x170] ss:$0 sps:$4 sm:$0x11]   ;;  %3337 = vmatpush3.bf16.msra.mxu0 %v3643_v42 }
  0x5a   : > { %1087 = vrot.lane.b32.xlu1 %v1086_v8, %s3718_s28  ;;  %v1342_v55 = vrot.slane %v1340_v49, 1  ;;  %v1303_v58 = vshll.u32 %v3625_v51, 16  ;;  %v1590_v60 = vshrl.u32 %v3626_v52, 16  ;;  %v1592_v62 = vshll.u32 %v3626_v52, 16  ;;  %3526 = vmatpush3.bf16.msra.mxu1 %v3643_v42  ;;  %v3645_v49 = vld [vmem:[%s4384_s1 + $0x18] sm:$0xff]   ;;  %v3646_v52 = vld [vmem:[%s4384_s1 + $0x60] sm:$0xff]  }
  0x5b   : > { %v1490_v53 = vsel %vm193_vm0, %v1485_v45, %v1489_v47  ;;  %v1338_v54 = vor.u32 %v1337_v48, %v1333_v43  ;;  %v1300_v0 = vrot.slane %v1298_v57, 1  ;;  %v1597_v2 = vshll.u32 %v3627_v59, 16  ;;  %v3637_v44 = vld [vmem:[%s3762_s23 + $0x188] ss:$0 sps:$4 sm:$0x11]   ;;  %v3644_v48 = vld [vmem:[%s4384_s1 + $0x58] sm:$0xff]  }
  0x5c   : > { %v1305_v1 = vrot.slane %v1303_v58, 1  ;;  %v1594_v4 = vrot.slane %v1592_v62, 1  ;;  %v1700_v5 = vshrl.u32 %v3628_v63, 16  ;;  %v1702_v6 = vshll.u32 %v3628_v63, 16  ;;  %3338 = vmatprep.subr.bf16.mxu0 %v3644_v48  ;;  %3519 = vmatprep.subr.bf16.mxu1 %v3644_v48  ;;  %v3648_v57 = vld [vmem:[%s3762_s23 + $0xc] sm:$0xff]   ;;  %v3674_v42 = vld [vmem:[%s4384_s1 + $0xa0] sm:$0xff]  }
  0x5d   : > { %1161 = vrot.lane.b32.xlu0 %v1160_v11, %s3718_s28  ;;  %v1343_v61 = vsel %vm193_vm0, %v1338_v54, %v1342_v55  ;;  %v1301_v8 = vor.u32 %v1300_v0, %v1296_v56  ;;  %v1599_v9 = vrot.slane %v1597_v2, 1  ;;  %v1707_v10 = vshll.u32 %v3629_v3, 16  ;;  %v3647_v56 = vld [vmem:[%s4384_s1 + $0x20] sm:$0xff]   ;;  %3339 = vmatpush3.bf16.msra.mxu0 %v3645_v49  ;;  %220 = vst.msk [vmem:[#allocation2 + $0x8] sm:$0xff] %vm180_vm1, %v3648_v57  ;;  %v3650_v62 = vld [vmem:[%s3762_s23 + $0x12c] sm:$0xff]  }
  0x5e   : > { %1271 = vrot.lane.b32.xlu1 %v1270_v19, %s3718_s28  ;;  %v1595_v11 = vor.u32 %v1594_v4, %v1590_v60  ;;  %v1704_v12 = vrot.slane %v1702_v6, 1  ;;  %v1443_v14 = vshrl.u32 %v3630_v7, 16  ;;  %v1445_v15 = vshll.u32 %v3630_v7, 16  ;;  %3527 = vmatpush3.bf16.msra.mxu1 %v3645_v49  ;;  %v3649_v60 = vld [vmem:[%s4384_s1 + $0x68] sm:$0xff]   ;;  %1540 = vst.msk [vmem:[#allocation2 + $0x128] sm:$0xff] %vm180_vm1, %v3650_v62  ;;  %v3653_v2 = vld [vmem:[%s4384_s1 + $0x70] sm:$0xff]  }
  0x5f   : > { %v1306_v16 = vsel %vm193_vm0, %v1301_v8, %v1305_v1  ;;  %v1709_v17 = vrot.slane %v1707_v10, 1  ;;  %v1450_v22 = vshll.u32 %v3631_v13, 16  ;;  %v1406_v24 = vshrl.u32 %v3632_v18, 16  ;;  %3340 = vmatprep.subr.bf16.mxu0 %v3646_v52  ;;  %3520 = vmatprep.subr.bf16.mxu1 %v3646_v52  ;;  %v3651_v63 = vld [vmem:[%s4384_s1 + $0x28] sm:$0xff]   ;;  %v3652_v1 = vld [vmem:[%s3762_s23] sm:$0xff]   ;;  %v3657_v8 = vld [vmem:[%s4384_s1 + $0x78] sm:$0xff]  }
  0x60   : > { %v1600_v19 = vsel %vm193_vm0, %v1595_v11, %v1599_v9  ;;  %v1705_v20 = vor.u32 %v1704_v12, %v1700_v5  ;;  %v1447_v21 = vrot.slane %v1445_v15, 1  ;;  %v1408_v25 = vshll.u32 %v3632_v18, 16  ;;  %181 = vst.msk [vmem:[#allocation2] sm:$0xff] %vm180_vm1, %v3652_v1  ;;  %v3654_v4 = vld [vmem:[%s3762_s23 + $0x120] sm:$0xff]   ;;  %v3655_v5 = vld [vmem:[%s4384_s1 + $0x30] sm:$0xff]   ;;  %v3658_v9 = vld [vmem:[%s3762_s23 + $0x18] sm:$0xff]  }
  0x61   : > { %1234 = vrot.lane.b32.xlu0 %v1233_v27, %s3718_s28  ;;  %v1452_v29 = vrot.slane %v1450_v22, 1  ;;  %v1413_v32 = vshll.u32 %v3633_v23, 16  ;;  %v1810_v34 = vshrl.u32 %v3634_v26, 16  ;;  %v1812_v36 = vshll.u32 %v3634_v26, 16  ;;  %3341 = vmatpush3.bf16.msra.mxu0 %v3647_v56  ;;  %1503 = vst.msk [vmem:[#allocation2 + $0x120] sm:$0xff] %vm180_vm1, %v3654_v4  ;;  %v3656_v6 = vld [vmem:[%s3762_s23 + $0x24] sm:$0xff]  }
  0x62   : > { %1197 = vrot.lane.b32.xlu1 %v1196_v37, %s3718_s28  ;;  %v1710_v27 = vsel %vm193_vm0, %v1705_v20, %v1709_v17  ;;  %v1448_v28 = vor.u32 %v1447_v21, %v1443_v14  ;;  %v1410_v31 = vrot.slane %v1408_v25, 1  ;;  %v1920_v37 = vshrl.u32 %v3636_v30, 16  ;;  %3528 = vmatpush3.bf16.msra.mxu1 %v3647_v56  ;;  %330 = vst.msk [vmem:[#allocation2 + $0x20] sm:$0xff] %vm180_vm1, %v3656_v6  ;;  %v3659_v12 = vld [vmem:[%s4384_s1 + $0x38] sm:$0xff]   ;;  %v3660_v13 = vld [vmem:[%s3762_s23 + $0x144] sm:$0xff]   ;;  %v3664_v22 = vld [vmem:[%s3762_s23 + $0x30] sm:$0xff]  }
  0x63   : > { %v1415_v39 = vrot.slane %v1413_v32, 1  ;;  %v1817_v40 = vshll.u32 %v3635_v33, 16  ;;  %v1922_v41 = vshll.u32 %v3636_v30, 16  ;;  %v1814_v43 = vrot.slane %v1812_v36, 1  ;;  %3342 = vmatprep.subr.bf16.mxu0 %v3649_v60  ;;  %3521 = vmatprep.subr.bf16.mxu1 %v3649_v60  ;;  %293 = vst.msk [vmem:[#allocation2 + $0x18] sm:$0xff] %vm180_vm1, %v3658_v9  ;;  %1650 = vst.msk [vmem:[#allocation2 + $0x140] sm:$0xff] %vm180_vm1, %v3660_v13 }
  0x64   : > { %v1453_v35 = vsel %vm193_vm0, %v1448_v28, %v1452_v29  ;;  %v1411_v38 = vor.u32 %v1410_v31, %v1406_v24  ;;  %v1927_v51 = vshll.u32 %v3637_v44, 16  ;;  %v3662_v18 = vld [vmem:[%s4384_s1 + $0x80] sm:$0xff]   ;;  %v3665_v24 = vld [vmem:[%s4384_s1 + $0x88] sm:$0xff]   ;;  %403 = vst.msk [vmem:[#allocation2 + $0x30] sm:$0xff] %vm180_vm1, %v3664_v22  ;;  %v3668_v30 = vld [vmem:[%s4384_s1 + $0x90] sm:$0xff]  }
  0x65   : > { %1381 = vrot.lane.b32.xlu0 %v1380_v46, %s3718_s28  ;;  %v1819_v46 = vrot.slane %v1817_v40, 1  ;;  %v1924_v47 = vrot.slane %v1922_v41, 1  ;;  %v1815_v50 = vor.u32 %v1814_v43, %v1810_v34  ;;  %3343 = vmatpush3.bf16.msra.mxu0 %v3651_v63  ;;  %v3663_v21 = vld [vmem:[%s3762_s23 + $0x3c] sm:$0xff]   ;;  %v3669_v32 = vld [vmem:[%s3762_s23 + $0x54] sm:$0xff]   ;;  %v3673_v41 = vld [vmem:[%s3762_s23 + $0x168] sm:$0xff]  }
  0x66   : > { %1491 = vrot.lane.b32.xlu1 %v1490_v53, %s3718_s28  ;;  %v1416_v45 = vsel %vm193_vm0, %v1411_v38, %v1415_v39  ;;  %v1929_v55 = vrot.slane %v1927_v51, 1  ;;  %3529 = vmatpush3.bf16.msra.mxu1 %v3651_v63  ;;  %440 = vst.msk [vmem:[#allocation2 + $0x38] sm:$0xff] %vm180_vm1, %v3663_v21  ;;  %v3666_v25 = vld [vmem:[%s3762_s23 + $0x15c] sm:$0xff]   ;;  %550 = vst.msk [vmem:[#allocation2 + $0x50] sm:$0xff] %vm180_vm1, %v3669_v32  ;;  %v3672_v38 = vld [vmem:[%s3762_s23 + $0x174] sm:$0xff]  }
  0x67   : > { %v1925_v53 = vor.u32 %v1924_v47, %v1920_v37  ;;  %v1820_v54 = vsel %vm193_vm0, %v1815_v50, %v1819_v46  ;;  %3344 = vmatprep.subr.bf16.mxu0 %v3653_v2  ;;  %3522 = vmatprep.subr.bf16.mxu1 %v3653_v2  ;;  %1760 = vst.msk [vmem:[#allocation2 + $0x158] sm:$0xff] %vm180_vm1, %v3666_v25  ;;  %v3671_v36 = vld [vmem:[%s4384_s1 + $0x98] sm:$0xff]   ;;  %1870 = vst.msk [vmem:[#allocation2 + $0x170] sm:$0xff] %vm180_vm1, %v3672_v38  ;;  %v3675_v43 = vld [vmem:[%s3762_s23 + $0x6c] sm:$0xff]  }
  0x68   : > { %1833 = vst.msk [vmem:[#allocation2 + $0x168] sm:$0xff] %vm180_vm1, %v3673_v41  ;;  %v3676_v46 = vld [vmem:[%s3762_s23 + $0x60] sm:$0xff]   ;;  %660 = vst.msk [vmem:[#allocation2 + $0x68] sm:$0xff] %vm180_vm1, %v3675_v43  ;;  %v3677_v48 = vld [vmem:[%s4384_s1 + $0xa8] sm:$0xff]  }
  0x69   : > { %1344 = vrot.lane.b32.xlu0 %v1343_v61, %s3718_s28  ;;  %v1930_v59 = vsel %vm193_vm0, %v1925_v53, %v1929_v55  ;;  %3345 = vmatpush3.bf16.msra.mxu0 %v3655_v5  ;;  %623 = vst.msk [vmem:[#allocation2 + $0x60] sm:$0xff] %vm180_vm1, %v3676_v46  ;;  %v3678_v50 = vld [vmem:[%s3762_s23 + $0x18] sm:$0xff]   ;;  %v3679_v52 = vld [vmem:[%s3762_s23 + $0x30] sm:$0xff]   ;;  %v3681_v56 = vld [vmem:[%s3762_s23 + $0x84] sm:$0xff]  }
  0x6a   : > { %1307 = vrot.lane.b32.xlu1 %v1306_v16, %s3718_s28  ;;  %3530 = vmatpush3.bf16.msra.mxu1 %v3655_v5  ;;  %v3661_v16 = vld [vmem:[%s3762_s23 + $0x138] sm:$0xff]   ;;  %257 = vst.msk [vmem:[#allocation2 + $0x10] sm:$0xff] %vm180_vm1, %v3678_v50  ;;  %v3680_v55 = vld [vmem:[%s4384_s1 + $0xb0] sm:$0xff]   ;;  %367 = vst.msk [vmem:[#allocation2 + $0x28] sm:$0xff] %vm180_vm1, %v3679_v52 }
  0x6b   : > { %3346 = vmatprep.subr.bf16.mxu0 %v3657_v8  ;;  %3523 = vmatprep.subr.bf16.mxu1 %v3657_v8  ;;  %1613 = vst.msk [vmem:[#allocation2 + $0x138] sm:$0xff] %vm180_vm1, %v3661_v16  ;;  %770 = vst.msk [vmem:[#allocation2 + $0x80] sm:$0xff] %vm180_vm1, %v3681_v56  ;;  %v3683_v60 = vld [vmem:[%s4384_s1 + $0xb8] sm:$0xff]   ;;  %v3685_v63 = vld [vmem:[%s3762_s23 + $0x60] sm:$0xff]  }
  0x6c   : > { %v3686_v1 = vld [vmem:[%s3762_s23 + $0x9c] sm:$0xff]   ;;  %587 = vst.msk [vmem:[#allocation2 + $0x58] sm:$0xff] %vm180_vm1, %v3685_v63  ;;  %v3687_v4 = vld [vmem:[%s3762_s23 + $0x90] sm:$0xff]   ;;  %v3698_v25 = vld [vmem:[%s3762_s23 + $0xe4] sm:$0xff]  }
  0x6d   : > { %1601 = vrot.lane.b32.xlu0 %v1600_v19, %s3718_s28  ;;  %3347 = vmatpush3.bf16.msra.mxu0 %v3659_v12  ;;  %880 = vst.msk [vmem:[#allocation2 + $0x98] sm:$0xff] %vm180_vm1, %v3686_v1  ;;  %v3688_v5 = vld [vmem:[%s3762_s23 + $0x78] sm:$0xff]   ;;  %843 = vst.msk [vmem:[#allocation2 + $0x90] sm:$0xff] %vm180_vm1, %v3687_v4  ;;  %v3689_v8 = vld [vmem:[%s3762_s23 + $0x90] sm:$0xff]  }
  0x6e   : > { %1711 = vrot.lane.b32.xlu1 %v1710_v27, %s3718_s28  ;;  %3531 = vmatpush3.bf16.msra.mxu1 %v3659_v12  ;;  %v3667_v27 = vld [vmem:[%s3762_s23 + $0x150] sm:$0xff]   ;;  %697 = vst.msk [vmem:[#allocation2 + $0x70] sm:$0xff] %vm180_vm1, %v3688_v5  ;;  %807 = vst.msk [vmem:[#allocation2 + $0x88] sm:$0xff] %vm180_vm1, %v3689_v8  ;;  %v3692_v12 = vld [vmem:[%s3762_s23 + $0xa8] sm:$0xff]  }
  0x6f   : > { %3468 = vmatprep.subr.bf16.mxu1 %v3662_v18  ;;  %1723 = vst.msk [vmem:[#allocation2 + $0x150] sm:$0xff] %vm180_vm1, %v3667_v27  ;;  %917 = vst.msk [vmem:[#allocation2 + $0xa0] sm:$0xff] %vm180_vm1, %v3692_v12  ;;  %v3699_v27 = vld [vmem:[%s3762_s23 + $0xd8] sm:$0xff]   ;;  %v3705_v38 = vld [vmem:[%s3762_s23 + $0x150] sm:$0xff]  }
  0x70   : > { %1210 = vst.msk [vmem:[#allocation2 + $0xe0] sm:$0xff] %vm180_vm1, %v3698_v25  ;;  %1173 = vst.msk [vmem:[#allocation2 + $0xd8] sm:$0xff] %vm180_vm1, %v3699_v27 }
  0x71   : > { %1454 = vrot.lane.b32.xlu0 %v1453_v35, %s3718_s28  ;;  %v3670_v35 = vld [vmem:[%s3762_s23 + $0x48] sm:$0xff]   ;;  %1687 = vst.msk [vmem:[#allocation2 + $0x148] sm:$0xff] %vm180_vm1, %v3705_v38 }
  0x72   : > { %1417 = vrot.lane.b32.xlu1 %v1416_v45, %s3718_s28  ;;  %513 = vst.msk [vmem:[#allocation2 + $0x48] sm:$0xff] %vm180_vm1, %v3670_v35 }
  0x75   : > { %1821 = vrot.lane.b32.xlu0 %v1820_v54, %s3718_s28 }
  0x76   : > { %1931 = vrot.lane.b32.xlu1 %v1930_v59, %s3718_s28 }
  0x8b   : > { %v245_v58 = vpop.permute.xlu0 %244 }
  0x8c   : > { %v1565_v61 = vpop.permute.xlu1 %1564  ;;  %247 = vst.msk [vmem:[#allocation2 + $0x8] sm:$0xff] %vm209_vm2, %v245_v58  ;;  %v3682_v58 = vld [vmem:[%s3762_s23 + $0x78] sm:$0xff]  }
  0x8d   : > { %1567 = vst.msk [vmem:[#allocation2 + $0x128] sm:$0xff] %vm209_vm2, %v1565_v61  ;;  %v3684_v61 = vld [vmem:[%s3762_s23 + $0x48] sm:$0xff]  }
  0x8e   : > { %733 = vst.msk [vmem:[#allocation2 + $0x78] sm:$0xff] %vm180_vm1, %v3682_v58  ;;  %477 = vst.msk [vmem:[#allocation2 + $0x40] sm:$0xff] %vm180_vm1, %v3684_v61 }
  0x8f   : > { %v207_v0 = vpop.permute.xlu0 %206 }
  0x90   : > { %v1528_v3 = vpop.permute.xlu1 %1527  ;;  %210 = vst.msk [vmem:[#allocation2] sm:$0xff] %vm209_vm2, %v207_v0 }
  0x91   : > { %1530 = vst.msk [vmem:[#allocation2 + $0x120] sm:$0xff] %vm209_vm2, %v1528_v3 }
  0x93   : > { %v355_v7 = vpop.permute.xlu0 %354  ;;  %v1936_v10 = vld [vmem:[#allocation2 + $0x8] sm:$0xff] }
  0x94   : > { %357 = vst.msk [vmem:[#allocation2 + $0x20] sm:$0xff] %vm209_vm2, %v355_v7  ;;  %v318_v11 = vpop.permute.xlu1 %317  ;;  %2212 = vmatprep.mubr.bf16.mxu0 %v1936_v10  ;;  %v1972_v14 = vld [vmem:[#allocation2 + $0x128] sm:$0xff]  ;;  %v3690_v10 = vld [vmem:[%s3762_s23 + $0xb4] sm:$0xff]  }
  0x95   : > { %320 = vst.msk [vmem:[#allocation2 + $0x18] sm:$0xff] %vm209_vm2, %v318_v11  ;;  %2308 = vmatprep.mubr.bf16.mxu1 %v1972_v14  ;;  %v3691_v11 = vld [vmem:[%s3762_s23 + $0xa8] sm:$0xff]  }
  0x96   : > { %990 = vst.msk [vmem:[#allocation2 + $0xb0] sm:$0xff] %vm180_vm1, %v3690_v10  ;;  %953 = vst.msk [vmem:[#allocation2 + $0xa8] sm:$0xff] %vm180_vm1, %v3691_v11 }
  0x97   : > { %v1675_v15 = vpop.permute.xlu0 %1674  ;;  %v1935_v17 = vld [vmem:[#allocation2] sm:$0xff] }
  0x98   : > { %1677 = vst.msk [vmem:[#allocation2 + $0x140] sm:$0xff] %vm209_vm2, %v1675_v15  ;;  %v1638_v19 = vpop.permute.xlu1 %1637  ;;  %v1971_v20 = vld [vmem:[#allocation2 + $0x120] sm:$0xff]  ;;  %2213 = vmatmul.mubr.bf16.vlgmr.msra.gmra.mrb[0].mxu0 %v1935_v17  ;;  %v3694_v17 = vld [vmem:[%s3762_s23 + $0xcc] sm:$0xff]  }
  0x99   : > { %1640 = vst.msk [vmem:[#allocation2 + $0x138] sm:$0xff] %vm209_vm2, %v1638_v19  ;;  %2309 = vmatmul.mubr.bf16.vlgmr.msra.gmra.mrb[0].mxu1 %v1971_v20  ;;  %v3693_v15 = vld [vmem:[%s3762_s23 + $0xc0] sm:$0xff]   ;;  %v3696_v20 = vld [vmem:[%s3762_s23 + $0xd8] sm:$0xff]  }
  0x9a   : > { %3469 = vmatpush3.bf16.msra.mxu1 %v3662_v18  ;;  %1027 = vst.msk [vmem:[#allocation2 + $0xb8] sm:$0xff] %vm180_vm1, %v3693_v15  ;;  %v3695_v18 = vld [vmem:[%s3762_s23 + $0xc0] sm:$0xff]   ;;  %1100 = vst.msk [vmem:[#allocation2 + $0xc8] sm:$0xff] %vm180_vm1, %v3694_v17 }
  0x9b   : > { %v465_v23 = vpop.permute.xlu0 %464  ;;  %v1939_v26 = vld [vmem:[#allocation2 + $0x20] sm:$0xff]  ;;  %3470 = vmatprep.subr.bf16.mxu1 %v3665_v24  ;;  %1063 = vst.msk [vmem:[#allocation2 + $0xc0] sm:$0xff] %vm180_vm1, %v3695_v18  ;;  %1137 = vst.msk [vmem:[#allocation2 + $0xd0] sm:$0xff] %vm180_vm1, %v3696_v20 }
  0x9c   : > { %467 = vst.msk [vmem:[#allocation2 + $0x38] sm:$0xff] %vm209_vm2, %v465_v23  ;;  %2220 = vmatprep.mubr.bf16.mxu0 %v1939_v26  ;;  %v1938_v28 = vld [vmem:[#allocation2 + $0x18] sm:$0xff]  ;;  %v428_v31 = vpop.permute.xlu1 %427 }
  0x9d   : > { %430 = vst.msk [vmem:[#allocation2 + $0x30] sm:$0xff] %vm209_vm2, %v428_v31  ;;  %v3702_v31 = vld [vmem:[%s3762_s23 + $0xfc] sm:$0xff]  }
  0x9e   : > { %3471 = vmatpush3.bf16.msra.mxu1 %v3665_v24  ;;  %v3697_v24 = vld [vmem:[%s3762_s23 + $0xf0] sm:$0xff]   ;;  %1320 = vst.msk [vmem:[#allocation2 + $0xf8] sm:$0xff] %vm180_vm1, %v3702_v31 }
  0x9f   : > { %v1975_v29 = vld [vmem:[#allocation2 + $0x140] sm:$0xff]  ;;  %v1785_v33 = vpop.permute.xlu0 %1784  ;;  %3472 = vmatprep.subr.bf16.mxu1 %v3668_v30  ;;  %1247 = vst.msk [vmem:[#allocation2 + $0xe8] sm:$0xff] %vm180_vm1, %v3697_v24 }
  0xa0   : > { %2316 = vmatprep.mubr.bf16.mxu1 %v1975_v29  ;;  %v1974_v34 = vld [vmem:[#allocation2 + $0x138] sm:$0xff]  ;;  %1787 = vst.msk [vmem:[#allocation2 + $0x158] sm:$0xff] %vm209_vm2, %v1785_v33  ;;  %v1748_v37 = vpop.permute.xlu1 %1747  ;;  %2221 = vmatmul.mubr.bf16.gmra.mrb[4].mxu0 %v1938_v28  ;;  %v3700_v29 = vld [vmem:[%s3762_s23 + $0x108] sm:$0xff]  }
  0xa1   : > { %1750 = vst.msk [vmem:[#allocation2 + $0x150] sm:$0xff] %vm209_vm2, %v1748_v37  ;;  %2317 = vmatmul.mubr.bf16.gmra.mrb[4].mxu1 %v1974_v34  ;;  %v3703_v34 = vld [vmem:[%s3762_s23 + $0xf0] sm:$0xff]   ;;  %v3704_v37 = vld [vmem:[%s3762_s23 + $0x138] sm:$0xff]  }
  0xa2   : > { %3473 = vmatpush3.bf16.msra.mxu1 %v3668_v30  ;;  %v3701_v30 = vld [vmem:[%s3762_s23 + $0x120] sm:$0xff]   ;;  %1357 = vst.msk [vmem:[#allocation2 + $0x100] sm:$0xff] %vm180_vm1, %v3700_v29  ;;  %1283 = vst.msk [vmem:[#allocation2 + $0xf0] sm:$0xff] %vm180_vm1, %v3703_v34 }
  0xa3   : > { %v1942_v39 = vld [vmem:[#allocation2 + $0x38] sm:$0xff]  ;;  %v575_v40 = vpop.permute.xlu0 %574  ;;  %3474 = vmatprep.subr.bf16.mxu1 %v3671_v36  ;;  %1467 = vst.msk [vmem:[#allocation2 + $0x118] sm:$0xff] %vm180_vm1, %v3701_v30  ;;  %1577 = vst.msk [vmem:[#allocation2 + $0x130] sm:$0xff] %vm180_vm1, %v3704_v37 }
  0xa4   : > { %2228 = vmatprep.mubr.bf16.mxu0 %v1942_v39  ;;  %577 = vst.msk [vmem:[#allocation2 + $0x50] sm:$0xff] %vm209_vm2, %v575_v40  ;;  %v538_v44 = vpop.permute.xlu1 %537  ;;  %v1941_v45 = vld [vmem:[#allocation2 + $0x30] sm:$0xff] }
  0xa5   : > { %540 = vst.msk [vmem:[#allocation2 + $0x48] sm:$0xff] %vm209_vm2, %v538_v44  ;;  %v3706_v40 = vld [vmem:[%s3762_s23 + $0x114] sm:$0xff]   ;;  %v3708_v44 = vld [vmem:[%s3762_s23 + $0x168] sm:$0xff]  }
  0xa6   : > { %3475 = vmatpush3.bf16.msra.mxu1 %v3671_v36  ;;  %1430 = vst.msk [vmem:[#allocation2 + $0x110] sm:$0xff] %vm180_vm1, %v3706_v40  ;;  %1797 = vst.msk [vmem:[#allocation2 + $0x160] sm:$0xff] %vm180_vm1, %v3708_v44 }
  0xa7   : > { %v1978_v47 = vld [vmem:[#allocation2 + $0x158] sm:$0xff]  ;;  %v1895_v49 = vpop.permute.xlu0 %1894  ;;  %3476 = vmatprep.subr.bf16.mxu1 %v3674_v42 }
  0xa8   : > { %2324 = vmatprep.mubr.bf16.mxu1 %v1978_v47  ;;  %1897 = vst.msk [vmem:[#allocation2 + $0x170] sm:$0xff] %vm209_vm2, %v1895_v49  ;;  %2229 = vmatmul.mubr.bf16.gmra.mrb[8].mxu0 %v1941_v45  ;;  %v1977_v51 = vld [vmem:[#allocation2 + $0x150] sm:$0xff]  ;;  %v1858_v53 = vpop.permute.xlu1 %1857  ;;  %v3709_v45 = vld [vmem:[%s3762_s23 + $0x180] sm:$0xff]  }
  0xa9   : > { %2325 = vmatmul.mubr.bf16.gmra.mrb[8].mxu1 %v1977_v51  ;;  %1860 = vst.msk [vmem:[#allocation2 + $0x168] sm:$0xff] %vm209_vm2, %v1858_v53 }
  0xaa   : > { %3477 = vmatpush3.bf16.msra.mxu1 %v3674_v42  ;;  %v3707_v42 = vld [vmem:[%s3762_s23 + $0x108] sm:$0xff]   ;;  %1907 = vst.msk [vmem:[#allocation2 + $0x178] sm:$0xff] %vm180_vm1, %v3709_v45 }
  0xab   : > { %v1945_v54 = vld [vmem:[#allocation2 + $0x50] sm:$0xff]  ;;  %v685_v57 = vpop.permute.xlu0 %684  ;;  %3478 = vmatprep.subr.bf16.mxu1 %v3677_v48  ;;  %1393 = vst.msk [vmem:[#allocation2 + $0x108] sm:$0xff] %vm180_vm1, %v3707_v42 }
  0xac   : > { %2236 = vmatprep.mubr.bf16.mxu0 %v1945_v54  ;;  %687 = vst.msk [vmem:[#allocation2 + $0x68] sm:$0xff] %vm209_vm2, %v685_v57  ;;  %v1944_v59 = vld [vmem:[#allocation2 + $0x48] sm:$0xff]  ;;  %v648_v0 = vpop.permute.xlu1 %647 }
  0xad   : > { %650 = vst.msk [vmem:[#allocation2 + $0x60] sm:$0xff] %vm209_vm2, %v648_v0 }
  0xae   : > { %3479 = vmatpush3.bf16.msra.mxu1 %v3677_v48 }
  0xaf   : > { %v1981_v62 = vld [vmem:[#allocation2 + $0x170] sm:$0xff]  ;;  %3480 = vmatprep.subr.bf16.mxu1 %v3680_v55  ;;  %v282_v2 = vpop.permute.xlu0 %281 }
  0xb0   : > { %2237 = vmatmul.mubr.bf16.gmra.mrb[12].mxu0 %v1944_v59  ;;  %2332 = vmatprep.mubr.bf16.mxu1 %v1981_v62  ;;  %v1980_v3 = vld [vmem:[#allocation2 + $0x168] sm:$0xff]  ;;  %284 = vst.msk [vmem:[#allocation2 + $0x10] sm:$0xff] %vm209_vm2, %v282_v2  ;;  %v392_v7 = vpop.permute.xlu1 %391 }
  0xb1   : > { %2333 = vmatmul.mubr.bf16.gmra.mrb[12].mxu1 %v1980_v3  ;;  %394 = vst.msk [vmem:[#allocation2 + $0x28] sm:$0xff] %vm209_vm2, %v392_v7 }
  0xb2   : > { %3481 = vmatpush3.bf16.msra.mxu1 %v3680_v55 }
  0xb3   : > { %v1948_v6 = vld [vmem:[#allocation2 + $0x68] sm:$0xff]  ;;  %3482 = vmatprep.subr.bf16.mxu1 %v3683_v60  ;;  %v795_v9 = vpop.permute.xlu0 %794 }
  0xb4   : > { %2244 = vmatprep.mubr.bf16.mxu0 %v1948_v6  ;;  %797 = vst.msk [vmem:[#allocation2 + $0x80] sm:$0xff] %vm209_vm2, %v795_v9  ;;  %v758_v13 = vpop.permute.xlu1 %757  ;;  %v1947_v14 = vld [vmem:[#allocation2 + $0x60] sm:$0xff] }
  0xb5   : > { %760 = vst.msk [vmem:[#allocation2 + $0x78] sm:$0xff] %vm209_vm2, %v758_v13 }
  0xb6   : > { %3483 = vmatpush3.bf16.msra.mxu1 %v3683_v60 }
  0xb7   : > { %v1937_v16 = vld [vmem:[#allocation2 + $0x10] sm:$0xff]  ;;  %v502_v19 = vpop.permute.xlu0 %501 }
  0xb8   : > { %2245 = vmatmul.mubr.bf16.gmra.mrb[16].mxu0 %v1947_v14  ;;  %3484 = vmatprep.mubr.bf16.mxu1 %v1937_v16  ;;  %504 = vst.msk [vmem:[#allocation2 + $0x40] sm:$0xff] %vm209_vm2, %v502_v19  ;;  %v1940_v21 = vld [vmem:[#allocation2 + $0x28] sm:$0xff]  ;;  %v612_v22 = vpop.permute.xlu1 %611 }
  0xb9   : > { %3485 = vmatmul.mubr.bf16.vlgmr.msra.gmra.mrb[16].mxu1 %v1940_v21  ;;  %614 = vst.msk [vmem:[#allocation2 + $0x58] sm:$0xff] %vm209_vm2, %v612_v22 }
  0xbb   : > { %v1951_v23 = vld [vmem:[#allocation2 + $0x80] sm:$0xff]  ;;  %v905_v26 = vpop.permute.xlu0 %904 }
  0xbc   : > { %2252 = vmatprep.mubr.bf16.mxu0 %v1951_v23  ;;  %907 = vst.msk [vmem:[#allocation2 + $0x98] sm:$0xff] %vm209_vm2, %v905_v26  ;;  %v1950_v28 = vld [vmem:[#allocation2 + $0x78] sm:$0xff]  ;;  %v868_v33 = vpop.permute.xlu1 %867 }
  0xbd   : > { %870 = vst.msk [vmem:[#allocation2 + $0x90] sm:$0xff] %vm209_vm2, %v868_v33 }
  0xbf   : > { %v1943_v32 = vld [vmem:[#allocation2 + $0x40] sm:$0xff]  ;;  %v722_v35 = vpop.permute.xlu0 %721 }
  0xc0   : > { %2253 = vmatmul.mubr.bf16.gmra.mrb[20].mxu0 %v1950_v28  ;;  %3488 = vmatprep.mubr.bf16.mxu1 %v1943_v32  ;;  %v1946_v36 = vld [vmem:[#allocation2 + $0x58] sm:$0xff]  ;;  %724 = vst.msk [vmem:[#allocation2 + $0x70] sm:$0xff] %vm209_vm2, %v722_v35  ;;  %v832_v41 = vpop.permute.xlu1 %831 }
  0xc1   : > { %3489 = vmatmul.mubr.bf16.gmra.mrb[20].mxu1 %v1946_v36  ;;  %834 = vst.msk [vmem:[#allocation2 + $0x88] sm:$0xff] %vm209_vm2, %v832_v41 }
  0xc3   : > { %v1954_v39 = vld [vmem:[#allocation2 + $0x98] sm:$0xff]  ;;  %v1015_v43 = vpop.permute.xlu0 %1014 }
  0xc4   : > { %2260 = vmatprep.mubr.bf16.mxu0 %v1954_v39  ;;  %1017 = vst.msk [vmem:[#allocation2 + $0xb0] sm:$0xff] %vm209_vm2, %v1015_v43  ;;  %v978_v46 = vpop.permute.xlu1 %977  ;;  %v1953_v47 = vld [vmem:[#allocation2 + $0x90] sm:$0xff] }
  0xc5   : > { %980 = vst.msk [vmem:[#allocation2 + $0xa8] sm:$0xff] %vm209_vm2, %v978_v46 }
  0xc7   : > { %v1949_v48 = vld [vmem:[#allocation2 + $0x70] sm:$0xff]  ;;  %v942_v49 = vpop.permute.xlu0 %941 }
  0xc8   : > { %2261 = vmatmul.mubr.bf16.gmra.mrb[24].mxu0 %v1953_v47  ;;  %3492 = vmatprep.mubr.bf16.mxu1 %v1949_v48  ;;  %944 = vst.msk [vmem:[#allocation2 + $0xa0] sm:$0xff] %vm209_vm2, %v942_v49  ;;  %v1952_v50 = vld [vmem:[#allocation2 + $0x88] sm:$0xff]  ;;  %v1052_v51 = vpop.permute.xlu1 %1051 }
  0xc9   : > { %3493 = vmatmul.mubr.bf16.gmra.mrb[24].mxu1 %v1952_v50  ;;  %1054 = vst.msk [vmem:[#allocation2 + $0xb8] sm:$0xff] %vm209_vm2, %v1052_v51 }
  0xcb   : > { %v1957_v52 = vld [vmem:[#allocation2 + $0xb0] sm:$0xff]  ;;  %v1125_v53 = vpop.permute.xlu0 %1124 }
  0xcc   : > { %2268 = vmatprep.mubr.bf16.mxu0 %v1957_v52  ;;  %1127 = vst.msk [vmem:[#allocation2 + $0xc8] sm:$0xff] %vm209_vm2, %v1125_v53  ;;  %v1956_v54 = vld [vmem:[#allocation2 + $0xa8] sm:$0xff]  ;;  %v1088_v56 = vpop.permute.xlu1 %1087 }
  0xcd   : > { %1090 = vst.msk [vmem:[#allocation2 + $0xc0] sm:$0xff] %vm209_vm2, %v1088_v56 }
  0xcf   : > { %v1955_v55 = vld [vmem:[#allocation2 + $0xa0] sm:$0xff]  ;;  %v1162_v57 = vpop.permute.xlu0 %1161 }
  0xd0   : > { %2269 = vmatmul.mubr.bf16.gmra.mrb[28].mxu0 %v1956_v54  ;;  %3496 = vmatprep.mubr.bf16.mxu1 %v1955_v55  ;;  %v1958_v58 = vld [vmem:[#allocation2 + $0xb8] sm:$0xff]  ;;  %1164 = vst.msk [vmem:[#allocation2 + $0xd0] sm:$0xff] %vm209_vm2, %v1162_v57  ;;  %v1272_v60 = vpop.permute.xlu1 %1271 }
  0xd1   : > { %3497 = vmatmul.mubr.bf16.gmra.mrb[28].mxu1 %v1958_v58  ;;  %1274 = vst.msk [vmem:[#allocation2 + $0xe8] sm:$0xff] %vm209_vm2, %v1272_v60  ;;  %v2032_v60 = vlaneseq }
  0xd3   : > { %v1960_v59 = vld [vmem:[#allocation2 + $0xc8] sm:$0xff]  ;;  %v1235_v61 = vpop.permute.xlu0 %1234 }
  0xd4   : > { %2276 = vmatprep.mubr.bf16.mxu0 %v1960_v59  ;;  %1237 = vst.msk [vmem:[#allocation2 + $0xe0] sm:$0xff] %vm209_vm2, %v1235_v61  ;;  %v1198_v62 = vpop.permute.xlu1 %1197  ;;  %v1959_v63 = vld [vmem:[#allocation2 + $0xc0] sm:$0xff] }
  0xd5   : > { %1200 = vst.msk [vmem:[#allocation2 + $0xd8] sm:$0xff] %vm209_vm2, %v1198_v62 }
  0xd7   : > { %v1961_v0 = vld [vmem:[#allocation2 + $0xd0] sm:$0xff]  ;;  %v1382_v1 = vpop.permute.xlu0 %1381 }
  0xd8   : > { %2277 = vmatmul.mubr.bf16.gmra.mrb[32].mxu0 %v1959_v63  ;;  %3500 = vmatprep.mubr.bf16.mxu1 %v1961_v0  ;;  %1384 = vst.msk [vmem:[#allocation2 + $0x100] sm:$0xff] %vm209_vm2, %v1382_v1  ;;  %v1964_v2 = vld [vmem:[#allocation2 + $0xe8] sm:$0xff]  ;;  %v1492_v3 = vpop.permute.xlu1 %1491  ;;  %v2033_v63 = vshrl.u32 %v2032_v60, 7 }
  0xd9   : > { %3501 = vmatmul.mubr.bf16.gmra.mrb[32].mxu1 %v1964_v2  ;;  %1494 = vst.msk [vmem:[#allocation2 + $0x118] sm:$0xff] %vm209_vm2, %v1492_v3 }
  0xdb   : > { %v1963_v4 = vld [vmem:[#allocation2 + $0xe0] sm:$0xff]  ;;  %v1345_v5 = vpop.permute.xlu0 %1344 }
  0xdc   : > { %2284 = vmatprep.mubr.bf16.mxu0 %v1963_v4  ;;  %1347 = vst.msk [vmem:[#allocation2 + $0xf8] sm:$0xff] %vm209_vm2, %v1345_v5  ;;  %v1962_v6 = vld [vmem:[#allocation2 + $0xd8] sm:$0xff]  ;;  %v1308_v8 = vpop.permute.xlu1 %1307 }
  0xdd   : > { %1310 = vst.msk [vmem:[#allocation2 + $0xf0] sm:$0xff] %vm209_vm2, %v1308_v8 }
  0xdf   : > { %v1967_v7 = vld [vmem:[#allocation2 + $0x100] sm:$0xff]  ;;  %v1602_v9 = vpop.permute.xlu0 %1601 }
  0xe0   : > { %2285 = vmatmul.mubr.bf16.gmra.mrb[36].mxu0 %v1962_v6  ;;  %3504 = vmatprep.mubr.bf16.mxu1 %v1967_v7  ;;  %v1970_v10 = vld [vmem:[#allocation2 + $0x118] sm:$0xff]  ;;  %1604 = vst.msk [vmem:[#allocation2 + $0x130] sm:$0xff] %vm209_vm2, %v1602_v9  ;;  %v1712_v12 = vpop.permute.xlu1 %1711  ;;  %v2034_v9 = vsub.s32 0, %v2033_v63 }
  0xe1   : > { %3505 = vmatmul.mubr.bf16.gmra.mrb[36].mxu1 %v1970_v10  ;;  %1714 = vst.msk [vmem:[#allocation2 + $0x148] sm:$0xff] %vm209_vm2, %v1712_v12 }
  0xe3   : > { %v1966_v11 = vld [vmem:[#allocation2 + $0xf8] sm:$0xff]  ;;  %v1455_v13 = vpop.permute.xlu0 %1454 }
  0xe4   : > { %2292 = vmatprep.mubr.bf16.mxu0 %v1966_v11  ;;  %1457 = vst.msk [vmem:[#allocation2 + $0x110] sm:$0xff] %vm209_vm2, %v1455_v13  ;;  %v1418_v14 = vpop.permute.xlu1 %1417  ;;  %v1965_v15 = vld [vmem:[#allocation2 + $0xf0] sm:$0xff]  ;;  %v2031_v11 = vld [vmem:[%s4385_s2] sm:$0x7] }
  0xe5   : > { %1420 = vst.msk [vmem:[#allocation2 + $0x108] sm:$0xff] %vm209_vm2, %v1418_v14  ;;  %v4186_v13 = vrot.slane %v2031_v11, %v2034_v9 }
  0xe7   : > { %v1973_v16 = vld [vmem:[#allocation2 + $0x130] sm:$0xff]  ;;  %v1822_v17 = vpop.permute.xlu0 %1821 }
  0xe8   : > { %2293 = vmatmul.mubr.bf16.gmra.mrb[40].mxu0 %v1965_v15  ;;  %3508 = vmatprep.mubr.bf16.mxu1 %v1973_v16  ;;  %1824 = vst.msk [vmem:[#allocation2 + $0x160] sm:$0xff] %vm209_vm2, %v1822_v17  ;;  %v1976_v18 = vld [vmem:[#allocation2 + $0x148] sm:$0xff]  ;;  %v1932_v19 = vpop.permute.xlu1 %1931 }
  0xe9   : > { %3509 = vmatmul.mubr.bf16.gmra.mrb[40].mxu1 %v1976_v18  ;;  %1934 = vst.msk [vmem:[#allocation2 + $0x178] sm:$0xff] %vm209_vm2, %v1932_v19  ;;  %v2568_v18 = vsub.s32 1, %v2033_v63 }
  0xeb   : > { %v1969_v20 = vld [vmem:[#allocation2 + $0x110] sm:$0xff] }
  0xec   : > { %2300 = vmatprep.mubr.bf16.mxu0 %v1969_v20  ;;  %v1968_v21 = vld [vmem:[#allocation2 + $0x108] sm:$0xff] }
  0xef   : > { %v1979_v22 = vld [vmem:[#allocation2 + $0x160] sm:$0xff] }
  0xf0   : > { %2301 = vmatmul.mubr.bf16.gmra.mrb[44].mxu0 %v1968_v21  ;;  %3512 = vmatprep.mubr.bf16.mxu1 %v1979_v22  ;;  %v1982_v23 = vld [vmem:[#allocation2 + $0x178] sm:$0xff] }
  0xf1   : > { %3513 = vmatmul.mubr.bf16.gmra.mrb[44].mxu1 %v1982_v23 }
 0x16b   : > { %v3348_v24 = vpop.f32.mrb[0].mxu0 }
 0x16c   : > { %v3349_v25 = vpop.f32.mrb[1].mxu0  ;;  %v3420_v26 = vpop.f32.mrb[0].mxu1 }
 0x16d   : > { %v3350_v27 = vadd.f32 %v3349_v25, %v3348_v24  ;;  %v3351_v28 = vpop.f32.mrb[2].mxu0  ;;  %v3421_v29 = vpop.f32.mrb[1].mxu1  ;;  %v2604_v24 = vsub.s32 2, %v2033_v63 }
 0x16e   : > { %v4163_v30 = vadd.f32 %v3421_v29, %v3420_v26  ;;  %v3352_v31 = vpop.f32.mrb[3].mxu0  ;;  %v3423_v32 = vpop.f32.mrb[2].mxu1 }
 0x16f   : > { %v3353_v33 = vadd.f32 %v3352_v31, %v3351_v28  ;;  %v3424_v34 = vpop.f32.mrb[3].mxu1  ;;  %v2215_v21 = vadd.f32 %v3350_v27, %v4186_v13 }
 0x170   : > { %v4165_v35 = vadd.f32 %v3424_v34, %v3423_v32  ;;  %v4196_v34 = vrot.slane %v2031_v11, %v2568_v18 }
 0x171   : > { %v2218_v31 = vadd.f32 %v3353_v33, %v4186_v13 }
 0x173   : > { %v3354_v36 = vpop.f32.mrb[4].mxu0 }
 0x174   : > { %v3355_v37 = vpop.f32.mrb[5].mxu0  ;;  %v3426_v38 = vpop.f32.mrb[4].mxu1 }
 0x175   : > { %v3356_v39 = vadd.f32 %v3355_v37, %v3354_v36  ;;  %v3357_v40 = vpop.f32.mrb[6].mxu0  ;;  %v3427_v41 = vpop.f32.mrb[5].mxu1 }
 0x176   : > { %v4167_v42 = vadd.f32 %v3427_v41, %v3426_v38  ;;  %v3358_v43 = vpop.f32.mrb[7].mxu0  ;;  %v3429_v44 = vpop.f32.mrb[6].mxu1  ;;  %v4198_v41 = vrot.slane %v2031_v11, %v2604_v24 }
 0x177   : > { %v3359_v45 = vadd.f32 %v3358_v43, %v3357_v40  ;;  %v3430_v46 = vpop.f32.mrb[7].mxu1  ;;  %v2223_v17 = vadd.f32 %v3356_v39, %v4186_v13 }
 0x178   : > { %v4169_v47 = vadd.f32 %v3430_v46, %v3429_v44 }
 0x179   : > { %v2226_v26 = vadd.f32 %v3359_v45, %v4186_v13 }
 0x17b   : > { %v3360_v48 = vpop.f32.mrb[8].mxu0 }
 0x17c   : > { %v3361_v49 = vpop.f32.mrb[9].mxu0  ;;  %v3432_v50 = vpop.f32.mrb[8].mxu1 }
 0x17d   : > { %v4171_v51 = vadd.f32 %v3361_v49, %v3360_v48  ;;  %v3363_v52 = vpop.f32.mrb[10].mxu0  ;;  %v3433_v53 = vpop.f32.mrb[9].mxu1 }
 0x17e   : > { %v4173_v54 = vadd.f32 %v3433_v53, %v3432_v50  ;;  %v3364_v55 = vpop.f32.mrb[11].mxu0  ;;  %v3435_v56 = vpop.f32.mrb[10].mxu1 }
 0x17f   : > { %v4175_v57 = vadd.f32 %v3364_v55, %v3363_v52  ;;  %v3436_v58 = vpop.f32.mrb[11].mxu1  ;;  %v2231_v63 = vadd.f32 %v4171_v51, %v4186_v13 }
 0x180   : > { %v4177_v59 = vadd.f32 %v3436_v58, %v3435_v56 }
 0x181   : > { %v2234_v11 = vadd.f32 %v4175_v57, %v4186_v13 }
 0x183   : > { %v3366_v61 = vpop.f32.mrb[12].mxu0 }
 0x184   : > { %v3367_v62 = vpop.f32.mrb[13].mxu0  ;;  %v3438_v1 = vpop.f32.mrb[12].mxu1 }
 0x185   : > { %v3368_v0 = vadd.f32 %v3367_v62, %v3366_v61  ;;  %v3369_v2 = vpop.f32.mrb[14].mxu0  ;;  %v3439_v3 = vpop.f32.mrb[13].mxu1 }
 0x186   : > { %v3370_v4 = vpop.f32.mrb[15].mxu0  ;;  %v4179_v5 = vadd.f32 %v3439_v3, %v3438_v1  ;;  %v3441_v7 = vpop.f32.mrb[14].mxu1 }
 0x187   : > { %v3371_v6 = vadd.f32 %v3370_v4, %v3369_v2  ;;  %v3442_v8 = vpop.f32.mrb[15].mxu1  ;;  %v2239_v56 = vadd.f32 %v3368_v0, %v4186_v13 }
 0x188   : > { %v4181_v10 = vadd.f32 %v3442_v8, %v3441_v7 }
 0x189   : > { %v2242_v4 = vadd.f32 %v3371_v6, %v4186_v13 }
 0x18b   : > { %v3372_v12 = vpop.f32.mrb[16].mxu0 }
 0x18c   : > { %v3373_v14 = vpop.f32.mrb[17].mxu0  ;;  %v3486_v20 = vpop.f32.mrb[16].mxu1 }
 0x18d   : > { %v4188_v15 = vadd.f32 %v3373_v14, %v3372_v12  ;;  %v3375_v16 = vpop.f32.mrb[18].mxu0  ;;  %v2384_v23 = vadd.f32 %v3486_v20, %v2223_v17  ;;  %v2375_v25 = vpop.f32.mrb[17].mxu1 }
 0x18e   : > { %v3376_v19 = vpop.f32.mrb[19].mxu0  ;;  %v2376_v28 = vadd.f32 %v2375_v25, %v2215_v21  ;;  %v3487_v29 = vpop.f32.mrb[18].mxu1 }
 0x18f   : > { %v4192_v22 = vadd.f32 %v3376_v19, %v3375_v16  ;;  %v2504_v32 = vmul.f32 0.01, %v2384_v23  ;;  %v2387_v36 = vadd.f32 %v3487_v29, %v2226_v26  ;;  %v2378_v37 = vpop.f32.mrb[19].mxu1 }
 0x190   : > { %v2502_v38 = vmul.f32 0.01, %v2376_v28  ;;  %v2379_v39 = vadd.f32 %v2378_v37, %v2218_v31 }
 0x191   : > { %v2536_v40 = vmax.f32 %v2384_v23, %v2504_v32  ;;  %v2505_v43 = vmul.f32 0.01, %v2387_v36 }
 0x192   : > { %v2534_v46 = vmax.f32 %v2376_v28, %v2502_v38  ;;  %v2503_v45 = vmul.f32 0.01, %v2379_v39 }
 0x193   : > { %v3378_v27 = vpop.f32.mrb[20].mxu0  ;;  %v2572_v33 = vmul.f32 %v4196_v34, %v2536_v40  ;;  %v2537_v50 = vmax.f32 %v2387_v36, %v2505_v43 }
 0x194   : > { %v3379_v44 = vpop.f32.mrb[21].mxu0  ;;  %v2570_v53 = vmul.f32 %v4196_v34, %v2534_v46  ;;  %v2535_v55 = vmax.f32 %v2379_v39, %v2503_v45  ;;  %v3490_v62 = vpop.f32.mrb[20].mxu1 }
 0x195   : > { %v3380_v48 = vadd.f32 %v3379_v44, %v3378_v27  ;;  %v3381_v49 = vpop.f32.mrb[22].mxu0  ;;  %v2608_v60 = vadd.f32 %v4198_v41, %v2572_v33  ;;  %v2573_v61 = vmul.f32 %v4196_v34, %v2537_v50  ;;  %v2400_v2 = vadd.f32 %v3490_v62, %v2239_v56  ;;  %v2391_v3 = vpop.f32.mrb[21].mxu1 }
 0x196   : > { %v3382_v52 = vpop.f32.mrb[23].mxu0  ;;  %v2606_v1 = vadd.f32 %v4198_v41, %v2570_v53  ;;  %v2571_v0 = vmul.f32 %v4196_v34, %v2535_v55  ;;  %v2392_v9 = vadd.f32 %v2391_v3, %v2231_v63  ;;  %v3491_v51 = vpop.f32.mrb[22].mxu1  ;;  %v2247_v50 = vadd.f32 %v4188_v15, %v4186_v13 }
 0x197   : > { %v3383_v58 = vadd.f32 %v3382_v52, %v3381_v49  ;;  %v3302_v7 = vpack.c.bf16 %v2608_v60, %v2608_v60  ;;  %v2609_v8 = vadd.f32 %v4198_v41, %v2573_v61  ;;  %v2508_v16 = vmul.f32 0.01, %v2400_v2  ;;  %v2394_v18 = vpop.f32.mrb[23].mxu1 }
 0x198   : > { %v3300_v12 = vpack.c.bf16 %v2606_v1, %v2606_v1  ;;  %v2607_v14 = vadd.f32 %v4198_v41, %v2571_v0  ;;  %v2403_v17 = vadd.f32 %v3491_v51, %v2242_v4  ;;  %v2506_v6 = vmul.f32 0.01, %v2392_v9 }
 0x199   : > { %2769 = vst.msk [vmem:[%s4211_s21 + $0x8] sm:$0xf] %vm2766_vm3, %v3302_v7  ;;  %v3303_v19 = vpack.c.bf16 %v2609_v8, %v2609_v8  ;;  %v2395_v20 = vadd.f32 %v2394_v18, %v2234_v11  ;;  %v2540_v23 = vmax.f32 %v2400_v2, %v2508_v16  ;;  %v2255_v44 = vadd.f32 %v3380_v48, %v4186_v13 }
 0x19a   : > { %2767 = vst.msk [vmem:[%s4211_s21] sm:$0xf] %vm2766_vm3, %v3300_v12  ;;  %v3301_v21 = vpack.c.bf16 %v2607_v14, %v2607_v14  ;;  %v2509_v24 = vmul.f32 0.01, %v2403_v17  ;;  %v2538_v57 = vmax.f32 %v2392_v9, %v2506_v6  ;;  %v2258_v61 = vadd.f32 %v3383_v58, %v4186_v13 }
 0x19b   : > { %2770 = vst.msk [vmem:[%s4211_s21 + $0xc] sm:$0xf] %vm2766_vm3, %v3303_v19  ;;  %v2507_v25 = vmul.f32 0.01, %v2395_v20  ;;  %v2576_v26 = vmul.f32 %v4196_v34, %v2540_v23  ;;  %v3384_v29 = vpop.f32.mrb[24].mxu0  ;;  %v2250_v1 = vadd.f32 %v4192_v22, %v4186_v13 }
 0x19c   : > { %2768 = vst.msk [vmem:[%s4211_s21 + $0x4] sm:$0xf] %vm2766_vm3, %v3301_v21  ;;  %v2541_v28 = vmax.f32 %v2403_v17, %v2509_v24  ;;  %v2574_v31 = vmul.f32 %v4196_v34, %v2538_v57  ;;  %v3385_v36 = vpop.f32.mrb[25].mxu0  ;;  %v3494_v33 = vpop.f32.mrb[24].mxu1 }
 0x19d   : > { %v2539_v32 = vmax.f32 %v2395_v20, %v2507_v25  ;;  %v2612_v37 = vadd.f32 %v4198_v41, %v2576_v26  ;;  %v3386_v39 = vadd.f32 %v3385_v36, %v3384_v29  ;;  %v3387_v27 = vpop.f32.mrb[26].mxu0  ;;  %v2416_v56 = vadd.f32 %v3494_v33, %v2255_v44  ;;  %v2407_v60 = vpop.f32.mrb[25].mxu1 }
 0x19e   : > { %v2577_v38 = vmul.f32 %v4196_v34, %v2541_v28  ;;  %v2610_v40 = vadd.f32 %v4198_v41, %v2574_v31  ;;  %v3388_v46 = vpop.f32.mrb[27].mxu0  ;;  %v2408_v62 = vadd.f32 %v2407_v60, %v2247_v50  ;;  %v3495_v63 = vpop.f32.mrb[26].mxu1 }
 0x19f   : > { %v2575_v43 = vmul.f32 %v4196_v34, %v2539_v32  ;;  %v3306_v45 = vpack.c.bf16 %v2612_v37, %v2612_v37  ;;  %v3389_v52 = vadd.f32 %v3388_v46, %v3387_v27  ;;  %v2512_v0 = vmul.f32 0.01, %v2416_v56  ;;  %v2410_v3 = vpop.f32.mrb[27].mxu1 }
 0x1a0   : > { %v2613_v49 = vadd.f32 %v4198_v41, %v2577_v38  ;;  %v3304_v53 = vpack.c.bf16 %v2610_v40, %v2610_v40  ;;  %v2419_v2 = vadd.f32 %v3495_v63, %v2258_v61  ;;  %v2510_v4 = vmul.f32 0.01, %v2408_v62 }
 0x1a1   : > { %v2611_v55 = vadd.f32 %v4198_v41, %v2575_v43  ;;  %2773 = vst.msk [vmem:[%s4211_s21 + $0x18] sm:$0xf] %vm2766_vm3, %v3306_v45  ;;  %v2411_v7 = vadd.f32 %v2410_v3, %v2250_v1  ;;  %v2544_v58 = vmax.f32 %v2416_v56, %v2512_v0  ;;  %v2263_v25 = vadd.f32 %v3386_v39, %v4186_v13 }
 0x1a2   : > { %v3307_v48 = vpack.c.bf16 %v2613_v49, %v2613_v49  ;;  %2771 = vst.msk [vmem:[%s4211_s21 + $0x10] sm:$0xf] %vm2766_vm3, %v3304_v53  ;;  %v2513_v9 = vmul.f32 0.01, %v2419_v2  ;;  %v2542_v11 = vmax.f32 %v2408_v62, %v2510_v4  ;;  %v2266_v40 = vadd.f32 %v3389_v52, %v4186_v13 }
 0x1a3   : > { %v3305_v15 = vpack.c.bf16 %v2611_v55, %v2611_v55  ;;  %v3390_v8 = vpop.f32.mrb[28].mxu0  ;;  %v2511_v12 = vmul.f32 0.01, %v2411_v7  ;;  %v2580_v16 = vmul.f32 %v4196_v34, %v2544_v58 }
 0x1a4   : > { %2774 = vst.msk [vmem:[%s4211_s21 + $0x1c] sm:$0xf] %vm2766_vm3, %v3307_v48  ;;  %v3391_v51 = vpop.f32.mrb[29].mxu0  ;;  %v2545_v17 = vmax.f32 %v2419_v2, %v2513_v9  ;;  %v2578_v19 = vmul.f32 %v4196_v34, %v2542_v11  ;;  %v3498_v57 = vpop.f32.mrb[28].mxu1 }
 0x1a5   : > { %2772 = vst.msk [vmem:[%s4211_s21 + $0x14] sm:$0xf] %vm2766_vm3, %v3305_v15  ;;  %v3392_v14 = vadd.f32 %v3391_v51, %v3390_v8  ;;  %v3393_v22 = vpop.f32.mrb[30].mxu0  ;;  %v2543_v6 = vmax.f32 %v2411_v7, %v2511_v12  ;;  %v2616_v23 = vadd.f32 %v4198_v41, %v2580_v16  ;;  %v2423_v31 = vpop.f32.mrb[29].mxu1 }
 0x1a6   : > { %v3394_v18 = vpop.f32.mrb[31].mxu0  ;;  %v2581_v24 = vmul.f32 %v4196_v34, %v2545_v17  ;;  %v2614_v26 = vadd.f32 %v4198_v41, %v2578_v19  ;;  %v2424_v38 = vadd.f32 %v2423_v31, %v2263_v25  ;;  %v3499_v27 = vpop.f32.mrb[30].mxu1 }
 0x1a7   : > { %v2271_v20 = vadd.f32 %v3392_v14, %v4186_v13  ;;  %v3395_v21 = vadd.f32 %v3394_v18, %v3393_v22  ;;  %v2579_v28 = vmul.f32 %v4196_v34, %v2543_v6  ;;  %v3310_v36 = vpack.c.bf16 %v2616_v23, %v2616_v23  ;;  %v2426_v45 = vpop.f32.mrb[31].mxu1 }
 0x1a8   : > { %v2617_v37 = vadd.f32 %v4198_v41, %v2581_v24  ;;  %v3308_v43 = vpack.c.bf16 %v2614_v26, %v2614_v26  ;;  %v2514_v33 = vmul.f32 0.01, %v2424_v38  ;;  %v2427_v50 = vadd.f32 %v2426_v45, %v2266_v40 }
 0x1a9   : > { %v2432_v29 = vadd.f32 %v3498_v57, %v2271_v20  ;;  %v2274_v32 = vadd.f32 %v3395_v21, %v4186_v13  ;;  %v2615_v39 = vadd.f32 %v4198_v41, %v2579_v28  ;;  %2777 = vst.msk [vmem:[%s4211_s21 + $0x28] sm:$0xf] %vm2766_vm3, %v3310_v36 }
 0x1aa   : > { %v3311_v49 = vpack.c.bf16 %v2617_v37, %v2617_v37  ;;  %2775 = vst.msk [vmem:[%s4211_s21 + $0x20] sm:$0xf] %vm2766_vm3, %v3308_v43  ;;  %v2546_v52 = vmax.f32 %v2424_v38, %v2514_v33  ;;  %v2515_v60 = vmul.f32 0.01, %v2427_v50 }
 0x1ab   : > { %v2516_v44 = vmul.f32 0.01, %v2432_v29  ;;  %v2435_v46 = vadd.f32 %v3499_v27, %v2274_v32  ;;  %v3309_v53 = vpack.c.bf16 %v2615_v39, %v2615_v39  ;;  %v3396_v62 = vpop.f32.mrb[32].mxu0 }
 0x1ac   : > { %2778 = vst.msk [vmem:[%s4211_s21 + $0x2c] sm:$0xf] %vm2766_vm3, %v3311_v49  ;;  %v2582_v63 = vmul.f32 %v4196_v34, %v2546_v52  ;;  %v2547_v1 = vmax.f32 %v2427_v50, %v2515_v60  ;;  %v3397_v15 = vpop.f32.mrb[33].mxu0  ;;  %v3502_v11 = vpop.f32.mrb[32].mxu1 }
 0x1ad   : > { %v2548_v55 = vmax.f32 %v2432_v29, %v2516_v44  ;;  %v2517_v56 = vmul.f32 0.01, %v2435_v46  ;;  %2776 = vst.msk [vmem:[%s4211_s21 + $0x24] sm:$0xf] %vm2766_vm3, %v3309_v53  ;;  %v3398_v3 = vadd.f32 %v3397_v15, %v3396_v62  ;;  %v3399_v4 = vpop.f32.mrb[34].mxu0  ;;  %v2439_v17 = vpop.f32.mrb[33].mxu1 }
 0x1ae   : > { %v2618_v7 = vadd.f32 %v4198_v41, %v2582_v63  ;;  %v2583_v8 = vmul.f32 %v4196_v34, %v2547_v1  ;;  %v3400_v58 = vpop.f32.mrb[35].mxu0  ;;  %v3503_v6 = vpop.f32.mrb[34].mxu1 }
 0x1af   : > { %v2584_v61 = vmul.f32 %v4196_v34, %v2548_v55  ;;  %v2549_v48 = vmax.f32 %v2435_v46, %v2517_v56  ;;  %v2279_v12 = vadd.f32 %v3398_v3, %v4186_v13  ;;  %v3401_v14 = vadd.f32 %v3400_v58, %v3399_v4  ;;  %v2442_v23 = vpop.f32.mrb[35].mxu1 }
 0x1b0   : > { %v3312_v22 = vpack.c.bf16 %v2618_v7, %v2618_v7  ;;  %v2619_v16 = vadd.f32 %v4198_v41, %v2583_v8  ;;  %v2319_v7 = vadd.f32 %v4167_v42, %v4186_v13  ;;  %v2311_v8 = vadd.f32 %v4163_v30, %v4186_v13 }
 0x1b1   : > { %v2620_v0 = vadd.f32 %v4198_v41, %v2584_v61  ;;  %v2585_v2 = vmul.f32 %v4196_v34, %v2549_v48  ;;  %v2440_v19 = vadd.f32 %v2439_v17, %v2279_v12  ;;  %v2282_v20 = vadd.f32 %v3401_v14, %v4186_v13 }
 0x1b2   : > { %2779 = vst.msk [vmem:[%s4211_s21 + $0x30] sm:$0xf] %vm2766_vm3, %v3312_v22  ;;  %v3313_v21 = vpack.c.bf16 %v2619_v16, %v2619_v16  ;;  %v2322_v17 = vadd.f32 %v4169_v47, %v4186_v13  ;;  %v2314_v42 = vadd.f32 %v4165_v35, %v4186_v13 }
 0x1b3   : > { %v3314_v9 = vpack.c.bf16 %v2620_v0, %v2620_v0  ;;  %v2621_v51 = vadd.f32 %v4198_v41, %v2585_v2  ;;  %v2518_v24 = vmul.f32 0.01, %v2440_v19  ;;  %v2443_v57 = vadd.f32 %v2442_v23, %v2282_v20  ;;  %v3402_v25 = vpop.f32.mrb[36].mxu0 }
 0x1b4   : > { %2780 = vst.msk [vmem:[%s4211_s21 + $0x34] sm:$0xf] %vm2766_vm3, %v3313_v21  ;;  %v3403_v26 = vpop.f32.mrb[37].mxu0  ;;  %v4290_v43 = vpop.f32.mrb[36].mxu1 }
 0x1b5   : > { %2781 = vst.msk [vmem:[%s4211_s21 + $0x38] sm:$0xf] %vm2766_vm3, %v3314_v9  ;;  %v3315_v18 = vpack.c.bf16 %v2621_v51, %v2621_v51  ;;  %v2550_v28 = vmax.f32 %v2440_v19, %v2518_v24  ;;  %v2519_v29 = vmul.f32 0.01, %v2443_v57  ;;  %v3404_v31 = vadd.f32 %v3403_v26, %v3402_v25  ;;  %v3405_v32 = vpop.f32.mrb[38].mxu0  ;;  %v2455_v45 = vpop.f32.mrb[37].mxu1 }
 0x1b6   : > { %v3406_v36 = vpop.f32.mrb[39].mxu0  ;;  %v4295_v33 = vpop.f32.mrb[38].mxu1 }
 0x1b7   : > { %2782 = vst.msk [vmem:[%s4211_s21 + $0x3c] sm:$0xf] %vm2766_vm3, %v3315_v18  ;;  %v2586_v37 = vmul.f32 %v4196_v34, %v2550_v28  ;;  %v2551_v38 = vmax.f32 %v2443_v57, %v2519_v29  ;;  %v2287_v27 = vadd.f32 %v3404_v31, %v4186_v13  ;;  %v3407_v40 = vadd.f32 %v3406_v36, %v3405_v32  ;;  %v2458_v52 = vpop.f32.mrb[39].mxu1 }
 0x1b8   : > { %v2327_v57 = vadd.f32 %v4173_v54, %v4186_v13  ;;  %v2335_v36 = vadd.f32 %v4179_v5, %v4186_v13 }
 0x1b9   : > { %v2622_v39 = vadd.f32 %v4198_v41, %v2586_v37  ;;  %v2587_v44 = vmul.f32 %v4196_v34, %v2551_v38  ;;  %v2448_v46 = vadd.f32 %v3502_v11, %v2287_v27  ;;  %v2290_v49 = vadd.f32 %v3407_v40, %v4186_v13 }
 0x1ba   : > { %v2330_v37 = vadd.f32 %v4177_v59, %v4186_v13 }
 0x1bb   : > { %v3316_v50 = vpack.c.bf16 %v2622_v39, %v2622_v39  ;;  %v2623_v53 = vadd.f32 %v4198_v41, %v2587_v44  ;;  %v2520_v55 = vmul.f32 0.01, %v2448_v46  ;;  %v2451_v56 = vadd.f32 %v3503_v6, %v2290_v49  ;;  %v3408_v1 = vpop.f32.mrb[40].mxu0 }
 0x1bc   : > { %v3409_v15 = vpop.f32.mrb[41].mxu0  ;;  %v3510_v12 = vpop.f32.mrb[40].mxu1 }
 0x1bd   : > { %2783 = vst.msk [vmem:[%s4211_s21 + $0x40] sm:$0xf] %vm2766_vm3, %v3316_v50  ;;  %v3317_v60 = vpack.c.bf16 %v2623_v53, %v2623_v53  ;;  %v2552_v61 = vmax.f32 %v2448_v46, %v2520_v55  ;;  %v2521_v48 = vmul.f32 0.01, %v2451_v56  ;;  %v3410_v3 = vadd.f32 %v3409_v15, %v3408_v1  ;;  %v3411_v4 = vpop.f32.mrb[42].mxu0  ;;  %v2471_v16 = vpop.f32.mrb[41].mxu1 }
 0x1be   : > { %v3412_v58 = vpop.f32.mrb[43].mxu0  ;;  %v2480_v22 = vadd.f32 %v3510_v12, %v2319_v7  ;;  %v2472_v19 = vadd.f32 %v2471_v16, %v2311_v8  ;;  %v3511_v20 = vpop.f32.mrb[42].mxu1  ;;  %v2338_v50 = vadd.f32 %v4181_v10, %v4186_v13 }
 0x1bf   : > { %2784 = vst.msk [vmem:[%s4211_s21 + $0x44] sm:$0xf] %vm2766_vm3, %v3317_v60  ;;  %v2588_v62 = vmul.f32 %v4196_v34, %v2552_v61  ;;  %v2553_v63 = vmax.f32 %v2451_v56, %v2521_v48  ;;  %v2295_v11 = vadd.f32 %v3410_v3, %v4186_v13  ;;  %v3413_v14 = vadd.f32 %v3412_v58, %v3411_v4  ;;  %v2474_v24 = vpop.f32.mrb[43].mxu1 }
 0x1c0   : > { %v2528_v21 = vmul.f32 0.01, %v2480_v22  ;;  %v2483_v23 = vadd.f32 %v3511_v20, %v2322_v17  ;;  %v2526_v25 = vmul.f32 0.01, %v2472_v19  ;;  %v2475_v35 = vadd.f32 %v2474_v24, %v2314_v42 }
 0x1c1   : > { %v2624_v0 = vadd.f32 %v4198_v41, %v2588_v62  ;;  %v2589_v2 = vmul.f32 %v4196_v34, %v2553_v63  ;;  %v2456_v18 = vadd.f32 %v2455_v45, %v2295_v11  ;;  %v2298_v6 = vadd.f32 %v3413_v14, %v4186_v13 }
 0x1c2   : > { %v2560_v29 = vmax.f32 %v2480_v22, %v2528_v21  ;;  %v2529_v31 = vmul.f32 0.01, %v2483_v23  ;;  %v2558_v27 = vmax.f32 %v2472_v19, %v2526_v25  ;;  %v2527_v54 = vmul.f32 0.01, %v2475_v35 }
 0x1c3   : > { %v3318_v9 = vpack.c.bf16 %v2624_v0, %v2624_v0  ;;  %v2625_v51 = vadd.f32 %v4198_v41, %v2589_v2  ;;  %v2522_v47 = vmul.f32 0.01, %v2456_v18  ;;  %v2459_v26 = vadd.f32 %v2458_v52, %v2298_v6  ;;  %v3414_v28 = vpop.f32.mrb[44].mxu0 }
 0x1c4   : > { %v3415_v32 = vpop.f32.mrb[45].mxu0  ;;  %v2596_v44 = vmul.f32 %v4196_v34, %v2560_v29  ;;  %v2561_v46 = vmax.f32 %v2483_v23, %v2529_v31  ;;  %v2594_v5 = vmul.f32 %v4196_v34, %v2558_v27  ;;  %v2559_v56 = vmax.f32 %v2475_v35, %v2527_v54  ;;  %v3514_v61 = vpop.f32.mrb[44].mxu1 }
 0x1c5   : > { %2785 = vst.msk [vmem:[%s4211_s21 + $0x48] sm:$0xf] %vm2766_vm3, %v3318_v9  ;;  %v3319_v30 = vpack.c.bf16 %v2625_v51, %v2625_v51  ;;  %v2554_v38 = vmax.f32 %v2456_v18, %v2522_v47  ;;  %v2523_v40 = vmul.f32 0.01, %v2459_v26  ;;  %v3417_v39 = vpop.f32.mrb[46].mxu0  ;;  %v3416_v45 = vadd.f32 %v3415_v32, %v3414_v28  ;;  %v2487_v15 = vpop.f32.mrb[45].mxu1 }
 0x1c6   : > { %v3418_v49 = vpop.f32.mrb[47].mxu0  ;;  %v2632_v59 = vadd.f32 %v4198_v41, %v2596_v44  ;;  %v2597_v52 = vmul.f32 %v4196_v34, %v2561_v46  ;;  %v2630_v63 = vadd.f32 %v4198_v41, %v2594_v5  ;;  %v2595_v1 = vmul.f32 %v4196_v34, %v2559_v56  ;;  %v3515_v7 = vpop.f32.mrb[46].mxu1 }
 0x1c7   : > { %2786 = vst.msk [vmem:[%s4211_s21 + $0x4c] sm:$0xf] %vm2766_vm3, %v3319_v30  ;;  %v2590_v53 = vmul.f32 %v4196_v34, %v2554_v38  ;;  %v2555_v55 = vmax.f32 %v2459_v26, %v2523_v40  ;;  %v2303_v60 = vadd.f32 %v3416_v45, %v4186_v13  ;;  %v3419_v48 = vadd.f32 %v3418_v49, %v3417_v39  ;;  %v2490_v11 = vpop.f32.mrb[47].mxu1 }
 0x1c8   : > { %v3326_v0 = vpack.c.bf16 %v2632_v59, %v2632_v59  ;;  %v2633_v2 = vadd.f32 %v4198_v41, %v2597_v52  ;;  %v2496_v4 = vadd.f32 %v3514_v61, %v2335_v36  ;;  %v3324_v58 = vpack.c.bf16 %v2630_v63, %v2630_v63 }
 0x1c9   : > { %v2626_v62 = vadd.f32 %v4198_v41, %v2590_v53  ;;  %v2591_v10 = vmul.f32 %v4196_v34, %v2555_v55  ;;  %v2464_v3 = vadd.f32 %v4290_v43, %v2303_v60  ;;  %v2631_v51 = vadd.f32 %v4198_v41, %v2595_v1 }
 0x1ca   : > { %2793 = vst.msk [vmem:[%s4211_s21 + $0x68] sm:$0xf] %vm2766_vm3, %v3326_v0  ;;  %v3327_v12 = vpack.c.bf16 %v2633_v2, %v2633_v2  ;;  %v2532_v22 = vmul.f32 0.01, %v2496_v4  ;;  %v2488_v16 = vadd.f32 %v2487_v15, %v2327_v57  ;;  %2791 = vst.msk [vmem:[%s4211_s21 + $0x60] sm:$0xf] %vm2766_vm3, %v3324_v58  ;;  %v2306_v42 = vadd.f32 %v3419_v48, %v4186_v13 }
 0x1cb   : > { %v3320_v8 = vpack.c.bf16 %v2626_v62, %v2626_v62  ;;  %v2627_v9 = vadd.f32 %v4198_v41, %v2591_v10  ;;  %v2524_v14 = vmul.f32 0.01, %v2464_v3  ;;  %v3325_v17 = vpack.c.bf16 %v2631_v51, %v2631_v51 }
 0x1cc   : > { %v2499_v30 = vadd.f32 %v3515_v7, %v2338_v50  ;;  %2794 = vst.msk [vmem:[%s4211_s21 + $0x6c] sm:$0xf] %vm2766_vm3, %v3327_v12  ;;  %v2564_v19 = vmax.f32 %v2496_v4, %v2532_v22  ;;  %v2530_v6 = vmul.f32 0.01, %v2488_v16  ;;  %v2491_v20 = vadd.f32 %v2490_v11, %v2330_v37 }
 0x1cd   : > { %2787 = vst.msk [vmem:[%s4211_s21 + $0x50] sm:$0xf] %vm2766_vm3, %v3320_v8  ;;  %v3321_v43 = vpack.c.bf16 %v2627_v9, %v2627_v9  ;;  %v2556_v18 = vmax.f32 %v2464_v3, %v2524_v14  ;;  %2792 = vst.msk [vmem:[%s4211_s21 + $0x64] sm:$0xf] %vm2766_vm3, %v3325_v17  ;;  %v2467_v21 = vadd.f32 %v4295_v33, %v2306_v42 }
 0x1ce   : > { %v2533_v23 = vmul.f32 0.01, %v2499_v30  ;;  %v2600_v57 = vmul.f32 %v4196_v34, %v2564_v19  ;;  %v2562_v47 = vmax.f32 %v2488_v16, %v2530_v6  ;;  %v2531_v13 = vmul.f32 0.01, %v2491_v20 }
 0x1cf   : > { %2788 = vst.msk [vmem:[%s4211_s21 + $0x54] sm:$0xf] %vm2766_vm3, %v3321_v43  ;;  %v2592_v24 = vmul.f32 %v4196_v34, %v2556_v18  ;;  %v2525_v25 = vmul.f32 0.01, %v2467_v21 }
 0x1d0   : > { %v2565_v26 = vmax.f32 %v2499_v30, %v2533_v23  ;;  %v2636_v28 = vadd.f32 %v4198_v41, %v2600_v57  ;;  %v2598_v29 = vmul.f32 %v4196_v34, %v2562_v47  ;;  %v2563_v31 = vmax.f32 %v2491_v20, %v2531_v13 }
 0x1d1   : > { %v2628_v35 = vadd.f32 %v4198_v41, %v2592_v24  ;;  %v2557_v33 = vmax.f32 %v2467_v21, %v2525_v25 }
 0x1d2   : > { %v2601_v32 = vmul.f32 %v4196_v34, %v2565_v26  ;;  %v3330_v37 = vpack.c.bf16 %v2636_v28, %v2636_v28  ;;  %v2634_v38 = vadd.f32 %v4198_v41, %v2598_v29  ;;  %v2599_v27 = vmul.f32 %v4196_v34, %v2563_v31 }
 0x1d3   : > { %v3322_v36 = vpack.c.bf16 %v2628_v35, %v2628_v35  ;;  %v2593_v40 = vmul.f32 %v4196_v34, %v2557_v33 }
 0x1d4   : > { %v2637_v54 = vadd.f32 %v4198_v41, %v2601_v32  ;;  %2797 = vst.msk [vmem:[%s4211_s21 + $0x78] sm:$0xf] %vm2766_vm3, %v3330_v37  ;;  %v3328_v39 = vpack.c.bf16 %v2634_v38, %v2634_v38  ;;  %v2635_v44 = vadd.f32 %v4198_v41, %v2599_v27 }
 0x1d5   : > { %2789 = vst.msk [vmem:[%s4211_s21 + $0x58] sm:$0xf] %vm2766_vm3, %v3322_v36  ;;  %v2629_v46 = vadd.f32 %v4198_v41, %v2593_v40 }
 0x1d6   : > { %v3331_v45 = vpack.c.bf16 %v2637_v54, %v2637_v54  ;;  %2795 = vst.msk [vmem:[%s4211_s21 + $0x70] sm:$0xf] %vm2766_vm3, %v3328_v39  ;;  %v3329_v49 = vpack.c.bf16 %v2635_v44, %v2635_v44 }
 0x1d7   : > { %v3323_v50 = vpack.c.bf16 %v2629_v46, %v2629_v46 }
 0x1d8   : > { %2798 = vst.msk [vmem:[%s4211_s21 + $0x7c] sm:$0xf] %vm2766_vm3, %v3331_v45  ;;  %2796 = vst.msk [vmem:[%s4211_s21 + $0x74] sm:$0xf] %vm2766_vm3, %v3329_v49 }
 0x1d9   : > { %2790 = vst.msk [vmem:[%s4211_s21 + $0x5c] sm:$0xf] %vm2766_vm3, %v3323_v50 }
 0x1da PF: > { %s13_s12 = sadd.s32 1, %s3716_s12  }
 0x1db   : > { %p10_p4 = scmp.ge.s32.totalorder %s13_s12, 4  }
 0x1dd   :  { %12 = sbr.rel (!%p10_p4) target bundleno = 1 (0x1), region = 94 }

// kernel: encoder_forward.8
= control target key start
LH: loop header
LB: loop body
LE: loop exit
PB: predicated region body
PF: predicated region fallthrough
CT: control target
= control target key end

     0   :  { %s1883_s12 = smov 0   ;;  %s2130_s0 = inlined_call_operand.vmem [shape: bf16[2,18,9,128], index: 0, kind: input, shape index: {}]   ;;  %s2131_s1 = inlined_call_operand.vmem [shape: bf16[768,128], index: 1, kind: input, shape index: {}]   ;;  %s2132_s2 = inlined_call_operand.vmem [shape: f32[3,128], index: 2, kind: input, shape index: {}]   ;;  %s2133_s3 = inlined_call_operand.vmem [shape: bf16[2,64,128], index: 3, kind: output, shape index: {}]  }
   0x1 LB: > { %s1423_s13 = sadd.s32 4294967295, %s1861_s12   ;;  %p1427_p0 = scmp.ge.s32.totalorder %s1861_s12, 1  ;;  %s1861_s12 = sphi %s1883_s12, %s13_s12  }
   0x2   : > { %p137_p1 = scmp.lt.s32.totalorder %s1861_s12, 3 }
   0x4   : > { %p138_p2 = pnand %p1427_p0, %p137_p1 }
   0x5   : > { %v1771_v0 = vld [vmem:[%s2131_s1 + $0x40] sm:$0xff] (!%p138_p2)   ;;  %v1775_v4 = vld [vmem:[%s2131_s1 + $0x48] sm:$0xff] (!%p138_p2)   ;;  %v1779_v8 = vld [vmem:[%s2131_s1 + $0x50] sm:$0xff] (!%p138_p2)   ;;  %p161_p3 = scmp.lt.s32.totalorder (!%p138_p2), %s1423_s13, 1 }
   0x6   : > { %141 = sbr.rel (%p138_p2) target bundleno = 313 (0x139), region = 32  ;;  %v1772_v1 = vld [vmem:[%s2131_s1 + $0xc0] sm:$0xff] (!%p138_p2)   ;;  %1626 = vmatprep.subr.bf16.mxu0 (!%p138_p2), %v1771_v0  ;;  %v1776_v5 = vld [vmem:[%s2131_s1 + $0xc8] sm:$0xff] (!%p138_p2)   ;;  %v1780_v9 = vld [vmem:[%s2131_s1 + $0xd0] sm:$0xff] (!%p138_p2)  }
   0x7   : > { %v1773_v2 = vld [vmem:[%s2131_s1] sm:$0xff] (!%p138_p2)   ;;  %1666 = vmatprep.subr.bf16.mxu1 (!%p138_p2), %v1772_v1  ;;  %v1777_v6 = vld [vmem:[%s2131_s1 + $0x8] sm:$0xff] (!%p138_p2)   ;;  %v1781_v10 = vld [vmem:[%s2131_s1 + $0x10] sm:$0xff] (!%p138_p2)  }
   0x8   : > { %v1774_v3 = vld [vmem:[%s2131_s1 + $0x80] sm:$0xff] (!%p138_p2)   ;;  %1627 = vmatpush3.bf16.msra.mxu0 (!%p138_p2), %v1773_v2  ;;  %v1778_v7 = vld [vmem:[%s2131_s1 + $0x88] sm:$0xff] (!%p138_p2)   ;;  %v1782_v11 = vld [vmem:[%s2131_s1 + $0x90] sm:$0xff] (!%p138_p2)  }
   0x9   : > { %1667 = vmatpush3.bf16.msra.mxu1 (!%p138_p2), %v1774_v3  ;;  %1628 = vmatprep.subr.bf16.mxu0 (!%p138_p2), %v1775_v4  ;;  %v1783_v12 = vld [vmem:[%s2131_s1 + $0x58] sm:$0xff] (!%p138_p2)   ;;  %v1787_v16 = vld [vmem:[%s2131_s1 + $0x60] sm:$0xff] (!%p138_p2)   ;;  %v1791_v20 = vld [vmem:[%s2131_s1 + $0x68] sm:$0xff] (!%p138_p2)  }
   0xa   : > { %1668 = vmatprep.subr.bf16.mxu1 (!%p138_p2), %v1776_v5  ;;  %v1784_v13 = vld [vmem:[%s2131_s1 + $0xd8] sm:$0xff] (!%p138_p2)   ;;  %v1788_v17 = vld [vmem:[%s2131_s1 + $0xe0] sm:$0xff] (!%p138_p2)   ;;  %v1792_v21 = vld [vmem:[%s2131_s1 + $0xe8] sm:$0xff] (!%p138_p2)  }
   0xb   : > { %v1785_v14 = vld [vmem:[%s2131_s1 + $0x18] sm:$0xff] (!%p138_p2)   ;;  %v1789_v18 = vld [vmem:[%s2131_s1 + $0x20] sm:$0xff] (!%p138_p2)   ;;  %v1793_v22 = vld [vmem:[%s2131_s1 + $0x28] sm:$0xff] (!%p138_p2)  }
   0xc   : > { %1629 = vmatpush3.bf16.msra.mxu0 (!%p138_p2), %v1777_v6  ;;  %v1786_v15 = vld [vmem:[%s2131_s1 + $0x98] sm:$0xff] (!%p138_p2)   ;;  %v1790_v19 = vld [vmem:[%s2131_s1 + $0xa0] sm:$0xff] (!%p138_p2)   ;;  %v1794_v23 = vld [vmem:[%s2131_s1 + $0xa8] sm:$0xff] (!%p138_p2)  }
   0xd   : > { %1669 = vmatpush3.bf16.msra.mxu1 %v1778_v7  ;;  %1630 = vmatprep.subr.bf16.mxu0 %v1779_v8  ;;  %s2135_s13 = smov (!%p161_p3, %s1423_s13), 1  ;;  %v1795_v24 = vld [vmem:[%s2131_s1 + $0x70] sm:$0xff]   ;;  %v1799_v28 = vld [vmem:[%s2131_s1 + $0x78] sm:$0xff]   ;;  %v1809_v41 = vld [vmem:[%s2131_s1 + $0x140] sm:$0xff]  }
   0xe   : > { %1670 = vmatprep.subr.bf16.mxu1 %v1780_v9  ;;  %v1796_v25 = vld [vmem:[%s2131_s1 + $0xf0] sm:$0xff]   ;;  %s1762_s16 = smul.u32 144, %s2135_s13  ;;  %v1800_v29 = vld [vmem:[%s2131_s1 + $0xf8] sm:$0xff]   ;;  %v1810_v60 = vld [vmem:[%s2131_s1 + $0x100] sm:$0xff]  }
   0xf   : > { %v1797_v26 = vld [vmem:[%s2131_s1 + $0x30] sm:$0xff]   ;;  %v1801_v30 = vld [vmem:[%s2131_s1 + $0x38] sm:$0xff]   ;;  %v1811_v1 = vld [vmem:[%s2131_s1 + $0x148] sm:$0xff]  }
  0x10   : > { %1631 = vmatpush3.bf16.msra.mxu0 %v1781_v10  ;;  %v1798_v27 = vld [vmem:[%s2131_s1 + $0xb0] sm:$0xff]   ;;  %s1991_s27 = scalar_lea.vmem %s2130_s0, %s1762_s16  ;;  %v1802_v31 = vld [vmem:[%s2131_s1 + $0xb8] sm:$0xff]   ;;  %v1812_v8 = vld [vmem:[%s2131_s1 + $0x108] sm:$0xff]   ;;  %s1594_s16 = sshll.u32 %s2135_s13, 5 }
  0x11   : > { %1671 = vmatpush3.bf16.msra.mxu1 %v1782_v11  ;;  %1632 = vmatprep.subr.bf16.mxu0 %v1783_v12  ;;  %v1803_v32 = vld [vmem:[%s1991_s27] sm:$0x1f]   ;;  %v1804_v33 = vld [vmem:[%s1991_s27 + $0x10] sm:$0x1f]   ;;  %v1805_v38 = vld [vmem:[%s1991_s27 + $0x8] sm:$0x1f]   ;;  %s2120_s19 = scalar_lea.vmem %s2133_s3, %s1594_s16 }
  0x12   : > { %1672 = vmatprep.subr.bf16.mxu1 %v1784_v13  ;;  %v182_v34 = vshrl.u32 %v1803_v32, 16  ;;  %v184_v35 = vshll.u32 %v1803_v32, 16  ;;  %v242_v36 = vshrl.u32 %v1804_v33, 16  ;;  %v245_v37 = vshll.u32 %v1804_v33, 16  ;;  %v1806_v40 = vld [vmem:[%s1991_s27 + $0x18] sm:$0x1f]  }
  0x13   : > { %v201_v44 = vshrl.u32 %v1805_v38, 16  ;;  %v203_v45 = vshll.u32 %v1805_v38, 16  ;;  %v172_v46 = vld [vmem:[%s1991_s27] sm:$0xf]  ;;  %v266_v48 = vshrl.u32 %v1806_v40, 16  ;;  %v269_v49 = vshll.u32 %v1806_v40, 16 }
  0x14   : > { %1633 = vmatpush3.bf16.msra.mxu0 %v1785_v14  ;;  %v186_v39 = vrot.slane %v184_v35, 1  ;;  %v244_v42 = vrot.slane %v242_v36, 4  ;;  %v247_v43 = vrot.slane %v245_v37, 5  ;;  %173 = vst [vmem:[#allocation2] sm:$0xf] %v172_v46 }
  0x15   : > { %1673 = vmatpush3.bf16.msra.mxu1 %v1786_v15  ;;  %1634 = vmatprep.subr.bf16.mxu0 %v1787_v16  ;;  %v1807_v50 = vld [vmem:[%s1991_s27 + $0x10] ss:$0 sps:$4 sm:$0xff]   ;;  %v205_v52 = vrot.slane %v203_v45, 1  ;;  %v1432_v53 = vld [vmem:[%s1991_s27 + $0x8] sm:$0xf]  ;;  %v268_v54 = vrot.slane %v266_v48, 4 }
  0x16   : > { %1674 = vmatprep.subr.bf16.mxu1 %v1788_v17  ;;  %v187_v47 = vor.u32 %v186_v39, %v182_v34  ;;  %v248_v51 = vor.u32 %v247_v43, %v244_v42  ;;  %v271_v55 = vrot.slane %v269_v49, 5  ;;  %233 = vst [vmem:[#allocation2] sm:$0xf0] %v1807_v50  ;;  %192 = vst [vmem:[#allocation2 + $0x10] sm:$0xf] %v1432_v53  ;;  %v1819_v16 = vld [vmem:[%s2131_s1 + $0x150] sm:$0xff]  }
  0x17   : > { %v1808_v56 = vld [vmem:[%s1991_s27 + $0x18] ss:$0 sps:$4 sm:$0xff]   ;;  %v206_v57 = vor.u32 %v205_v52, %v201_v44  ;;  %v1813_v59 = vld [vmem:[%s1991_s27 + $0x20] sm:$0x1f]   ;;  %v1814_v61 = vld [vmem:[%s1991_s27 + $0x30] sm:$0x1f]  }
  0x18   : > { %1635 = vmatpush3.bf16.msra.mxu0 %v1789_v18  ;;  %189 = vst [vmem:[#allocation2 + $0x8] sm:$0xf] %v187_v47  ;;  %250 = vst [vmem:[#allocation2 + $0x8] sm:$0xf0] %v248_v51  ;;  %v272_v58 = vor.u32 %v271_v55, %v268_v54  ;;  %v309_v62 = vshrl.u32 %v1813_v59, 16  ;;  %v311_v63 = vshll.u32 %v1813_v59, 16 }
  0x19   : > { %1675 = vmatpush3.bf16.msra.mxu1 %v1790_v19  ;;  %1636 = vmatprep.subr.bf16.mxu0 %v1791_v20  ;;  %257 = vst [vmem:[#allocation2 + $0x10] sm:$0xf0] %v1808_v56  ;;  %208 = vst [vmem:[#allocation2 + $0x18] sm:$0xf] %v206_v57  ;;  %v369_v2 = vshrl.u32 %v1814_v61, 16  ;;  %v372_v3 = vshll.u32 %v1814_v61, 16 }
  0x1a   : > { %1676 = vmatprep.subr.bf16.mxu1 %v1792_v21  ;;  %274 = vst [vmem:[#allocation2 + $0x18] sm:$0xf0] %v272_v58  ;;  %v1815_v4 = vld [vmem:[%s1991_s27 + $0x28] sm:$0x1f]   ;;  %v313_v6 = vrot.slane %v311_v63, 1  ;;  %v1829_v52 = vld [vmem:[%s2131_s1 + $0x160] sm:$0xff]  }
  0x1b   : > { %v371_v9 = vrot.slane %v369_v2, 4  ;;  %v374_v10 = vrot.slane %v372_v3, 5  ;;  %v328_v11 = vshrl.u32 %v1815_v4, 16  ;;  %v330_v12 = vshll.u32 %v1815_v4, 16  ;;  %v1816_v14 = vld [vmem:[%s1991_s27 + $0x38] sm:$0x1f]  }
  0x1c   : > { %1637 = vmatpush3.bf16.msra.mxu0 %v1793_v22  ;;  %v314_v13 = vor.u32 %v313_v6, %v309_v62  ;;  %v1455_v15 = vld [vmem:[%s1991_s27 + $0x20] sm:$0xf]  ;;  %v1817_v20 = vld [vmem:[%s1991_s27 + $0x30] ss:$0 sps:$4 sm:$0xff]   ;;  %v1459_v21 = vld [vmem:[%s1991_s27 + $0x28] sm:$0xf] }
  0x1d   : > { %1677 = vmatpush3.bf16.msra.mxu1 %v1794_v23  ;;  %1638 = vmatprep.subr.bf16.mxu0 %v1795_v24  ;;  %v680_v0 = vld [vmem:[#allocation2] sm:$0xff]  ;;  %v375_v18 = vor.u32 %v374_v10, %v371_v9  ;;  %v332_v19 = vrot.slane %v330_v12, 1  ;;  %300 = vst [vmem:[#allocation2 + $0x30] sm:$0xf] %v1455_v15  ;;  %v393_v22 = vshrl.u32 %v1816_v14, 16  ;;  %v396_v23 = vshll.u32 %v1816_v14, 16 }
  0x1e   : > { %1678 = vmatprep.subr.bf16.mxu1 %v1796_v25  ;;  %316 = vst [vmem:[#allocation2 + $0x38] sm:$0xf] %v314_v13  ;;  %319 = vst [vmem:[#allocation2 + $0x40] sm:$0xf] %v1459_v21  ;;  %v1818_v24 = vld [vmem:[%s1991_s27 + $0x38] ss:$0 sps:$4 sm:$0xff]  }
  0x1f   : > { %v681_v5 = vld [vmem:[#allocation2 + $0x8] sm:$0xff]  ;;  %377 = vst [vmem:[#allocation2 + $0x38] sm:$0xf0] %v375_v18  ;;  %v333_v25 = vor.u32 %v332_v19, %v328_v11  ;;  %360 = vst [vmem:[#allocation2 + $0x30] sm:$0xf0] %v1817_v20  ;;  %v1830_v62 = vld [vmem:[%s2131_s1 + $0x120] sm:$0xff]  }
  0x20   : > { %1639 = vmatpush3.bf16.msra.mxu0 %v1797_v26  ;;  %1125 = vmatprep.mubr.bf16.mxu0 %v681_v5  ;;  %v682_v7 = vld [vmem:[#allocation2 + $0x10] sm:$0xff]  ;;  %v395_v26 = vrot.slane %v393_v22, 4  ;;  %384 = vst [vmem:[#allocation2 + $0x40] sm:$0xf0] %v1818_v24  ;;  %v1823_v32 = vld [vmem:[%s1991_s27 + $0x40] sm:$0x1f]  }
  0x21   : > { %1679 = vmatpush3.bf16.msra.mxu1 %v1798_v27  ;;  %1640 = vmatprep.subr.bf16.mxu0 %v1799_v28  ;;  %v683_v17 = vld [vmem:[#allocation2 + $0x18] sm:$0xff]  ;;  %v398_v27 = vrot.slane %v396_v23, 5  ;;  %335 = vst [vmem:[#allocation2 + $0x48] sm:$0xf] %v333_v25  ;;  %v1820_v28 = vld [vmem:[%s2131_s1 + $0x110] sm:$0xff]   ;;  %v436_v34 = vshrl.u32 %v1823_v32, 16 }
  0x22   : > { %1680 = vmatprep.subr.bf16.mxu1 %v1800_v29  ;;  %1190 = vmatprep.mubr.bf16.mxu1 %v683_v17  ;;  %v1824_v33 = vld [vmem:[%s1991_s27 + $0x50] sm:$0x1f]   ;;  %v438_v35 = vshll.u32 %v1823_v32, 16  ;;  %v1825_v36 = vld [vmem:[%s1991_s27 + $0x48] sm:$0x1f]  }
  0x23   : > { %v399_v29 = vor.u32 %v398_v27, %v395_v26  ;;  %v496_v39 = vshrl.u32 %v1824_v33, 16  ;;  %v499_v40 = vshll.u32 %v1824_v33, 16  ;;  %v455_v42 = vshrl.u32 %v1825_v36, 16  ;;  %v1826_v47 = vld [vmem:[%s1991_s27 + $0x58] sm:$0x1f]   ;;  %v1840_v12 = vld [vmem:[%s2131_s1 + $0x130] sm:$0xff]  }
  0x24   : > { %1641 = vmatpush3.bf16.msra.mxu0 %v1801_v30  ;;  %v1821_v30 = vld [vmem:[%s2131_s1 + $0x158] sm:$0xff]   ;;  %v457_v43 = vshll.u32 %v1825_v36, 16  ;;  %v1482_v48 = vld [vmem:[%s1991_s27 + $0x40] sm:$0xf]  ;;  %v1827_v51 = vld [vmem:[%s1991_s27 + $0x50] ss:$0 sps:$4 sm:$0xff]  }
  0x25   : > { %1681 = vmatpush3.bf16.msra.mxu1 %v1802_v31  ;;  %1706 = vmatprep.subr.bf16.mxu0 %v1809_v41  ;;  %v1822_v31 = vld [vmem:[%s2131_s1 + $0x118] sm:$0xff]   ;;  %401 = vst [vmem:[#allocation2 + $0x48] sm:$0xf0] %v399_v29  ;;  %v498_v45 = vrot.slane %v496_v39, 4  ;;  %v501_v46 = vrot.slane %v499_v40, 5  ;;  %v520_v54 = vshrl.u32 %v1826_v47, 16 }
  0x26   : > { %1746 = vmatprep.subr.bf16.mxu1 %v1809_v41  ;;  %v687_v37 = vld [vmem:[#allocation2 + $0x38] sm:$0xff]  ;;  %v686_v38 = vld [vmem:[#allocation2 + $0x30] sm:$0xff]  ;;  %v440_v41 = vrot.slane %v438_v35, 1  ;;  %v459_v50 = vrot.slane %v457_v43, 1  ;;  %427 = vst [vmem:[#allocation2 + $0x60] sm:$0xf] %v1482_v48 }
  0x27   : > { %1126 = vmatmul.mubr.bf16.vlgmr.msra.gmra.mrb[0].mxu0 %v680_v0  ;;  %v688_v44 = vld [vmem:[#allocation2 + $0x40] sm:$0xff]  ;;  %v502_v53 = vor.u32 %v501_v46, %v498_v45  ;;  %v523_v55 = vshll.u32 %v1826_v47, 16  ;;  %v1486_v56 = vld [vmem:[%s1991_s27 + $0x48] sm:$0xf]  ;;  %487 = vst [vmem:[#allocation2 + $0x60] sm:$0xf0] %v1827_v51 }
  0x28   : > { %1707 = vmatpush3.bf16.msra.mxu0 %v1810_v60  ;;  %1191 = vmatmul.mubr.bf16.vlgmr.msra.gmra.mrb[0].mxu1 %v682_v7  ;;  %v441_v49 = vor.u32 %v440_v41, %v436_v34  ;;  %v460_v58 = vor.u32 %v459_v50, %v455_v42  ;;  %446 = vst [vmem:[#allocation2 + $0x70] sm:$0xf] %v1486_v56  ;;  %v1828_v59 = vld [vmem:[%s1991_s27 + $0x58] ss:$0 sps:$4 sm:$0xff]   ;;  %v1831_v0 = vld [vmem:[%s2131_s1 + $0x168] sm:$0xff]   ;;  %v1839_v7 = vld [vmem:[%s2131_s1 + $0x170] sm:$0xff]  }
  0x29   : > { %1708 = vmatprep.subr.bf16.mxu0 %v1811_v1  ;;  %1754 = vmatpush3.bf16.msra.mxu1 %v1810_v60  ;;  %504 = vst [vmem:[#allocation2 + $0x68] sm:$0xf0] %v502_v53  ;;  %v522_v60 = vrot.slane %v520_v54, 4  ;;  %v525_v61 = vrot.slane %v523_v55, 5  ;;  %511 = vst [vmem:[#allocation2 + $0x70] sm:$0xf0] %v1828_v59 }
  0x2a   : > { %1747 = vmatprep.subr.bf16.mxu1 %v1811_v1  ;;  %1133 = vmatprep.mubr.bf16.mxu0 %v687_v37  ;;  %443 = vst [vmem:[#allocation2 + $0x68] sm:$0xf] %v441_v49  ;;  %462 = vst [vmem:[#allocation2 + $0x78] sm:$0xf] %v460_v58  ;;  %v1832_v1 = vld [vmem:[%s2131_s1 + $0x128] sm:$0xff]   ;;  %v1841_v34 = vld [vmem:[%s2131_s1 + $0x178] sm:$0xff]  }
  0x2b   : > { %v526_v63 = vor.u32 %v525_v61, %v522_v60  ;;  %v1833_v2 = vld [vmem:[%s1991_s27 + $0x60] sm:$0x1f]   ;;  %v1834_v3 = vld [vmem:[%s1991_s27 + $0x70] sm:$0x1f]   ;;  %v1835_v11 = vld [vmem:[%s1991_s27 + $0x68] sm:$0x1f]  }
  0x2c   : > { %1709 = vmatpush3.bf16.msra.mxu0 %v1812_v8  ;;  %v689_v57 = vld [vmem:[#allocation2 + $0x48] sm:$0xff]  ;;  %v563_v5 = vshrl.u32 %v1833_v2, 16  ;;  %v565_v6 = vshll.u32 %v1833_v2, 16  ;;  %v623_v9 = vshrl.u32 %v1834_v3, 16  ;;  %v626_v10 = vshll.u32 %v1834_v3, 16  ;;  %v1842_v35 = vld [vmem:[%s2131_s1 + $0x138] sm:$0xff]  }
  0x2d   : > { %1710 = vmatprep.subr.bf16.mxu0 %v1819_v16  ;;  %1755 = vmatpush3.bf16.msra.mxu1 %v1812_v8  ;;  %528 = vst [vmem:[#allocation2 + $0x78] sm:$0xf0] %v526_v63  ;;  %v582_v17 = vshrl.u32 %v1835_v11, 16  ;;  %v584_v18 = vshll.u32 %v1835_v11, 16  ;;  %v1836_v19 = vld [vmem:[%s1991_s27 + $0x78] sm:$0x1f]  }
  0x2e   : > { %1748 = vmatprep.subr.bf16.mxu1 %v1819_v16  ;;  %1198 = vmatprep.mubr.bf16.mxu1 %v689_v57  ;;  %v692_v4 = vld [vmem:[#allocation2 + $0x60] sm:$0xff]  ;;  %v567_v14 = vrot.slane %v565_v6, 1  ;;  %v625_v15 = vrot.slane %v623_v9, 4  ;;  %v628_v16 = vrot.slane %v626_v10, 5  ;;  %v1837_v22 = vld [vmem:[%s1991_s27 + $0x70] ss:$0 sps:$4 sm:$0xff]  }
  0x2f   : > { %1134 = vmatmul.mubr.bf16.gmra.mrb[4].mxu0 %v686_v38  ;;  %v1509_v21 = vld [vmem:[%s1991_s27 + $0x60] sm:$0xf]  ;;  %v586_v25 = vrot.slane %v584_v18, 1  ;;  %v647_v26 = vshrl.u32 %v1836_v19, 16  ;;  %v650_v27 = vshll.u32 %v1836_v19, 16 }
  0x30   : > { %1711 = vmatpush3.bf16.msra.mxu0 %v1820_v28  ;;  %1199 = vmatmul.mubr.bf16.gmra.mrb[4].mxu1 %v688_v44  ;;  %v694_v13 = vld [vmem:[#allocation2 + $0x70] sm:$0xff]  ;;  %v568_v20 = vor.u32 %v567_v14, %v563_v5  ;;  %v629_v24 = vor.u32 %v628_v16, %v625_v15  ;;  %554 = vst [vmem:[#allocation2 + $0x90] sm:$0xf] %v1509_v21  ;;  %614 = vst [vmem:[#allocation2 + $0x90] sm:$0xf0] %v1837_v22 }
  0x31   : > { %1712 = vmatprep.subr.bf16.mxu0 %v1821_v30  ;;  %1756 = vmatpush3.bf16.msra.mxu1 %v1820_v28  ;;  %v693_v8 = vld [vmem:[#allocation2 + $0x68] sm:$0xff]  ;;  %v1838_v29 = vld [vmem:[%s1991_s27 + $0x78] ss:$0 sps:$4 sm:$0xff]   ;;  %v652_v32 = vrot.slane %v650_v27, 5  ;;  %v1843_v36 = vld [vmem:[%s1991_s27 + $0x10] sm:$0x1f]  }
  0x32   : > { %1749 = vmatprep.subr.bf16.mxu1 %v1821_v30  ;;  %1141 = vmatprep.mubr.bf16.mxu0 %v693_v8  ;;  %v1513_v28 = vld [vmem:[%s1991_s27 + $0x68] sm:$0xf]  ;;  %570 = vst [vmem:[#allocation2 + $0x98] sm:$0xf] %v568_v20  ;;  %631 = vst [vmem:[#allocation2 + $0x98] sm:$0xf0] %v629_v24  ;;  %v587_v30 = vor.u32 %v586_v25, %v582_v17 }
  0x33   : > { %573 = vst [vmem:[#allocation2 + $0xa0] sm:$0xf] %v1513_v28  ;;  %638 = vst [vmem:[#allocation2 + $0xa0] sm:$0xf0] %v1838_v29  ;;  %v1844_v37 = vld [vmem:[%s1991_s27 + $0x20] sm:$0x1f]  }
  0x34   : > { %1713 = vmatpush3.bf16.msra.mxu0 %v1822_v31  ;;  %v695_v23 = vld [vmem:[#allocation2 + $0x78] sm:$0xff]  ;;  %589 = vst [vmem:[#allocation2 + $0xa8] sm:$0xf] %v587_v30  ;;  %v220_v39 = vshrl.u32 %v1843_v36, 16  ;;  %v222_v40 = vshll.u32 %v1843_v36, 16  ;;  %v290_v43 = vshrl.u32 %v1844_v37, 16  ;;  %v801_v36 = vlaneseq }
  0x35   : > { %1714 = vmatprep.subr.bf16.mxu0 %v1829_v52  ;;  %1757 = vmatpush3.bf16.msra.mxu1 %v1822_v31  ;;  %v649_v31 = vrot.slane %v647_v26, 4  ;;  %v1845_v41 = vld [vmem:[%s1991_s27 + $0x50] sm:$0x1f]   ;;  %v293_v44 = vshll.u32 %v1844_v37, 16  ;;  %v1846_v50 = vld [vmem:[%s1991_s27 + $0x60] sm:$0x1f]  }
  0x36   : > { %1750 = vmatprep.subr.bf16.mxu1 %v1829_v52  ;;  %1206 = vmatprep.mubr.bf16.mxu1 %v695_v23  ;;  %v224_v45 = vrot.slane %v222_v40, 1  ;;  %v474_v46 = vshrl.u32 %v1845_v41, 16  ;;  %v476_v47 = vshll.u32 %v1845_v41, 16  ;;  %v292_v48 = vrot.slane %v290_v43, 4  ;;  %v1436_v51 = vld [vmem:[%s1991_s27 + $0x10] sm:$0xf] }
  0x37   : > { %1142 = vmatmul.mubr.bf16.gmra.mrb[8].mxu0 %v692_v4  ;;  %v653_v33 = vor.u32 %v652_v32, %v649_v31  ;;  %v698_v38 = vld [vmem:[#allocation2 + $0x90] sm:$0xff]  ;;  %v295_v49 = vrot.slane %v293_v44, 5  ;;  %211 = vst [vmem:[#allocation2 + $0x20] sm:$0xf] %v1436_v51  ;;  %v1847_v55 = vld [vmem:[%s1991_s27 + $0x20] ss:$0 sps:$4 sm:$0xff]  }
  0x38   : > { %1715 = vmatpush3.bf16.msra.mxu0 %v1830_v62  ;;  %1207 = vmatmul.mubr.bf16.gmra.mrb[8].mxu1 %v694_v13  ;;  %v225_v53 = vor.u32 %v224_v45, %v220_v39  ;;  %v478_v54 = vrot.slane %v476_v47, 1  ;;  %v544_v58 = vshrl.u32 %v1846_v50, 16  ;;  %v547_v59 = vshll.u32 %v1846_v50, 16  ;;  %v1490_v60 = vld [vmem:[%s1991_s27 + $0x50] sm:$0xf] }
  0x39   : > { %1758 = vmatpush3.bf16.msra.mxu1 %v1830_v62  ;;  %1716 = vmatprep.subr.bf16.mxu0 %v1831_v0  ;;  %655 = vst [vmem:[#allocation2 + $0xa8] sm:$0xf0] %v653_v33  ;;  %v699_v42 = vld [vmem:[#allocation2 + $0x98] sm:$0xff]  ;;  %v296_v57 = vor.u32 %v295_v49, %v292_v48  ;;  %281 = vst [vmem:[#allocation2 + $0x20] sm:$0xf0] %v1847_v55  ;;  %v2095_v37 = vshrl.u32 %v801_v36, 7 }
  0x3a   : > { %1751 = vmatprep.subr.bf16.mxu1 %v1831_v0  ;;  %1149 = vmatprep.mubr.bf16.mxu0 %v699_v42  ;;  %v700_v52 = vld [vmem:[#allocation2 + $0xa0] sm:$0xff]  ;;  %227 = vst [vmem:[#allocation2 + $0x28] sm:$0xf] %v225_v53  ;;  %v479_v61 = vor.u32 %v478_v54, %v474_v46  ;;  %465 = vst [vmem:[#allocation2 + $0x80] sm:$0xf] %v1490_v60  ;;  %v546_v63 = vrot.slane %v544_v58, 4 }
  0x3b   : > { %v1848_v62 = vld [vmem:[%s1991_s27 + $0x60] ss:$0 sps:$4 sm:$0xff]   ;;  %298 = vst [vmem:[#allocation2 + $0x28] sm:$0xf0] %v296_v57  ;;  %v549_v0 = vrot.slane %v547_v59, 5 }
  0x3c   : > { %1717 = vmatpush3.bf16.msra.mxu0 %v1832_v1  ;;  %481 = vst [vmem:[#allocation2 + $0x88] sm:$0xf] %v479_v61  ;;  %535 = vst [vmem:[#allocation2 + $0x80] sm:$0xf0] %v1848_v62  ;;  %v1850_v2 = vld [vmem:[%s1991_s27 + $0x40] sm:$0x1f]  }
  0x3d   : > { %1759 = vmatpush3.bf16.msra.mxu1 %v1832_v1  ;;  %1718 = vmatprep.subr.bf16.mxu0 %v1839_v7  ;;  %v1849_v1 = vld [vmem:[%s1991_s27 + $0x30] sm:$0x1f]   ;;  %v550_v3 = vor.u32 %v549_v0, %v546_v63  ;;  %v417_v6 = vshrl.u32 %v1850_v2, 16  ;;  %v1852_v10 = vld [vmem:[%s1991_s27 + $0x80] sm:$0x1f]  }
  0x3e   : > { %1752 = vmatprep.subr.bf16.mxu1 %v1839_v7  ;;  %v347_v4 = vshrl.u32 %v1849_v1, 16  ;;  %v349_v5 = vshll.u32 %v1849_v1, 16  ;;  %v420_v7 = vshll.u32 %v1850_v2, 16  ;;  %v1851_v8 = vld [vmem:[%s1991_s27 + $0x70] sm:$0x1f]   ;;  %v671_v18 = vshrl.u32 %v1852_v10, 16 }
  0x3f   : > { %1150 = vmatmul.mubr.bf16.gmra.mrb[12].mxu0 %v698_v38  ;;  %552 = vst [vmem:[#allocation2 + $0x88] sm:$0xf0] %v550_v3  ;;  %v419_v11 = vrot.slane %v417_v6, 4  ;;  %v601_v13 = vshrl.u32 %v1851_v8, 16  ;;  %v603_v14 = vshll.u32 %v1851_v8, 16  ;;  %v674_v19 = vshll.u32 %v1852_v10, 16 }
  0x40   : > { %1719 = vmatpush3.bf16.msra.mxu0 %v1840_v12  ;;  %v701_v56 = vld [vmem:[#allocation2 + $0xa8] sm:$0xff]  ;;  %v351_v9 = vrot.slane %v349_v5, 1  ;;  %v1463_v15 = vld [vmem:[%s1991_s27 + $0x30] sm:$0xf]  ;;  %v684_v16 = vld [vmem:[#allocation2 + $0x20] sm:$0xff]  ;;  %v673_v25 = vrot.slane %v671_v18, 4 }
  0x41   : > { %1760 = vmatpush3.bf16.msra.mxu1 %v1840_v12  ;;  %1720 = vmatprep.subr.bf16.mxu0 %v1841_v34  ;;  %v422_v12 = vrot.slane %v420_v7, 5  ;;  %338 = vst [vmem:[#allocation2 + $0x50] sm:$0xf] %v1463_v15  ;;  %v605_v22 = vrot.slane %v603_v14, 1  ;;  %v1853_v23 = vld [vmem:[%s1991_s27 + $0x40] ss:$0 sps:$4 sm:$0xff]  }
  0x42   : > { %1753 = vmatprep.subr.bf16.mxu1 %v1841_v34  ;;  %1214 = vmatprep.mubr.bf16.mxu1 %v701_v56  ;;  %v352_v17 = vor.u32 %v351_v9, %v347_v4  ;;  %v685_v20 = vld [vmem:[#allocation2 + $0x28] sm:$0xff]  ;;  %v1517_v24 = vld [vmem:[%s1991_s27 + $0x70] sm:$0xf]  ;;  %v676_v26 = vrot.slane %v674_v19, 5  ;;  %408 = vst [vmem:[#allocation2 + $0x50] sm:$0xf0] %v1853_v23 }
  0x43   : > { %1215 = vmatmul.mubr.bf16.gmra.mrb[12].mxu1 %v700_v52  ;;  %v423_v21 = vor.u32 %v422_v12, %v419_v11  ;;  %1255 = vmatprep.mubr.bf16.mxu0 %v685_v20  ;;  %592 = vst [vmem:[#allocation2 + $0xb0] sm:$0xf] %v1517_v24  ;;  %v606_v27 = vor.u32 %v605_v22, %v601_v13  ;;  %v1854_v28 = vld [vmem:[%s1991_s27 + $0x80] ss:$0 sps:$4 sm:$0xff]   ;;  %v803_v38 = vsub.s32 0, %v2095_v37 }
  0x44   : > { %1721 = vmatpush3.bf16.msra.mxu0 %v1842_v35  ;;  %354 = vst [vmem:[#allocation2 + $0x58] sm:$0xf] %v352_v17  ;;  %v696_v29 = vld [vmem:[#allocation2 + $0x80] sm:$0xff]  ;;  %v677_v30 = vor.u32 %v676_v26, %v673_v25  ;;  %662 = vst [vmem:[#allocation2 + $0xb0] sm:$0xf0] %v1854_v28 }
  0x45   : > { %1761 = vmatpush3.bf16.msra.mxu1 %v1842_v35  ;;  %425 = vst [vmem:[#allocation2 + $0x58] sm:$0xf0] %v423_v21  ;;  %608 = vst [vmem:[#allocation2 + $0xb8] sm:$0xf] %v606_v27  ;;  %v2101_v39 = vld [vmem:[%s2132_s2] sm:$0x7] }
  0x46   : > { %v697_v31 = vld [vmem:[#allocation2 + $0x88] sm:$0xff]  ;;  %679 = vst [vmem:[#allocation2 + $0xb8] sm:$0xf0] %v677_v30  ;;  %v804_v41 = vrot.slane %v2101_v39, %v803_v38 }
  0x47   : > { %1256 = vmatmul.mubr.bf16.vlgmr.msra.gmra.mrb[16].mxu0 %v684_v16  ;;  %1271 = vmatprep.mubr.bf16.mxu1 %v697_v31 }
  0x49   : > { %v690_v33 = vld [vmem:[#allocation2 + $0x50] sm:$0xff] }
  0x4b   : > { %1272 = vmatmul.mubr.bf16.vlgmr.msra.gmra.mrb[16].mxu1 %v696_v29  ;;  %v702_v34 = vld [vmem:[#allocation2 + $0xb0] sm:$0xff] }
  0x4c   : > { %v691_v32 = vld [vmem:[#allocation2 + $0x58] sm:$0xff] }
  0x4d   : > { %1263 = vmatprep.mubr.bf16.mxu0 %v691_v32  ;;  %v703_v35 = vld [vmem:[#allocation2 + $0xb8] sm:$0xff] }
  0x4e   : > { %1279 = vmatprep.mubr.bf16.mxu1 %v703_v35 }
  0x4f   : > { %1264 = vmatmul.mubr.bf16.gmra.mrb[20].mxu0 %v690_v33 }
  0x53   : > { %1280 = vmatmul.mubr.bf16.gmra.mrb[20].mxu1 %v702_v34 }
  0xfa   : > { %v1642_v40 = vpop.f32.mrb[0].mxu0 }
  0xfb   : > { %v1643_v42 = vpop.f32.mrb[1].mxu0  ;;  %v1682_v45 = vpop.f32.mrb[0].mxu1 }
  0xfc   : > { %v1644_v43 = vadd.f32 %v1643_v42, %v1642_v40  ;;  %v1645_v44 = vpop.f32.mrb[2].mxu0  ;;  %v1683_v48 = vpop.f32.mrb[1].mxu1 }
  0xfd   : > { %v1646_v46 = vpop.f32.mrb[3].mxu0  ;;  %v1684_v50 = vadd.f32 %v1683_v48, %v1682_v45  ;;  %v1685_v51 = vpop.f32.mrb[2].mxu1 }
  0xfe   : > { %v1128_v47 = vadd.f32 %v1644_v43, %v804_v41  ;;  %v1647_v49 = vadd.f32 %v1646_v46, %v1645_v44  ;;  %v1686_v53 = vpop.f32.mrb[3].mxu1 }
  0xff   : > { %v1687_v55 = vadd.f32 %v1686_v53, %v1685_v51  ;;  %v1318_v53 = vsub.s32 2, %v2095_v37 }
 0x100   : > { %v1131_v52 = vadd.f32 %v1647_v49, %v804_v41  ;;  %v1193_v54 = vadd.f32 %v1684_v50, %v1128_v47  ;;  %v1306_v47 = vsub.s32 1, %v2095_v37 }
 0x102   : > { %v2104_v56 = vadd.f32 %v1687_v55, %v1131_v52  ;;  %v1648_v57 = vpop.f32.mrb[4].mxu0 }
 0x103   : > { %v1649_v58 = vpop.f32.mrb[5].mxu0  ;;  %v1688_v63 = vpop.f32.mrb[4].mxu1 }
 0x104   : > { %v1650_v59 = vadd.f32 %v1649_v58, %v1648_v57  ;;  %v1651_v60 = vpop.f32.mrb[6].mxu0  ;;  %v1689_v1 = vpop.f32.mrb[5].mxu1 }
 0x105   : > { %v1652_v61 = vpop.f32.mrb[7].mxu0  ;;  %v1690_v2 = vadd.f32 %v1689_v1, %v1688_v63  ;;  %v1691_v3 = vpop.f32.mrb[6].mxu1 }
 0x106   : > { %v1653_v62 = vadd.f32 %v1652_v61, %v1651_v60  ;;  %v1136_v0 = vadd.f32 %v1650_v59, %v804_v41  ;;  %v1692_v5 = vpop.f32.mrb[7].mxu1 }
 0x107   : > { %v1693_v7 = vadd.f32 %v1692_v5, %v1691_v3 }
 0x108   : > { %v1139_v4 = vadd.f32 %v1653_v62, %v804_v41  ;;  %v2106_v6 = vadd.f32 %v1690_v2, %v1136_v0  ;;  %v1319_v2 = vrot.slane %v2101_v39, %v1318_v53 }
 0x10a   : > { %v2108_v8 = vadd.f32 %v1693_v7, %v1139_v4  ;;  %v1654_v9 = vpop.f32.mrb[8].mxu0 }
 0x10b   : > { %v1655_v10 = vpop.f32.mrb[9].mxu0  ;;  %v1694_v14 = vpop.f32.mrb[8].mxu1 }
 0x10c   : > { %v1656_v11 = vadd.f32 %v1655_v10, %v1654_v9  ;;  %v1657_v12 = vpop.f32.mrb[10].mxu0  ;;  %v1695_v17 = vpop.f32.mrb[9].mxu1 }
 0x10d   : > { %v1658_v13 = vpop.f32.mrb[11].mxu0  ;;  %v1696_v18 = vadd.f32 %v1695_v17, %v1694_v14  ;;  %v1697_v19 = vpop.f32.mrb[10].mxu1 }
 0x10e   : > { %v1144_v15 = vadd.f32 %v1656_v11, %v804_v41  ;;  %v1659_v16 = vadd.f32 %v1658_v13, %v1657_v12  ;;  %v1698_v21 = vpop.f32.mrb[11].mxu1 }
 0x10f   : > { %v1699_v23 = vadd.f32 %v1698_v21, %v1697_v19 }
 0x110   : > { %v1147_v20 = vadd.f32 %v1659_v16, %v804_v41  ;;  %v1209_v22 = vadd.f32 %v1696_v18, %v1144_v15 }
 0x112   : > { %v1212_v24 = vadd.f32 %v1699_v23, %v1147_v20  ;;  %v1660_v25 = vpop.f32.mrb[12].mxu0 }
 0x113   : > { %v1661_v26 = vpop.f32.mrb[13].mxu0 }
 0x114   : > { %v1662_v27 = vadd.f32 %v1661_v26, %v1660_v25  ;;  %v1663_v28 = vpop.f32.mrb[14].mxu0 }
 0x115   : > { %v1664_v29 = vpop.f32.mrb[15].mxu0 }
 0x116   : > { %v1700_v30 = vpop.f32.mrb[12].mxu1  ;;  %v1152_v31 = vadd.f32 %v1662_v27, %v804_v41  ;;  %v1665_v32 = vadd.f32 %v1664_v29, %v1663_v28 }
 0x117   : > { %v1701_v33 = vpop.f32.mrb[13].mxu1 }
 0x118   : > { %v1702_v34 = vadd.f32 %v1701_v33, %v1700_v30  ;;  %v1703_v35 = vpop.f32.mrb[14].mxu1  ;;  %v1155_v36 = vadd.f32 %v1665_v32, %v804_v41  ;;  %v1307_v41 = vrot.slane %v2101_v39, %v1306_v47 }
 0x119   : > { %v1704_v38 = vpop.f32.mrb[15].mxu1 }
 0x11a   : > { %v1217_v40 = vadd.f32 %v1702_v34, %v1152_v31  ;;  %v1705_v42 = vadd.f32 %v1704_v38, %v1703_v35  ;;  %v1722_v44 = vpop.f32.mrb[16].mxu0 }
 0x11b   : > { %v1723_v45 = vpop.f32.mrb[17].mxu0 }
 0x11c   : > { %v1220_v43 = vadd.f32 %v1705_v42, %v1155_v36  ;;  %v1724_v46 = vadd.f32 %v1723_v45, %v1722_v44  ;;  %v1725_v48 = vpop.f32.mrb[18].mxu0 }
 0x11d   : > { %v1726_v49 = vpop.f32.mrb[19].mxu0 }
 0x11e   : > { %v1734_v50 = vpop.f32.mrb[16].mxu1  ;;  %v1258_v51 = vadd.f32 %v1724_v46, %v1193_v54  ;;  %v1727_v52 = vadd.f32 %v1726_v49, %v1725_v48 }
 0x11f   : > { %v1735_v55 = vpop.f32.mrb[17].mxu1 }
 0x120   : > { %v1288_v57 = vmul.f32 0.01, %v1258_v51  ;;  %v1736_v58 = vadd.f32 %v1735_v55, %v1734_v50  ;;  %v1737_v59 = vpop.f32.mrb[18].mxu1  ;;  %v1261_v60 = vadd.f32 %v1727_v52, %v2104_v56 }
 0x121   : > { %v1738_v61 = vpop.f32.mrb[19].mxu1 }
 0x122   : > { %v1296_v62 = vmax.f32 %v1258_v51, %v1288_v57  ;;  %v1274_v63 = vadd.f32 %v1736_v58, %v1209_v22  ;;  %v1289_v0 = vmul.f32 0.01, %v1261_v60  ;;  %v1739_v1 = vadd.f32 %v1738_v61, %v1737_v59  ;;  %v1728_v54 = vpop.f32.mrb[20].mxu0 }
 0x123   : > { %v1729_v7 = vpop.f32.mrb[21].mxu0 }
 0x124   : > { %v1308_v3 = vmul.f32 %v1307_v41, %v1296_v62  ;;  %v1292_v4 = vmul.f32 0.01, %v1274_v63  ;;  %v1297_v37 = vmax.f32 %v1261_v60, %v1289_v0  ;;  %v1277_v5 = vadd.f32 %v1739_v1, %v1212_v24  ;;  %v1731_v10 = vpop.f32.mrb[22].mxu0 }
 0x125   : > { %v1730_v9 = vadd.f32 %v1729_v7, %v1728_v54  ;;  %v1732_v14 = vpop.f32.mrb[23].mxu0 }
 0x126   : > { %v1300_v11 = vmax.f32 %v1274_v63, %v1292_v4  ;;  %v1309_v12 = vmul.f32 %v1307_v41, %v1297_v37  ;;  %v1293_v56 = vmul.f32 0.01, %v1277_v5  ;;  %v1740_v13 = vpop.f32.mrb[20].mxu1  ;;  %v1320_v15 = vadd.f32 %v1319_v2, %v1308_v3 }
 0x127   : > { %v1266_v16 = vadd.f32 %v1730_v9, %v2106_v6  ;;  %v1741_v17 = vpop.f32.mrb[21].mxu1  ;;  %v1733_v18 = vadd.f32 %v1732_v14, %v1731_v10 }
 0x128   : > { %v1312_v39 = vmul.f32 %v1307_v41, %v1300_v11  ;;  %v1321_v19 = vadd.f32 %v1319_v2, %v1309_v12  ;;  %v1301_v20 = vmax.f32 %v1277_v5, %v1293_v56  ;;  %v1742_v21 = vadd.f32 %v1741_v17, %v1740_v13  ;;  %v1743_v22 = vpop.f32.mrb[22].mxu1 }
 0x129   : > { %v1290_v23 = vmul.f32 0.01, %v1266_v16  ;;  %v1269_v24 = vadd.f32 %v1733_v18, %v2108_v8  ;;  %v1744_v25 = vpop.f32.mrb[23].mxu1 }
 0x12a   : > { %v1606_v26 = vpack.c.bf16 %v1321_v19, %v1320_v15  ;;  %v1313_v27 = vmul.f32 %v1307_v41, %v1301_v20  ;;  %v1282_v6 = vadd.f32 %v1742_v21, %v1217_v40  ;;  %v1745_v30 = vadd.f32 %v1744_v25, %v1743_v22 }
 0x12b   : > { %v1298_v28 = vmax.f32 %v1266_v16, %v1290_v23  ;;  %v1291_v29 = vmul.f32 0.01, %v1269_v24  ;;  %v1324_v31 = vadd.f32 %v1319_v2, %v1312_v39 }
 0x12c   : > { %1607 = vst [vmem:[%s2120_s19] sm:$0xff] %v1606_v26   ;;  %v1325_v32 = vadd.f32 %v1319_v2, %v1313_v27  ;;  %v1294_v33 = vmul.f32 0.01, %v1282_v6  ;;  %v1285_v36 = vadd.f32 %v1745_v30, %v1220_v43 }
 0x12d   : > { %v1310_v34 = vmul.f32 %v1307_v41, %v1298_v28  ;;  %v1299_v35 = vmax.f32 %v1269_v24, %v1291_v29 }
 0x12e   : > { %v1616_v38 = vpack.c.bf16 %v1325_v32, %v1324_v31  ;;  %v1302_v42 = vmax.f32 %v1282_v6, %v1294_v33  ;;  %v1295_v44 = vmul.f32 0.01, %v1285_v36 }
 0x12f   : > { %v1311_v8 = vmul.f32 %v1307_v41, %v1299_v35  ;;  %v1322_v45 = vadd.f32 %v1319_v2, %v1310_v34 }
 0x130   : > { %1624 = vst [vmem:[%s2120_s19 + $0x10] sm:$0xff] %v1616_v38   ;;  %v1314_v46 = vmul.f32 %v1307_v41, %v1302_v42  ;;  %v1303_v47 = vmax.f32 %v1285_v36, %v1295_v44 }
 0x131   : > { %v1323_v40 = vadd.f32 %v1319_v2, %v1311_v8 }
 0x132   : > { %v1315_v49 = vmul.f32 %v1307_v41, %v1303_v47  ;;  %v1326_v50 = vadd.f32 %v1319_v2, %v1314_v46 }
 0x133   : > { %v1611_v48 = vpack.c.bf16 %v1323_v40, %v1322_v45 }
 0x134   : > { %v1327_v51 = vadd.f32 %v1319_v2, %v1315_v49 }
 0x135   : > { %1623 = vst [vmem:[%s2120_s19 + $0x8] sm:$0xff] %v1611_v48  }
 0x136   : > { %v1621_v52 = vpack.c.bf16 %v1327_v51, %v1326_v50 }
 0x138   : > { %1625 = vst [vmem:[%s2120_s19 + $0x18] sm:$0xff] %v1621_v52  }
 0x139 PF: > { %s13_s12 = sadd.s32 1, %s1861_s12  }
 0x13a   : > { %p10_p4 = scmp.ge.s32.totalorder %s13_s12, 4  }
 0x13c   :  { %12 = sbr.rel (!%p10_p4) target bundleno = 1 (0x1), region = 78 }

// kernel: encoder_forward.10
= control target key start
LH: loop header
LB: loop body
LE: loop exit
PB: predicated region body
PF: predicated region fallthrough
CT: control target
= control target key end

     0   :  { %s666_s12 = smov 0   ;;  %s793_s0 = inlined_call_operand.vmem [shape: bf16[32,256], index: 0, kind: input, shape index: {}]   ;;  %s794_s1 = inlined_call_operand.vmem [shape: bf16[256,256], index: 1, kind: input, shape index: {}]   ;;  %s795_s2 = inlined_call_operand.vmem [shape: f32[3,256], index: 2, kind: input, shape index: {}]   ;;  %s796_s3 = inlined_call_operand.vmem [shape: bf16[32,256], index: 3, kind: output, shape index: {}]  }
   0x1 LB: > { %s526_s13 = sadd.s32 4294967295, %s644_s12   ;;  %p530_p0 = scmp.ge.s32.totalorder %s644_s12, 1  ;;  %s644_s12 = sphi %s666_s12, %s13_s12  }
   0x2   : > { %p139_p1 = scmp.lt.s32.totalorder %s644_s12, 3 }
   0x4   : > { %p140_p2 = pnand %p530_p0, %p139_p1 }
   0x5   : > { %v587_v0 = vld [vmem:[%s794_s1 + $0x4] ss:$8 sps:$4 sm:$0xff] (!%p140_p2)   ;;  %v589_v1 = vld [vmem:[%s794_s1] ss:$8 sps:$4 sm:$0xff] (!%p140_p2)   ;;  %v590_v2 = vld [vmem:[%s794_s1 + $0x14] ss:$8 sps:$4 sm:$0xff] (!%p140_p2)   ;;  %v215_v34 = vlaneseq (!%p140_p2) }
   0x6   : > { %143 = sbr.rel (%p140_p2) target bundleno = 294 (0x126), region = 32  ;;  %403 = vmatprep.subr.bf16.mxu0 (!%p140_p2), %v587_v0  ;;  %v592_v3 = vld [vmem:[%s794_s1 + $0x10] ss:$8 sps:$4 sm:$0xff] (!%p140_p2)   ;;  %v593_v4 = vld [vmem:[%s794_s1 + $0x24] ss:$8 sps:$4 sm:$0xff] (!%p140_p2)   ;;  %s531_s24 = sshll.u32 (!%p140_p2), %s526_s13, 1 }
   0x7   : > { %404 = vmatpush1.bf16.msra.mxu0 (!%p140_p2), %v589_v1  ;;  %v595_v5 = vld [vmem:[%s794_s1 + $0x20] ss:$8 sps:$4 sm:$0xff] (!%p140_p2)   ;;  %v596_v6 = vld [vmem:[%s794_s1 + $0x34] ss:$8 sps:$4 sm:$0xff] (!%p140_p2)   ;;  %p166_p3 = scmp.lt.s32.totalorder (!%p140_p2), %s531_s24, 3  ;;  %v216_v35 = vshrl.u32 (!%p140_p2), %v215_v34, 7 }
   0x8   : > { %405 = vmatprep.subr.bf16.mxu0 (!%p140_p2), %v590_v2  ;;  %v598_v7 = vld [vmem:[%s794_s1 + $0x30] ss:$8 sps:$4 sm:$0xff] (!%p140_p2)   ;;  %v599_v8 = vld [vmem:[%s794_s1 + $0x44] ss:$8 sps:$4 sm:$0xff] (!%p140_p2)   ;;  %v601_v9 = vld [vmem:[%s794_s1 + $0x40] ss:$8 sps:$4 sm:$0xff] (!%p140_p2)  }
   0x9   : > { %v602_v10 = vld [vmem:[%s794_s1 + $0x54] ss:$8 sps:$4 sm:$0xff] (!%p140_p2)   ;;  %v604_v11 = vld [vmem:[%s794_s1 + $0x50] ss:$8 sps:$4 sm:$0xff] (!%p140_p2)   ;;  %v605_v12 = vld [vmem:[%s794_s1 + $0x64] ss:$8 sps:$4 sm:$0xff] (!%p140_p2)  }
   0xa   : > { %v607_v14 = vld [vmem:[%s794_s1 + $0x60] ss:$8 sps:$4 sm:$0xff] (!%p140_p2)   ;;  %v608_v15 = vld [vmem:[%s794_s1 + $0x74] ss:$8 sps:$4 sm:$0xff] (!%p140_p2)   ;;  %v610_v16 = vld [vmem:[%s794_s1 + $0x70] ss:$8 sps:$4 sm:$0xff] (!%p140_p2)  }
   0xb   : > { %406 = vmatpush1.bf16.msra.mxu0 (!%p140_p2), %v592_v3  ;;  %v611_v17 = vld [vmem:[%s794_s1 + $0x84] ss:$8 sps:$4 sm:$0xff] (!%p140_p2)   ;;  %v613_v18 = vld [vmem:[%s794_s1 + $0x80] ss:$8 sps:$4 sm:$0xff] (!%p140_p2)   ;;  %v614_v19 = vld [vmem:[%s794_s1 + $0x94] ss:$8 sps:$4 sm:$0xff] (!%p140_p2)  }
   0xc   : > { %407 = vmatprep.subr.bf16.mxu0 (!%p140_p2), %v593_v4  ;;  %v616_v20 = vld [vmem:[%s794_s1 + $0x90] ss:$8 sps:$4 sm:$0xff] (!%p140_p2)   ;;  %v617_v21 = vld [vmem:[%s794_s1 + $0xa4] ss:$8 sps:$4 sm:$0xff] (!%p140_p2)   ;;  %v619_v22 = vld [vmem:[%s794_s1 + $0xa0] ss:$8 sps:$4 sm:$0xff] (!%p140_p2)  }
   0xd   : > { %s798_s24 = smov (!%p166_p3, %s531_s24), 3  ;;  %v620_v23 = vld [vmem:[%s794_s1 + $0xb4] ss:$8 sps:$4 sm:$0xff]   ;;  %v622_v24 = vld [vmem:[%s794_s1 + $0xb0] ss:$8 sps:$4 sm:$0xff]   ;;  %v217_v36 = vsub.s32 0, %v216_v35 }
   0xe   : > { %s575_s10 = sshll.u32 %s798_s24, 3  ;;  %v623_v25 = vld [vmem:[%s794_s1 + $0xc4] ss:$8 sps:$4 sm:$0xff]   ;;  %v625_v26 = vld [vmem:[%s794_s1 + $0xc0] ss:$8 sps:$4 sm:$0xff]   ;;  %v221_v38 = vsub.s32 4, %v216_v35 }
   0xf   : > { %408 = vmatpush1.bf16.msra.mxu0 %v595_v5  ;;  %s718_s16 = scalar_lea.vmem %s793_s0, %s575_s10  ;;  %v626_v27 = vld [vmem:[%s794_s1 + $0xd4] ss:$8 sps:$4 sm:$0xff]   ;;  %v628_v28 = vld [vmem:[%s794_s1 + $0xd0] ss:$8 sps:$4 sm:$0xff]   ;;  %v629_v29 = vld [vmem:[%s794_s1 + $0xe4] ss:$8 sps:$4 sm:$0xff]   ;;  %s177_s13 = scalar_lea.vmem %s796_s3, %s575_s10 }
  0x10   : > { %409 = vmatprep.subr.bf16.mxu0 %v596_v6  ;;  %v637_v13 = vld [vmem:[%s718_s16 + $0x4] ss:$8 sps:$4 sm:$0xff]   ;;  %v631_v30 = vld [vmem:[%s794_s1 + $0xe0] ss:$8 sps:$4 sm:$0xff]   ;;  %v632_v31 = vld [vmem:[%s794_s1 + $0xf4] ss:$8 sps:$4 sm:$0xff]  }
  0x11   : > { %435 = vmatprep.mubr.bf16.mxu0 %v637_v13  ;;  %v634_v32 = vld [vmem:[%s794_s1 + $0xf0] ss:$8 sps:$4 sm:$0xff]   ;;  %v635_v33 = vld [vmem:[%s718_s16] ss:$8 sps:$4 sm:$0xff]  }
  0x12   : > { %v213_v37 = vld [vmem:[%s795_s2] sm:$0x77] }
  0x13   : > { %410 = vmatpush1.bf16.msra.mxu0 %v598_v7  ;;  %v218_v39 = vrot.slane %v213_v37, %v217_v36  ;;  %v222_v40 = vrot.slane %v213_v37, %v221_v38 }
  0x14   : > { %411 = vmatprep.subr.bf16.mxu0 %v599_v8 }
  0x15   : > { %v228_v41 = vrot.slane %v218_v39, %v217_v36  ;;  %v232_v42 = vrot.slane %v222_v40, %v217_v36 }
  0x17   : > { %412 = vmatpush1.bf16.msra.mxu0 %v601_v9 }
  0x18   : > { %413 = vmatprep.subr.bf16.mxu0 %v602_v10 }
  0x1b   : > { %414 = vmatpush1.bf16.msra.mxu0 %v604_v11 }
  0x1c   : > { %415 = vmatprep.subr.bf16.mxu0 %v605_v12 }
  0x1f   : > { %416 = vmatpush1.bf16.msra.mxu0 %v607_v14 }
  0x20   : > { %417 = vmatprep.subr.bf16.mxu0 %v608_v15 }
  0x23   : > { %418 = vmatpush1.bf16.msra.mxu0 %v610_v16 }
  0x24   : > { %419 = vmatprep.subr.bf16.mxu0 %v611_v17 }
  0x27   : > { %420 = vmatpush1.bf16.msra.mxu0 %v613_v18 }
  0x28   : > { %421 = vmatprep.subr.bf16.mxu0 %v614_v19 }
  0x2b   : > { %422 = vmatpush1.bf16.msra.mxu0 %v616_v20 }
  0x2c   : > { %423 = vmatprep.subr.bf16.mxu0 %v617_v21 }
  0x2f   : > { %424 = vmatpush1.bf16.msra.mxu0 %v619_v22 }
  0x30   : > { %425 = vmatprep.subr.bf16.mxu0 %v620_v23 }
  0x33   : > { %426 = vmatpush1.bf16.msra.mxu0 %v622_v24 }
  0x34   : > { %427 = vmatprep.subr.bf16.mxu0 %v623_v25 }
  0x37   : > { %428 = vmatpush1.bf16.msra.mxu0 %v625_v26 }
  0x38   : > { %429 = vmatprep.subr.bf16.mxu0 %v626_v27 }
  0x3b   : > { %430 = vmatpush1.bf16.msra.mxu0 %v628_v28 }
  0x3c   : > { %431 = vmatprep.subr.bf16.mxu0 %v629_v29 }
  0x3f   : > { %432 = vmatpush1.bf16.msra.mxu0 %v631_v30 }
  0x40   : > { %433 = vmatprep.subr.bf16.mxu0 %v632_v31 }
  0x43   : > { %434 = vmatpush1.bf16.msra.mxu0 %v634_v32 }
  0x46   : > { %436 = vmatmul.mubr.bf16.vlgmr.msra.gmra.mrb[0].mxu0 %v635_v33 }
 0x119   : > { %v437_v43 = vpop.f32.mrb[0].mxu0 }
 0x11a   : > { %v438_v44 = vadd.f32 %v437_v43, %v228_v41  ;;  %v439_v45 = vpop.f32.mrb[1].mxu0 }
 0x11b   : > { %v440_v46 = vadd.f32 %v439_v45, %v232_v42  ;;  %v441_v47 = vpop.f32.mrb[2].mxu0 }
 0x11c   : > { %v446_v48 = vmul.f32 0.01, %v438_v44  ;;  %v442_v49 = vadd.f32 %v441_v47, %v228_v41  ;;  %v443_v50 = vpop.f32.mrb[3].mxu0 }
 0x11d   : > { %v447_v51 = vmul.f32 0.01, %v440_v46  ;;  %v444_v52 = vadd.f32 %v443_v50, %v232_v42 }
 0x11e   : > { %v450_v53 = vmax.f32 %v438_v44, %v446_v48  ;;  %v448_v54 = vmul.f32 0.01, %v442_v49 }
 0x11f   : > { %v451_v55 = vmax.f32 %v440_v46, %v447_v51  ;;  %v449_v56 = vmul.f32 0.01, %v444_v52 }
 0x120   : > { %v452_v57 = vmax.f32 %v442_v49, %v448_v54 }
 0x121   : > { %v577_v58 = vpack.c.bf16 %v451_v55, %v450_v53  ;;  %v453_v59 = vmax.f32 %v444_v52, %v449_v56 }
 0x123   : > { %466 = vst [vmem:[%s177_s13] sm:$0xff] %v577_v58  ;;  %v578_v60 = vpack.c.bf16 %v453_v59, %v452_v57 }
 0x125   : > { %467 = vst [vmem:[%s177_s13 + $0x8] sm:$0xff] %v578_v60 }
 0x126 PF: > { %s13_s12 = sadd.s32 1, %s644_s12  }
 0x127   : > { %p10_p4 = scmp.ge.s32.totalorder %s13_s12, 4  }
 0x129   :  { %12 = sbr.rel (!%p10_p4) target bundleno = 1 (0x1), region = 62 }

// kernel: encoder_forward.9
= control target key start
LH: loop header
LB: loop body
LE: loop exit
PB: predicated region body
PF: predicated region fallthrough
CT: control target
= control target key end

     0   :  { %s2854_s12 = smov 0   ;;  %s3536_s0 = inlined_call_operand.vmem [shape: bf16[2,10,5,256], index: 0, kind: input, shape index: {}]   ;;  %s3537_s1 = inlined_call_operand.vmem [shape: bf16[1536,256], index: 1, kind: input, shape index: {}]   ;;  %s3538_s2 = inlined_call_operand.vmem [shape: f32[3,256], index: 2, kind: input, shape index: {}]   ;;  %s3539_s3 = inlined_call_operand.vmem [shape: bf16[2,16,256], index: 3, kind: output, shape index: {}]  }
   0x1 LB: > { %s2180_s13 = sadd.s32 4294967295, %s2832_s12   ;;  %p2184_p0 = scmp.ge.s32.totalorder %s2832_s12, 1  ;;  %s2832_s12 = sphi %s2854_s12, %s13_s12  }
   0x2   : > { %p137_p1 = scmp.lt.s32.totalorder %s2832_s12, 3 }
   0x4   : > { %p138_p2 = pnand %p2184_p0, %p137_p1 }
   0x5   : > { %v2490_v0 = vld [vmem:[%s3537_s1 + $0x4] ss:$8 sps:$4 sm:$0xff] (!%p138_p2)   ;;  %v2494_v2 = vld [vmem:[%s3537_s1] ss:$8 sps:$4 sm:$0xff] (!%p138_p2)   ;;  %v2496_v4 = vld [vmem:[%s3537_s1 + $0x14] ss:$8 sps:$4 sm:$0xff] (!%p138_p2)  }
   0x6   : > { %141 = sbr.rel (%p138_p2) target bundleno = 428 (0x1ac), region = 32  ;;  %v2492_v1 = vld [vmem:[%s3537_s1 + $0x304] ss:$8 sps:$4 sm:$0xff] (!%p138_p2)   ;;  %1801 = vmatprep.subr.bf16.mxu1 (!%p138_p2), %v2490_v0  ;;  %v2495_v3 = vld [vmem:[%s3537_s1 + $0x300] ss:$8 sps:$4 sm:$0xff] (!%p138_p2)   ;;  %p161_p3 = scmp.lt.s32.totalorder (!%p138_p2), %s2180_s13, 1 }
   0x7   : > { %1930 = vmatprep.subr.bf16.mxu0 (!%p138_p2), %v2492_v1  ;;  %1802 = vmatpush1.bf16.msra.mxu1 (!%p138_p2), %v2494_v2  ;;  %v2498_v5 = vld [vmem:[%s3537_s1 + $0x314] ss:$8 sps:$4 sm:$0xff] (!%p138_p2)   ;;  %v2500_v6 = vld [vmem:[%s3537_s1 + $0x10] ss:$8 sps:$4 sm:$0xff] (!%p138_p2)   ;;  %v2502_v8 = vld [vmem:[%s3537_s1 + $0x24] ss:$8 sps:$4 sm:$0xff] (!%p138_p2)  }
   0x8   : > { %1931 = vmatpush1.bf16.msra.mxu0 (!%p138_p2), %v2495_v3  ;;  %1803 = vmatprep.subr.bf16.mxu1 (!%p138_p2), %v2496_v4  ;;  %v2501_v7 = vld [vmem:[%s3537_s1 + $0x310] ss:$8 sps:$4 sm:$0xff] (!%p138_p2)   ;;  %v2504_v9 = vld [vmem:[%s3537_s1 + $0x324] ss:$8 sps:$4 sm:$0xff] (!%p138_p2)   ;;  %v2506_v10 = vld [vmem:[%s3537_s1 + $0x20] ss:$8 sps:$4 sm:$0xff] (!%p138_p2)  }
   0x9   : > { %1932 = vmatprep.subr.bf16.mxu0 (!%p138_p2), %v2498_v5  ;;  %v2507_v11 = vld [vmem:[%s3537_s1 + $0x320] ss:$8 sps:$4 sm:$0xff] (!%p138_p2)   ;;  %v2508_v12 = vld [vmem:[%s3537_s1 + $0x34] ss:$8 sps:$4 sm:$0xff] (!%p138_p2)   ;;  %v2512_v14 = vld [vmem:[%s3537_s1 + $0x30] ss:$8 sps:$4 sm:$0xff] (!%p138_p2)  }
   0xa   : > { %v2510_v13 = vld [vmem:[%s3537_s1 + $0x334] ss:$8 sps:$4 sm:$0xff] (!%p138_p2)   ;;  %v2513_v15 = vld [vmem:[%s3537_s1 + $0x330] ss:$8 sps:$4 sm:$0xff] (!%p138_p2)   ;;  %v2514_v16 = vld [vmem:[%s3537_s1 + $0x44] ss:$8 sps:$4 sm:$0xff] (!%p138_p2)  }
   0xb   : > { %1804 = vmatpush1.bf16.msra.mxu1 (!%p138_p2), %v2500_v6  ;;  %v2516_v17 = vld [vmem:[%s3537_s1 + $0x344] ss:$8 sps:$4 sm:$0xff] (!%p138_p2)   ;;  %v2518_v18 = vld [vmem:[%s3537_s1 + $0x40] ss:$8 sps:$4 sm:$0xff] (!%p138_p2)   ;;  %v2520_v20 = vld [vmem:[%s3537_s1 + $0x54] ss:$8 sps:$4 sm:$0xff] (!%p138_p2)  }
   0xc   : > { %1933 = vmatpush1.bf16.msra.mxu0 (!%p138_p2), %v2501_v7  ;;  %1805 = vmatprep.subr.bf16.mxu1 (!%p138_p2), %v2502_v8  ;;  %v2519_v19 = vld [vmem:[%s3537_s1 + $0x340] ss:$8 sps:$4 sm:$0xff] (!%p138_p2)   ;;  %v2522_v21 = vld [vmem:[%s3537_s1 + $0x354] ss:$8 sps:$4 sm:$0xff] (!%p138_p2)   ;;  %v2524_v22 = vld [vmem:[%s3537_s1 + $0x50] ss:$8 sps:$4 sm:$0xff] (!%p138_p2)  }
   0xd   : > { %1934 = vmatprep.subr.bf16.mxu0 %v2504_v9  ;;  %v2525_v23 = vld [vmem:[%s3537_s1 + $0x350] ss:$8 sps:$4 sm:$0xff]   ;;  %v2526_v24 = vld [vmem:[%s3537_s1 + $0x64] ss:$8 sps:$4 sm:$0xff]   ;;  %v2530_v26 = vld [vmem:[%s3537_s1 + $0x60] ss:$8 sps:$4 sm:$0xff]  }
   0xe   : > { %v2528_v25 = vld [vmem:[%s3537_s1 + $0x364] ss:$8 sps:$4 sm:$0xff]   ;;  %v2531_v27 = vld [vmem:[%s3537_s1 + $0x360] ss:$8 sps:$4 sm:$0xff]   ;;  %v2532_v28 = vld [vmem:[%s3537_s1 + $0x74] ss:$8 sps:$4 sm:$0xff]  }
   0xf   : > { %1806 = vmatpush1.bf16.msra.mxu1 %v2506_v10  ;;  %v2534_v29 = vld [vmem:[%s3537_s1 + $0x374] ss:$8 sps:$4 sm:$0xff]   ;;  %v2536_v30 = vld [vmem:[%s3537_s1 + $0x70] ss:$8 sps:$4 sm:$0xff]   ;;  %v2538_v32 = vld [vmem:[%s3537_s1 + $0x84] ss:$8 sps:$4 sm:$0xff]  }
  0x10   : > { %1935 = vmatpush1.bf16.msra.mxu0 %v2507_v11  ;;  %1807 = vmatprep.subr.bf16.mxu1 %v2508_v12  ;;  %v2537_v31 = vld [vmem:[%s3537_s1 + $0x370] ss:$8 sps:$4 sm:$0xff]   ;;  %v2540_v33 = vld [vmem:[%s3537_s1 + $0x384] ss:$8 sps:$4 sm:$0xff]   ;;  %v2542_v34 = vld [vmem:[%s3537_s1 + $0x80] ss:$8 sps:$4 sm:$0xff]  }
  0x11   : > { %1936 = vmatprep.subr.bf16.mxu0 %v2510_v13  ;;  %v2543_v35 = vld [vmem:[%s3537_s1 + $0x380] ss:$8 sps:$4 sm:$0xff]   ;;  %v2544_v36 = vld [vmem:[%s3537_s1 + $0x94] ss:$8 sps:$4 sm:$0xff]   ;;  %s3541_s13 = smov (!%p161_p3, %s2180_s13), 1 }
  0x12   : > { %v2546_v37 = vld [vmem:[%s3537_s1 + $0x394] ss:$8 sps:$4 sm:$0xff]   ;;  %v2548_v38 = vld [vmem:[%s3537_s1 + $0x90] ss:$8 sps:$4 sm:$0xff]   ;;  %v2550_v40 = vld [vmem:[%s3537_s1 + $0xa4] ss:$8 sps:$4 sm:$0xff]  }
  0x13   : > { %1808 = vmatpush1.bf16.msra.mxu1 %v2512_v14  ;;  %v2549_v39 = vld [vmem:[%s3537_s1 + $0x390] ss:$8 sps:$4 sm:$0xff]   ;;  %v2552_v41 = vld [vmem:[%s3537_s1 + $0x3a4] ss:$8 sps:$4 sm:$0xff]   ;;  %s2481_s23 = smul.u32 80, %s3541_s13  ;;  %s2454_s10 = sshll.u32 %s3541_s13, 4 }
  0x14   : > { %1937 = vmatpush1.bf16.msra.mxu0 %v2513_v15  ;;  %1809 = vmatprep.subr.bf16.mxu1 %v2514_v16  ;;  %v2554_v42 = vld [vmem:[%s3537_s1 + $0xa0] ss:$8 sps:$4 sm:$0xff]   ;;  %v2556_v44 = vld [vmem:[%s3537_s1 + $0xb4] ss:$8 sps:$4 sm:$0xff]   ;;  %v2560_v46 = vld [vmem:[%s3537_s1 + $0xb0] ss:$8 sps:$4 sm:$0xff]   ;;  %s170_s15 = scalar_lea.vmem %s3539_s3, %s2454_s10 }
  0x15   : > { %1938 = vmatprep.subr.bf16.mxu0 %v2516_v17  ;;  %v2555_v43 = vld [vmem:[%s3537_s1 + $0x3a0] ss:$8 sps:$4 sm:$0xff]   ;;  %v2558_v45 = vld [vmem:[%s3537_s1 + $0x3b4] ss:$8 sps:$4 sm:$0xff]   ;;  %s3010_s7 = scalar_lea.vmem %s3536_s0, %s2481_s23  ;;  %v2561_v47 = vld [vmem:[%s3537_s1 + $0x3b0] ss:$8 sps:$4 sm:$0xff]  }
  0x16   : > { %v171_v48 = vld [vmem:[%s3010_s7] sm:$0x33]  ;;  %v2204_v50 = vld [vmem:[%s3010_s7 + $0x10] sm:$0x33]  ;;  %v2195_v59 = vld [vmem:[%s3010_s7 + $0x8] sm:$0x77] }
  0x17   : > { %1810 = vmatpush1.bf16.msra.mxu1 %v2518_v18  ;;  %v2189_v49 = vcombine.high %v171_v48, %v171_v48  ;;  %v2222_v51 = vld [vmem:[%s3010_s7 + $0x20] sm:$0x33]  ;;  %v2240_v52 = vld [vmem:[%s3010_s7 + $0x30] sm:$0x33]  ;;  %v2188_v53 = vcombine.low %v171_v48, %v171_v48  ;;  %v2206_v55 = vcombine.high %v2204_v50, %v2204_v50  ;;  %v2213_v60 = vld [vmem:[%s3010_s7 + $0x18] sm:$0x77]  ;;  %v2205_v61 = vcombine.low %v2204_v50, %v2204_v50 }
  0x18   : > { %1939 = vmatpush1.bf16.msra.mxu0 %v2519_v19  ;;  %1811 = vmatprep.subr.bf16.mxu1 %v2520_v20  ;;  %v2562_v54 = vld [vmem:[%s3537_s1 + $0xc4] ss:$8 sps:$4 sm:$0xff]   ;;  %v2224_v56 = vcombine.high %v2222_v51, %v2222_v51  ;;  %v2242_v57 = vcombine.high %v2240_v52, %v2240_v52  ;;  %v2223_v62 = vcombine.low %v2222_v51, %v2222_v51  ;;  %v2566_v0 = vld [vmem:[%s3537_s1 + $0xc0] ss:$8 sps:$4 sm:$0xff]   ;;  %v2249_v7 = vld [vmem:[%s3010_s7 + $0x38] sm:$0x77] }
  0x19   : > { %1940 = vmatprep.subr.bf16.mxu0 %v2522_v21  ;;  %v2564_v58 = vld [vmem:[%s3537_s1 + $0x3c4] ss:$8 sps:$4 sm:$0xff]   ;;  %180 = vst [vmem:[#allocation2 + $0x8] sm:$0x3] %v2189_v49  ;;  %179 = vst [vmem:[#allocation2] sm:$0x3] %v2188_v53  ;;  %v2241_v63 = vcombine.low %v2240_v52, %v2240_v52  ;;  %v2197_v4 = vcombine.high %v2195_v59, %v2195_v59  ;;  %v2215_v5 = vcombine.high %v2213_v60, %v2213_v60 }
  0x1a   : > { %v2567_v1 = vld [vmem:[%s3537_s1 + $0x3c0] ss:$8 sps:$4 sm:$0xff]   ;;  %v282_v2 = vrot.slane %v2206_v55, 6  ;;  %400 = vst [vmem:[#allocation2 + $0x8] sm:$0x30] %v2224_v56  ;;  %v508_v3 = vrot.slane %v2242_v57, 2  ;;  %v2251_v10 = vcombine.high %v2249_v7, %v2249_v7 }
  0x1b   : > { %1812 = vmatpush1.bf16.msra.mxu1 %v2524_v22  ;;  %v2231_v6 = vld [vmem:[%s3010_s7 + $0x28] sm:$0x77]  ;;  %v2568_v8 = vld [vmem:[%s3537_s1 + $0xd4] ss:$8 sps:$4 sm:$0xff]   ;;  %v281_v11 = vrot.slane %v2205_v61, 6  ;;  %v507_v12 = vrot.slane %v2241_v63, 2 }
  0x1c   : > { %1941 = vmatpush1.bf16.msra.mxu0 %v2525_v23  ;;  %1813 = vmatprep.subr.bf16.mxu1 %v2526_v24  ;;  %v2233_v9 = vcombine.high %v2231_v6, %v2231_v6  ;;  %399 = vst [vmem:[#allocation2] sm:$0x30] %v2223_v62  ;;  %v2570_v13 = vld [vmem:[%s3537_s1 + $0x3d4] ss:$8 sps:$4 sm:$0xff]   ;;  %286 = vst [vmem:[#allocation2 + $0x8] sm:$0xc] %v282_v2 }
  0x1d   : > { %1942 = vmatprep.subr.bf16.mxu0 %v2528_v25  ;;  %512 = vst [vmem:[#allocation2 + $0x8] sm:$0xc0] %v508_v3  ;;  %v230_v14 = vshrl.u32 %v2197_v4, 16  ;;  %v232_v15 = vshll.u32 %v2197_v4, 16  ;;  %v341_v16 = vshrl.u32 %v2215_v5, 16  ;;  %v344_v17 = vshll.u32 %v2215_v5, 16 }
  0x1e   : > { %v453_v18 = vshrl.u32 %v2233_v9, 16  ;;  %v456_v19 = vshll.u32 %v2233_v9, 16  ;;  %v567_v20 = vshrl.u32 %v2251_v10, 16  ;;  %v570_v21 = vshll.u32 %v2251_v10, 16  ;;  %285 = vst [vmem:[#allocation2] sm:$0xc] %v281_v11 }
  0x1f   : > { %1814 = vmatpush1.bf16.msra.mxu1 %v2530_v26  ;;  %511 = vst [vmem:[#allocation2] sm:$0xc0] %v507_v12  ;;  %v234_v22 = vrot.slane %v232_v15, 1  ;;  %v343_v23 = vrot.slane %v341_v16, 6  ;;  %v346_v24 = vrot.slane %v344_v17, 7  ;;  %v2196_v25 = vcombine.low %v2195_v59, %v2195_v59 }
  0x20   : > { %1943 = vmatpush1.bf16.msra.mxu0 %v2531_v27  ;;  %1815 = vmatprep.subr.bf16.mxu1 %v2532_v28  ;;  %v2572_v26 = vld [vmem:[%s3537_s1 + $0xd0] ss:$8 sps:$4 sm:$0xff]   ;;  %v455_v27 = vrot.slane %v453_v18, 4  ;;  %v458_v28 = vrot.slane %v456_v19, 5  ;;  %v2580_v49 = vld [vmem:[%s3537_s1 + $0xf4] ss:$8 sps:$4 sm:$0xff]  }
  0x21   : > { %1944 = vmatprep.subr.bf16.mxu0 %v2534_v29  ;;  %v569_v29 = vrot.slane %v567_v20, 2  ;;  %v2584_v61 = vld [vmem:[%s3537_s1 + $0xf0] ss:$8 sps:$4 sm:$0xff]   ;;  %v2599_v3 = vld [vmem:[%s3537_s1 + $0x404] ss:$8 sps:$4 sm:$0xff]  }
  0x22   : > { %v2585_v62 = vld [vmem:[%s3537_s1 + $0x3f0] ss:$8 sps:$4 sm:$0xff]   ;;  %v2597_v9 = vld [vmem:[%s3537_s1 + $0x400] ss:$8 sps:$4 sm:$0xff]   ;;  %v2613_v11 = vld [vmem:[%s3537_s1 + $0x414] ss:$8 sps:$4 sm:$0xff]  }
  0x23   : > { %1816 = vmatpush1.bf16.msra.mxu1 %v2536_v30  ;;  %v572_v30 = vrot.slane %v570_v21, 3  ;;  %v2608_v10 = vld [vmem:[%s3537_s1 + $0x110] ss:$8 sps:$4 sm:$0xff]   ;;  %v2616_v12 = vld [vmem:[%s3537_s1 + $0x124] ss:$8 sps:$4 sm:$0xff]  }
  0x24   : > { %1945 = vmatpush1.bf16.msra.mxu0 %v2537_v31  ;;  %1817 = vmatprep.subr.bf16.mxu1 %v2538_v32  ;;  %v2573_v31 = vld [vmem:[%s3537_s1 + $0x3d0] ss:$8 sps:$4 sm:$0xff]   ;;  %v235_v32 = vor.u32 %v234_v22, %v230_v14  ;;  %v2614_v15 = vld [vmem:[%s3537_s1 + $0x120] ss:$8 sps:$4 sm:$0xff]   ;;  %v2619_v16 = vld [vmem:[%s3537_s1 + $0x424] ss:$8 sps:$4 sm:$0xff]  }
  0x25   : > { %1946 = vmatprep.subr.bf16.mxu0 %v2540_v33  ;;  %v347_v33 = vor.u32 %v346_v24, %v343_v23  ;;  %v2611_v14 = vld [vmem:[%s3537_s1 + $0x410] ss:$8 sps:$4 sm:$0xff]   ;;  %v2622_v17 = vld [vmem:[%s3537_s1 + $0x134] ss:$8 sps:$4 sm:$0xff]   ;;  %v2617_v18 = vld [vmem:[%s3537_s1 + $0x420] ss:$8 sps:$4 sm:$0xff]  }
  0x26   : > { %239 = vst [vmem:[#allocation2 + $0x38] sm:$0x3] %v235_v32  ;;  %v2620_v19 = vld [vmem:[%s3537_s1 + $0x130] ss:$8 sps:$4 sm:$0xff]   ;;  %v2625_v20 = vld [vmem:[%s3537_s1 + $0x434] ss:$8 sps:$4 sm:$0xff]  }
  0x27   : > { %1818 = vmatpush1.bf16.msra.mxu1 %v2542_v34  ;;  %v223_v34 = vshrl.u32 %v2196_v25, 16  ;;  %351 = vst [vmem:[#allocation2 + $0x38] sm:$0xc] %v347_v33  ;;  %v2628_v21 = vld [vmem:[%s3537_s1 + $0x144] ss:$8 sps:$4 sm:$0xff]  }
  0x28   : > { %1947 = vmatpush1.bf16.msra.mxu0 %v2543_v35  ;;  %1819 = vmatprep.subr.bf16.mxu1 %v2544_v36  ;;  %v225_v35 = vshll.u32 %v2196_v25, 16  ;;  %v2574_v36 = vld [vmem:[%s3537_s1 + $0xe4] ss:$8 sps:$4 sm:$0xff]   ;;  %v2623_v22 = vld [vmem:[%s3537_s1 + $0x430] ss:$8 sps:$4 sm:$0xff]  }
  0x29   : > { %1948 = vmatprep.subr.bf16.mxu0 %v2546_v37  ;;  %v2576_v37 = vld [vmem:[%s3537_s1 + $0x3e4] ss:$8 sps:$4 sm:$0xff]   ;;  %v2626_v23 = vld [vmem:[%s3537_s1 + $0x140] ss:$8 sps:$4 sm:$0xff]   ;;  %v2634_v25 = vld [vmem:[%s3537_s1 + $0x154] ss:$8 sps:$4 sm:$0xff]  }
  0x2a   : > { %v2631_v24 = vld [vmem:[%s3537_s1 + $0x444] ss:$8 sps:$4 sm:$0xff]   ;;  %v2646_v33 = vld [vmem:[%s3537_s1 + $0x174] ss:$8 sps:$4 sm:$0xff]  }
  0x2b   : > { %1820 = vmatpush1.bf16.msra.mxu1 %v2548_v38  ;;  %v459_v38 = vor.u32 %v458_v28, %v455_v27  ;;  %v2632_v27 = vld [vmem:[%s3537_s1 + $0x150] ss:$8 sps:$4 sm:$0xff]   ;;  %v2637_v28 = vld [vmem:[%s3537_s1 + $0x454] ss:$8 sps:$4 sm:$0xff]   ;;  %v2643_v32 = vld [vmem:[%s3537_s1 + $0x464] ss:$8 sps:$4 sm:$0xff]  }
  0x2c   : > { %1949 = vmatpush1.bf16.msra.mxu0 %v2549_v39  ;;  %1821 = vmatprep.subr.bf16.mxu1 %v2550_v40  ;;  %v573_v39 = vor.u32 %v572_v30, %v569_v29  ;;  %v2214_v40 = vcombine.low %v2213_v60, %v2213_v60  ;;  %v2640_v29 = vld [vmem:[%s3537_s1 + $0x164] ss:$8 sps:$4 sm:$0xff]   ;;  %v2635_v30 = vld [vmem:[%s3537_s1 + $0x450] ss:$8 sps:$4 sm:$0xff]  }
  0x2d   : > { %1950 = vmatprep.subr.bf16.mxu0 %v2552_v41  ;;  %v2578_v41 = vld [vmem:[%s3537_s1 + $0xe0] ss:$8 sps:$4 sm:$0xff]   ;;  %463 = vst [vmem:[#allocation2 + $0x38] sm:$0x30] %v459_v38 }
  0x2e   : > { %577 = vst [vmem:[#allocation2 + $0x38] sm:$0xc0] %v573_v39  ;;  %v336_v48 = vshll.u32 %v2214_v40, 16  ;;  %v181_v38 = vld [vmem:[%s3010_s7] sm:$0x77] }
  0x2f   : > { %1822 = vmatpush1.bf16.msra.mxu1 %v2554_v42  ;;  %v227_v42 = vrot.slane %v225_v35, 1  ;;  %v2644_v35 = vld [vmem:[%s3537_s1 + $0x170] ss:$8 sps:$4 sm:$0xff]   ;;  %v2191_v39 = vcombine.high %v181_v38, %v181_v38 }
  0x30   : > { %1951 = vmatpush1.bf16.msra.mxu0 %v2555_v43  ;;  %1823 = vmatprep.subr.bf16.mxu1 %v2556_v44  ;;  %v2232_v43 = vcombine.low %v2231_v6, %v2231_v6  ;;  %v2250_v44 = vcombine.low %v2249_v7, %v2249_v7  ;;  %v338_v56 = vrot.slane %v336_v48, 7  ;;  %v2590_v6 = vld [vmem:[%s3537_s1 + $0x100] ss:$8 sps:$4 sm:$0xff]  }
  0x31   : > { %1952 = vmatprep.subr.bf16.mxu0 %v2558_v45  ;;  %v2579_v45 = vld [vmem:[%s3537_s1 + $0x3e0] ss:$8 sps:$4 sm:$0xff]   ;;  %v228_v50 = vor.u32 %v227_v42, %v223_v34  ;;  %v2243_v42 = vld [vmem:[%s3010_s7 + $0x30] sm:$0x77] }
  0x32   : > { %v445_v51 = vshrl.u32 %v2232_v43, 16  ;;  %v448_v52 = vshll.u32 %v2232_v43, 16  ;;  %v559_v53 = vshrl.u32 %v2250_v44, 16  ;;  %v562_v57 = vshll.u32 %v2250_v44, 16  ;;  %v617_v7 = vld [vmem:[#allocation2] sm:$0xff] }
  0x33   : > { %1824 = vmatpush1.bf16.msra.mxu1 %v2560_v46  ;;  %v618_v46 = vld [vmem:[#allocation2 + $0x8] sm:$0xff]  ;;  %238 = vst [vmem:[#allocation2 + $0x30] sm:$0x3] %v228_v50  ;;  %v3174_v43 = vcombine.low %v181_v38, %v181_v38  ;;  %v2647_v44 = vld [vmem:[%s3537_s1 + $0x470] ss:$8 sps:$4 sm:$0xff]   ;;  %v2245_v48 = vcombine.high %v2243_v42, %v2243_v42 }
  0x34   : > { %1953 = vmatpush1.bf16.msra.mxu0 %v2561_v47  ;;  %1825 = vmatprep.subr.bf16.mxu1 %v2562_v54  ;;  %v333_v47 = vshrl.u32 %v2214_v40, 16  ;;  %v2582_v54 = vld [vmem:[%s3537_s1 + $0x3f4] ss:$8 sps:$4 sm:$0xff]   ;;  %v450_v59 = vrot.slane %v448_v52, 5  ;;  %v561_v60 = vrot.slane %v559_v53, 2  ;;  %v195_v52 = vshrl.u32 %v2191_v39, 16 }
  0x35   : > { %1954 = vmatprep.subr.bf16.mxu0 %v2564_v58  ;;  %1833 = vmatprep.mubr.bf16.mxu1 %v618_v46  ;;  %v447_v58 = vrot.slane %v445_v51, 4  ;;  %v624_v5 = vld [vmem:[#allocation2 + $0x38] sm:$0xff]  ;;  %v2641_v34 = vld [vmem:[%s3537_s1 + $0x460] ss:$8 sps:$4 sm:$0xff]   ;;  %v2207_v40 = vld [vmem:[%s3010_s7 + $0x10] sm:$0x77] }
  0x36   : > { %v335_v55 = vrot.slane %v333_v47, 6  ;;  %1962 = vmatprep.mubr.bf16.mxu0 %v624_v5  ;;  %v2209_v46 = vcombine.high %v2207_v40, %v2207_v40  ;;  %v2655_v50 = vld [vmem:[%s3537_s1 + $0x484] ss:$8 sps:$4 sm:$0xff]   ;;  %v2658_v51 = vld [vmem:[%s3537_s1 + $0x194] ss:$8 sps:$4 sm:$0xff]   ;;  %v197_v53 = vshll.u32 %v2191_v39, 16 }
  0x37   : > { %1826 = vmatpush1.bf16.msra.mxu1 %v2566_v0  ;;  %v564_v0 = vrot.slane %v562_v57, 3  ;;  %v451_v2 = vor.u32 %v450_v59, %v447_v58  ;;  %v2667_v38 = vld [vmem:[%s3537_s1 + $0x4a4] ss:$8 sps:$4 sm:$0xff]   ;;  %v2670_v39 = vld [vmem:[%s3537_s1 + $0x1b4] ss:$8 sps:$4 sm:$0xff]  }
  0x38   : > { %1955 = vmatpush1.bf16.msra.mxu0 %v2567_v1  ;;  %1827 = vmatprep.subr.bf16.mxu1 %v2568_v8  ;;  %v339_v63 = vor.u32 %v338_v56, %v335_v55  ;;  %v2592_v1 = vld [vmem:[%s3537_s1 + $0x104] ss:$8 sps:$4 sm:$0xff]   ;;  %v2610_v8 = vld [vmem:[%s3537_s1 + $0x114] ss:$8 sps:$4 sm:$0xff]   ;;  %v3195_v56 = vcombine.low %v2243_v42, %v2243_v42  ;;  %v302_v57 = vshrl.u32 %v2209_v46, 16  ;;  %v305_v58 = vshll.u32 %v2209_v46, 16 }
  0x39   : > { %1956 = vmatprep.subr.bf16.mxu0 %v2570_v13  ;;  %v565_v4 = vor.u32 %v564_v0, %v561_v60  ;;  %462 = vst [vmem:[#allocation2 + $0x30] sm:$0x30] %v451_v2  ;;  %v531_v0 = vshll.u32 %v2245_v48, 16  ;;  %v3203_v2 = vld [vmem:[%s3010_s7 + $0x30] sm:$0x33] }
  0x3a   : > { %350 = vst [vmem:[#allocation2 + $0x30] sm:$0xc] %v339_v63  ;;  %v528_v63 = vshrl.u32 %v2245_v48, 16 }
  0x3b   : > { %1828 = vmatpush1.bf16.msra.mxu1 %v2572_v26  ;;  %576 = vst [vmem:[#allocation2 + $0x30] sm:$0xc0] %v565_v4  ;;  %v2629_v26 = vld [vmem:[%s3537_s1 + $0x440] ss:$8 sps:$4 sm:$0xff]   ;;  %v307_v4 = vrot.slane %v305_v58, 7 }
  0x3c   : > { %1957 = vmatpush1.bf16.msra.mxu0 %v2573_v31  ;;  %1829 = vmatprep.subr.bf16.mxu1 %v2574_v36  ;;  %v2638_v31 = vld [vmem:[%s3537_s1 + $0x160] ss:$8 sps:$4 sm:$0xff]   ;;  %v2649_v36 = vld [vmem:[%s3537_s1 + $0x474] ss:$8 sps:$4 sm:$0xff]  }
  0x3d   : > { %1958 = vmatprep.subr.bf16.mxu0 %v2576_v37  ;;  %v2652_v37 = vld [vmem:[%s3537_s1 + $0x184] ss:$8 sps:$4 sm:$0xff]   ;;  %v2674_v58 = vld [vmem:[%s3537_s1 + $0x1c0] ss:$8 sps:$4 sm:$0xff]  }
  0x3f   : > { %1830 = vmatpush1.bf16.msra.mxu1 %v2578_v41  ;;  %v2225_v41 = vld [vmem:[%s3010_s7 + $0x20] sm:$0x77] }
  0x40   : > { %1959 = vmatpush1.bf16.msra.mxu0 %v2579_v45  ;;  %1831 = vmatprep.subr.bf16.mxu1 %v2580_v49  ;;  %v2650_v45 = vld [vmem:[%s3537_s1 + $0x180] ss:$8 sps:$4 sm:$0xff]   ;;  %v2227_v47 = vcombine.high %v2225_v41, %v2225_v41  ;;  %v3182_v49 = vcombine.low %v2207_v40, %v2207_v40  ;;  %v3193_v55 = vcombine.low %v2225_v41, %v2225_v41 }
  0x41   : > { %1960 = vmatprep.subr.bf16.mxu0 %v2582_v54  ;;  %v3191_v54 = vld [vmem:[%s3010_s7 + $0x10] sm:$0x33] }
  0x42   : > { %v623_v13 = vld [vmem:[#allocation2 + $0x30] sm:$0xff]  ;;  %v416_v59 = vshrl.u32 %v2227_v47, 16  ;;  %v419_v60 = vshll.u32 %v2227_v47, 16  ;;  %v2235_v47 = vcombine.low %v3203_v2, %v3203_v2 }
  0x43   : > { %1832 = vmatpush1.bf16.msra.mxu1 %v2584_v61  ;;  %v3198_v61 = vld [vmem:[%s3010_s7 + $0x20] sm:$0x33] }
  0x44   : > { %1961 = vmatpush1.bf16.msra.mxu0 %v2585_v62  ;;  %1844 = vmatprep.subr.bf16.mxu1 %v2592_v1  ;;  %v199_v62 = vrot.slane %v197_v53, 1  ;;  %v2200_v1 = vcombine.high %v3191_v54, %v3191_v54  ;;  %v418_v5 = vrot.slane %v416_v59, 4  ;;  %v2217_v46 = vcombine.low %v3198_v61, %v3198_v61  ;;  %473 = vst [vmem:[#allocation2 + $0x40] sm:$0x30] %v2235_v47  ;;  %v2673_v53 = vld [vmem:[%s3537_s1 + $0x4b4] ss:$8 sps:$4 sm:$0xff]  }
  0x45   : > { %1973 = vmatprep.subr.bf16.mxu0 %v2599_v3  ;;  %v304_v3 = vrot.slane %v302_v57, 6  ;;  %v2671_v57 = vld [vmem:[%s3537_s1 + $0x4b0] ss:$8 sps:$4 sm:$0xff]   ;;  %v2679_v59 = vld [vmem:[%s3537_s1 + $0x4c4] ss:$8 sps:$4 sm:$0xff]  }
  0x46   : > { %1834 = vmatmul.mubr.bf16.vlgmr.msra.gmra.mrb[0].mxu1 %v617_v7  ;;  %v3206_v7 = vld [vmem:[%s3010_s7 + $0x40] sm:$0x33]  ;;  %250 = vst [vmem:[#allocation2 + $0x48] sm:$0x3] %v2200_v1 }
  0x47   : > { %1845 = vmatpush1.bf16.msra.mxu1 %v2590_v6  ;;  %1963 = vmatmul.mubr.bf16.vlgmr.msra.gmra.mrb[0].mxu0 %v623_v13  ;;  %v421_v6 = vrot.slane %v419_v60, 5  ;;  %v2656_v13 = vld [vmem:[%s3537_s1 + $0x190] ss:$8 sps:$4 sm:$0xff]   ;;  %v2688_v1 = vld [vmem:[%s3537_s1 + $0x1e4] ss:$8 sps:$4 sm:$0xff]  }
  0x48   : > { %1846 = vmatprep.subr.bf16.mxu1 %v2610_v8  ;;  %1974 = vmatpush1.bf16.msra.mxu0 %v2597_v9  ;;  %v2653_v8 = vld [vmem:[%s3537_s1 + $0x480] ss:$8 sps:$4 sm:$0xff]   ;;  %v200_v9 = vor.u32 %v199_v62, %v195_v52  ;;  %v359_v52 = vrot.slane %v2217_v46, 6 }
  0x49   : > { %1975 = vmatprep.subr.bf16.mxu0 %v2613_v11  ;;  %v533_v11 = vrot.slane %v531_v0, 3  ;;  %v2677_v62 = vld [vmem:[%s3537_s1 + $0x4c0] ss:$8 sps:$4 sm:$0xff]   ;;  %v2685_v0 = vld [vmem:[%s3537_s1 + $0x4d4] ss:$8 sps:$4 sm:$0xff]  }
  0x4a   : > { %204 = vst [vmem:[#allocation2 + $0x18] sm:$0x3] %v200_v9  ;;  %363 = vst [vmem:[#allocation2 + $0x40] sm:$0xc] %v359_v52  ;;  %v2704_v9 = vld [vmem:[%s3537_s1 + $0x204] ss:$8 sps:$4 sm:$0xff]  }
  0x4b   : > { %1847 = vmatpush1.bf16.msra.mxu1 %v2608_v10  ;;  %v530_v10 = vrot.slane %v528_v63, 2  ;;  %v2680_v63 = vld [vmem:[%s3537_s1 + $0x1d0] ss:$8 sps:$4 sm:$0xff]   ;;  %v2741_v46 = vld [vmem:[%s3537_s1 + $0x540] ss:$8 sps:$4 sm:$0xff]  }
  0x4c   : > { %1848 = vmatprep.subr.bf16.mxu1 %v2616_v12  ;;  %1976 = vmatpush1.bf16.msra.mxu0 %v2611_v14  ;;  %v2218_v12 = vcombine.high %v3198_v61, %v3198_v61  ;;  %v2661_v14 = vld [vmem:[%s3537_s1 + $0x494] ss:$8 sps:$4 sm:$0xff]  }
  0x4d   : > { %1977 = vmatprep.subr.bf16.mxu0 %v2619_v16  ;;  %v422_v16 = vor.u32 %v421_v6, %v418_v5  ;;  %v2682_v61 = vld [vmem:[%s3537_s1 + $0x1d4] ss:$8 sps:$4 sm:$0xff]   ;;  %v2689_v6 = vld [vmem:[%s3537_s1 + $0x4e0] ss:$8 sps:$4 sm:$0xff]  }
  0x4e   : > { %v2694_v5 = vld [vmem:[%s3537_s1 + $0x1f4] ss:$8 sps:$4 sm:$0xff]  }
  0x4f   : > { %1849 = vmatpush1.bf16.msra.mxu1 %v2614_v15  ;;  %v308_v15 = vor.u32 %v307_v4, %v304_v3  ;;  %426 = vst [vmem:[#allocation2 + $0x18] sm:$0x30] %v422_v16  ;;  %v2686_v3 = vld [vmem:[%s3537_s1 + $0x1e0] ss:$8 sps:$4 sm:$0xff]   ;;  %v2691_v4 = vld [vmem:[%s3537_s1 + $0x4e4] ss:$8 sps:$4 sm:$0xff]  }
  0x50   : > { %1850 = vmatprep.subr.bf16.mxu1 %v2622_v17  ;;  %1978 = vmatpush1.bf16.msra.mxu0 %v2617_v18  ;;  %v2236_v17 = vcombine.high %v3203_v2, %v3203_v2  ;;  %v188_v18 = vshrl.u32 %v3174_v43, 16  ;;  %v2683_v2 = vld [vmem:[%s3537_s1 + $0x4d0] ss:$8 sps:$4 sm:$0xff]  }
  0x51   : > { %1979 = vmatprep.subr.bf16.mxu0 %v2625_v20  ;;  %v534_v20 = vor.u32 %v533_v11, %v530_v10  ;;  %312 = vst [vmem:[#allocation2 + $0x18] sm:$0xc] %v308_v15  ;;  %v2695_v10 = vld [vmem:[%s3537_s1 + $0x4f0] ss:$8 sps:$4 sm:$0xff]   ;;  %v2702_v11 = vld [vmem:[%s3537_s1 + $0x200] ss:$8 sps:$4 sm:$0xff]  }
  0x52   : > { %474 = vst [vmem:[#allocation2 + $0x48] sm:$0x30] %v2236_v17  ;;  %v2709_v15 = vld [vmem:[%s3537_s1 + $0x500] ss:$8 sps:$4 sm:$0xff]   ;;  %v2720_v17 = vld [vmem:[%s3537_s1 + $0x210] ss:$8 sps:$4 sm:$0xff]  }
  0x53   : > { %1851 = vmatpush1.bf16.msra.mxu1 %v2620_v19  ;;  %v2664_v19 = vld [vmem:[%s3537_s1 + $0x1a4] ss:$8 sps:$4 sm:$0xff]   ;;  %538 = vst [vmem:[#allocation2 + $0x18] sm:$0xc0] %v534_v20  ;;  %v2723_v20 = vld [vmem:[%s3537_s1 + $0x510] ss:$8 sps:$4 sm:$0xff]  }
  0x54   : > { %1852 = vmatprep.subr.bf16.mxu1 %v2628_v21  ;;  %1980 = vmatpush1.bf16.msra.mxu0 %v2623_v22  ;;  %v360_v21 = vrot.slane %v2218_v12, 6  ;;  %v2254_v22 = vcombine.high %v3206_v7, %v3206_v7 }
  0x55   : > { %1981 = vmatprep.subr.bf16.mxu0 %v2631_v24  ;;  %v2659_v24 = vld [vmem:[%s3537_s1 + $0x490] ss:$8 sps:$4 sm:$0xff]  }
  0x56   : > { %364 = vst [vmem:[#allocation2 + $0x48] sm:$0xc] %v360_v21  ;;  %v2726_v21 = vld [vmem:[%s3537_s1 + $0x220] ss:$8 sps:$4 sm:$0xff]  }
  0x57   : > { %1853 = vmatpush1.bf16.msra.mxu1 %v2626_v23  ;;  %v190_v23 = vshll.u32 %v3174_v43, 16  ;;  %v2199_v43 = vcombine.low %v3191_v54, %v3191_v54  ;;  %v2676_v54 = vld [vmem:[%s3537_s1 + $0x1c4] ss:$8 sps:$4 sm:$0xff]  }
  0x58   : > { %1854 = vmatprep.subr.bf16.mxu1 %v2634_v25  ;;  %1982 = vmatpush1.bf16.msra.mxu0 %v2629_v26  ;;  %v294_v25 = vshrl.u32 %v3182_v49, 16  ;;  %v297_v26 = vshll.u32 %v3182_v49, 16  ;;  %v2253_v49 = vcombine.low %v3206_v7, %v3206_v7  ;;  %v2692_v7 = vld [vmem:[%s3537_s1 + $0x1f0] ss:$8 sps:$4 sm:$0xff]  }
  0x59   : > { %1983 = vmatprep.subr.bf16.mxu0 %v2637_v28  ;;  %v411_v28 = vshll.u32 %v3193_v55, 16  ;;  %249 = vst [vmem:[#allocation2 + $0x40] sm:$0x3] %v2199_v43  ;;  %v2219_v43 = vld [vmem:[%s3010_s7 + $0x20] sm:$0x77] }
  0x5b   : > { %1855 = vmatpush1.bf16.msra.mxu1 %v2632_v27  ;;  %v408_v27 = vshrl.u32 %v3193_v55, 16  ;;  %v585_v55 = vrot.slane %v2253_v49, 2 }
  0x5c   : > { %1856 = vmatprep.subr.bf16.mxu1 %v2640_v29  ;;  %1984 = vmatpush1.bf16.msra.mxu0 %v2635_v30  ;;  %v2662_v29 = vld [vmem:[%s3537_s1 + $0x1a0] ss:$8 sps:$4 sm:$0xff]   ;;  %v586_v30 = vrot.slane %v2254_v22, 2  ;;  %v2731_v22 = vld [vmem:[%s3537_s1 + $0x524] ss:$8 sps:$4 sm:$0xff]  }
  0x5d   : > { %1985 = vmatprep.subr.bf16.mxu0 %v2643_v32  ;;  %v520_v32 = vshrl.u32 %v3195_v56, 16  ;;  %589 = vst [vmem:[#allocation2 + $0x40] sm:$0xc0] %v585_v55 }
  0x5e   : > { %590 = vst [vmem:[#allocation2 + $0x48] sm:$0xc0] %v586_v30  ;;  %v2743_v30 = vld [vmem:[%s3537_s1 + $0x544] ss:$8 sps:$4 sm:$0xff]  }
  0x5f   : > { %1857 = vmatpush1.bf16.msra.mxu1 %v2638_v31  ;;  %v192_v31 = vrot.slane %v190_v23, 1  ;;  %v522_v41 = vrot.slane %v520_v32, 2  ;;  %v2734_v23 = vld [vmem:[%s3537_s1 + $0x234] ss:$8 sps:$4 sm:$0xff]   ;;  %v2192_v32 = vld [vmem:[%s3010_s7 + $0x8] sm:$0x33] }
  0x60   : > { %1858 = vmatprep.subr.bf16.mxu1 %v2646_v33  ;;  %1986 = vmatpush1.bf16.msra.mxu0 %v2641_v34  ;;  %v523_v33 = vshll.u32 %v3195_v56, 16  ;;  %v296_v34 = vrot.slane %v294_v25, 6  ;;  %v620_v56 = vld [vmem:[#allocation2 + $0x18] sm:$0xff] }
  0x61   : > { %1987 = vmatprep.subr.bf16.mxu0 %v2649_v36  ;;  %v410_v36 = vrot.slane %v408_v27, 4  ;;  %v193_v40 = vor.u32 %v192_v31, %v188_v18  ;;  %1876 = vmatprep.mubr.bf16.mxu1 %v620_v56  ;;  %v2725_v18 = vld [vmem:[%s3537_s1 + $0x514] ss:$8 sps:$4 sm:$0xff]   ;;  %v2732_v25 = vld [vmem:[%s3537_s1 + $0x230] ss:$8 sps:$4 sm:$0xff]  }
  0x62   : > { %v525_v42 = vrot.slane %v523_v33, 3  ;;  %v2740_v27 = vld [vmem:[%s3537_s1 + $0x244] ss:$8 sps:$4 sm:$0xff]   ;;  %v2746_v31 = vld [vmem:[%s3537_s1 + $0x254] ss:$8 sps:$4 sm:$0xff]  }
  0x63   : > { %1859 = vmatpush1.bf16.msra.mxu1 %v2644_v35  ;;  %v299_v35 = vrot.slane %v297_v26, 7  ;;  %203 = vst [vmem:[#allocation2 + $0x10] sm:$0x3] %v193_v40  ;;  %v2737_v26 = vld [vmem:[%s3537_s1 + $0x534] ss:$8 sps:$4 sm:$0xff]  }
  0x64   : > { %1860 = vmatprep.subr.bf16.mxu1 %v2652_v37  ;;  %1988 = vmatpush1.bf16.msra.mxu0 %v2647_v44  ;;  %v413_v37 = vrot.slane %v411_v28, 5  ;;  %v526_v48 = vor.u32 %v525_v42, %v522_v41  ;;  %v625_v16 = vld [vmem:[#allocation2 + $0x40] sm:$0xff]  ;;  %v2735_v28 = vld [vmem:[%s3537_s1 + $0x530] ss:$8 sps:$4 sm:$0xff]   ;;  %v2749_v56 = vld [vmem:[%s3537_s1 + $0x554] ss:$8 sps:$4 sm:$0xff]  }
  0x65   : > { %1989 = vmatprep.subr.bf16.mxu0 %v2655_v50  ;;  %v300_v44 = vor.u32 %v299_v35, %v296_v34  ;;  %v2665_v50 = vld [vmem:[%s3537_s1 + $0x4a0] ss:$8 sps:$4 sm:$0xff]   ;;  %v2210_v33 = vld [vmem:[%s3010_s7 + $0x18] sm:$0x33]  ;;  %v2194_v34 = vcombine.high %v2192_v32, %v2192_v32 }
  0x66   : > { %537 = vst [vmem:[#allocation2 + $0x10] sm:$0xc0] %v526_v48  ;;  %v626_v60 = vld [vmem:[#allocation2 + $0x48] sm:$0xff]  ;;  %v2212_v35 = vcombine.high %v2210_v33, %v2210_v33  ;;  %v2221_v48 = vcombine.high %v2219_v43, %v2219_v43  ;;  %v2211_v55 = vcombine.low %v2210_v33, %v2210_v33 }
  0x67   : > { %1861 = vmatpush1.bf16.msra.mxu1 %v2650_v45  ;;  %v414_v45 = vor.u32 %v413_v37, %v410_v36  ;;  %311 = vst [vmem:[#allocation2 + $0x10] sm:$0xc] %v300_v44  ;;  %2005 = vmatprep.mubr.bf16.mxu0 %v626_v60  ;;  %v3377_v36 = vld [vmem:[%s3010_s7 + $0x28] sm:$0x33]  ;;  %v3380_v37 = vld [vmem:[%s3010_s7 + $0x38] sm:$0x33] }
  0x68   : > { %1862 = vmatprep.subr.bf16.mxu1 %v2658_v51  ;;  %1990 = vmatpush1.bf16.msra.mxu0 %v2653_v8  ;;  %v2668_v51 = vld [vmem:[%s3537_s1 + $0x1b0] ss:$8 sps:$4 sm:$0xff]   ;;  %v2697_v8 = vld [vmem:[%s3537_s1 + $0x4f4] ss:$8 sps:$4 sm:$0xff]   ;;  %v2230_v40 = vcombine.high %v3377_v36, %v3377_v36  ;;  %v2248_v41 = vcombine.high %v3380_v37, %v3380_v37  ;;  %215 = vst [vmem:[#allocation2 + $0x28] sm:$0x3] %v2194_v34 }
  0x69   : > { %1991 = vmatprep.subr.bf16.mxu0 %v2661_v14  ;;  %425 = vst [vmem:[#allocation2 + $0x10] sm:$0x30] %v414_v45  ;;  %v2722_v14 = vld [vmem:[%s3537_s1 + $0x214] ss:$8 sps:$4 sm:$0xff]   ;;  %v2255_v45 = vld [vmem:[%s3010_s7 + $0x40] sm:$0x77] }
  0x6a   : > { %v2237_v44 = vld [vmem:[%s3010_s7 + $0x30] sm:$0x77]  ;;  %v321_v47 = vrot.slane %v2212_v35, 6  ;;  %437 = vst [vmem:[#allocation2 + $0x28] sm:$0x30] %v2230_v40  ;;  %v547_v52 = vrot.slane %v2248_v41, 2 }
  0x6b   : > { %1863 = vmatpush1.bf16.msra.mxu1 %v2656_v13  ;;  %v2711_v13 = vld [vmem:[%s3537_s1 + $0x504] ss:$8 sps:$4 sm:$0xff]   ;;  %v2239_v49 = vcombine.high %v2237_v44, %v2237_v44 }
  0x6c   : > { %1864 = vmatprep.subr.bf16.mxu1 %v2664_v19  ;;  %1992 = vmatpush1.bf16.msra.mxu0 %v2659_v24  ;;  %v2728_v19 = vld [vmem:[%s3537_s1 + $0x224] ss:$8 sps:$4 sm:$0xff]   ;;  %v2729_v24 = vld [vmem:[%s3537_s1 + $0x520] ss:$8 sps:$4 sm:$0xff]   ;;  %325 = vst [vmem:[#allocation2 + $0x28] sm:$0xc] %v321_v47 }
  0x6d   : > { %1993 = vmatprep.subr.bf16.mxu0 %v2667_v38  ;;  %v2201_v38 = vld [vmem:[%s3010_s7 + $0x10] sm:$0x77]  ;;  %v493_v60 = vshll.u32 %v2239_v49, 16  ;;  %551 = vst [vmem:[#allocation2 + $0x28] sm:$0xc0] %v547_v52 }
  0x6e   : > { %v2203_v42 = vcombine.high %v2201_v38, %v2201_v38  ;;  %v2764_v35 = vld [vmem:[%s3537_s1 + $0x284] ss:$8 sps:$4 sm:$0xff]   ;;  %v2765_v52 = vld [vmem:[%s3537_s1 + $0x580] ss:$8 sps:$4 sm:$0xff]  }
  0x6f   : > { %1865 = vmatpush1.bf16.msra.mxu1 %v2662_v29  ;;  %v2738_v29 = vld [vmem:[%s3537_s1 + $0x240] ss:$8 sps:$4 sm:$0xff]  }
  0x70   : > { %1866 = vmatprep.subr.bf16.mxu1 %v2670_v39  ;;  %1994 = vmatpush1.bf16.msra.mxu0 %v2665_v50  ;;  %v619_v12 = vld [vmem:[#allocation2 + $0x10] sm:$0xff]  ;;  %v2193_v39 = vcombine.low %v2192_v32, %v2192_v32  ;;  %v2257_v50 = vcombine.high %v2255_v45, %v2255_v45 }
  0x71   : > { %1995 = vmatprep.subr.bf16.mxu0 %v2673_v53  ;;  %v265_v53 = vshrl.u32 %v2203_v42, 16 }
  0x72   : > { %214 = vst [vmem:[#allocation2 + $0x20] sm:$0x3] %v2193_v39 }
  0x73   : > { %1867 = vmatpush1.bf16.msra.mxu1 %v2668_v51  ;;  %v2744_v51 = vld [vmem:[%s3537_s1 + $0x250] ss:$8 sps:$4 sm:$0xff]  }
  0x74   : > { %1868 = vmatprep.subr.bf16.mxu1 %v2676_v54  ;;  %1996 = vmatpush1.bf16.msra.mxu0 %v2671_v57  ;;  %v267_v54 = vshll.u32 %v2203_v42, 16  ;;  %v380_v57 = vshrl.u32 %v2221_v48, 16 }
  0x75   : > { %1997 = vmatprep.subr.bf16.mxu0 %v2679_v59  ;;  %v490_v59 = vshrl.u32 %v2239_v49, 16  ;;  %v2767_v49 = vld [vmem:[%s3537_s1 + $0x584] ss:$8 sps:$4 sm:$0xff]  }
  0x77   : > { %1869 = vmatpush1.bf16.msra.mxu1 %v2674_v58  ;;  %v383_v58 = vshll.u32 %v2221_v48, 16 }
  0x78   : > { %1870 = vmatprep.subr.bf16.mxu1 %v2682_v61  ;;  %1998 = vmatpush1.bf16.msra.mxu0 %v2677_v62  ;;  %v2752_v61 = vld [vmem:[%s3537_s1 + $0x264] ss:$8 sps:$4 sm:$0xff]   ;;  %v269_v62 = vrot.slane %v267_v54, 1  ;;  %v2773_v54 = vld [vmem:[%s3537_s1 + $0x594] ss:$8 sps:$4 sm:$0xff]  }
  0x79   : > { %1999 = vmatprep.subr.bf16.mxu0 %v2685_v0  ;;  %v609_v0 = vshll.u32 %v2257_v50, 16 }
  0x7b   : > { %1871 = vmatpush1.bf16.msra.mxu1 %v2680_v63  ;;  %v606_v63 = vshrl.u32 %v2257_v50, 16  ;;  %v2770_v50 = vld [vmem:[%s3537_s1 + $0x294] ss:$8 sps:$4 sm:$0xff]  }
  0x7c   : > { %1872 = vmatprep.subr.bf16.mxu1 %v2688_v1  ;;  %2000 = vmatpush1.bf16.msra.mxu0 %v2683_v2  ;;  %v320_v1 = vrot.slane %v2211_v55, 6  ;;  %v382_v2 = vrot.slane %v380_v57, 6  ;;  %v2776_v55 = vld [vmem:[%s3537_s1 + $0x2a4] ss:$8 sps:$4 sm:$0xff]   ;;  %v2774_v57 = vld [vmem:[%s3537_s1 + $0x2a0] ss:$8 sps:$4 sm:$0xff]  }
  0x7d   : > { %2001 = vmatprep.subr.bf16.mxu0 %v2691_v4  ;;  %v492_v4 = vrot.slane %v490_v59, 4  ;;  %v2782_v59 = vld [vmem:[%s3537_s1 + $0x2b4] ss:$8 sps:$4 sm:$0xff]  }
  0x7e   : > { %324 = vst [vmem:[#allocation2 + $0x20] sm:$0xc] %v320_v1  ;;  %v2786_v1 = vld [vmem:[%s3537_s1 + $0x2c0] ss:$8 sps:$4 sm:$0xff]  }
  0x7f   : > { %1873 = vmatpush1.bf16.msra.mxu1 %v2686_v3  ;;  %v385_v3 = vrot.slane %v383_v58, 7  ;;  %v2779_v58 = vld [vmem:[%s3537_s1 + $0x5a4] ss:$8 sps:$4 sm:$0xff]  }
  0x80   : > { %1874 = vmatprep.subr.bf16.mxu1 %v2694_v5  ;;  %2002 = vmatpush1.bf16.msra.mxu0 %v2689_v6  ;;  %v495_v5 = vrot.slane %v493_v60, 5  ;;  %v270_v6 = vor.u32 %v269_v62, %v265_v53  ;;  %v2768_v53 = vld [vmem:[%s3537_s1 + $0x290] ss:$8 sps:$4 sm:$0xff]   ;;  %v2777_v60 = vld [vmem:[%s3537_s1 + $0x5a0] ss:$8 sps:$4 sm:$0xff]  }
  0x81   : > { %2003 = vmatprep.subr.bf16.mxu0 %v2697_v8  ;;  %v611_v8 = vrot.slane %v609_v0, 3  ;;  %v2785_v62 = vld [vmem:[%s3537_s1 + $0x5b4] ss:$8 sps:$4 sm:$0xff]   ;;  %v2783_v0 = vld [vmem:[%s3537_s1 + $0x5b0] ss:$8 sps:$4 sm:$0xff]  }
  0x82   : > { %274 = vst [vmem:[#allocation2 + $0x58] sm:$0x3] %v270_v6  ;;  %v2797_v6 = vld [vmem:[%s3537_s1 + $0x5d4] ss:$8 sps:$4 sm:$0xff]  }
  0x83   : > { %1875 = vmatpush1.bf16.msra.mxu1 %v2692_v7  ;;  %v608_v7 = vrot.slane %v606_v63, 2  ;;  %v2788_v63 = vld [vmem:[%s3537_s1 + $0x2c4] ss:$8 sps:$4 sm:$0xff]  }
  0x84   : > { %1887 = vmatprep.subr.bf16.mxu1 %v2704_v9  ;;  %2004 = vmatpush1.bf16.msra.mxu0 %v2695_v10  ;;  %v2229_v9 = vcombine.low %v3377_v36, %v3377_v36  ;;  %v2747_v10 = vld [vmem:[%s3537_s1 + $0x550] ss:$8 sps:$4 sm:$0xff]  }
  0x85   : > { %2016 = vmatprep.subr.bf16.mxu0 %v2711_v13  ;;  %v496_v13 = vor.u32 %v495_v5, %v492_v4  ;;  %v2789_v4 = vld [vmem:[%s3537_s1 + $0x5c0] ss:$8 sps:$4 sm:$0xff]   ;;  %v2792_v5 = vld [vmem:[%s3537_s1 + $0x2d0] ss:$8 sps:$4 sm:$0xff]  }
  0x86   : > { %1877 = vmatmul.mubr.bf16.vlgmr.msra.gmra.mrb[0].mxu1 %v619_v12  ;;  %v386_v12 = vor.u32 %v385_v3, %v382_v2  ;;  %436 = vst [vmem:[#allocation2 + $0x20] sm:$0x30] %v2229_v9  ;;  %v2791_v2 = vld [vmem:[%s3537_s1 + $0x5c4] ss:$8 sps:$4 sm:$0xff]   ;;  %v2794_v3 = vld [vmem:[%s3537_s1 + $0x2d4] ss:$8 sps:$4 sm:$0xff]  }
  0x87   : > { %1888 = vmatpush1.bf16.msra.mxu1 %v2702_v11  ;;  %2006 = vmatmul.mubr.bf16.vlgmr.msra.gmra.mrb[0].mxu0 %v625_v16  ;;  %v2750_v11 = vld [vmem:[%s3537_s1 + $0x260] ss:$8 sps:$4 sm:$0xff]   ;;  %v2758_v16 = vld [vmem:[%s3537_s1 + $0x274] ss:$8 sps:$4 sm:$0xff]   ;;  %500 = vst [vmem:[#allocation2 + $0x58] sm:$0x30] %v496_v13 }
  0x88   : > { %1889 = vmatprep.subr.bf16.mxu1 %v2722_v14  ;;  %2017 = vmatpush1.bf16.msra.mxu0 %v2709_v15  ;;  %v2247_v14 = vcombine.low %v3380_v37, %v3380_v37  ;;  %v2755_v15 = vld [vmem:[%s3537_s1 + $0x564] ss:$8 sps:$4 sm:$0xff]   ;;  %390 = vst [vmem:[#allocation2 + $0x58] sm:$0xc] %v386_v12  ;;  %v2798_v9 = vld [vmem:[%s3537_s1 + $0x2e0] ss:$8 sps:$4 sm:$0xff]  }
  0x89   : > { %2018 = vmatprep.subr.bf16.mxu0 %v2725_v18  ;;  %v2202_v18 = vcombine.low %v2201_v38, %v2201_v38  ;;  %v2801_v12 = vld [vmem:[%s3537_s1 + $0x5e0] ss:$8 sps:$4 sm:$0xff]   ;;  %v2804_v13 = vld [vmem:[%s3537_s1 + $0x2f0] ss:$8 sps:$4 sm:$0xff]  }
  0x8b   : > { %1890 = vmatpush1.bf16.msra.mxu1 %v2720_v17  ;;  %v612_v17 = vor.u32 %v611_v8, %v608_v7  ;;  %v2800_v7 = vld [vmem:[%s3537_s1 + $0x2e4] ss:$8 sps:$4 sm:$0xff]   ;;  %v2795_v8 = vld [vmem:[%s3537_s1 + $0x5d0] ss:$8 sps:$4 sm:$0xff]  }
  0x8c   : > { %1891 = vmatprep.subr.bf16.mxu1 %v2728_v19  ;;  %2019 = vmatpush1.bf16.msra.mxu0 %v2723_v20  ;;  %v2220_v19 = vcombine.low %v2219_v43, %v2219_v43  ;;  %v2753_v20 = vld [vmem:[%s3537_s1 + $0x560] ss:$8 sps:$4 sm:$0xff]  }
  0x8d   : > { %2020 = vmatprep.subr.bf16.mxu0 %v2731_v22  ;;  %v546_v22 = vrot.slane %v2247_v14, 2  ;;  %616 = vst [vmem:[#allocation2 + $0x58] sm:$0xc0] %v612_v17  ;;  %v2809_v14 = vld [vmem:[%s3537_s1 + $0x5f4] ss:$8 sps:$4 sm:$0xff]  }
  0x8f   : > { %1892 = vmatpush1.bf16.msra.mxu1 %v2726_v21  ;;  %v2756_v21 = vld [vmem:[%s3537_s1 + $0x270] ss:$8 sps:$4 sm:$0xff]   ;;  %550 = vst [vmem:[#allocation2 + $0x20] sm:$0xc0] %v546_v22 }
  0x90   : > { %1893 = vmatprep.subr.bf16.mxu1 %v2734_v23  ;;  %2021 = vmatpush1.bf16.msra.mxu0 %v2729_v24  ;;  %v2238_v23 = vcombine.low %v2237_v44, %v2237_v44  ;;  %v2256_v24 = vcombine.low %v2255_v45, %v2255_v45  ;;  %v2759_v45 = vld [vmem:[%s3537_s1 + $0x570] ss:$8 sps:$4 sm:$0xff]  }
  0x91   : > { %2022 = vmatprep.subr.bf16.mxu0 %v2737_v26  ;;  %v258_v26 = vshrl.u32 %v2202_v18, 16 }
  0x92   : > { %v485_v32 = vshll.u32 %v2238_v23, 16  ;;  %v598_v33 = vshrl.u32 %v2256_v24, 16  ;;  %v601_v34 = vshll.u32 %v2256_v24, 16 }
  0x93   : > { %1894 = vmatpush1.bf16.msra.mxu1 %v2732_v25  ;;  %v2761_v25 = vld [vmem:[%s3537_s1 + $0x574] ss:$8 sps:$4 sm:$0xff]  }
  0x94   : > { %1895 = vmatprep.subr.bf16.mxu1 %v2740_v27  ;;  %2023 = vmatpush1.bf16.msra.mxu0 %v2735_v28  ;;  %v260_v27 = vshll.u32 %v2202_v18, 16  ;;  %v372_v28 = vshrl.u32 %v2220_v19, 16  ;;  %v487_v40 = vrot.slane %v485_v32, 5  ;;  %v600_v41 = vrot.slane %v598_v33, 2 }
  0x95   : > { %2024 = vmatprep.subr.bf16.mxu0 %v2743_v30  ;;  %v622_v30 = vld [vmem:[#allocation2 + $0x28] sm:$0xff]  ;;  %v603_v42 = vrot.slane %v601_v34, 3  ;;  %v823_v18 = vlaneseq }
  0x96   : > { %v262_v36 = vrot.slane %v260_v27, 1  ;;  %v374_v37 = vrot.slane %v372_v28, 6  ;;  %1919 = vmatprep.mubr.bf16.mxu1 %v622_v30 }
  0x97   : > { %1896 = vmatpush1.bf16.msra.mxu1 %v2738_v29  ;;  %v375_v29 = vshll.u32 %v2220_v19, 16  ;;  %v604_v48 = vor.u32 %v603_v42, %v600_v41  ;;  %v824_v19 = vshrl.u32 %v823_v18, 7 }
  0x98   : > { %1897 = vmatprep.subr.bf16.mxu1 %v2746_v31  ;;  %2025 = vmatpush1.bf16.msra.mxu0 %v2741_v46  ;;  %v482_v31 = vshrl.u32 %v2238_v23, 16  ;;  %v263_v43 = vor.u32 %v262_v36, %v258_v26  ;;  %v2762_v46 = vld [vmem:[%s3537_s1 + $0x280] ss:$8 sps:$4 sm:$0xff]  }
  0x99   : > { %2026 = vmatprep.subr.bf16.mxu0 %v2749_v56  ;;  %v377_v38 = vrot.slane %v375_v29, 7  ;;  %615 = vst [vmem:[#allocation2 + $0x50] sm:$0xc0] %v604_v48  ;;  %v2771_v56 = vld [vmem:[%s3537_s1 + $0x590] ss:$8 sps:$4 sm:$0xff]   ;;  %v829_v22 = vsub.s32 4, %v824_v19 }
  0x9a   : > { %v484_v39 = vrot.slane %v482_v31, 4  ;;  %273 = vst [vmem:[#allocation2 + $0x50] sm:$0x3] %v263_v43  ;;  %v2069_v27 = vsub.s32 1, %v824_v19  ;;  %v2073_v29 = vsub.s32 5, %v824_v19  ;;  %v2091_v31 = vsub.s32 2, %v824_v19 }
  0x9b   : > { %1898 = vmatpush1.bf16.msra.mxu1 %v2744_v51  ;;  %v378_v44 = vor.u32 %v377_v38, %v374_v37  ;;  %v628_v51 = vld [vmem:[#allocation2 + $0x58] sm:$0xff]  ;;  %v2095_v34 = vsub.s32 6, %v824_v19 }
  0x9c   : > { %1899 = vmatprep.subr.bf16.mxu1 %v2752_v61  ;;  %2027 = vmatpush1.bf16.msra.mxu0 %v2747_v10  ;;  %v488_v47 = vor.u32 %v487_v40, %v484_v39  ;;  %v2780_v61 = vld [vmem:[%s3537_s1 + $0x2b0] ss:$8 sps:$4 sm:$0xff]   ;;  %v2803_v10 = vld [vmem:[%s3537_s1 + $0x5e4] ss:$8 sps:$4 sm:$0xff]  }
  0x9d   : > { %2028 = vmatprep.subr.bf16.mxu0 %v2755_v15  ;;  %389 = vst [vmem:[#allocation2 + $0x50] sm:$0xc] %v378_v44  ;;  %2048 = vmatprep.mubr.bf16.mxu0 %v628_v51  ;;  %v2807_v15 = vld [vmem:[%s3537_s1 + $0x5f0] ss:$8 sps:$4 sm:$0xff]  }
  0x9e   : > { %499 = vst [vmem:[#allocation2 + $0x50] sm:$0x30] %v488_v47 }
  0x9f   : > { %1900 = vmatpush1.bf16.msra.mxu1 %v2750_v11  ;;  %v2806_v11 = vld [vmem:[%s3537_s1 + $0x2f4] ss:$8 sps:$4 sm:$0xff]  }
  0xa0   : > { %1901 = vmatprep.subr.bf16.mxu1 %v2758_v16  ;;  %2029 = vmatpush1.bf16.msra.mxu0 %v2753_v20  ;;  %v621_v16 = vld [vmem:[#allocation2 + $0x20] sm:$0xff]  ;;  %v825_v20 = vsub.s32 0, %v824_v19 }
  0xa1   : > { %2030 = vmatprep.subr.bf16.mxu0 %v2761_v25 }
  0xa3   : > { %1902 = vmatpush1.bf16.msra.mxu1 %v2756_v21  ;;  %v821_v21 = vld [vmem:[%s3538_s2] sm:$0x77] }
  0xa4   : > { %1903 = vmatprep.subr.bf16.mxu1 %v2764_v35  ;;  %2031 = vmatpush1.bf16.msra.mxu0 %v2759_v45  ;;  %v826_v23 = vrot.slane %v821_v21, %v825_v20  ;;  %v830_v24 = vrot.slane %v821_v21, %v829_v22  ;;  %v2070_v36 = vrot.slane %v821_v21, %v2069_v27 }
  0xa5   : > { %2032 = vmatprep.subr.bf16.mxu0 %v2767_v49  ;;  %v627_v17 = vld [vmem:[#allocation2 + $0x50] sm:$0xff]  ;;  %v2074_v40 = vrot.slane %v821_v21, %v2073_v29  ;;  %v2092_v43 = vrot.slane %v821_v21, %v2091_v31 }
  0xa6   : > { %v836_v25 = vrot.slane %v826_v23, %v825_v20  ;;  %v840_v26 = vrot.slane %v830_v24, %v825_v20  ;;  %v2080_v49 = vrot.slane %v2070_v36, %v2069_v27 }
  0xa7   : > { %1904 = vmatpush1.bf16.msra.mxu1 %v2762_v46  ;;  %v2096_v46 = vrot.slane %v821_v21, %v2095_v34 }
  0xa8   : > { %1905 = vmatprep.subr.bf16.mxu1 %v2770_v50  ;;  %2033 = vmatpush1.bf16.msra.mxu0 %v2765_v52 }
  0xa9   : > { %2034 = vmatprep.subr.bf16.mxu0 %v2773_v54 }
  0xab   : > { %1906 = vmatpush1.bf16.msra.mxu1 %v2768_v53  ;;  %v2084_v53 = vrot.slane %v2074_v40, %v2069_v27 }
  0xac   : > { %1907 = vmatprep.subr.bf16.mxu1 %v2776_v55  ;;  %2035 = vmatpush1.bf16.msra.mxu0 %v2771_v56  ;;  %v2102_v56 = vrot.slane %v2092_v43, %v2091_v31 }
  0xad   : > { %2036 = vmatprep.subr.bf16.mxu0 %v2779_v58 }
  0xaf   : > { %1908 = vmatpush1.bf16.msra.mxu1 %v2774_v57 }
  0xb0   : > { %1909 = vmatprep.subr.bf16.mxu1 %v2782_v59  ;;  %2037 = vmatpush1.bf16.msra.mxu0 %v2777_v60  ;;  %v2106_v59 = vrot.slane %v2096_v46, %v2091_v31 }
  0xb1   : > { %2038 = vmatprep.subr.bf16.mxu0 %v2785_v62 }
  0xb3   : > { %1910 = vmatpush1.bf16.msra.mxu1 %v2780_v61 }
  0xb4   : > { %1911 = vmatprep.subr.bf16.mxu1 %v2788_v63  ;;  %2039 = vmatpush1.bf16.msra.mxu0 %v2783_v0 }
  0xb5   : > { %2040 = vmatprep.subr.bf16.mxu0 %v2791_v2 }
  0xb7   : > { %1912 = vmatpush1.bf16.msra.mxu1 %v2786_v1 }
  0xb8   : > { %1913 = vmatprep.subr.bf16.mxu1 %v2794_v3  ;;  %2041 = vmatpush1.bf16.msra.mxu0 %v2789_v4 }
  0xb9   : > { %2042 = vmatprep.subr.bf16.mxu0 %v2797_v6 }
  0xbb   : > { %1914 = vmatpush1.bf16.msra.mxu1 %v2792_v5 }
  0xbc   : > { %1915 = vmatprep.subr.bf16.mxu1 %v2800_v7  ;;  %2043 = vmatpush1.bf16.msra.mxu0 %v2795_v8 }
  0xbd   : > { %2044 = vmatprep.subr.bf16.mxu0 %v2803_v10 }
  0xbf   : > { %1916 = vmatpush1.bf16.msra.mxu1 %v2798_v9 }
  0xc0   : > { %1917 = vmatprep.subr.bf16.mxu1 %v2806_v11  ;;  %2045 = vmatpush1.bf16.msra.mxu0 %v2801_v12 }
  0xc1   : > { %2046 = vmatprep.subr.bf16.mxu0 %v2809_v14 }
  0xc3   : > { %1918 = vmatpush1.bf16.msra.mxu1 %v2804_v13 }
  0xc4   : > { %2047 = vmatpush1.bf16.msra.mxu0 %v2807_v15 }
  0xc6   : > { %1920 = vmatmul.mubr.bf16.vlgmr.msra.gmra.mrb[0].mxu1 %v621_v16 }
  0xc7   : > { %2049 = vmatmul.mubr.bf16.vlgmr.msra.gmra.mrb[0].mxu0 %v627_v17 }
 0x199   : > { %v1921_v28 = vpop.f32.mrb[0].mxu1 }
 0x19a   : > { %v2457_v30 = vadd.f32 %v1921_v28, %v836_v25  ;;  %v1923_v32 = vpop.f32.mrb[1].mxu1  ;;  %v2050_v39 = vpop.f32.mrb[0].mxu0 }
 0x19b   : > { %v2459_v33 = vadd.f32 %v1923_v32, %v840_v26  ;;  %v1925_v35 = vpop.f32.mrb[2].mxu1  ;;  %v2052_v44 = vpop.f32.mrb[1].mxu0 }
 0x19c   : > { %v2461_v37 = vadd.f32 %v1925_v35, %v836_v25  ;;  %v1927_v38 = vpop.f32.mrb[3].mxu1  ;;  %v2458_v42 = vadd.f32 %v2457_v30, %v2050_v39  ;;  %v2054_v47 = vpop.f32.mrb[2].mxu0 }
 0x19d   : > { %v2463_v41 = vadd.f32 %v1927_v38, %v840_v26  ;;  %v2460_v45 = vadd.f32 %v2459_v33, %v2052_v44  ;;  %v2056_v51 = vpop.f32.mrb[3].mxu0 }
 0x19e   : > { %v2059_v48 = vmul.f32 0.01, %v2458_v42  ;;  %v2462_v50 = vadd.f32 %v2461_v37, %v2054_v47 }
 0x19f   : > { %v2060_v52 = vmul.f32 0.01, %v2460_v45  ;;  %v2464_v54 = vadd.f32 %v2463_v41, %v2056_v51 }
 0x1a0   : > { %v2063_v55 = vmax.f32 %v2458_v42, %v2059_v48  ;;  %v2061_v57 = vmul.f32 0.01, %v2462_v50 }
 0x1a1   : > { %v2064_v58 = vmax.f32 %v2460_v45, %v2060_v52  ;;  %v2062_v60 = vmul.f32 0.01, %v2464_v54 }
 0x1a2   : > { %v2085_v61 = vmul.f32 %v2080_v49, %v2063_v55  ;;  %v2065_v62 = vmax.f32 %v2462_v50, %v2061_v57 }
 0x1a3   : > { %v2086_v63 = vmul.f32 %v2084_v53, %v2064_v58  ;;  %v2066_v0 = vmax.f32 %v2464_v54, %v2062_v60 }
 0x1a4   : > { %v2107_v1 = vadd.f32 %v2102_v56, %v2085_v61  ;;  %v2087_v2 = vmul.f32 %v2080_v49, %v2065_v62 }
 0x1a5   : > { %v2108_v3 = vadd.f32 %v2106_v59, %v2086_v63  ;;  %v2088_v4 = vmul.f32 %v2084_v53, %v2066_v0 }
 0x1a6   : > { %v2109_v5 = vadd.f32 %v2102_v56, %v2087_v2 }
 0x1a7   : > { %v2455_v6 = vpack.c.bf16 %v2108_v3, %v2107_v1  ;;  %v2110_v7 = vadd.f32 %v2106_v59, %v2088_v4 }
 0x1a9   : > { %2123 = vst [vmem:[%s170_s15] sm:$0xff] %v2455_v6  ;;  %v2456_v8 = vpack.c.bf16 %v2110_v7, %v2109_v5 }
 0x1ab   : > { %2124 = vst [vmem:[%s170_s15 + $0x8] sm:$0xff] %v2456_v8 }
 0x1ac PF: > { %s13_s12 = sadd.s32 1, %s2832_s12  }
 0x1ad   : > { %p10_p4 = scmp.ge.s32.totalorder %s13_s12, 4  }
 0x1af   :  { %12 = sbr.rel (!%p10_p4) target bundleno = 1 (0x1), region = 70 }

// kernel: encoder_forward.11
= control target key start
LH: loop header
LB: loop body
LE: loop exit
PB: predicated region body
PF: predicated region fallthrough
CT: control target
= control target key end

     0   :  { %v4077_v22 = vmov 1966171168   ;;  %v564_v24 = vlaneseq  ;;  %vm2977_vm0 = vcmask 1041408   ;;  %vm4079_vm1 = vmmov 0   ;;  %s5001_s2 = inlined_call_operand.vmem [shape: bf16[4096,32], index: 2, kind: input, shape index: {}]   ;;  %s5002_s0 = inlined_call_operand.vmem [shape: bf16[2,4096], index: 0, kind: input, shape index: {}]   ;;  %s5003_s3 = inlined_call_operand.vmem [shape: f32[1,32], index: 3, kind: input, shape index: {}]   ;;  %s5004_s4 = inlined_call_operand.vmem [shape: bf16[32,32], index: 4, kind: input, shape index: {}]   ;;  %s5005_s5 = inlined_call_operand.vmem [shape: bf16[4,32], index: 5, kind: input, shape index: {}]   ;;  %s5006_s1 = inlined_call_operand.vmem [shape: bf16[2,4], index: 1, kind: input, shape index: {}]   ;;  %s5007_s7 = inlined_call_operand.vmem [shape: bf16[32,32], index: 7, kind: input, shape index: {}]   ;;  %s5008_s6 = inlined_call_operand.vmem [shape: f32[1,32], index: 6, kind: input, shape index: {}]   ;;  %s5009_s8 = inlined_call_operand.vmem [shape: f32[2,32], index: 8, kind: input, shape index: {}]   ;;  %s5010_s9 = inlined_call_operand.vmem [shape: f32[2,32], index: 9, kind: output, shape index: {}]  }
   0x1   :  { %v3813_v0 = vld [vmem:[%s5001_s2 + $0x40] sm:$0xff]   ;;  %v3817_v4 = vld [vmem:[%s5001_s2 + $0x48] sm:$0xff]   ;;  %v3821_v8 = vld [vmem:[%s5001_s2 + $0x50] sm:$0xff]   ;;  %v562_v23 = vunpack.c.l.s4 %v4077_v22  ;;  %vm2973_vm2 = vcmask 31744   ;;  %vm3033_vm3 = vcmask 261120   ;;  %vm3157_vm4 = vcmask 254976  }
   0x2   :  { %v3814_v1 = vld [vmem:[%s5001_s2 + $0xc0] sm:$0xff]   ;;  %3428 = vmatprep.subr.bf16.mxu0 %v3813_v0  ;;  %v3818_v5 = vld [vmem:[%s5001_s2 + $0xc8] sm:$0xff]   ;;  %v3822_v9 = vld [vmem:[%s5001_s2 + $0xd0] sm:$0xff]   ;;  %v4208_v30 = vshrl.u32 %v564_v24, 7 }
   0x3   :  { %v3815_v2 = vld [vmem:[%s5001_s2] sm:$0xff]   ;;  %3450 = vmatprep.subr.bf16.mxu1 %v3814_v1  ;;  %v3819_v6 = vld [vmem:[%s5001_s2 + $0x8] sm:$0xff]   ;;  %v3823_v10 = vld [vmem:[%s5001_s2 + $0x10] sm:$0xff]   ;;  %v563_v29 = vunpack.c.0.s8 %v562_v23 }
   0x4   :  { %v3816_v3 = vld [vmem:[%s5001_s2 + $0x80] sm:$0xff]   ;;  %3429 = vmatpush3.bf16.msra.mxu0 %v3815_v2  ;;  %v3820_v7 = vld [vmem:[%s5001_s2 + $0x88] sm:$0xff]   ;;  %v3824_v11 = vld [vmem:[%s5001_s2 + $0x90] sm:$0xff]  }
   0x5   :  { %3451 = vmatpush3.bf16.msra.mxu1 %v3816_v3  ;;  %3430 = vmatprep.subr.bf16.mxu0 %v3817_v4  ;;  %v3825_v12 = vld [vmem:[%s5001_s2 + $0x58] sm:$0xff]   ;;  %v3829_v16 = vld [vmem:[%s5001_s2 + $0x60] sm:$0xff]   ;;  %v3833_v20 = vld [vmem:[%s5001_s2 + $0x68] sm:$0xff]   ;;  %v4223_v35 = vsub.s32 %v563_v29, %v4208_v30 }
   0x6   :  { %3452 = vmatprep.subr.bf16.mxu1 %v3818_v5  ;;  %v3826_v13 = vld [vmem:[%s5001_s2 + $0xd8] sm:$0xff]   ;;  %v3830_v17 = vld [vmem:[%s5001_s2 + $0xe0] sm:$0xff]   ;;  %v3834_v21 = vld [vmem:[%s5001_s2 + $0xe8] sm:$0xff]  }
   0x7   :  { %v3827_v14 = vld [vmem:[%s5001_s2 + $0x18] sm:$0xff]   ;;  %v3831_v18 = vld [vmem:[%s5001_s2 + $0x20] sm:$0xff]   ;;  %v3835_v25 = vld [vmem:[%s5001_s2 + $0x28] sm:$0xff]  }
   0x8   :  { %3431 = vmatpush3.bf16.msra.mxu0 %v3819_v6  ;;  %v3828_v15 = vld [vmem:[%s5001_s2 + $0x98] sm:$0xff]   ;;  %v3832_v19 = vld [vmem:[%s5001_s2 + $0xa0] sm:$0xff]   ;;  %v3836_v26 = vld [vmem:[%s5001_s2 + $0xa8] sm:$0xff]  }
   0x9   :  { %3453 = vmatpush3.bf16.msra.mxu1 %v3820_v7  ;;  %3432 = vmatprep.subr.bf16.mxu0 %v3821_v8  ;;  %v3837_v27 = vld [vmem:[%s5001_s2 + $0x70] sm:$0xff]   ;;  %v3841_v33 = vld [vmem:[%s5001_s2 + $0x78] sm:$0xff]   ;;  %v33_v38 = vld [vmem:[%s5002_s0] sm:$0xff] }
   0xa   :  { %3454 = vmatprep.subr.bf16.mxu1 %v3822_v9  ;;  %v3838_v28 = vld [vmem:[%s5001_s2 + $0xf0] sm:$0xff]   ;;  %v3842_v34 = vld [vmem:[%s5001_s2 + $0xf8] sm:$0xff]   ;;  %v560_v39 = vcombine.high %v33_v38, %v33_v38  ;;  %v567_v40 = vrot.slane %v33_v38, %v4223_v35  ;;  %v3846_v41 = vld [vmem:[%s5001_s2 + $0x140] sm:$0xff]  }
   0xb   :  { %v3839_v31 = vld [vmem:[%s5001_s2 + $0x30] sm:$0xff]   ;;  %v3843_v36 = vld [vmem:[%s5001_s2 + $0x38] sm:$0xff]   ;;  %v3847_v42 = vld [vmem:[%s5001_s2 + $0x1c0] sm:$0xff]  }
   0xc   :  { %3433 = vmatpush3.bf16.msra.mxu0 %v3823_v10  ;;  %v3840_v32 = vld [vmem:[%s5001_s2 + $0xb0] sm:$0xff]   ;;  %v3844_v37 = vld [vmem:[%s5001_s2 + $0xb8] sm:$0xff]   ;;  %v575_v43 = vcombine.high %v567_v40, %v567_v40  ;;  %v583_v44 = vrot.slane %v567_v40, %v4223_v35  ;;  %v4243_v45 = vrot.slane %v560_v39, %v4223_v35  ;;  %v3848_v46 = vld [vmem:[%s5001_s2 + $0x100] sm:$0xff]  }
   0xd   :  { %3455 = vmatpush3.bf16.msra.mxu1 %v3824_v11  ;;  %3434 = vmatprep.subr.bf16.mxu0 %v3825_v12  ;;  %v3849_v48 = vld [vmem:[%s5001_s2 + $0x180] sm:$0xff]   ;;  %v3850_v51 = vld [vmem:[%s5001_s2 + $0x148] sm:$0xff]   ;;  %v3854_v58 = vld [vmem:[%s5001_s2 + $0x150] sm:$0xff]  }
   0xe   :  { %3456 = vmatprep.subr.bf16.mxu1 %v3826_v13  ;;  %v597_v47 = vrot.slane %v575_v43, %v4223_v35  ;;  %v576_v49 = vcombine.high %v4243_v45, %v4243_v45  ;;  %v605_v50 = vcombine.high %v583_v44, %v583_v44  ;;  %v3851_v53 = vld [vmem:[%s5001_s2 + $0x1c8] sm:$0xff]   ;;  %v3855_v59 = vld [vmem:[%s5001_s2 + $0x1d0] sm:$0xff]   ;;  %v3858_v62 = vld [vmem:[%s5001_s2 + $0x158] sm:$0xff]  }
   0xf   :  { %v3852_v55 = vld [vmem:[%s5001_s2 + $0x108] sm:$0xff]   ;;  %v3856_v60 = vld [vmem:[%s5001_s2 + $0x110] sm:$0xff]   ;;  %v3859_v63 = vld [vmem:[%s5001_s2 + $0x1d8] sm:$0xff]  }
  0x10   :  { %3435 = vmatpush3.bf16.msra.mxu0 %v3827_v14  ;;  %2356 = vmatprep.mubr.bf16.mxu0 %v597_v47  ;;  %v607_v52 = vcombine.high %v597_v47, %v597_v47  ;;  %v604_v54 = vrot.slane %v576_v49, %v4223_v35  ;;  %v3853_v56 = vld [vmem:[%s5001_s2 + $0x188] sm:$0xff]   ;;  %v3857_v61 = vld [vmem:[%s5001_s2 + $0x190] sm:$0xff]   ;;  %v3860_v0 = vld [vmem:[%s5001_s2 + $0x118] sm:$0xff]  }
  0x11   :  { %3457 = vmatpush3.bf16.msra.mxu1 %v3828_v15  ;;  %3436 = vmatprep.subr.bf16.mxu0 %v3829_v16  ;;  %v3861_v1 = vld [vmem:[%s5001_s2 + $0x198] sm:$0xff]   ;;  %v3862_v2 = vld [vmem:[%s5001_s2 + $0x160] sm:$0xff]   ;;  %v3866_v6 = vld [vmem:[%s5001_s2 + $0x168] sm:$0xff]  }
  0x12   :  { %3458 = vmatprep.subr.bf16.mxu1 %v3830_v17  ;;  %2396 = vmatprep.mubr.bf16.mxu1 %v607_v52  ;;  %v608_v57 = vcombine.high %v604_v54, %v604_v54  ;;  %v3863_v3 = vld [vmem:[%s5001_s2 + $0x1e0] sm:$0xff]   ;;  %v3867_v7 = vld [vmem:[%s5001_s2 + $0x1e8] sm:$0xff]   ;;  %v3870_v10 = vld [vmem:[%s5001_s2 + $0x170] sm:$0xff]  }
  0x13   :  { %v3864_v4 = vld [vmem:[%s5001_s2 + $0x120] sm:$0xff]   ;;  %v3868_v8 = vld [vmem:[%s5001_s2 + $0x128] sm:$0xff]   ;;  %v3871_v11 = vld [vmem:[%s5001_s2 + $0x1f0] sm:$0xff]  }
  0x14   :  { %3437 = vmatpush3.bf16.msra.mxu0 %v3831_v18  ;;  %v3865_v5 = vld [vmem:[%s5001_s2 + $0x1a0] sm:$0xff]   ;;  %v3869_v9 = vld [vmem:[%s5001_s2 + $0x1a8] sm:$0xff]   ;;  %v3872_v12 = vld [vmem:[%s5001_s2 + $0x130] sm:$0xff]   ;;  %v590_v18 = vrot.slane %v4243_v45, %v4223_v35 }
  0x15   :  { %3459 = vmatpush3.bf16.msra.mxu1 %v3832_v19  ;;  %3438 = vmatprep.subr.bf16.mxu0 %v3833_v20  ;;  %v3873_v13 = vld [vmem:[%s5001_s2 + $0x1b0] sm:$0xff]   ;;  %v3874_v14 = vld [vmem:[%s5001_s2 + $0x178] sm:$0xff]   ;;  %v3878_v19 = vld [vmem:[%s5001_s2 + $0x240] sm:$0xff]  }
  0x16   :  { %3460 = vmatprep.subr.bf16.mxu1 %v3834_v21  ;;  %v3875_v15 = vld [vmem:[%s5001_s2 + $0x1f8] sm:$0xff]   ;;  %v3879_v20 = vld [vmem:[%s5001_s2 + $0x2c0] sm:$0xff]   ;;  %v606_v23 = vcombine.high %v590_v18, %v590_v18  ;;  %v3882_v24 = vld [vmem:[%s5001_s2 + $0x248] sm:$0xff]  }
  0x17   :  { %v3876_v16 = vld [vmem:[%s5001_s2 + $0x138] sm:$0xff]   ;;  %v3880_v21 = vld [vmem:[%s5001_s2 + $0x200] sm:$0xff]   ;;  %v3887_v29 = vld [vmem:[%s5001_s2 + $0x2d0] sm:$0xff]  }
  0x18   :  { %3439 = vmatpush3.bf16.msra.mxu0 %v3835_v25  ;;  %v3877_v17 = vld [vmem:[%s5001_s2 + $0x1b8] sm:$0xff]   ;;  %v3881_v22 = vld [vmem:[%s5001_s2 + $0x280] sm:$0xff]   ;;  %v3883_v25 = vld [vmem:[%s5001_s2 + $0x2c8] sm:$0xff]  }
  0x19   :  { %3461 = vmatpush3.bf16.msra.mxu1 %v3836_v26  ;;  %3440 = vmatprep.subr.bf16.mxu0 %v3837_v27  ;;  %v3884_v26 = vld [vmem:[%s5001_s2 + $0x208] sm:$0xff]   ;;  %v3894_v38 = vld [vmem:[%s5001_s2 + $0x260] sm:$0xff]   ;;  %v3903_v47 = vld [vmem:[%s5001_s2 + $0x2f0] sm:$0xff]  }
  0x1a   :  { %3462 = vmatprep.subr.bf16.mxu1 %v3838_v28  ;;  %v3885_v27 = vld [vmem:[%s5001_s2 + $0x288] sm:$0xff]   ;;  %v3886_v28 = vld [vmem:[%s5001_s2 + $0x250] sm:$0xff]   ;;  %v3895_v39 = vld [vmem:[%s5001_s2 + $0x2e0] sm:$0xff]  }
  0x1b   :  { %v3896_v40 = vld [vmem:[%s5001_s2 + $0x220] sm:$0xff]   ;;  %v3899_v43 = vld [vmem:[%s5001_s2 + $0x2e8] sm:$0xff]   ;;  %v3905_v49 = vld [vmem:[%s5001_s2 + $0x2b0] sm:$0xff]  }
  0x1c   :  { %3441 = vmatpush3.bf16.msra.mxu0 %v3839_v31  ;;  %v3888_v31 = vld [vmem:[%s5001_s2 + $0x210] sm:$0xff]   ;;  %v3901_v45 = vld [vmem:[%s5001_s2 + $0x2a8] sm:$0xff]   ;;  %v3908_v52 = vld [vmem:[%s5001_s2 + $0x238] sm:$0xff]  }
  0x1d   :  { %3463 = vmatpush3.bf16.msra.mxu1 %v3840_v32  ;;  %3442 = vmatprep.subr.bf16.mxu0 %v3841_v33  ;;  %v3889_v32 = vld [vmem:[%s5001_s2 + $0x290] sm:$0xff]   ;;  %v3890_v33 = vld [vmem:[%s5001_s2 + $0x258] sm:$0xff]  }
  0x1e   :  { %3464 = vmatprep.subr.bf16.mxu1 %v3842_v34  ;;  %v3891_v34 = vld [vmem:[%s5001_s2 + $0x2d8] sm:$0xff]  }
  0x20   :  { %3443 = vmatpush3.bf16.msra.mxu0 %v3843_v36  ;;  %v3892_v36 = vld [vmem:[%s5001_s2 + $0x218] sm:$0xff]  }
  0x21   :  { %3465 = vmatpush3.bf16.msra.mxu1 %v3844_v37  ;;  %3472 = vmatprep.subr.bf16.mxu0 %v3846_v41  ;;  %v3893_v37 = vld [vmem:[%s5001_s2 + $0x298] sm:$0xff]   ;;  %v3897_v41 = vld [vmem:[%s5001_s2 + $0x2a0] sm:$0xff]  }
  0x22   :  { %3494 = vmatprep.subr.bf16.mxu1 %v3847_v42  ;;  %v3898_v42 = vld [vmem:[%s5001_s2 + $0x268] sm:$0xff]  }
  0x23   :  { %2357 = vmatmul.mubr.bf16.vlgmr.msra.gmra.mrb[0].mxu0 %v583_v44  ;;  %v3900_v44 = vld [vmem:[%s5001_s2 + $0x228] sm:$0xff]  }
  0x24   :  { %3473 = vmatpush3.bf16.msra.mxu0 %v3848_v46  ;;  %2397 = vmatmul.mubr.bf16.vlgmr.msra.gmra.mrb[0].mxu1 %v605_v50  ;;  %v3902_v46 = vld [vmem:[%s5001_s2 + $0x270] sm:$0xff]   ;;  %v3906_v50 = vld [vmem:[%s5001_s2 + $0x278] sm:$0xff]  }
  0x25   :  { %3474 = vmatprep.subr.bf16.mxu0 %v3850_v51  ;;  %3495 = vmatpush3.bf16.msra.mxu1 %v3849_v48  ;;  %v3904_v48 = vld [vmem:[%s5001_s2 + $0x230] sm:$0xff]   ;;  %v3907_v51 = vld [vmem:[%s5001_s2 + $0x2f8] sm:$0xff]  }
  0x26   :  { %2436 = vmatprep.mubr.bf16.mxu0 %v604_v54  ;;  %3496 = vmatprep.subr.bf16.mxu1 %v3851_v53  ;;  %v34_v53 = vld [vmem:[%s5002_s0 + $0x8] sm:$0xff]  ;;  %v3909_v54 = vld [vmem:[%s5001_s2 + $0x2b8] sm:$0xff]  }
  0x27   :  { %2476 = vmatprep.mubr.bf16.mxu1 %v608_v57  ;;  %v3910_v57 = vld [vmem:[%s5001_s2 + $0x340] sm:$0xff]  }
  0x28   :  { %3475 = vmatpush3.bf16.msra.mxu0 %v3852_v55  ;;  %v616_v55 = vrot.slane %v34_v53, %v4223_v35 }
  0x29   :  { %3476 = vmatprep.subr.bf16.mxu0 %v3854_v58  ;;  %3497 = vmatpush3.bf16.msra.mxu1 %v3853_v56  ;;  %v609_v56 = vcombine.high %v34_v53, %v34_v53  ;;  %v3958_v53 = vld [vmem:[%s5001_s2 + $0x498] sm:$0xff]  }
  0x2a   :  { %3498 = vmatprep.subr.bf16.mxu1 %v3855_v59  ;;  %v624_v58 = vcombine.high %v616_v55, %v616_v55  ;;  %v632_v59 = vrot.slane %v616_v55, %v4223_v35  ;;  %v3960_v55 = vld [vmem:[%s5001_s2 + $0x4e0] sm:$0xff]  }
  0x2c   :  { %3477 = vmatpush3.bf16.msra.mxu0 %v3856_v60  ;;  %v3911_v60 = vld [vmem:[%s5001_s2 + $0x3c0] sm:$0xff]  }
  0x2d   :  { %3478 = vmatprep.subr.bf16.mxu0 %v3858_v62  ;;  %3499 = vmatpush3.bf16.msra.mxu1 %v3857_v61  ;;  %v4449_v61 = vrot.slane %v609_v56, %v4223_v35  ;;  %v3912_v62 = vld [vmem:[%s5001_s2 + $0x300] sm:$0xff]  }
  0x2e   :  { %3500 = vmatprep.subr.bf16.mxu1 %v3859_v63  ;;  %v646_v63 = vrot.slane %v624_v58, %v4223_v35  ;;  %v3961_v56 = vld [vmem:[%s5001_s2 + $0x420] sm:$0xff]   ;;  %v3963_v58 = vld [vmem:[%s5001_s2 + $0x468] sm:$0xff]  }
  0x30   :  { %3479 = vmatpush3.bf16.msra.mxu0 %v3860_v0  ;;  %v3913_v0 = vld [vmem:[%s5001_s2 + $0x380] sm:$0xff]  }
  0x31   :  { %3480 = vmatprep.subr.bf16.mxu0 %v3862_v2  ;;  %3501 = vmatpush3.bf16.msra.mxu1 %v3861_v1  ;;  %v625_v1 = vcombine.high %v4449_v61, %v4449_v61  ;;  %v654_v2 = vcombine.high %v632_v59, %v632_v59 }
  0x32   :  { %3502 = vmatprep.subr.bf16.mxu1 %v3863_v3  ;;  %v3914_v3 = vld [vmem:[%s5001_s2 + $0x348] sm:$0xff]  }
  0x34   :  { %3481 = vmatpush3.bf16.msra.mxu0 %v3864_v4  ;;  %v656_v4 = vcombine.high %v646_v63, %v646_v63 }
  0x35   :  { %3482 = vmatprep.subr.bf16.mxu0 %v3866_v6  ;;  %3503 = vmatpush3.bf16.msra.mxu1 %v3865_v5  ;;  %v3915_v5 = vld [vmem:[%s5001_s2 + $0x3c8] sm:$0xff]   ;;  %v653_v6 = vrot.slane %v625_v1, %v4223_v35  ;;  %v3970_v1 = vld [vmem:[%s5001_s2 + $0x4b0] sm:$0xff]  }
  0x36   :  { %3504 = vmatprep.subr.bf16.mxu1 %v3867_v7  ;;  %v3916_v7 = vld [vmem:[%s5001_s2 + $0x308] sm:$0xff]  }
  0x38   :  { %3483 = vmatpush3.bf16.msra.mxu0 %v3868_v8  ;;  %v3917_v8 = vld [vmem:[%s5001_s2 + $0x388] sm:$0xff]  }
  0x39   :  { %3484 = vmatprep.subr.bf16.mxu0 %v3870_v10  ;;  %3505 = vmatpush3.bf16.msra.mxu1 %v3869_v9  ;;  %v657_v9 = vcombine.high %v653_v6, %v653_v6  ;;  %v3918_v10 = vld [vmem:[%s5001_s2 + $0x350] sm:$0xff]  }
  0x3a   :  { %3506 = vmatprep.subr.bf16.mxu1 %v3871_v11  ;;  %v3919_v11 = vld [vmem:[%s5001_s2 + $0x3d0] sm:$0xff]  }
  0x3c   :  { %3485 = vmatpush3.bf16.msra.mxu0 %v3872_v12  ;;  %v3920_v12 = vld [vmem:[%s5001_s2 + $0x310] sm:$0xff]  }
  0x3d   :  { %3486 = vmatprep.subr.bf16.mxu0 %v3874_v14  ;;  %3507 = vmatpush3.bf16.msra.mxu1 %v3873_v13  ;;  %v3921_v13 = vld [vmem:[%s5001_s2 + $0x390] sm:$0xff]   ;;  %v3922_v14 = vld [vmem:[%s5001_s2 + $0x358] sm:$0xff]  }
  0x3e   :  { %3508 = vmatprep.subr.bf16.mxu1 %v3875_v15  ;;  %v3923_v15 = vld [vmem:[%s5001_s2 + $0x3d8] sm:$0xff]  }
  0x40   :  { %3487 = vmatpush3.bf16.msra.mxu0 %v3876_v16  ;;  %v3924_v16 = vld [vmem:[%s5001_s2 + $0x318] sm:$0xff]  }
  0x41   :  { %3516 = vmatprep.subr.bf16.mxu0 %v3878_v19  ;;  %3509 = vmatpush3.bf16.msra.mxu1 %v3877_v17  ;;  %v3925_v17 = vld [vmem:[%s5001_s2 + $0x398] sm:$0xff]   ;;  %v3927_v19 = vld [vmem:[%s5001_s2 + $0x3e0] sm:$0xff]  }
  0x42   :  { %3538 = vmatprep.subr.bf16.mxu1 %v3879_v20  ;;  %v3928_v20 = vld [vmem:[%s5001_s2 + $0x320] sm:$0xff]  }
  0x43   :  { %2437 = vmatmul.mubr.bf16.vlgmr.msra.gmra.mrb[4].mxu0 %v590_v18  ;;  %v3926_v18 = vld [vmem:[%s5001_s2 + $0x360] sm:$0xff]  }
  0x44   :  { %3517 = vmatpush3.bf16.msra.mxu0 %v3880_v21  ;;  %2477 = vmatmul.mubr.bf16.vlgmr.msra.gmra.mrb[4].mxu1 %v606_v23  ;;  %v3929_v21 = vld [vmem:[%s5001_s2 + $0x3a0] sm:$0xff]   ;;  %v3931_v23 = vld [vmem:[%s5001_s2 + $0x3e8] sm:$0xff]  }
  0x45   :  { %3518 = vmatprep.subr.bf16.mxu0 %v3882_v24  ;;  %3539 = vmatpush3.bf16.msra.mxu1 %v3881_v22  ;;  %v3930_v22 = vld [vmem:[%s5001_s2 + $0x368] sm:$0xff]  }
  0x46   :  { %3540 = vmatprep.subr.bf16.mxu1 %v3883_v25  ;;  %2516 = vmatprep.mubr.bf16.mxu0 %v646_v63  ;;  %v3932_v24 = vld [vmem:[%s5001_s2 + $0x328] sm:$0xff]   ;;  %v3968_v63 = vld [vmem:[%s5001_s2 + $0x4f0] sm:$0xff]  }
  0x47   :  { %2556 = vmatprep.mubr.bf16.mxu1 %v656_v4  ;;  %v3933_v25 = vld [vmem:[%s5001_s2 + $0x3a8] sm:$0xff]   ;;  %v3973_v4 = vld [vmem:[%s5001_s2 + $0x438] sm:$0xff]  }
  0x48   :  { %3519 = vmatpush3.bf16.msra.mxu0 %v3884_v26  ;;  %v3934_v26 = vld [vmem:[%s5001_s2 + $0x370] sm:$0xff]  }
  0x49   :  { %3520 = vmatprep.subr.bf16.mxu0 %v3886_v28  ;;  %3541 = vmatpush3.bf16.msra.mxu1 %v3885_v27  ;;  %v3935_v27 = vld [vmem:[%s5001_s2 + $0x3f0] sm:$0xff]  }
  0x4a   :  { %3542 = vmatprep.subr.bf16.mxu1 %v3887_v29  ;;  %v3936_v28 = vld [vmem:[%s5001_s2 + $0x330] sm:$0xff]  }
  0x4b   :  { %v3937_v29 = vld [vmem:[%s5001_s2 + $0x3b0] sm:$0xff]  }
  0x4c   :  { %3521 = vmatpush3.bf16.msra.mxu0 %v3888_v31  ;;  %v3938_v31 = vld [vmem:[%s5001_s2 + $0x378] sm:$0xff]  }
  0x4d   :  { %3522 = vmatprep.subr.bf16.mxu0 %v3890_v33  ;;  %3543 = vmatpush3.bf16.msra.mxu1 %v3889_v32  ;;  %v3939_v32 = vld [vmem:[%s5001_s2 + $0x3f8] sm:$0xff]  }
  0x4e   :  { %3544 = vmatprep.subr.bf16.mxu1 %v3891_v34  ;;  %v3940_v33 = vld [vmem:[%s5001_s2 + $0x338] sm:$0xff]  }
  0x4f   :  { %v3941_v34 = vld [vmem:[%s5001_s2 + $0x3b8] sm:$0xff]  }
  0x50   :  { %3523 = vmatpush3.bf16.msra.mxu0 %v3892_v36  ;;  %v639_v36 = vrot.slane %v4449_v61, %v4223_v35  ;;  %v3966_v61 = vld [vmem:[%s5001_s2 + $0x4a8] sm:$0xff]  }
  0x51   :  { %3524 = vmatprep.subr.bf16.mxu0 %v3894_v38  ;;  %3545 = vmatpush3.bf16.msra.mxu1 %v3893_v37  ;;  %v3943_v37 = vld [vmem:[%s5001_s2 + $0x440] sm:$0xff]  }
  0x52   :  { %3546 = vmatprep.subr.bf16.mxu1 %v3895_v39  ;;  %v3944_v38 = vld [vmem:[%s5001_s2 + $0x4c0] sm:$0xff]  }
  0x53   :  { %v3945_v39 = vld [vmem:[%s5001_s2 + $0x400] sm:$0xff]  }
  0x54   :  { %3525 = vmatpush3.bf16.msra.mxu0 %v3896_v40  ;;  %v3946_v40 = vld [vmem:[%s5001_s2 + $0x480] sm:$0xff]  }
  0x55   :  { %3526 = vmatprep.subr.bf16.mxu0 %v3898_v42  ;;  %3547 = vmatpush3.bf16.msra.mxu1 %v3897_v41  ;;  %v655_v41 = vcombine.high %v639_v36, %v639_v36  ;;  %v3947_v42 = vld [vmem:[%s5001_s2 + $0x448] sm:$0xff]  }
  0x56   :  { %3548 = vmatprep.subr.bf16.mxu1 %v3899_v43  ;;  %v3948_v43 = vld [vmem:[%s5001_s2 + $0x4c8] sm:$0xff]  }
  0x58   :  { %3527 = vmatpush3.bf16.msra.mxu0 %v3900_v44  ;;  %v3949_v44 = vld [vmem:[%s5001_s2 + $0x408] sm:$0xff]  }
  0x59   :  { %3528 = vmatprep.subr.bf16.mxu0 %v3902_v46  ;;  %3549 = vmatpush3.bf16.msra.mxu1 %v3901_v45  ;;  %v3950_v45 = vld [vmem:[%s5001_s2 + $0x488] sm:$0xff]   ;;  %v3951_v46 = vld [vmem:[%s5001_s2 + $0x450] sm:$0xff]  }
  0x5a   :  { %3550 = vmatprep.subr.bf16.mxu1 %v3903_v47  ;;  %v3952_v47 = vld [vmem:[%s5001_s2 + $0x4d0] sm:$0xff]  }
  0x5c   :  { %3529 = vmatpush3.bf16.msra.mxu0 %v3904_v48  ;;  %v3953_v48 = vld [vmem:[%s5001_s2 + $0x410] sm:$0xff]  }
  0x5d   :  { %3530 = vmatprep.subr.bf16.mxu0 %v3906_v50  ;;  %3551 = vmatpush3.bf16.msra.mxu1 %v3905_v49  ;;  %v3954_v49 = vld [vmem:[%s5001_s2 + $0x490] sm:$0xff]   ;;  %v3955_v50 = vld [vmem:[%s5001_s2 + $0x458] sm:$0xff]  }
  0x5e   :  { %3552 = vmatprep.subr.bf16.mxu1 %v3907_v51  ;;  %v3956_v51 = vld [vmem:[%s5001_s2 + $0x4d8] sm:$0xff]  }
  0x60   :  { %3531 = vmatpush3.bf16.msra.mxu0 %v3908_v52  ;;  %v3957_v52 = vld [vmem:[%s5001_s2 + $0x418] sm:$0xff]  }
  0x61   :  { %3560 = vmatprep.subr.bf16.mxu0 %v3910_v57  ;;  %3553 = vmatpush3.bf16.msra.mxu1 %v3909_v54  ;;  %v3959_v54 = vld [vmem:[%s5001_s2 + $0x460] sm:$0xff]  }
  0x62   :  { %3582 = vmatprep.subr.bf16.mxu1 %v3911_v60  ;;  %v3962_v57 = vld [vmem:[%s5001_s2 + $0x4a0] sm:$0xff]   ;;  %v3965_v60 = vld [vmem:[%s5001_s2 + $0x428] sm:$0xff]  }
  0x63   :  { %2517 = vmatmul.mubr.bf16.vlgmr.msra.gmra.mrb[8].mxu0 %v632_v59  ;;  %v3964_v59 = vld [vmem:[%s5001_s2 + $0x4e8] sm:$0xff]  }
  0x64   :  { %3561 = vmatpush3.bf16.msra.mxu0 %v3912_v62  ;;  %2557 = vmatmul.mubr.bf16.vlgmr.msra.gmra.mrb[8].mxu1 %v654_v2  ;;  %v3967_v62 = vld [vmem:[%s5001_s2 + $0x470] sm:$0xff]   ;;  %v3971_v2 = vld [vmem:[%s5001_s2 + $0x478] sm:$0xff]  }
  0x65   :  { %3562 = vmatprep.subr.bf16.mxu0 %v3914_v3  ;;  %3583 = vmatpush3.bf16.msra.mxu1 %v3913_v0  ;;  %v3969_v0 = vld [vmem:[%s5001_s2 + $0x430] sm:$0xff]   ;;  %v3972_v3 = vld [vmem:[%s5001_s2 + $0x4f8] sm:$0xff]  }
  0x66   :  { %2596 = vmatprep.mubr.bf16.mxu0 %v653_v6  ;;  %3584 = vmatprep.subr.bf16.mxu1 %v3915_v5  ;;  %v35_v5 = vld [vmem:[%s5002_s0 + $0x10] sm:$0xff]  ;;  %v3974_v6 = vld [vmem:[%s5001_s2 + $0x4b8] sm:$0xff]  }
  0x67   :  { %2636 = vmatprep.mubr.bf16.mxu1 %v657_v9  ;;  %v3975_v9 = vld [vmem:[%s5001_s2 + $0x540] sm:$0xff]  }
  0x68   :  { %3563 = vmatpush3.bf16.msra.mxu0 %v3916_v7  ;;  %v665_v7 = vrot.slane %v35_v5, %v4223_v35 }
  0x69   :  { %3564 = vmatprep.subr.bf16.mxu0 %v3918_v10  ;;  %3585 = vmatpush3.bf16.msra.mxu1 %v3917_v8  ;;  %v658_v8 = vcombine.high %v35_v5, %v35_v5  ;;  %v4023_v5 = vld [vmem:[%s5001_s2 + $0x698] sm:$0xff]  }
  0x6a   :  { %3586 = vmatprep.subr.bf16.mxu1 %v3919_v11  ;;  %v673_v10 = vcombine.high %v665_v7, %v665_v7  ;;  %v681_v11 = vrot.slane %v665_v7, %v4223_v35  ;;  %v4025_v7 = vld [vmem:[%s5001_s2 + $0x6e0] sm:$0xff]  }
  0x6c   :  { %3565 = vmatpush3.bf16.msra.mxu0 %v3920_v12  ;;  %v3976_v12 = vld [vmem:[%s5001_s2 + $0x5c0] sm:$0xff]  }
  0x6d   :  { %3566 = vmatprep.subr.bf16.mxu0 %v3922_v14  ;;  %3587 = vmatpush3.bf16.msra.mxu1 %v3921_v13  ;;  %v4655_v13 = vrot.slane %v658_v8, %v4223_v35  ;;  %v3977_v14 = vld [vmem:[%s5001_s2 + $0x500] sm:$0xff]  }
  0x6e   :  { %3588 = vmatprep.subr.bf16.mxu1 %v3923_v15  ;;  %v695_v15 = vrot.slane %v673_v10, %v4223_v35  ;;  %v4026_v8 = vld [vmem:[%s5001_s2 + $0x620] sm:$0xff]   ;;  %v4028_v10 = vld [vmem:[%s5001_s2 + $0x668] sm:$0xff]  }
  0x70   :  { %3567 = vmatpush3.bf16.msra.mxu0 %v3924_v16  ;;  %v3978_v16 = vld [vmem:[%s5001_s2 + $0x580] sm:$0xff]  }
  0x71   :  { %3568 = vmatprep.subr.bf16.mxu0 %v3926_v18  ;;  %3589 = vmatpush3.bf16.msra.mxu1 %v3925_v17  ;;  %v674_v17 = vcombine.high %v4655_v13, %v4655_v13  ;;  %v703_v18 = vcombine.high %v681_v11, %v681_v11 }
  0x72   :  { %3590 = vmatprep.subr.bf16.mxu1 %v3927_v19  ;;  %v3979_v19 = vld [vmem:[%s5001_s2 + $0x548] sm:$0xff]  }
  0x74   :  { %3569 = vmatpush3.bf16.msra.mxu0 %v3928_v20  ;;  %v705_v20 = vcombine.high %v695_v15, %v695_v15 }
  0x75   :  { %3570 = vmatprep.subr.bf16.mxu0 %v3930_v22  ;;  %3591 = vmatpush3.bf16.msra.mxu1 %v3929_v21  ;;  %v3980_v21 = vld [vmem:[%s5001_s2 + $0x5c8] sm:$0xff]   ;;  %v702_v22 = vrot.slane %v674_v17, %v4223_v35  ;;  %v4035_v17 = vld [vmem:[%s5001_s2 + $0x6b0] sm:$0xff]  }
  0x76   :  { %3592 = vmatprep.subr.bf16.mxu1 %v3931_v23  ;;  %v3981_v23 = vld [vmem:[%s5001_s2 + $0x508] sm:$0xff]  }
  0x78   :  { %3571 = vmatpush3.bf16.msra.mxu0 %v3932_v24  ;;  %v3982_v24 = vld [vmem:[%s5001_s2 + $0x588] sm:$0xff]  }
  0x79   :  { %3572 = vmatprep.subr.bf16.mxu0 %v3934_v26  ;;  %3593 = vmatpush3.bf16.msra.mxu1 %v3933_v25  ;;  %v706_v25 = vcombine.high %v702_v22, %v702_v22  ;;  %v3983_v26 = vld [vmem:[%s5001_s2 + $0x550] sm:$0xff]  }
  0x7a   :  { %3594 = vmatprep.subr.bf16.mxu1 %v3935_v27  ;;  %v3984_v27 = vld [vmem:[%s5001_s2 + $0x5d0] sm:$0xff]  }
  0x7c   :  { %3573 = vmatpush3.bf16.msra.mxu0 %v3936_v28  ;;  %v3985_v28 = vld [vmem:[%s5001_s2 + $0x510] sm:$0xff]  }
  0x7d   :  { %3574 = vmatprep.subr.bf16.mxu0 %v3938_v31  ;;  %3595 = vmatpush3.bf16.msra.mxu1 %v3937_v29  ;;  %v3986_v29 = vld [vmem:[%s5001_s2 + $0x590] sm:$0xff]   ;;  %v3987_v31 = vld [vmem:[%s5001_s2 + $0x558] sm:$0xff]  }
  0x7e   :  { %3596 = vmatprep.subr.bf16.mxu1 %v3939_v32  ;;  %v3988_v32 = vld [vmem:[%s5001_s2 + $0x5d8] sm:$0xff]  }
  0x80   :  { %3575 = vmatpush3.bf16.msra.mxu0 %v3940_v33  ;;  %v3989_v33 = vld [vmem:[%s5001_s2 + $0x518] sm:$0xff]  }
  0x81   :  { %3604 = vmatprep.subr.bf16.mxu0 %v3943_v37  ;;  %3597 = vmatpush3.bf16.msra.mxu1 %v3941_v34  ;;  %v3990_v34 = vld [vmem:[%s5001_s2 + $0x598] sm:$0xff]   ;;  %v3992_v37 = vld [vmem:[%s5001_s2 + $0x5e0] sm:$0xff]  }
  0x82   :  { %3626 = vmatprep.subr.bf16.mxu1 %v3944_v38  ;;  %v3993_v38 = vld [vmem:[%s5001_s2 + $0x520] sm:$0xff]  }
  0x83   :  { %2597 = vmatmul.mubr.bf16.vlgmr.msra.gmra.mrb[12].mxu0 %v639_v36  ;;  %v3991_v36 = vld [vmem:[%s5001_s2 + $0x560] sm:$0xff]  }
  0x84   :  { %3605 = vmatpush3.bf16.msra.mxu0 %v3945_v39  ;;  %2637 = vmatmul.mubr.bf16.vlgmr.msra.gmra.mrb[12].mxu1 %v655_v41  ;;  %v3994_v39 = vld [vmem:[%s5001_s2 + $0x5a0] sm:$0xff]   ;;  %v3996_v41 = vld [vmem:[%s5001_s2 + $0x5e8] sm:$0xff]  }
  0x85   :  { %3606 = vmatprep.subr.bf16.mxu0 %v3947_v42  ;;  %3627 = vmatpush3.bf16.msra.mxu1 %v3946_v40  ;;  %v3995_v40 = vld [vmem:[%s5001_s2 + $0x568] sm:$0xff]  }
  0x86   :  { %3628 = vmatprep.subr.bf16.mxu1 %v3948_v43  ;;  %2676 = vmatprep.mubr.bf16.mxu0 %v695_v15  ;;  %v3997_v42 = vld [vmem:[%s5001_s2 + $0x528] sm:$0xff]   ;;  %v4033_v15 = vld [vmem:[%s5001_s2 + $0x6f0] sm:$0xff]  }
  0x87   :  { %2716 = vmatprep.mubr.bf16.mxu1 %v705_v20  ;;  %v3998_v43 = vld [vmem:[%s5001_s2 + $0x5a8] sm:$0xff]   ;;  %v4038_v20 = vld [vmem:[%s5001_s2 + $0x638] sm:$0xff]  }
  0x88   :  { %3607 = vmatpush3.bf16.msra.mxu0 %v3949_v44  ;;  %v3999_v44 = vld [vmem:[%s5001_s2 + $0x570] sm:$0xff]  }
  0x89   :  { %3608 = vmatprep.subr.bf16.mxu0 %v3951_v46  ;;  %3629 = vmatpush3.bf16.msra.mxu1 %v3950_v45  ;;  %v4000_v45 = vld [vmem:[%s5001_s2 + $0x5f0] sm:$0xff]  }
  0x8a   :  { %3630 = vmatprep.subr.bf16.mxu1 %v3952_v47  ;;  %v4001_v46 = vld [vmem:[%s5001_s2 + $0x530] sm:$0xff]  }
  0x8b   :  { %v4002_v47 = vld [vmem:[%s5001_s2 + $0x5b0] sm:$0xff]  }
  0x8c   :  { %3609 = vmatpush3.bf16.msra.mxu0 %v3953_v48  ;;  %v4003_v48 = vld [vmem:[%s5001_s2 + $0x578] sm:$0xff]  }
  0x8d   :  { %3610 = vmatprep.subr.bf16.mxu0 %v3955_v50  ;;  %3631 = vmatpush3.bf16.msra.mxu1 %v3954_v49  ;;  %v4004_v49 = vld [vmem:[%s5001_s2 + $0x5f8] sm:$0xff]  }
  0x8e   :  { %3632 = vmatprep.subr.bf16.mxu1 %v3956_v51  ;;  %v4005_v50 = vld [vmem:[%s5001_s2 + $0x538] sm:$0xff]  }
  0x8f   :  { %v4006_v51 = vld [vmem:[%s5001_s2 + $0x5b8] sm:$0xff]  }
  0x90   :  { %3611 = vmatpush3.bf16.msra.mxu0 %v3957_v52  ;;  %v688_v52 = vrot.slane %v4655_v13, %v4223_v35  ;;  %v4031_v13 = vld [vmem:[%s5001_s2 + $0x6a8] sm:$0xff]  }
  0x91   :  { %3612 = vmatprep.subr.bf16.mxu0 %v3959_v54  ;;  %3633 = vmatpush3.bf16.msra.mxu1 %v3958_v53  ;;  %v4008_v53 = vld [vmem:[%s5001_s2 + $0x640] sm:$0xff]  }
  0x92   :  { %3634 = vmatprep.subr.bf16.mxu1 %v3960_v55  ;;  %v4009_v54 = vld [vmem:[%s5001_s2 + $0x6c0] sm:$0xff]  }
  0x93   :  { %v4010_v55 = vld [vmem:[%s5001_s2 + $0x600] sm:$0xff]  }
  0x94   :  { %3613 = vmatpush3.bf16.msra.mxu0 %v3961_v56  ;;  %v4011_v56 = vld [vmem:[%s5001_s2 + $0x680] sm:$0xff]  }
  0x95   :  { %3614 = vmatprep.subr.bf16.mxu0 %v3963_v58  ;;  %3635 = vmatpush3.bf16.msra.mxu1 %v3962_v57  ;;  %v704_v57 = vcombine.high %v688_v52, %v688_v52  ;;  %v4012_v58 = vld [vmem:[%s5001_s2 + $0x648] sm:$0xff]  }
  0x96   :  { %3636 = vmatprep.subr.bf16.mxu1 %v3964_v59  ;;  %v4013_v59 = vld [vmem:[%s5001_s2 + $0x6c8] sm:$0xff]  }
  0x98   :  { %3615 = vmatpush3.bf16.msra.mxu0 %v3965_v60  ;;  %v4014_v60 = vld [vmem:[%s5001_s2 + $0x608] sm:$0xff]  }
  0x99   :  { %3616 = vmatprep.subr.bf16.mxu0 %v3967_v62  ;;  %3637 = vmatpush3.bf16.msra.mxu1 %v3966_v61  ;;  %v4015_v61 = vld [vmem:[%s5001_s2 + $0x688] sm:$0xff]   ;;  %v4016_v62 = vld [vmem:[%s5001_s2 + $0x650] sm:$0xff]  }
  0x9a   :  { %3638 = vmatprep.subr.bf16.mxu1 %v3968_v63  ;;  %v4017_v63 = vld [vmem:[%s5001_s2 + $0x6d0] sm:$0xff]  }
  0x9c   :  { %3617 = vmatpush3.bf16.msra.mxu0 %v3969_v0  ;;  %v4018_v0 = vld [vmem:[%s5001_s2 + $0x610] sm:$0xff]  }
  0x9d   :  { %3618 = vmatprep.subr.bf16.mxu0 %v3971_v2  ;;  %3639 = vmatpush3.bf16.msra.mxu1 %v3970_v1  ;;  %v4019_v1 = vld [vmem:[%s5001_s2 + $0x690] sm:$0xff]   ;;  %v4020_v2 = vld [vmem:[%s5001_s2 + $0x658] sm:$0xff]  }
  0x9e   :  { %3640 = vmatprep.subr.bf16.mxu1 %v3972_v3  ;;  %v4021_v3 = vld [vmem:[%s5001_s2 + $0x6d8] sm:$0xff]  }
  0xa0   :  { %3619 = vmatpush3.bf16.msra.mxu0 %v3973_v4  ;;  %v4022_v4 = vld [vmem:[%s5001_s2 + $0x618] sm:$0xff]  }
  0xa1   :  { %3648 = vmatprep.subr.bf16.mxu0 %v3975_v9  ;;  %3641 = vmatpush3.bf16.msra.mxu1 %v3974_v6  ;;  %v4024_v6 = vld [vmem:[%s5001_s2 + $0x660] sm:$0xff]  }
  0xa2   :  { %3670 = vmatprep.subr.bf16.mxu1 %v3976_v12  ;;  %v4027_v9 = vld [vmem:[%s5001_s2 + $0x6a0] sm:$0xff]   ;;  %v4030_v12 = vld [vmem:[%s5001_s2 + $0x628] sm:$0xff]  }
  0xa3   :  { %2677 = vmatmul.mubr.bf16.vlgmr.msra.gmra.mrb[16].mxu0 %v681_v11  ;;  %v4029_v11 = vld [vmem:[%s5001_s2 + $0x6e8] sm:$0xff]  }
  0xa4   :  { %3649 = vmatpush3.bf16.msra.mxu0 %v3977_v14  ;;  %2717 = vmatmul.mubr.bf16.vlgmr.msra.gmra.mrb[16].mxu1 %v703_v18  ;;  %v4032_v14 = vld [vmem:[%s5001_s2 + $0x670] sm:$0xff]   ;;  %v4036_v18 = vld [vmem:[%s5001_s2 + $0x678] sm:$0xff]  }
  0xa5   :  { %3650 = vmatprep.subr.bf16.mxu0 %v3979_v19  ;;  %3671 = vmatpush3.bf16.msra.mxu1 %v3978_v16  ;;  %v4034_v16 = vld [vmem:[%s5001_s2 + $0x630] sm:$0xff]   ;;  %v4037_v19 = vld [vmem:[%s5001_s2 + $0x6f8] sm:$0xff]  }
  0xa6   :  { %2756 = vmatprep.mubr.bf16.mxu0 %v702_v22  ;;  %3672 = vmatprep.subr.bf16.mxu1 %v3980_v21  ;;  %v36_v21 = vld [vmem:[%s5002_s0 + $0x18] sm:$0xff] }
  0xa7   :  { %2796 = vmatprep.mubr.bf16.mxu1 %v706_v25  ;;  %v714_v22 = vrot.slane %v36_v21, %v4223_v35  ;;  %v4039_v25 = vld [vmem:[%s5001_s2 + $0x6b8] sm:$0xff]  }
  0xa8   :  { %3651 = vmatpush3.bf16.msra.mxu0 %v3981_v23  ;;  %v4040_v23 = vld [vmem:[%s5001_s2 + $0x740] sm:$0xff]  }
  0xa9   :  { %3652 = vmatprep.subr.bf16.mxu0 %v3983_v26  ;;  %3673 = vmatpush3.bf16.msra.mxu1 %v3982_v24  ;;  %v707_v24 = vcombine.high %v36_v21, %v36_v21  ;;  %v722_v26 = vcombine.high %v714_v22, %v714_v22 }
  0xaa   :  { %3674 = vmatprep.subr.bf16.mxu1 %v3984_v27  ;;  %v730_v27 = vrot.slane %v714_v22, %v4223_v35 }
  0xac   :  { %3653 = vmatpush3.bf16.msra.mxu0 %v3985_v28  ;;  %v4041_v28 = vld [vmem:[%s5001_s2 + $0x7c0] sm:$0xff]  }
  0xad   :  { %3654 = vmatprep.subr.bf16.mxu0 %v3987_v31  ;;  %3675 = vmatpush3.bf16.msra.mxu1 %v3986_v29  ;;  %v4861_v29 = vrot.slane %v707_v24, %v4223_v35  ;;  %v744_v31 = vrot.slane %v722_v26, %v4223_v35 }
  0xae   :  { %3676 = vmatprep.subr.bf16.mxu1 %v3988_v32  ;;  %v4042_v32 = vld [vmem:[%s5001_s2 + $0x700] sm:$0xff]  }
  0xb0   :  { %3655 = vmatpush3.bf16.msra.mxu0 %v3989_v33  ;;  %v723_v33 = vcombine.high %v4861_v29, %v4861_v29 }
  0xb1   :  { %3656 = vmatprep.subr.bf16.mxu0 %v3991_v36  ;;  %3677 = vmatpush3.bf16.msra.mxu1 %v3990_v34  ;;  %v752_v34 = vcombine.high %v730_v27, %v730_v27  ;;  %v4044_v36 = vld [vmem:[%s5001_s2 + $0x748] sm:$0xff]  }
  0xb2   :  { %3678 = vmatprep.subr.bf16.mxu1 %v3992_v37  ;;  %v754_v37 = vcombine.high %v744_v31, %v744_v31 }
  0xb4   :  { %3657 = vmatpush3.bf16.msra.mxu0 %v3993_v38  ;;  %v4043_v38 = vld [vmem:[%s5001_s2 + $0x780] sm:$0xff]  }
  0xb5   :  { %3658 = vmatprep.subr.bf16.mxu0 %v3995_v40  ;;  %3679 = vmatpush3.bf16.msra.mxu1 %v3994_v39  ;;  %v751_v39 = vrot.slane %v723_v33, %v4223_v35  ;;  %v4045_v40 = vld [vmem:[%s5001_s2 + $0x7c8] sm:$0xff]  }
  0xb6   :  { %3680 = vmatprep.subr.bf16.mxu1 %v3996_v41  ;;  %v4046_v41 = vld [vmem:[%s5001_s2 + $0x708] sm:$0xff]  }
  0xb8   :  { %3659 = vmatpush3.bf16.msra.mxu0 %v3997_v42  ;;  %v755_v42 = vcombine.high %v751_v39, %v751_v39 }
  0xb9   :  { %3660 = vmatprep.subr.bf16.mxu0 %v3999_v44  ;;  %3681 = vmatpush3.bf16.msra.mxu1 %v3998_v43  ;;  %v4048_v43 = vld [vmem:[%s5001_s2 + $0x750] sm:$0xff]   ;;  %v4047_v44 = vld [vmem:[%s5001_s2 + $0x788] sm:$0xff]  }
  0xba   :  { %3682 = vmatprep.subr.bf16.mxu1 %v4000_v45  ;;  %v4049_v45 = vld [vmem:[%s5001_s2 + $0x7d0] sm:$0xff]  }
  0xbc   :  { %3661 = vmatpush3.bf16.msra.mxu0 %v4001_v46  ;;  %v4050_v46 = vld [vmem:[%s5001_s2 + $0x710] sm:$0xff]  }
  0xbd   :  { %3662 = vmatprep.subr.bf16.mxu0 %v4003_v48  ;;  %3683 = vmatpush3.bf16.msra.mxu1 %v4002_v47  ;;  %v4052_v47 = vld [vmem:[%s5001_s2 + $0x758] sm:$0xff]   ;;  %v4051_v48 = vld [vmem:[%s5001_s2 + $0x790] sm:$0xff]  }
  0xbe   :  { %3684 = vmatprep.subr.bf16.mxu1 %v4004_v49  ;;  %v4053_v49 = vld [vmem:[%s5001_s2 + $0x7d8] sm:$0xff]  }
  0xc0   :  { %3663 = vmatpush3.bf16.msra.mxu0 %v4005_v50  ;;  %v4054_v50 = vld [vmem:[%s5001_s2 + $0x718] sm:$0xff]  }
  0xc1   :  { %3692 = vmatprep.subr.bf16.mxu0 %v4008_v53  ;;  %3685 = vmatpush3.bf16.msra.mxu1 %v4006_v51  ;;  %v4056_v51 = vld [vmem:[%s5001_s2 + $0x760] sm:$0xff]  }
  0xc2   :  { %3714 = vmatprep.subr.bf16.mxu1 %v4009_v54  ;;  %v4057_v53 = vld [vmem:[%s5001_s2 + $0x7e0] sm:$0xff]  }
  0xc3   :  { %2757 = vmatmul.mubr.bf16.vlgmr.msra.gmra.mrb[20].mxu0 %v688_v52  ;;  %v4055_v52 = vld [vmem:[%s5001_s2 + $0x798] sm:$0xff]   ;;  %v4058_v54 = vld [vmem:[%s5001_s2 + $0x720] sm:$0xff]  }
  0xc4   :  { %3693 = vmatpush3.bf16.msra.mxu0 %v4010_v55  ;;  %2797 = vmatmul.mubr.bf16.vlgmr.msra.gmra.mrb[20].mxu1 %v704_v57  ;;  %v4060_v55 = vld [vmem:[%s5001_s2 + $0x768] sm:$0xff]  }
  0xc5   :  { %3694 = vmatprep.subr.bf16.mxu0 %v4012_v58  ;;  %3715 = vmatpush3.bf16.msra.mxu1 %v4011_v56  ;;  %v4059_v56 = vld [vmem:[%s5001_s2 + $0x7a0] sm:$0xff]   ;;  %v4061_v57 = vld [vmem:[%s5001_s2 + $0x7e8] sm:$0xff]  }
  0xc6   :  { %3716 = vmatprep.subr.bf16.mxu1 %v4013_v59  ;;  %2836 = vmatprep.mubr.bf16.mxu0 %v744_v31  ;;  %v3163_v58 = vld [vmem:[%s5003_s3] ss:$0 sm:$0xff]  ;;  %v4062_v59 = vld [vmem:[%s5001_s2 + $0x728] sm:$0xff]  }
  0xc7   :  { %2876 = vmatprep.mubr.bf16.mxu1 %v754_v37 }
  0xc8   :  { %3695 = vmatpush3.bf16.msra.mxu0 %v4014_v60 }
  0xc9   :  { %3696 = vmatprep.subr.bf16.mxu0 %v4016_v62  ;;  %3717 = vmatpush3.bf16.msra.mxu1 %v4015_v61  ;;  %v4064_v61 = vld [vmem:[%s5001_s2 + $0x770] sm:$0xff]  }
  0xca   :  { %3718 = vmatprep.subr.bf16.mxu1 %v4017_v63  ;;  %v4063_v63 = vld [vmem:[%s5001_s2 + $0x7a8] sm:$0xff]  }
  0xcc   :  { %3697 = vmatpush3.bf16.msra.mxu0 %v4018_v0 }
  0xcd   :  { %3698 = vmatprep.subr.bf16.mxu0 %v4020_v2  ;;  %3719 = vmatpush3.bf16.msra.mxu1 %v4019_v1 }
  0xce   :  { %3720 = vmatprep.subr.bf16.mxu1 %v4021_v3  ;;  %v4065_v3 = vld [vmem:[%s5001_s2 + $0x7f0] sm:$0xff]  }
  0xd0   :  { %3699 = vmatpush3.bf16.msra.mxu0 %v4022_v4  ;;  %v4066_v4 = vld [vmem:[%s5001_s2 + $0x730] sm:$0xff]  }
  0xd1   :  { %3700 = vmatprep.subr.bf16.mxu0 %v4024_v6  ;;  %3721 = vmatpush3.bf16.msra.mxu1 %v4023_v5 }
  0xd2   :  { %3722 = vmatprep.subr.bf16.mxu1 %v4025_v7 }
  0xd4   :  { %3701 = vmatpush3.bf16.msra.mxu0 %v4026_v8 }
  0xd5   :  { %3702 = vmatprep.subr.bf16.mxu0 %v4028_v10  ;;  %3723 = vmatpush3.bf16.msra.mxu1 %v4027_v9  ;;  %v4068_v10 = vld [vmem:[%s5001_s2 + $0x778] sm:$0xff]  }
  0xd6   :  { %3724 = vmatprep.subr.bf16.mxu1 %v4029_v11 }
  0xd8   :  { %3703 = vmatpush3.bf16.msra.mxu0 %v4030_v12  ;;  %v4067_v12 = vld [vmem:[%s5001_s2 + $0x7b0] sm:$0xff]  }
  0xd9   :  { %3704 = vmatprep.subr.bf16.mxu0 %v4032_v14  ;;  %3725 = vmatpush3.bf16.msra.mxu1 %v4031_v13  ;;  %v4069_v14 = vld [vmem:[%s5001_s2 + $0x7f8] sm:$0xff]  }
  0xda   :  { %3726 = vmatprep.subr.bf16.mxu1 %v4033_v15  ;;  %v4070_v15 = vld [vmem:[%s5001_s2 + $0x738] sm:$0xff]  }
  0xdc   :  { %3705 = vmatpush3.bf16.msra.mxu0 %v4034_v16  ;;  %v737_v16 = vrot.slane %v4861_v29, %v4223_v35 }
  0xdd   :  { %3706 = vmatprep.subr.bf16.mxu0 %v4036_v18  ;;  %3727 = vmatpush3.bf16.msra.mxu1 %v4035_v17  ;;  %v4071_v17 = vld [vmem:[%s5001_s2 + $0x7b8] sm:$0xff]  }
  0xde   :  { %3728 = vmatprep.subr.bf16.mxu1 %v4037_v19  ;;  %v753_v18 = vcombine.high %v737_v16, %v737_v16 }
  0xe0   :  { %3707 = vmatpush3.bf16.msra.mxu0 %v4038_v20 }
  0xe1   :  { %3736 = vmatprep.subr.bf16.mxu0 %v4040_v23  ;;  %3729 = vmatpush3.bf16.msra.mxu1 %v4039_v25 }
  0xe2   :  { %3758 = vmatprep.subr.bf16.mxu1 %v4041_v28 }
  0xe3   :  { %2837 = vmatmul.mubr.bf16.vlgmr.msra.gmra.mrb[24].mxu0 %v730_v27 }
  0xe4   :  { %3737 = vmatpush3.bf16.msra.mxu0 %v4042_v32  ;;  %2877 = vmatmul.mubr.bf16.vlgmr.msra.gmra.mrb[24].mxu1 %v752_v34 }
  0xe5   :  { %3738 = vmatprep.subr.bf16.mxu0 %v4044_v36  ;;  %3759 = vmatpush3.bf16.msra.mxu1 %v4043_v38 }
  0xe6   :  { %2916 = vmatprep.mubr.bf16.mxu0 %v751_v39  ;;  %3760 = vmatprep.subr.bf16.mxu1 %v4045_v40 }
  0xe7   :  { %2956 = vmatprep.mubr.bf16.mxu1 %v755_v42 }
  0xe8   :  { %3739 = vmatpush3.bf16.msra.mxu0 %v4046_v41 }
  0xe9   :  { %3740 = vmatprep.subr.bf16.mxu0 %v4048_v43  ;;  %3761 = vmatpush3.bf16.msra.mxu1 %v4047_v44 }
  0xea   :  { %3762 = vmatprep.subr.bf16.mxu1 %v4049_v45 }
  0xec   :  { %3741 = vmatpush3.bf16.msra.mxu0 %v4050_v46 }
  0xed   :  { %3742 = vmatprep.subr.bf16.mxu0 %v4052_v47  ;;  %3763 = vmatpush3.bf16.msra.mxu1 %v4051_v48 }
  0xee   :  { %3764 = vmatprep.subr.bf16.mxu1 %v4053_v49 }
  0xf0   :  { %3743 = vmatpush3.bf16.msra.mxu0 %v4054_v50 }
  0xf1   :  { %3744 = vmatprep.subr.bf16.mxu0 %v4056_v51  ;;  %3765 = vmatpush3.bf16.msra.mxu1 %v4055_v52 }
  0xf2   :  { %3766 = vmatprep.subr.bf16.mxu1 %v4057_v53 }
  0xf4   :  { %3745 = vmatpush3.bf16.msra.mxu0 %v4058_v54 }
  0xf5   :  { %3746 = vmatprep.subr.bf16.mxu0 %v4060_v55  ;;  %3767 = vmatpush3.bf16.msra.mxu1 %v4059_v56  ;;  %v4073_v56 = vld [vmem:[%s5004_s4] sm:$0xff]  }
  0xf6   :  { %v3444_v60 = vpop.f32.mrb[0].mxu0  ;;  %3768 = vmatprep.subr.bf16.mxu1 %v4061_v57  ;;  %v4078_v57 = vmov 0.0  }
  0xf7   :  { %v3445_v62 = vpop.f32.mrb[1].mxu0  ;;  %v3466_v0 = vpop.f32.mrb[0].mxu1 }
  0xf8   :  { %v3446_v1 = vadd.f32 %v3445_v62, %v3444_v60  ;;  %v3447_v2 = vpop.f32.mrb[2].mxu0  ;;  %v3467_v5 = vpop.f32.mrb[1].mxu1  ;;  %3747 = vmatpush3.bf16.msra.mxu0 %v4062_v59  ;;  %v4074_v60 = vld [vmem:[%s5004_s4 + $0x8] sm:$0xff]  }
  0xf9   :  { %v3448_v6 = vpop.f32.mrb[3].mxu0  ;;  %v3468_v8 = vadd.f32 %v3467_v5, %v3466_v0  ;;  %v3469_v9 = vpop.f32.mrb[2].mxu1  ;;  %3748 = vmatprep.subr.bf16.mxu0 %v4064_v61  ;;  %3769 = vmatpush3.bf16.msra.mxu1 %v4063_v63  ;;  %v2971_v61 = vld [vmem:[%s5006_s1] sm:$0x1] }
  0xfa   :  { %v2359_v7 = vadd.f32 %v3446_v1, %v3163_v58  ;;  %v3470_v11 = vpop.f32.mrb[3].mxu1  ;;  %3770 = vmatprep.subr.bf16.mxu1 %v4065_v3  ;;  %v2972_v58 = vld [vmem:[%s5005_s5] sm:$0x3] }
  0xfb   :  { %v2979_v59 = vsel %vm2977_vm0, %v2972_v58, 0  ;;  %v3424_v58 = vld [vmem:[%s5008_s6] ss:$0 sm:$0xff] }
  0xfc   :  { %v2399_v13 = vadd.f32 %v3468_v8, %v2359_v7  ;;  %3749 = vmatpush3.bf16.msra.mxu0 %v4066_v4 }
  0xfd   :  { %3750 = vmatprep.subr.bf16.mxu0 %v4068_v10  ;;  %3771 = vmatpush3.bf16.msra.mxu1 %v4067_v12 }
  0xfe   :  { %3772 = vmatprep.subr.bf16.mxu1 %v4069_v14 }
 0x100   :  { %3751 = vmatpush3.bf16.msra.mxu0 %v4070_v15 }
 0x101   :  { %3773 = vmatpush3.bf16.msra.mxu1 %v4071_v17  ;;  %3788 = vmatprep.subr.bf16.mxu0 %v4078_v57 }
 0x102   :  { %3794 = vmatprep.subr.bf16.mxu1 %v4078_v57 }
 0x103   :  { %2917 = vmatmul.mubr.bf16.vlgmr.msra.gmra.mrb[28].mxu0 %v737_v16 }
 0x104   :  { %2957 = vmatmul.mubr.bf16.vlgmr.msra.gmra.mrb[28].mxu1 %v753_v18  ;;  %3789 = vmatpush3.bf16.msra.mxu0 %v2979_v59 }
 0x105   :  { %3795 = vmatpush3.bf16.msra.mxu1 %v4073_v56  ;;  %3802 = vmatprep.subr.bf16.mxu0 %v4078_v57 }
 0x106   :  { %3796 = vmatprep.subr.bf16.mxu1 %v4078_v57  ;;  %3790 = vmatprep.mubr.msk.bf16.mxu0 %vm4079_vm1, %v4078_v57 }
 0x107   :  { %3798 = vmatprep.mubr.msk.bf16.mxu1 %vm4079_vm1, %v4078_v57 }
 0x109   :  { %3797 = vmatpush3.bf16.msra.mxu1 %v4074_v60 }
 0x10b   :  { %3791 = vmatmul.mubr.msk.bf16.vlgmr.msra.gmra.mrb[32].mxu0 %vm2973_vm2, %v2971_v61 }
 0x10c   :  { %3806 = vmatprep.mubr.msk.bf16.mxu0 %vm4079_vm1, %v4078_v57 }
 0x116   :  { %v3488_v19 = vpop.f32.mrb[4].mxu0 }
 0x117   :  { %v3489_v20 = vpop.f32.mrb[5].mxu0  ;;  %v3510_v21 = vpop.f32.mrb[4].mxu1 }
 0x118   :  { %v3490_v22 = vadd.f32 %v3489_v20, %v3488_v19  ;;  %v3491_v23 = vpop.f32.mrb[6].mxu0  ;;  %v3511_v24 = vpop.f32.mrb[5].mxu1 }
 0x119   :  { %v3492_v25 = vpop.f32.mrb[7].mxu0  ;;  %v3512_v35 = vadd.f32 %v3511_v24, %v3510_v21  ;;  %v3513_v27 = vpop.f32.mrb[6].mxu1 }
 0x11a   :  { %v2439_v26 = vadd.f32 %v3490_v22, %v2399_v13  ;;  %v3514_v28 = vpop.f32.mrb[7].mxu1 }
 0x11c   :  { %v2479_v29 = vadd.f32 %v3512_v35, %v2439_v26 }
 0x136   :  { %v3532_v31 = vpop.f32.mrb[8].mxu0 }
 0x137   :  { %v3533_v32 = vpop.f32.mrb[9].mxu0  ;;  %v3554_v33 = vpop.f32.mrb[8].mxu1 }
 0x138   :  { %v3534_v34 = vadd.f32 %v3533_v32, %v3532_v31  ;;  %v3535_v36 = vpop.f32.mrb[10].mxu0  ;;  %v3555_v37 = vpop.f32.mrb[9].mxu1 }
 0x139   :  { %v3536_v38 = vpop.f32.mrb[11].mxu0  ;;  %v3556_v40 = vadd.f32 %v3555_v37, %v3554_v33  ;;  %v3557_v41 = vpop.f32.mrb[10].mxu1 }
 0x13a   :  { %v2519_v39 = vadd.f32 %v3534_v34, %v2479_v29  ;;  %v3558_v42 = vpop.f32.mrb[11].mxu1 }
 0x13c   :  { %v2559_v43 = vadd.f32 %v3556_v40, %v2519_v39 }
 0x156   :  { %v3576_v44 = vpop.f32.mrb[12].mxu0 }
 0x157   :  { %v3577_v45 = vpop.f32.mrb[13].mxu0  ;;  %v3598_v46 = vpop.f32.mrb[12].mxu1 }
 0x158   :  { %v3578_v47 = vadd.f32 %v3577_v45, %v3576_v44  ;;  %v3579_v48 = vpop.f32.mrb[14].mxu0  ;;  %v3599_v49 = vpop.f32.mrb[13].mxu1 }
 0x159   :  { %v3580_v50 = vpop.f32.mrb[15].mxu0  ;;  %v3600_v52 = vadd.f32 %v3599_v49, %v3598_v46  ;;  %v3601_v53 = vpop.f32.mrb[14].mxu1 }
 0x15a   :  { %v2599_v51 = vadd.f32 %v3578_v47, %v2559_v43  ;;  %v3602_v54 = vpop.f32.mrb[15].mxu1 }
 0x15b   :  { %v4075_v54 = vld [vmem:[%s5007_s7] sm:$0xff]  }
 0x15c   :  { %v2639_v55 = vadd.f32 %v3600_v52, %v2599_v51  ;;  %3803 = vmatpush3.bf16.msra.mxu0 %v4075_v54 }
 0x15d   :  { %3804 = vmatprep.subr.bf16.mxu0 %v4078_v57  ;;  %v3095_v57 = vsub.s32 0, %v4208_v30 }
 0x176   :  { %v3620_v62 = vpop.f32.mrb[16].mxu0 }
 0x177   :  { %v3621_v63 = vpop.f32.mrb[17].mxu0  ;;  %v3642_v0 = vpop.f32.mrb[16].mxu1 }
 0x178   :  { %v3622_v1 = vadd.f32 %v3621_v63, %v3620_v62  ;;  %v3623_v2 = vpop.f32.mrb[18].mxu0  ;;  %v3643_v3 = vpop.f32.mrb[17].mxu1 }
 0x179   :  { %v3624_v4 = vpop.f32.mrb[19].mxu0  ;;  %v3644_v6 = vadd.f32 %v3643_v3, %v3642_v0  ;;  %v3645_v7 = vpop.f32.mrb[18].mxu1  ;;  %v3092_v3 = vld [vmem:[%s5009_s8] sm:$0x3] }
 0x17a   :  { %v2679_v5 = vadd.f32 %v3622_v1, %v2639_v55  ;;  %v3646_v8 = vpop.f32.mrb[19].mxu1  ;;  %v4076_v55 = vld [vmem:[%s5007_s7 + $0x8] sm:$0xff]   ;;  %v3154_v4 = vsub.s32 1, %v4208_v30 }
 0x17b   :  { %3805 = vmatpush3.bf16.msra.mxu0 %v4076_v55 }
 0x17c   :  { %v2719_v9 = vadd.f32 %v3644_v6, %v2679_v5  ;;  %v3096_v5 = vrot.slane %v3092_v3, %v3095_v57  ;;  %v3155_v6 = vrot.slane %v3092_v3, %v3154_v4 }
 0x196   :  { %v3664_v10 = vpop.f32.mrb[20].mxu0 }
 0x197   :  { %v3665_v11 = vpop.f32.mrb[21].mxu0  ;;  %v3686_v12 = vpop.f32.mrb[20].mxu1 }
 0x198   :  { %v3666_v13 = vadd.f32 %v3665_v11, %v3664_v10  ;;  %v3667_v14 = vpop.f32.mrb[22].mxu0  ;;  %v3687_v15 = vpop.f32.mrb[21].mxu1 }
 0x199   :  { %v3668_v16 = vpop.f32.mrb[23].mxu0  ;;  %v3688_v18 = vadd.f32 %v3687_v15, %v3686_v12  ;;  %v3689_v19 = vpop.f32.mrb[22].mxu1 }
 0x19a   :  { %v2759_v17 = vadd.f32 %v3666_v13, %v2719_v9  ;;  %v3690_v20 = vpop.f32.mrb[23].mxu1 }
 0x19c   :  { %v2799_v21 = vadd.f32 %v3688_v18, %v2759_v17 }
 0x1b6   :  { %v3708_v22 = vpop.f32.mrb[24].mxu0 }
 0x1b7   :  { %v3709_v23 = vpop.f32.mrb[25].mxu0  ;;  %v3730_v24 = vpop.f32.mrb[24].mxu1 }
 0x1b8   :  { %v3710_v25 = vadd.f32 %v3709_v23, %v3708_v22  ;;  %v3711_v26 = vpop.f32.mrb[26].mxu0  ;;  %v3731_v35 = vpop.f32.mrb[25].mxu1 }
 0x1b9   :  { %v3712_v27 = vpop.f32.mrb[27].mxu0  ;;  %v3732_v29 = vadd.f32 %v3731_v35, %v3730_v24  ;;  %v3733_v31 = vpop.f32.mrb[26].mxu1 }
 0x1ba   :  { %v2839_v28 = vadd.f32 %v3710_v25, %v2799_v21  ;;  %v3734_v32 = vpop.f32.mrb[27].mxu1 }
 0x1bc   :  { %v2879_v33 = vadd.f32 %v3732_v29, %v2839_v28 }
 0x1d6   :  { %v3752_v34 = vpop.f32.mrb[28].mxu0 }
 0x1d7   :  { %v3753_v36 = vpop.f32.mrb[29].mxu0  ;;  %v3774_v37 = vpop.f32.mrb[28].mxu1 }
 0x1d8   :  { %v3754_v38 = vadd.f32 %v3753_v36, %v3752_v34  ;;  %v3755_v39 = vpop.f32.mrb[30].mxu0  ;;  %v3775_v40 = vpop.f32.mrb[29].mxu1 }
 0x1d9   :  { %v3756_v41 = vpop.f32.mrb[31].mxu0  ;;  %v3776_v43 = vadd.f32 %v3775_v40, %v3774_v37  ;;  %v3777_v44 = vpop.f32.mrb[30].mxu1 }
 0x1da   :  { %v2919_v42 = vadd.f32 %v3754_v38, %v2879_v33  ;;  %v3778_v45 = vpop.f32.mrb[31].mxu1 }
 0x1dc   :  { %v2959_v46 = vadd.f32 %v3776_v43, %v2919_v42 }
 0x1de   :  { %v2964_v47 = vmul.f32 0.01, %v2959_v46  ;;  %v3015_v50 = vpop.f32.mrb[32].mxu0 }
 0x1df   :  { %v3792_v51 = vpop.f32.mrb[33].mxu0 }
 0x1e0   :  { %v2965_v48 = vmax.f32 %v2959_v46, %v2964_v47  ;;  %v3018_v52 = vpop.f32.mrb[34].mxu0 }
 0x1e1   :  { %v3793_v53 = vpop.f32.mrb[35].mxu0 }
 0x1e2   :  { %v2966_v49 = vpack.c.bf16 %v2965_v48, %v2965_v48 }
 0x1e4   :  { %3799 = vmatmul.mubr.msk.bf16.vlgmr.msra.gmra.mrb[32].mxu1 %vm3033_vm3, %v2966_v49 }
 0x2b7   :  { %v3071_v56 = vpop.f32.mrb[32].mxu1 }
 0x2b8   :  { %v3072_v59 = vadd.f32 %v3071_v56, %v3015_v50  ;;  %v3800_v60 = vpop.f32.mrb[33].mxu1 }
 0x2b9   :  { %v3074_v61 = vpop.f32.mrb[34].mxu1 }
 0x2ba   :  { %v3084_v62 = vadd.f32 %v3424_v58, %v3072_v59  ;;  %v3801_v63 = vpop.f32.mrb[35].mxu1 }
 0x2bc   :  { %v3085_v0 = vmul.f32 0.01, %v3084_v62 }
 0x2be   :  { %v3086_v1 = vmax.f32 %v3084_v62, %v3085_v0 }
 0x2c0   :  { %v3087_v2 = vpack.c.bf16 %v3086_v1, %v3086_v1 }
 0x2c2   :  { %3807 = vmatmul.mubr.msk.bf16.vlgmr.msra.gmra.mrb[36].mxu0 %vm3033_vm3, %v3087_v2 }
 0x395   :  { %v3146_v7 = vpop.f32.mrb[36].mxu0 }
 0x396   :  { %v3147_v8 = vadd.f32 %v3146_v7, %v3096_v5  ;;  %v3808_v9 = vpop.f32.mrb[37].mxu0 }
 0x397   :  { %v3149_v10 = vpop.f32.mrb[38].mxu0 }
 0x398   :  { %v3156_v11 = vmax.f32 %v3147_v8, %v3155_v6  ;;  %v3809_v12 = vpop.f32.mrb[39].mxu0 }
 0x39a   :  { %3158 = vst.msk [vmem:[%s5010_s9] sm:$0x3] %vm3157_vm4, %v3156_v11 }

</bundles_post_ra>
